<compile_context>
chip_gen: v7x
topology: tpu7x:2x2x1
jax: 0.10.0
libtpu: 0.0.40
codegen_flags: <defaults>
</compile_context>

<pallas_src>
import numpy as np
import jax
import jax.numpy as jnp
from jax.experimental import pallas as pl
from jax.experimental.pallas import tpu as pltpu


def _leaky(x):
    return jnp.where(x > 0, x, 0.2 * x)


def _make_kernel(*, fin, fout, Ho, Wo, BB, learned_shortcut):
    C1 = 4 * fin
    M = BB * Ho * Wo
    f32, bf16 = jnp.float32, jnp.bfloat16

    def kernel(*refs):
        if learned_shortcut:
            (xs2d_ref, w1_ref, w2_ref, ws_ref, bs_ref, gamma_ref,
             out_ref, y1pad_ref) = refs
        else:
            xs2d_ref, w1_ref, w2_ref, gamma_ref, out_ref, y1pad_ref = refs

        # xs2d_ref : (BB, Ho+1, Wo+1, 4*fin) bf16 ; channel = (r*2+s)*fin + c of pad(x,1)
        # w1_ref   : (4, 4*fin, fout) bf16, tap (a,b) -> index 2a+b, inner order (r,s,c)
        # w2_ref   : (9, fout, fout) bf16, tap (kh,kw) -> index 3kh+kw
        # ws_ref   : (fin, fout) bf16 (only when fin != fout) ; bs_ref: (1, fout) f32
        # gamma_ref: (1,) f32 scalar in SMEM
        # out_ref  : (BB, Ho*Wo, fout) f32
        # y1pad_ref: (BB, Ho+2, Wo+2, fout) bf16 VMEM scratch (zero-padded conv2 input)

        # ---- conv_r[0]: 4x4/s2/p1 == 2x2/s1 conv over the space-to-depth view.
        #      4 whole-plane tap matmuls, f32 accumulation, no im2col patches.
        y1 = None
        for a in range(2):
            for b in range(2):
                tap = xs2d_ref[:, a:a + Ho, b:b + Wo, :].reshape(M, C1)
                p = jnp.dot(tap, w1_ref[2 * a + b], preferred_element_type=f32)
                y1 = p if y1 is None else y1 + p
        y1 = _leaky(y1)                                            # (M, fout) f32

        # ---- zero-padded y1 scratch; interior overwritten every step, border zeroed
        #      every step too (cheap, and safe under megacore grid partitioning).
        y1pad_ref[...] = jnp.zeros_like(y1pad_ref)
        y1pad_ref[:, 1:Ho + 1, 1:Wo + 1, :] = (
            y1.astype(bf16).reshape(BB, Ho, Wo, fout))

        # ---- conv_r[2]: 3x3/s1/p1 as 9 tap matmuls accumulated in f32 (no patches2).
        res = None
        for kh in range(3):
            for kw in range(3):
                tap = y1pad_ref[:, kh:kh + Ho, kw:kw + Wo, :].reshape(M, fout)
                p = jnp.dot(tap, w2_ref[3 * kh + kw], preferred_element_type=f32)
                res = p if res is None else res + p
        res = _leaky(res)                                          # (M, fout) f32

        # ---- shortcut: avg_pool2d(x, 2) built from the same 4 s2d phases, then
        #      (optionally) the 1x1 conv.  pool-then-conv == conv-then-pool (linear).
        pooled = 0.25 * (
            xs2d_ref[:, 0:Ho, 0:Wo, 3 * fin:4 * fin].astype(f32)
            + xs2d_ref[:, 0:Ho, 1:Wo + 1, 2 * fin:3 * fin].astype(f32)
            + xs2d_ref[:, 1:Ho + 1, 0:Wo, 1 * fin:2 * fin].astype(f32)
            + xs2d_ref[:, 1:Ho + 1, 1:Wo + 1, 0:fin].astype(f32))
        pooled = pooled.reshape(M, fin)
        if learned_shortcut:
            sc = jnp.dot(pooled.astype(bf16), ws_ref[...],
                         preferred_element_type=f32) + bs_ref[...]
        else:
            sc = pooled                                            # fin == fout

        out = sc + gamma_ref[0] * res
        out_ref[...] = out.reshape(BB, Ho * Wo, fout).astype(out_ref.dtype)

    return kernel


def _pick_block_batch(B, Ho, Wo):
    """Fold samples into the matmul M dimension when images are small (target ~256 rows)."""
    hw = Ho * Wo
    bb = 1
    for cand in range(1, min(B, 8) + 1):
        if B % cand == 0 and cand * hw <= max(256, hw):
            bb = cand
    return bb


def _vmem_limit_bytes(BB, Ho, Wo, fin, fout, single_buffer_weights):
    """Working-set based scoped-VMEM limit (floor 32 MiB, generous headroom)."""
    C1 = 4 * fin
    M = BB * Ho * Wo
    in_blk = BB * (Ho + 1) * (Wo + 1) * C1 * 2 * 2          # bf16, double-buffered
    out_blk = BB * Ho * Wo * fout * 4 * 2                   # f32, double-buffered
    wmult = 1 if single_buffer_weights else 2
    w = ((4 * C1 * fout + 9 * fout * fout + fin * fout) * 2 + fout * 4) * wmult
    scratch = BB * (Ho + 2) * (Wo + 2) * fout * 2
    live = M * max(C1, fout) * 4 * 6                         # taps + f32 accumulators
    est = in_blk + out_blk + w + scratch + live + (4 << 20)
    return int(min(max(est, 32 << 20), 100 << 20))


def d_block_forward(x, params, downsample=True, single_buffer_weights=True):
    """x: (B, fin, H, W) float32 (NCHW, as in the PyTorch module).  Returns (B, fout, H/2, W/2)."""
    assert downsample, "downsample=False is not representable (see TODO at top)"
    w1 = params["w1"]                  # (fout, fin, 4, 4)
    w2 = params["w2"]                  # (fout, fout, 3, 3)
    B, fin, H, W = x.shape
    fout = w1.shape[0]
    assert H % 2 == 0 and W % 2 == 0
    Ho, Wo = H // 2, W // 2
    C1 = 4 * fin
    learned_shortcut = (fin != fout)

    # ---- layout plumbing only (no module compute here); single bf16 cast ----
    x_nhwc = jnp.transpose(x, (0, 2, 3, 1))
    x_pad = jnp.pad(x_nhwc, ((0, 0), (1, 1), (1, 1), (0, 0)))
    # space-to-depth, block 2: xs2d[b, i, j, (r*2+s)*fin + c] = x_pad[b, 2i+r, 2j+s, c]
    xs2d = (x_pad.reshape(B, Ho + 1, 2, Wo + 1, 2, fin)
            .transpose(0, 1, 3, 2, 4, 5)
            .reshape(B, Ho + 1, Wo + 1, C1)).astype(jnp.bfloat16)

    # conv1 weights -> (tap=2a+b, (r,s,c), o) ; kh = 2a + r, kw = 2b + s
    w1r = (w1.reshape(fout, fin, 2, 2, 2, 2)        # (o, c, a, r, b, s)
           .transpose(2, 4, 3, 5, 1, 0)             # (a, b, r, s, c, o)
           .reshape(4, C1, fout)).astype(jnp.bfloat16)
    # conv2 weights -> (tap=3kh+kw, c, o)
    w2r = (w2.transpose(2, 3, 1, 0)                 # (kh, kw, c, o)
           .reshape(9, fout, fout)).astype(jnp.bfloat16)
    gamma = params["gamma"].reshape(1).astype(jnp.float32)

    BB = _pick_block_batch(B, Ho, Wo)

    def _const_spec(shape):
        idx = lambda b: (0,) * len(shape)
        if single_buffer_weights:
            # Constant across the grid: don't burn VMEM double-buffering it.
            return pl.BlockSpec(shape, idx, pipeline_mode=pl.Buffered(1))
        return pl.BlockSpec(shape, idx)

    in_specs = [pl.BlockSpec((BB, Ho + 1, Wo + 1, C1), lambda b: (b, 0, 0, 0)),
                _const_spec((4, C1, fout)),
                _const_spec((9, fout, fout))]
    args = [xs2d, w1r, w2r]
    if learned_shortcut:
        wsr = params["ws"].reshape(fout, fin).T.astype(jnp.bfloat16)   # (fin, fout)
        bsr = params["bs"].reshape(1, fout).astype(jnp.float32)
        in_specs += [_const_spec((fin, fout)), _const_spec((1, fout))]
        args += [wsr, bsr]
    in_specs.append(pl.BlockSpec(memory_space=pltpu.MemorySpace.SMEM))
    args.append(gamma)

    kernel = _make_kernel(fin=fin, fout=fout, Ho=Ho, Wo=Wo, BB=BB,
                          learned_shortcut=learned_shortcut)

    out_flat = pl.pallas_call(
        kernel,
        out_shape=jax.ShapeDtypeStruct((B, Ho * Wo, fout), jnp.float32),
        grid=(B // BB,),
        in_specs=in_specs,
        out_specs=pl.BlockSpec((BB, Ho * Wo, fout), lambda b: (b, 0, 0)),
        scratch_shapes=[pltpu.VMEM((BB, Ho + 2, Wo + 2, fout), jnp.bfloat16)],
        compiler_params=pltpu.CompilerParams(
            dimension_semantics=("parallel",),
            vmem_limit_bytes=_vmem_limit_bytes(BB, Ho, Wo, fin, fout,
                                               single_buffer_weights)),
    )(*args)

    # (B, Ho*Wo, fout) -> (B, fout, Ho, Wo) to match the module's NCHW convention.
    # (Drop this transpose if the consumer can take channels-last.)
    return out_flat.reshape(B, Ho, Wo, fout).transpose(0, 3, 1, 2)


def d_block_reference(x, params):
    """Pure-JAX f32 reference matching the PyTorch D_Block forward (NCHW)."""
    dn = ("NCHW", "OIHW", "NCHW")
    res = jax.lax.conv_general_dilated(x, params["w1"], (2, 2), ((1, 1), (1, 1)),
                                       dimension_numbers=dn)
    res = _leaky(res)
    res = jax.lax.conv_general_dilated(res, params["w2"], (1, 1), ((1, 1), (1, 1)),
                                       dimension_numbers=dn)
    res = _leaky(res)
    fout, fin = params["ws"].shape
    if fin != fout:
        ws4 = params["ws"].reshape(fout, fin, 1, 1)
        sc = jax.lax.conv_general_dilated(x, ws4, (1, 1), ((0, 0), (0, 0)),
                                          dimension_numbers=dn)
        sc = sc + params["bs"].reshape(1, fout, 1, 1)
    else:
        sc = x
    B, C, H, W = sc.shape
    sc = sc.reshape(B, C, H // 2, 2, W // 2, 2).mean(axis=(3, 5))     # avg_pool2d(., 2)
    return sc + params["gamma"][0] * res


def init_params(key, fin, fout):
    ks = jax.random.split(key, 4)

    def u(k, shape, bound):
        return jax.random.uniform(k, shape, jnp.float32, -bound, bound)

    b1 = 1.0 / (fin * 16) ** 0.5
    b2 = 1.0 / (fout * 9) ** 0.5
    bs = 1.0 / fin ** 0.5
    return dict(
        w1=u(ks[0], (fout, fin, 4, 4), b1),
        w2=u(ks[1], (fout, fout, 3, 3), b2),
        ws=u(ks[2], (fout, fin), bs),
        bs=u(ks[3], (fout,), bs),
        # The module initializes gamma to 0; use a nonzero value here so the
        # residual branch is actually exercised by the numeric check.
        gamma=jnp.full((1,), 0.25, jnp.float32),
    )


if __name__ == "__main__":
    B, fin, fout, H, W = 2, 32, 64, 16, 16

    key = jax.random.PRNGKey(0)
    kx, kp = jax.random.split(key)
    x = jax.random.normal(kx, (B, fin, H, W), jnp.float32)
    params = init_params(kp, fin, fout)

    try:
        out = d_block_forward(x, params)
    except Exception:
        # Fallback for jax builds without BlockSpec(pipeline_mode=pl.Buffered(1)).
        out = d_block_forward(x, params, single_buffer_weights=False)
    jax.block_until_ready(out)
    assert out.shape == (B, fout, H // 2, W // 2)

    ref = d_block_reference(x, params)
    # bf16 MXU inputs with f32 accumulation -> slightly looser tolerance than pure f32.
    np.testing.assert_allclose(np.asarray(out), np.asarray(ref), rtol=2e-2, atol=2e-2)

    print("KERNEL_OK")
</pallas_src>

<mosaic_0001>
module attributes {stable_mosaic.version = 11 : i64} {
  func.func @kernel(%arg0: i32, %arg1: memref<2x9x9x128xbf16, #tpu.memory_space<vmem>>, %arg2: memref<4x128x64xbf16, #tpu.memory_space<vmem>>, %arg3: memref<9x64x64xbf16, #tpu.memory_space<vmem>>, %arg4: memref<32x64xbf16, #tpu.memory_space<vmem>>, %arg5: memref<1x64xf32, #tpu.memory_space<vmem>>, %arg6: memref<1xf32, #tpu.memory_space<smem>>, %arg7: memref<2x64x64xf32, #tpu.memory_space<vmem>>, %arg8: memref<2x10x10x64xbf16, #tpu.memory_space<vmem>>) attributes {dimension_semantics = [#tpu.dimension_semantics<parallel>], iteration_bounds = array<i64: 1>, scalar_prefetch = 0 : i64, scratch_operands = 1 : i64, tpu.core_type = #tpu.core_type<tc>, window_params = [{transform_indices = @transform_0, window_bounds = array<i64: 2, 9, 9, 128>}, {pipeline_mode = #tpu.pipeline_mode<synchronous>, transform_indices = @transform_1, window_bounds = array<i64: 4, 128, 64>}, {pipeline_mode = #tpu.pipeline_mode<synchronous>, transform_indices = @transform_2, window_bounds = array<i64: 9, 64, 64>}, {pipeline_mode = #tpu.pipeline_mode<synchronous>, transform_indices = @transform_3, window_bounds = array<i64: 32, 64>}, {pipeline_mode = #tpu.pipeline_mode<synchronous>, transform_indices = @transform_4, window_bounds = array<i64: 1, 64>}, {transform_indices = @transform_5, window_bounds = array<i64: 1>}, {transform_indices = @transform_6, window_bounds = array<i64: 2, 64, 64>}]} {
    %c0 = arith.constant 0 : index
    %c0_0 = arith.constant 0 : index
    %c0_1 = arith.constant 0 : index
    %c0_2 = arith.constant 0 : index
    %0 = vector.load %arg1[%c0, %c0_0, %c0_1, %c0_2] : memref<2x9x9x128xbf16, #tpu.memory_space<vmem>>, vector<2x8x8x128xbf16>
    %1 = vector.shape_cast %0 : vector<2x8x8x128xbf16> to vector<128x128xbf16>
    %c0_3 = arith.constant 0 : index
    %c0_4 = arith.constant 0 : index
    %c0_5 = arith.constant 0 : index
    %2 = vector.load %arg2[%c0_3, %c0_4, %c0_5] : memref<4x128x64xbf16, #tpu.memory_space<vmem>>, vector<1x128x64xbf16>
    %3 = vector.shape_cast %2 : vector<1x128x64xbf16> to vector<128x64xbf16>
    %cst = arith.constant dense<0.000000e+00> : vector<128x64xf32>
    %4 = tpu.matmul %1, %3, %cst {dimension_numbers = #tpu.dot_dimension_numbers<[1], [0], [0], [1], [0, 0, 1, 1], [], []>} : vector<128x128xbf16>, vector<128x64xbf16>, vector<128x64xf32> -> vector<128x64xf32>
    %c0_6 = arith.constant 0 : index
    %c0_7 = arith.constant 0 : index
    %c1 = arith.constant 1 : index
    %c0_8 = arith.constant 0 : index
    %5 = vector.load %arg1[%c0_6, %c0_7, %c1, %c0_8] : memref<2x9x9x128xbf16, #tpu.memory_space<vmem>>, vector<2x8x8x128xbf16>
    %6 = vector.shape_cast %5 : vector<2x8x8x128xbf16> to vector<128x128xbf16>
    %c1_9 = arith.constant 1 : index
    %c0_10 = arith.constant 0 : index
    %c0_11 = arith.constant 0 : index
    %7 = vector.load %arg2[%c1_9, %c0_10, %c0_11] : memref<4x128x64xbf16, #tpu.memory_space<vmem>>, vector<1x128x64xbf16>
    %8 = vector.shape_cast %7 : vector<1x128x64xbf16> to vector<128x64xbf16>
    %cst_12 = arith.constant dense<0.000000e+00> : vector<128x64xf32>
    %9 = tpu.matmul %6, %8, %cst_12 {dimension_numbers = #tpu.dot_dimension_numbers<[1], [0], [0], [1], [0, 0, 1, 1], [], []>} : vector<128x128xbf16>, vector<128x64xbf16>, vector<128x64xf32> -> vector<128x64xf32>
    %10 = arith.addf %4, %9 : vector<128x64xf32>
    %c0_13 = arith.constant 0 : index
    %c1_14 = arith.constant 1 : index
    %c0_15 = arith.constant 0 : index
    %c0_16 = arith.constant 0 : index
    %11 = vector.load %arg1[%c0_13, %c1_14, %c0_15, %c0_16] : memref<2x9x9x128xbf16, #tpu.memory_space<vmem>>, vector<2x8x8x128xbf16>
    %12 = vector.shape_cast %11 : vector<2x8x8x128xbf16> to vector<128x128xbf16>
    %c2 = arith.constant 2 : index
    %c0_17 = arith.constant 0 : index
    %c0_18 = arith.constant 0 : index
    %13 = vector.load %arg2[%c2, %c0_17, %c0_18] : memref<4x128x64xbf16, #tpu.memory_space<vmem>>, vector<1x128x64xbf16>
    %14 = vector.shape_cast %13 : vector<1x128x64xbf16> to vector<128x64xbf16>
    %cst_19 = arith.constant dense<0.000000e+00> : vector<128x64xf32>
    %15 = tpu.matmul %12, %14, %cst_19 {dimension_numbers = #tpu.dot_dimension_numbers<[1], [0], [0], [1], [0, 0, 1, 1], [], []>} : vector<128x128xbf16>, vector<128x64xbf16>, vector<128x64xf32> -> vector<128x64xf32>
    %16 = arith.addf %10, %15 : vector<128x64xf32>
    %c0_20 = arith.constant 0 : index
    %c1_21 = arith.constant 1 : index
    %c1_22 = arith.constant 1 : index
    %c0_23 = arith.constant 0 : index
    %17 = vector.load %arg1[%c0_20, %c1_21, %c1_22, %c0_23] : memref<2x9x9x128xbf16, #tpu.memory_space<vmem>>, vector<2x8x8x128xbf16>
    %18 = vector.shape_cast %17 : vector<2x8x8x128xbf16> to vector<128x128xbf16>
    %c3 = arith.constant 3 : index
    %c0_24 = arith.constant 0 : index
    %c0_25 = arith.constant 0 : index
    %19 = vector.load %arg2[%c3, %c0_24, %c0_25] : memref<4x128x64xbf16, #tpu.memory_space<vmem>>, vector<1x128x64xbf16>
    %20 = vector.shape_cast %19 : vector<1x128x64xbf16> to vector<128x64xbf16>
    %cst_26 = arith.constant dense<0.000000e+00> : vector<128x64xf32>
    %21 = tpu.matmul %18, %20, %cst_26 {dimension_numbers = #tpu.dot_dimension_numbers<[1], [0], [0], [1], [0, 0, 1, 1], [], []>} : vector<128x128xbf16>, vector<128x64xbf16>, vector<128x64xf32> -> vector<128x64xf32>
    %22 = arith.addf %16, %21 : vector<128x64xf32>
    %cst_27 = arith.constant 0.000000e+00 : f32
    %23 = vector.broadcast %cst_27 : f32 to vector<128x64xf32>
    %24 = arith.cmpf ogt, %22, %23 : vector<128x64xf32>
    %cst_28 = arith.constant 2.000000e-01 : f32
    %25 = vector.broadcast %cst_28 : f32 to vector<128x64xf32>
    %26 = arith.mulf %25, %22 : vector<128x64xf32>
    %27 = arith.select %24, %22, %26 : vector<128x64xi1>, vector<128x64xf32>
    %cst_29 = arith.constant 0.000000e+00 : bf16
    %28 = vector.broadcast %cst_29 : bf16 to vector<2x10x10x64xbf16>
    %c0_30 = arith.constant 0 : index
    %c0_31 = arith.constant 0 : index
    %c0_32 = arith.constant 0 : index
    %c0_33 = arith.constant 0 : index
    %29 = vector.load %arg8[%c0_30, %c0_31, %c0_32, %c0_33] : memref<2x10x10x64xbf16, #tpu.memory_space<vmem>>, vector<2x10x10x64xbf16>
    tpu.vector_store %arg8[%c0_30, %c0_31, %c0_32, %c0_33], %28 {strides = array<i32>} : memref<2x10x10x64xbf16, #tpu.memory_space<vmem>>, vector<2x10x10x64xbf16>,
    %30 = arith.truncf %27 : vector<128x64xf32> to vector<128x64xbf16>
    %31 = vector.shape_cast %30 : vector<128x64xbf16> to vector<2x8x8x64xbf16>
    %c0_34 = arith.constant 0 : index
    %c1_35 = arith.constant 1 : index
    %c1_36 = arith.constant 1 : index
    %c0_37 = arith.constant 0 : index
    %32 = vector.load %arg8[%c0_34, %c1_35, %c1_36, %c0_37] : memref<2x10x10x64xbf16, #tpu.memory_space<vmem>>, vector<2x8x8x64xbf16>
    tpu.vector_store %arg8[%c0_34, %c1_35, %c1_36, %c0_37], %31 {strides = array<i32>} : memref<2x10x10x64xbf16, #tpu.memory_space<vmem>>, vector<2x8x8x64xbf16>,
    %c0_38 = arith.constant 0 : index
    %c0_39 = arith.constant 0 : index
    %c0_40 = arith.constant 0 : index
    %c0_41 = arith.constant 0 : index
    %33 = vector.load %arg8[%c0_38, %c0_39, %c0_40, %c0_41] : memref<2x10x10x64xbf16, #tpu.memory_space<vmem>>, vector<2x8x8x64xbf16>
    %34 = vector.shape_cast %33 : vector<2x8x8x64xbf16> to vector<128x64xbf16>
    %c0_42 = arith.constant 0 : index
    %c0_43 = arith.constant 0 : index
    %c0_44 = arith.constant 0 : index
    %35 = vector.load %arg3[%c0_42, %c0_43, %c0_44] : memref<9x64x64xbf16, #tpu.memory_space<vmem>>, vector<1x64x64xbf16>
    %36 = vector.shape_cast %35 : vector<1x64x64xbf16> to vector<64x64xbf16>
    %cst_45 = arith.constant dense<0.000000e+00> : vector<128x64xf32>
    %37 = tpu.matmul %34, %36, %cst_45 {dimension_numbers = #tpu.dot_dimension_numbers<[1], [0], [0], [1], [0, 0, 1, 1], [], []>} : vector<128x64xbf16>, vector<64x64xbf16>, vector<128x64xf32> -> vector<128x64xf32>
    %c0_46 = arith.constant 0 : index
    %c0_47 = arith.constant 0 : index
    %c1_48 = arith.constant 1 : index
    %c0_49 = arith.constant 0 : index
    %38 = vector.load %arg8[%c0_46, %c0_47, %c1_48, %c0_49] : memref<2x10x10x64xbf16, #tpu.memory_space<vmem>>, vector<2x8x8x64xbf16>
    %39 = vector.shape_cast %38 : vector<2x8x8x64xbf16> to vector<128x64xbf16>
    %c1_50 = arith.constant 1 : index
    %c0_51 = arith.constant 0 : index
    %c0_52 = arith.constant 0 : index
    %40 = vector.load %arg3[%c1_50, %c0_51, %c0_52] : memref<9x64x64xbf16, #tpu.memory_space<vmem>>, vector<1x64x64xbf16>
    %41 = vector.shape_cast %40 : vector<1x64x64xbf16> to vector<64x64xbf16>
    %cst_53 = arith.constant dense<0.000000e+00> : vector<128x64xf32>
    %42 = tpu.matmul %39, %41, %cst_53 {dimension_numbers = #tpu.dot_dimension_numbers<[1], [0], [0], [1], [0, 0, 1, 1], [], []>} : vector<128x64xbf16>, vector<64x64xbf16>, vector<128x64xf32> -> vector<128x64xf32>
    %43 = arith.addf %37, %42 : vector<128x64xf32>
    %c0_54 = arith.constant 0 : index
    %c0_55 = arith.constant 0 : index
    %c2_56 = arith.constant 2 : index
    %c0_57 = arith.constant 0 : index
    %44 = vector.load %arg8[%c0_54, %c0_55, %c2_56, %c0_57] : memref<2x10x10x64xbf16, #tpu.memory_space<vmem>>, vector<2x8x8x64xbf16>
    %45 = vector.shape_cast %44 : vector<2x8x8x64xbf16> to vector<128x64xbf16>
    %c2_58 = arith.constant 2 : index
    %c0_59 = arith.constant 0 : index
    %c0_60 = arith.constant 0 : index
    %46 = vector.load %arg3[%c2_58, %c0_59, %c0_60] : memref<9x64x64xbf16, #tpu.memory_space<vmem>>, vector<1x64x64xbf16>
    %47 = vector.shape_cast %46 : vector<1x64x64xbf16> to vector<64x64xbf16>
    %cst_61 = arith.constant dense<0.000000e+00> : vector<128x64xf32>
    %48 = tpu.matmul %45, %47, %cst_61 {dimension_numbers = #tpu.dot_dimension_numbers<[1], [0], [0], [1], [0, 0, 1, 1], [], []>} : vector<128x64xbf16>, vector<64x64xbf16>, vector<128x64xf32> -> vector<128x64xf32>
    %49 = arith.addf %43, %48 : vector<128x64xf32>
    %c0_62 = arith.constant 0 : index
    %c1_63 = arith.constant 1 : index
    %c0_64 = arith.constant 0 : index
    %c0_65 = arith.constant 0 : index
    %50 = vector.load %arg8[%c0_62, %c1_63, %c0_64, %c0_65] : memref<2x10x10x64xbf16, #tpu.memory_space<vmem>>, vector<2x8x8x64xbf16>
    %51 = vector.shape_cast %50 : vector<2x8x8x64xbf16> to vector<128x64xbf16>
    %c3_66 = arith.constant 3 : index
    %c0_67 = arith.constant 0 : index
    %c0_68 = arith.constant 0 : index
    %52 = vector.load %arg3[%c3_66, %c0_67, %c0_68] : memref<9x64x64xbf16, #tpu.memory_space<vmem>>, vector<1x64x64xbf16>
    %53 = vector.shape_cast %52 : vector<1x64x64xbf16> to vector<64x64xbf16>
    %cst_69 = arith.constant dense<0.000000e+00> : vector<128x64xf32>
    %54 = tpu.matmul %51, %53, %cst_69 {dimension_numbers = #tpu.dot_dimension_numbers<[1], [0], [0], [1], [0, 0, 1, 1], [], []>} : vector<128x64xbf16>, vector<64x64xbf16>, vector<128x64xf32> -> vector<128x64xf32>
    %55 = arith.addf %49, %54 : vector<128x64xf32>
    %c0_70 = arith.constant 0 : index
    %c1_71 = arith.constant 1 : index
    %c1_72 = arith.constant 1 : index
    %c0_73 = arith.constant 0 : index
    %56 = vector.load %arg8[%c0_70, %c1_71, %c1_72, %c0_73] : memref<2x10x10x64xbf16, #tpu.memory_space<vmem>>, vector<2x8x8x64xbf16>
    %57 = vector.shape_cast %56 : vector<2x8x8x64xbf16> to vector<128x64xbf16>
    %c4 = arith.constant 4 : index
    %c0_74 = arith.constant 0 : index
    %c0_75 = arith.constant 0 : index
    %58 = vector.load %arg3[%c4, %c0_74, %c0_75] : memref<9x64x64xbf16, #tpu.memory_space<vmem>>, vector<1x64x64xbf16>
    %59 = vector.shape_cast %58 : vector<1x64x64xbf16> to vector<64x64xbf16>
    %cst_76 = arith.constant dense<0.000000e+00> : vector<128x64xf32>
    %60 = tpu.matmul %57, %59, %cst_76 {dimension_numbers = #tpu.dot_dimension_numbers<[1], [0], [0], [1], [0, 0, 1, 1], [], []>} : vector<128x64xbf16>, vector<64x64xbf16>, vector<128x64xf32> -> vector<128x64xf32>
    %61 = arith.addf %55, %60 : vector<128x64xf32>
    %c0_77 = arith.constant 0 : index
    %c1_78 = arith.constant 1 : index
    %c2_79 = arith.constant 2 : index
    %c0_80 = arith.constant 0 : index
    %62 = vector.load %arg8[%c0_77, %c1_78, %c2_79, %c0_80] : memref<2x10x10x64xbf16, #tpu.memory_space<vmem>>, vector<2x8x8x64xbf16>
    %63 = vector.shape_cast %62 : vector<2x8x8x64xbf16> to vector<128x64xbf16>
    %c5 = arith.constant 5 : index
    %c0_81 = arith.constant 0 : index
    %c0_82 = arith.constant 0 : index
    %64 = vector.load %arg3[%c5, %c0_81, %c0_82] : memref<9x64x64xbf16, #tpu.memory_space<vmem>>, vector<1x64x64xbf16>
    %65 = vector.shape_cast %64 : vector<1x64x64xbf16> to vector<64x64xbf16>
    %cst_83 = arith.constant dense<0.000000e+00> : vector<128x64xf32>
    %66 = tpu.matmul %63, %65, %cst_83 {dimension_numbers = #tpu.dot_dimension_numbers<[1], [0], [0], [1], [0, 0, 1, 1], [], []>} : vector<128x64xbf16>, vector<64x64xbf16>, vector<128x64xf32> -> vector<128x64xf32>
    %67 = arith.addf %61, %66 : vector<128x64xf32>
    %c0_84 = arith.constant 0 : index
    %c2_85 = arith.constant 2 : index
    %c0_86 = arith.constant 0 : index
    %c0_87 = arith.constant 0 : index
    %68 = vector.load %arg8[%c0_84, %c2_85, %c0_86, %c0_87] : memref<2x10x10x64xbf16, #tpu.memory_space<vmem>>, vector<2x8x8x64xbf16>
    %69 = vector.shape_cast %68 : vector<2x8x8x64xbf16> to vector<128x64xbf16>
    %c6 = arith.constant 6 : index
    %c0_88 = arith.constant 0 : index
    %c0_89 = arith.constant 0 : index
    %70 = vector.load %arg3[%c6, %c0_88, %c0_89] : memref<9x64x64xbf16, #tpu.memory_space<vmem>>, vector<1x64x64xbf16>
    %71 = vector.shape_cast %70 : vector<1x64x64xbf16> to vector<64x64xbf16>
    %cst_90 = arith.constant dense<0.000000e+00> : vector<128x64xf32>
    %72 = tpu.matmul %69, %71, %cst_90 {dimension_numbers = #tpu.dot_dimension_numbers<[1], [0], [0], [1], [0, 0, 1, 1], [], []>} : vector<128x64xbf16>, vector<64x64xbf16>, vector<128x64xf32> -> vector<128x64xf32>
    %73 = arith.addf %67, %72 : vector<128x64xf32>
    %c0_91 = arith.constant 0 : index
    %c2_92 = arith.constant 2 : index
    %c1_93 = arith.constant 1 : index
    %c0_94 = arith.constant 0 : index
    %74 = vector.load %arg8[%c0_91, %c2_92, %c1_93, %c0_94] : memref<2x10x10x64xbf16, #tpu.memory_space<vmem>>, vector<2x8x8x64xbf16>
    %75 = vector.shape_cast %74 : vector<2x8x8x64xbf16> to vector<128x64xbf16>
    %c7 = arith.constant 7 : index
    %c0_95 = arith.constant 0 : index
    %c0_96 = arith.constant 0 : index
    %76 = vector.load %arg3[%c7, %c0_95, %c0_96] : memref<9x64x64xbf16, #tpu.memory_space<vmem>>, vector<1x64x64xbf16>
    %77 = vector.shape_cast %76 : vector<1x64x64xbf16> to vector<64x64xbf16>
    %cst_97 = arith.constant dense<0.000000e+00> : vector<128x64xf32>
    %78 = tpu.matmul %75, %77, %cst_97 {dimension_numbers = #tpu.dot_dimension_numbers<[1], [0], [0], [1], [0, 0, 1, 1], [], []>} : vector<128x64xbf16>, vector<64x64xbf16>, vector<128x64xf32> -> vector<128x64xf32>
    %79 = arith.addf %73, %78 : vector<128x64xf32>
    %c0_98 = arith.constant 0 : index
    %c2_99 = arith.constant 2 : index
    %c2_100 = arith.constant 2 : index
    %c0_101 = arith.constant 0 : index
    %80 = vector.load %arg8[%c0_98, %c2_99, %c2_100, %c0_101] : memref<2x10x10x64xbf16, #tpu.memory_space<vmem>>, vector<2x8x8x64xbf16>
    %81 = vector.shape_cast %80 : vector<2x8x8x64xbf16> to vector<128x64xbf16>
    %c8 = arith.constant 8 : index
    %c0_102 = arith.constant 0 : index
    %c0_103 = arith.constant 0 : index
    %82 = vector.load %arg3[%c8, %c0_102, %c0_103] : memref<9x64x64xbf16, #tpu.memory_space<vmem>>, vector<1x64x64xbf16>
    %83 = vector.shape_cast %82 : vector<1x64x64xbf16> to vector<64x64xbf16>
    %cst_104 = arith.constant dense<0.000000e+00> : vector<128x64xf32>
    %84 = tpu.matmul %81, %83, %cst_104 {dimension_numbers = #tpu.dot_dimension_numbers<[1], [0], [0], [1], [0, 0, 1, 1], [], []>} : vector<128x64xbf16>, vector<64x64xbf16>, vector<128x64xf32> -> vector<128x64xf32>
    %85 = arith.addf %79, %84 : vector<128x64xf32>
    %cst_105 = arith.constant 0.000000e+00 : f32
    %86 = vector.broadcast %cst_105 : f32 to vector<128x64xf32>
    %87 = arith.cmpf ogt, %85, %86 : vector<128x64xf32>
    %cst_106 = arith.constant 2.000000e-01 : f32
    %88 = vector.broadcast %cst_106 : f32 to vector<128x64xf32>
    %89 = arith.mulf %88, %85 : vector<128x64xf32>
    %90 = arith.select %87, %85, %89 : vector<128x64xi1>, vector<128x64xf32>
    %c0_107 = arith.constant 0 : index
    %c0_108 = arith.constant 0 : index
    %c0_109 = arith.constant 0 : index
    %c96 = arith.constant 96 : index
    %91 = vector.load %arg1[%c0_107, %c0_108, %c0_109, %c96] : memref<2x9x9x128xbf16, #tpu.memory_space<vmem>>, vector<2x8x8x32xbf16>
    %92 = arith.extf %91 : vector<2x8x8x32xbf16> to vector<2x8x8x32xf32>
    %c0_110 = arith.constant 0 : index
    %c0_111 = arith.constant 0 : index
    %c1_112 = arith.constant 1 : index
    %c64 = arith.constant 64 : index
    %93 = vector.load %arg1[%c0_110, %c0_111, %c1_112, %c64] : memref<2x9x9x128xbf16, #tpu.memory_space<vmem>>, vector<2x8x8x32xbf16>
    %94 = arith.extf %93 : vector<2x8x8x32xbf16> to vector<2x8x8x32xf32>
    %95 = arith.addf %92, %94 : vector<2x8x8x32xf32>
    %c0_113 = arith.constant 0 : index
    %c1_114 = arith.constant 1 : index
    %c0_115 = arith.constant 0 : index
    %c32 = arith.constant 32 : index
    %96 = vector.load %arg1[%c0_113, %c1_114, %c0_115, %c32] : memref<2x9x9x128xbf16, #tpu.memory_space<vmem>>, vector<2x8x8x32xbf16>
    %97 = arith.extf %96 : vector<2x8x8x32xbf16> to vector<2x8x8x32xf32>
    %98 = arith.addf %95, %97 : vector<2x8x8x32xf32>
    %c0_116 = arith.constant 0 : index
    %c1_117 = arith.constant 1 : index
    %c1_118 = arith.constant 1 : index
    %c0_119 = arith.constant 0 : index
    %99 = vector.load %arg1[%c0_116, %c1_117, %c1_118, %c0_119] : memref<2x9x9x128xbf16, #tpu.memory_space<vmem>>, vector<2x8x8x32xbf16>
    %100 = arith.extf %99 : vector<2x8x8x32xbf16> to vector<2x8x8x32xf32>
    %101 = arith.addf %98, %100 : vector<2x8x8x32xf32>
    %cst_120 = arith.constant 2.500000e-01 : f32
    %102 = vector.broadcast %cst_120 : f32 to vector<2x8x8x32xf32>
    %103 = arith.mulf %102, %101 : vector<2x8x8x32xf32>
    %104 = vector.shape_cast %103 : vector<2x8x8x32xf32> to vector<128x32xf32>
    %105 = arith.truncf %104 : vector<128x32xf32> to vector<128x32xbf16>
    %c0_121 = arith.constant 0 : index
    %c0_122 = arith.constant 0 : index
    %106 = vector.load %arg4[%c0_121, %c0_122] : memref<32x64xbf16, #tpu.memory_space<vmem>>, vector<32x64xbf16>
    %cst_123 = arith.constant dense<0.000000e+00> : vector<128x64xf32>
    %107 = tpu.matmul %105, %106, %cst_123 {dimension_numbers = #tpu.dot_dimension_numbers<[1], [0], [0], [1], [0, 0, 1, 1], [], []>} : vector<128x32xbf16>, vector<32x64xbf16>, vector<128x64xf32> -> vector<128x64xf32>
    %c0_124 = arith.constant 0 : index
    %c0_125 = arith.constant 0 : index
    %108 = vector.load %arg5[%c0_124, %c0_125] : memref<1x64xf32, #tpu.memory_space<vmem>>, vector<1x64xf32>
    %109 = vector.broadcast %108 : vector<1x64xf32> to vector<128x64xf32>
    %110 = arith.addf %107, %109 : vector<128x64xf32>
    %c0_126 = arith.constant 0 : index
    %111 = memref.load %arg6[%c0_126] : memref<1xf32, #tpu.memory_space<smem>>
    %112 = vector.broadcast %111 : f32 to vector<128x64xf32>
    %113 = arith.mulf %112, %90 : vector<128x64xf32>
    %114 = arith.addf %110, %113 : vector<128x64xf32>
    %115 = vector.shape_cast %114 : vector<128x64xf32> to vector<2x64x64xf32>
    %c0_127 = arith.constant 0 : index
    %c0_128 = arith.constant 0 : index
    %c0_129 = arith.constant 0 : index
    %116 = vector.load %arg7[%c0_127, %c0_128, %c0_129] : memref<2x64x64xf32, #tpu.memory_space<vmem>>, vector<2x64x64xf32>
    tpu.vector_store %arg7[%c0_127, %c0_128, %c0_129], %115 {strides = array<i32>} : memref<2x64x64xf32, #tpu.memory_space<vmem>>, vector<2x64x64xf32>,
    return
  }
  func.func @transform_0(%arg0: i32) -> (i32, i32, i32, i32) {
    %c0_i32 = arith.constant 0 : i32
    %c0_i32_0 = arith.constant 0 : i32
    %c0_i32_1 = arith.constant 0 : i32
    %c0_i32_2 = arith.constant 0 : i32
    return %arg0, %c0_i32, %c0_i32_0, %c0_i32_1 : i32, i32, i32, i32
  }
  func.func @transform_1(%arg0: i32) -> (i32, i32, i32) {
    %c0_i32 = arith.constant 0 : i32
    %c0_i32_0 = arith.constant 0 : i32
    %c0_i32_1 = arith.constant 0 : i32
    %c0_i32_2 = arith.constant 0 : i32
    return %c0_i32, %c0_i32_0, %c0_i32_1 : i32, i32, i32
  }
  func.func @transform_2(%arg0: i32) -> (i32, i32, i32) {
    %c0_i32 = arith.constant 0 : i32
    %c0_i32_0 = arith.constant 0 : i32
    %c0_i32_1 = arith.constant 0 : i32
    %c0_i32_2 = arith.constant 0 : i32
    return %c0_i32, %c0_i32_0, %c0_i32_1 : i32, i32, i32
  }
  func.func @transform_3(%arg0: i32) -> (i32, i32) {
    %c0_i32 = arith.constant 0 : i32
    %c0_i32_0 = arith.constant 0 : i32
    %c0_i32_1 = arith.constant 0 : i32
    return %c0_i32, %c0_i32_0 : i32, i32
  }
  func.func @transform_4(%arg0: i32) -> (i32, i32) {
    %c0_i32 = arith.constant 0 : i32
    %c0_i32_0 = arith.constant 0 : i32
    %c0_i32_1 = arith.constant 0 : i32
    return %c0_i32, %c0_i32_0 : i32, i32
  }
  func.func @transform_5(%arg0: i32) -> i32 {
    %c0_i32 = arith.constant 0 : i32
    %c0_i32_0 = arith.constant 0 : i32
    return %c0_i32 : i32
  }
  func.func @transform_6(%arg0: i32) -> (i32, i32, i32) {
    %c0_i32 = arith.constant 0 : i32
    %c0_i32_0 = arith.constant 0 : i32
    %c0_i32_1 = arith.constant 0 : i32
    return %arg0, %c0_i32, %c0_i32_0 : i32, i32, i32
  }
}

module attributes {stable_mosaic.version = 11 : i64} {
  func.func @kernel(%arg0: i32, %arg1: memref<2x9x9x128xbf16, #tpu.memory_space<vmem>>, %arg2: memref<4x128x64xbf16, #tpu.memory_space<vmem>>, %arg3: memref<9x64x64xbf16, #tpu.memory_space<vmem>>, %arg4: memref<32x64xbf16, #tpu.memory_space<vmem>>, %arg5: memref<1x64xf32, #tpu.memory_space<vmem>>, %arg6: memref<1xf32, #tpu.memory_space<smem>>, %arg7: memref<2x64x64xf32, #tpu.memory_space<vmem>>, %arg8: memref<2x10x10x64xbf16, #tpu.memory_space<vmem>>) attributes {dimension_semantics = [#tpu.dimension_semantics<parallel>], iteration_bounds = array<i64: 1>, scalar_prefetch = 0 : i64, scratch_operands = 1 : i64, tpu.core_type = #tpu.core_type<tc>, window_params = [{transform_indices = @transform_0, window_bounds = array<i64: 2, 9, 9, 128>}, {pipeline_mode = #tpu.pipeline_mode<synchronous>, transform_indices = @transform_1, window_bounds = array<i64: 4, 128, 64>}, {pipeline_mode = #tpu.pipeline_mode<synchronous>, transform_indices = @transform_2, window_bounds = array<i64: 9, 64, 64>}, {pipeline_mode = #tpu.pipeline_mode<synchronous>, transform_indices = @transform_3, window_bounds = array<i64: 32, 64>}, {pipeline_mode = #tpu.pipeline_mode<synchronous>, transform_indices = @transform_4, window_bounds = array<i64: 1, 64>}, {transform_indices = @transform_5, window_bounds = array<i64: 1>}, {transform_indices = @transform_6, window_bounds = array<i64: 2, 64, 64>}]} {
    %c0 = arith.constant 0 : index
    %c0_0 = arith.constant 0 : index
    %c0_1 = arith.constant 0 : index
    %c0_2 = arith.constant 0 : index
    %0 = vector.load %arg1[%c0, %c0_0, %c0_1, %c0_2] : memref<2x9x9x128xbf16, #tpu.memory_space<vmem>>, vector<2x8x8x128xbf16>
    %1 = vector.shape_cast %0 : vector<2x8x8x128xbf16> to vector<128x128xbf16>
    %c0_3 = arith.constant 0 : index
    %c0_4 = arith.constant 0 : index
    %c0_5 = arith.constant 0 : index
    %2 = vector.load %arg2[%c0_3, %c0_4, %c0_5] : memref<4x128x64xbf16, #tpu.memory_space<vmem>>, vector<1x128x64xbf16>
    %3 = vector.shape_cast %2 : vector<1x128x64xbf16> to vector<128x64xbf16>
    %cst = arith.constant dense<0.000000e+00> : vector<128x64xf32>
    %4 = tpu.matmul %1, %3, %cst {dimension_numbers = #tpu.dot_dimension_numbers<[1], [0], [0], [1], [0, 0, 1, 1], [], []>} : vector<128x128xbf16>, vector<128x64xbf16>, vector<128x64xf32> -> vector<128x64xf32>
    %c0_6 = arith.constant 0 : index
    %c0_7 = arith.constant 0 : index
    %c1 = arith.constant 1 : index
    %c0_8 = arith.constant 0 : index
    %5 = vector.load %arg1[%c0_6, %c0_7, %c1, %c0_8] : memref<2x9x9x128xbf16, #tpu.memory_space<vmem>>, vector<2x8x8x128xbf16>
    %6 = vector.shape_cast %5 : vector<2x8x8x128xbf16> to vector<128x128xbf16>
    %c1_9 = arith.constant 1 : index
    %c0_10 = arith.constant 0 : index
    %c0_11 = arith.constant 0 : index
    %7 = vector.load %arg2[%c1_9, %c0_10, %c0_11] : memref<4x128x64xbf16, #tpu.memory_space<vmem>>, vector<1x128x64xbf16>
    %8 = vector.shape_cast %7 : vector<1x128x64xbf16> to vector<128x64xbf16>
    %cst_12 = arith.constant dense<0.000000e+00> : vector<128x64xf32>
    %9 = tpu.matmul %6, %8, %cst_12 {dimension_numbers = #tpu.dot_dimension_numbers<[1], [0], [0], [1], [0, 0, 1, 1], [], []>} : vector<128x128xbf16>, vector<128x64xbf16>, vector<128x64xf32> -> vector<128x64xf32>
    %10 = arith.addf %4, %9 : vector<128x64xf32>
    %c0_13 = arith.constant 0 : index
    %c1_14 = arith.constant 1 : index
    %c0_15 = arith.constant 0 : index
    %c0_16 = arith.constant 0 : index
    %11 = vector.load %arg1[%c0_13, %c1_14, %c0_15, %c0_16] : memref<2x9x9x128xbf16, #tpu.memory_space<vmem>>, vector<2x8x8x128xbf16>
    %12 = vector.shape_cast %11 : vector<2x8x8x128xbf16> to vector<128x128xbf16>
    %c2 = arith.constant 2 : index
    %c0_17 = arith.constant 0 : index
    %c0_18 = arith.constant 0 : index
    %13 = vector.load %arg2[%c2, %c0_17, %c0_18] : memref<4x128x64xbf16, #tpu.memory_space<vmem>>, vector<1x128x64xbf16>
    %14 = vector.shape_cast %13 : vector<1x128x64xbf16> to vector<128x64xbf16>
    %cst_19 = arith.constant dense<0.000000e+00> : vector<128x64xf32>
    %15 = tpu.matmul %12, %14, %cst_19 {dimension_numbers = #tpu.dot_dimension_numbers<[1], [0], [0], [1], [0, 0, 1, 1], [], []>} : vector<128x128xbf16>, vector<128x64xbf16>, vector<128x64xf32> -> vector<128x64xf32>
    %16 = arith.addf %10, %15 : vector<128x64xf32>
    %c0_20 = arith.constant 0 : index
    %c1_21 = arith.constant 1 : index
    %c1_22 = arith.constant 1 : index
    %c0_23 = arith.constant 0 : index
    %17 = vector.load %arg1[%c0_20, %c1_21, %c1_22, %c0_23] : memref<2x9x9x128xbf16, #tpu.memory_space<vmem>>, vector<2x8x8x128xbf16>
    %18 = vector.shape_cast %17 : vector<2x8x8x128xbf16> to vector<128x128xbf16>
    %c3 = arith.constant 3 : index
    %c0_24 = arith.constant 0 : index
    %c0_25 = arith.constant 0 : index
    %19 = vector.load %arg2[%c3, %c0_24, %c0_25] : memref<4x128x64xbf16, #tpu.memory_space<vmem>>, vector<1x128x64xbf16>
    %20 = vector.shape_cast %19 : vector<1x128x64xbf16> to vector<128x64xbf16>
    %cst_26 = arith.constant dense<0.000000e+00> : vector<128x64xf32>
    %21 = tpu.matmul %18, %20, %cst_26 {dimension_numbers = #tpu.dot_dimension_numbers<[1], [0], [0], [1], [0, 0, 1, 1], [], []>} : vector<128x128xbf16>, vector<128x64xbf16>, vector<128x64xf32> -> vector<128x64xf32>
    %22 = arith.addf %16, %21 : vector<128x64xf32>
    %cst_27 = arith.constant 0.000000e+00 : f32
    %23 = vector.broadcast %cst_27 : f32 to vector<128x64xf32>
    %24 = arith.cmpf ogt, %22, %23 : vector<128x64xf32>
    %cst_28 = arith.constant 2.000000e-01 : f32
    %25 = vector.broadcast %cst_28 : f32 to vector<128x64xf32>
    %26 = arith.mulf %25, %22 : vector<128x64xf32>
    %27 = arith.select %24, %22, %26 : vector<128x64xi1>, vector<128x64xf32>
    %cst_29 = arith.constant 0.000000e+00 : bf16
    %28 = vector.broadcast %cst_29 : bf16 to vector<2x10x10x64xbf16>
    %c0_30 = arith.constant 0 : index
    %c0_31 = arith.constant 0 : index
    %c0_32 = arith.constant 0 : index
    %c0_33 = arith.constant 0 : index
    %29 = vector.load %arg8[%c0_30, %c0_31, %c0_32, %c0_33] : memref<2x10x10x64xbf16, #tpu.memory_space<vmem>>, vector<2x10x10x64xbf16>
    tpu.vector_store %arg8[%c0_30, %c0_31, %c0_32, %c0_33], %28 {strides = array<i32>} : memref<2x10x10x64xbf16, #tpu.memory_space<vmem>>, vector<2x10x10x64xbf16>,
    %30 = arith.truncf %27 : vector<128x64xf32> to vector<128x64xbf16>
    %31 = vector.shape_cast %30 : vector<128x64xbf16> to vector<2x8x8x64xbf16>
    %c0_34 = arith.constant 0 : index
    %c1_35 = arith.constant 1 : index
    %c1_36 = arith.constant 1 : index
    %c0_37 = arith.constant 0 : index
    %32 = vector.load %arg8[%c0_34, %c1_35, %c1_36, %c0_37] : memref<2x10x10x64xbf16, #tpu.memory_space<vmem>>, vector<2x8x8x64xbf16>
    tpu.vector_store %arg8[%c0_34, %c1_35, %c1_36, %c0_37], %31 {strides = array<i32>} : memref<2x10x10x64xbf16, #tpu.memory_space<vmem>>, vector<2x8x8x64xbf16>,
    %c0_38 = arith.constant 0 : index
    %c0_39 = arith.constant 0 : index
    %c0_40 = arith.constant 0 : index
    %c0_41 = arith.constant 0 : index
    %33 = vector.load %arg8[%c0_38, %c0_39, %c0_40, %c0_41] : memref<2x10x10x64xbf16, #tpu.memory_space<vmem>>, vector<2x8x8x64xbf16>
    %34 = vector.shape_cast %33 : vector<2x8x8x64xbf16> to vector<128x64xbf16>
    %c0_42 = arith.constant 0 : index
    %c0_43 = arith.constant 0 : index
    %c0_44 = arith.constant 0 : index
    %35 = vector.load %arg3[%c0_42, %c0_43, %c0_44] : memref<9x64x64xbf16, #tpu.memory_space<vmem>>, vector<1x64x64xbf16>
    %36 = vector.shape_cast %35 : vector<1x64x64xbf16> to vector<64x64xbf16>
    %cst_45 = arith.constant dense<0.000000e+00> : vector<128x64xf32>
    %37 = tpu.matmul %34, %36, %cst_45 {dimension_numbers = #tpu.dot_dimension_numbers<[1], [0], [0], [1], [0, 0, 1, 1], [], []>} : vector<128x64xbf16>, vector<64x64xbf16>, vector<128x64xf32> -> vector<128x64xf32>
    %c0_46 = arith.constant 0 : index
    %c0_47 = arith.constant 0 : index
    %c1_48 = arith.constant 1 : index
    %c0_49 = arith.constant 0 : index
    %38 = vector.load %arg8[%c0_46, %c0_47, %c1_48, %c0_49] : memref<2x10x10x64xbf16, #tpu.memory_space<vmem>>, vector<2x8x8x64xbf16>
    %39 = vector.shape_cast %38 : vector<2x8x8x64xbf16> to vector<128x64xbf16>
    %c1_50 = arith.constant 1 : index
    %c0_51 = arith.constant 0 : index
    %c0_52 = arith.constant 0 : index
    %40 = vector.load %arg3[%c1_50, %c0_51, %c0_52] : memref<9x64x64xbf16, #tpu.memory_space<vmem>>, vector<1x64x64xbf16>
    %41 = vector.shape_cast %40 : vector<1x64x64xbf16> to vector<64x64xbf16>
    %cst_53 = arith.constant dense<0.000000e+00> : vector<128x64xf32>
    %42 = tpu.matmul %39, %41, %cst_53 {dimension_numbers = #tpu.dot_dimension_numbers<[1], [0], [0], [1], [0, 0, 1, 1], [], []>} : vector<128x64xbf16>, vector<64x64xbf16>, vector<128x64xf32> -> vector<128x64xf32>
    %43 = arith.addf %37, %42 : vector<128x64xf32>
    %c0_54 = arith.constant 0 : index
    %c0_55 = arith.constant 0 : index
    %c2_56 = arith.constant 2 : index
    %c0_57 = arith.constant 0 : index
    %44 = vector.load %arg8[%c0_54, %c0_55, %c2_56, %c0_57] : memref<2x10x10x64xbf16, #tpu.memory_space<vmem>>, vector<2x8x8x64xbf16>
    %45 = vector.shape_cast %44 : vector<2x8x8x64xbf16> to vector<128x64xbf16>
    %c2_58 = arith.constant 2 : index
    %c0_59 = arith.constant 0 : index
    %c0_60 = arith.constant 0 : index
    %46 = vector.load %arg3[%c2_58, %c0_59, %c0_60] : memref<9x64x64xbf16, #tpu.memory_space<vmem>>, vector<1x64x64xbf16>
    %47 = vector.shape_cast %46 : vector<1x64x64xbf16> to vector<64x64xbf16>
    %cst_61 = arith.constant dense<0.000000e+00> : vector<128x64xf32>
    %48 = tpu.matmul %45, %47, %cst_61 {dimension_numbers = #tpu.dot_dimension_numbers<[1], [0], [0], [1], [0, 0, 1, 1], [], []>} : vector<128x64xbf16>, vector<64x64xbf16>, vector<128x64xf32> -> vector<128x64xf32>
    %49 = arith.addf %43, %48 : vector<128x64xf32>
    %c0_62 = arith.constant 0 : index
    %c1_63 = arith.constant 1 : index
    %c0_64 = arith.constant 0 : index
    %c0_65 = arith.constant 0 : index
    %50 = vector.load %arg8[%c0_62, %c1_63, %c0_64, %c0_65] : memref<2x10x10x64xbf16, #tpu.memory_space<vmem>>, vector<2x8x8x64xbf16>
    %51 = vector.shape_cast %50 : vector<2x8x8x64xbf16> to vector<128x64xbf16>
    %c3_66 = arith.constant 3 : index
    %c0_67 = arith.constant 0 : index
    %c0_68 = arith.constant 0 : index
    %52 = vector.load %arg3[%c3_66, %c0_67, %c0_68] : memref<9x64x64xbf16, #tpu.memory_space<vmem>>, vector<1x64x64xbf16>
    %53 = vector.shape_cast %52 : vector<1x64x64xbf16> to vector<64x64xbf16>
    %cst_69 = arith.constant dense<0.000000e+00> : vector<128x64xf32>
    %54 = tpu.matmul %51, %53, %cst_69 {dimension_numbers = #tpu.dot_dimension_numbers<[1], [0], [0], [1], [0, 0, 1, 1], [], []>} : vector<128x64xbf16>, vector<64x64xbf16>, vector<128x64xf32> -> vector<128x64xf32>
    %55 = arith.addf %49, %54 : vector<128x64xf32>
    %c0_70 = arith.constant 0 : index
    %c1_71 = arith.constant 1 : index
    %c1_72 = arith.constant 1 : index
    %c0_73 = arith.constant 0 : index
    %56 = vector.load %arg8[%c0_70, %c1_71, %c1_72, %c0_73] : memref<2x10x10x64xbf16, #tpu.memory_space<vmem>>, vector<2x8x8x64xbf16>
    %57 = vector.shape_cast %56 : vector<2x8x8x64xbf16> to vector<128x64xbf16>
    %c4 = arith.constant 4 : index
    %c0_74 = arith.constant 0 : index
    %c0_75 = arith.constant 0 : index
    %58 = vector.load %arg3[%c4, %c0_74, %c0_75] : memref<9x64x64xbf16, #tpu.memory_space<vmem>>, vector<1x64x64xbf16>
    %59 = vector.shape_cast %58 : vector<1x64x64xbf16> to vector<64x64xbf16>
    %cst_76 = arith.constant dense<0.000000e+00> : vector<128x64xf32>
    %60 = tpu.matmul %57, %59, %cst_76 {dimension_numbers = #tpu.dot_dimension_numbers<[1], [0], [0], [1], [0, 0, 1, 1], [], []>} : vector<128x64xbf16>, vector<64x64xbf16>, vector<128x64xf32> -> vector<128x64xf32>
    %61 = arith.addf %55, %60 : vector<128x64xf32>
    %c0_77 = arith.constant 0 : index
    %c1_78 = arith.constant 1 : index
    %c2_79 = arith.constant 2 : index
    %c0_80 = arith.constant 0 : index
    %62 = vector.load %arg8[%c0_77, %c1_78, %c2_79, %c0_80] : memref<2x10x10x64xbf16, #tpu.memory_space<vmem>>, vector<2x8x8x64xbf16>
    %63 = vector.shape_cast %62 : vector<2x8x8x64xbf16> to vector<128x64xbf16>
    %c5 = arith.constant 5 : index
    %c0_81 = arith.constant 0 : index
    %c0_82 = arith.constant 0 : index
    %64 = vector.load %arg3[%c5, %c0_81, %c0_82] : memref<9x64x64xbf16, #tpu.memory_space<vmem>>, vector<1x64x64xbf16>
    %65 = vector.shape_cast %64 : vector<1x64x64xbf16> to vector<64x64xbf16>
    %cst_83 = arith.constant dense<0.000000e+00> : vector<128x64xf32>
    %66 = tpu.matmul %63, %65, %cst_83 {dimension_numbers = #tpu.dot_dimension_numbers<[1], [0], [0], [1], [0, 0, 1, 1], [], []>} : vector<128x64xbf16>, vector<64x64xbf16>, vector<128x64xf32> -> vector<128x64xf32>
    %67 = arith.addf %61, %66 : vector<128x64xf32>
    %c0_84 = arith.constant 0 : index
    %c2_85 = arith.constant 2 : index
    %c0_86 = arith.constant 0 : index
    %c0_87 = arith.constant 0 : index
    %68 = vector.load %arg8[%c0_84, %c2_85, %c0_86, %c0_87] : memref<2x10x10x64xbf16, #tpu.memory_space<vmem>>, vector<2x8x8x64xbf16>
    %69 = vector.shape_cast %68 : vector<2x8x8x64xbf16> to vector<128x64xbf16>
    %c6 = arith.constant 6 : index
    %c0_88 = arith.constant 0 : index
    %c0_89 = arith.constant 0 : index
    %70 = vector.load %arg3[%c6, %c0_88, %c0_89] : memref<9x64x64xbf16, #tpu.memory_space<vmem>>, vector<1x64x64xbf16>
    %71 = vector.shape_cast %70 : vector<1x64x64xbf16> to vector<64x64xbf16>
    %cst_90 = arith.constant dense<0.000000e+00> : vector<128x64xf32>
    %72 = tpu.matmul %69, %71, %cst_90 {dimension_numbers = #tpu.dot_dimension_numbers<[1], [0], [0], [1], [0, 0, 1, 1], [], []>} : vector<128x64xbf16>, vector<64x64xbf16>, vector<128x64xf32> -> vector<128x64xf32>
    %73 = arith.addf %67, %72 : vector<128x64xf32>
    %c0_91 = arith.constant 0 : index
    %c2_92 = arith.constant 2 : index
    %c1_93 = arith.constant 1 : index
    %c0_94 = arith.constant 0 : index
    %74 = vector.load %arg8[%c0_91, %c2_92, %c1_93, %c0_94] : memref<2x10x10x64xbf16, #tpu.memory_space<vmem>>, vector<2x8x8x64xbf16>
    %75 = vector.shape_cast %74 : vector<2x8x8x64xbf16> to vector<128x64xbf16>
    %c7 = arith.constant 7 : index
    %c0_95 = arith.constant 0 : index
    %c0_96 = arith.constant 0 : index
    %76 = vector.load %arg3[%c7, %c0_95, %c0_96] : memref<9x64x64xbf16, #tpu.memory_space<vmem>>, vector<1x64x64xbf16>
    %77 = vector.shape_cast %76 : vector<1x64x64xbf16> to vector<64x64xbf16>
    %cst_97 = arith.constant dense<0.000000e+00> : vector<128x64xf32>
    %78 = tpu.matmul %75, %77, %cst_97 {dimension_numbers = #tpu.dot_dimension_numbers<[1], [0], [0], [1], [0, 0, 1, 1], [], []>} : vector<128x64xbf16>, vector<64x64xbf16>, vector<128x64xf32> -> vector<128x64xf32>
    %79 = arith.addf %73, %78 : vector<128x64xf32>
    %c0_98 = arith.constant 0 : index
    %c2_99 = arith.constant 2 : index
    %c2_100 = arith.constant 2 : index
    %c0_101 = arith.constant 0 : index
    %80 = vector.load %arg8[%c0_98, %c2_99, %c2_100, %c0_101] : memref<2x10x10x64xbf16, #tpu.memory_space<vmem>>, vector<2x8x8x64xbf16>
    %81 = vector.shape_cast %80 : vector<2x8x8x64xbf16> to vector<128x64xbf16>
    %c8 = arith.constant 8 : index
    %c0_102 = arith.constant 0 : index
    %c0_103 = arith.constant 0 : index
    %82 = vector.load %arg3[%c8, %c0_102, %c0_103] : memref<9x64x64xbf16, #tpu.memory_space<vmem>>, vector<1x64x64xbf16>
    %83 = vector.shape_cast %82 : vector<1x64x64xbf16> to vector<64x64xbf16>
    %cst_104 = arith.constant dense<0.000000e+00> : vector<128x64xf32>
    %84 = tpu.matmul %81, %83, %cst_104 {dimension_numbers = #tpu.dot_dimension_numbers<[1], [0], [0], [1], [0, 0, 1, 1], [], []>} : vector<128x64xbf16>, vector<64x64xbf16>, vector<128x64xf32> -> vector<128x64xf32>
    %85 = arith.addf %79, %84 : vector<128x64xf32>
    %cst_105 = arith.constant 0.000000e+00 : f32
    %86 = vector.broadcast %cst_105 : f32 to vector<128x64xf32>
    %87 = arith.cmpf ogt, %85, %86 : vector<128x64xf32>
    %cst_106 = arith.constant 2.000000e-01 : f32
    %88 = vector.broadcast %cst_106 : f32 to vector<128x64xf32>
    %89 = arith.mulf %88, %85 : vector<128x64xf32>
    %90 = arith.select %87, %85, %89 : vector<128x64xi1>, vector<128x64xf32>
    %c0_107 = arith.constant 0 : index
    %c0_108 = arith.constant 0 : index
    %c0_109 = arith.constant 0 : index
    %c96 = arith.constant 96 : index
    %91 = vector.load %arg1[%c0_107, %c0_108, %c0_109, %c96] : memref<2x9x9x128xbf16, #tpu.memory_space<vmem>>, vector<2x8x8x32xbf16>
    %92 = arith.extf %91 : vector<2x8x8x32xbf16> to vector<2x8x8x32xf32>
    %c0_110 = arith.constant 0 : index
    %c0_111 = arith.constant 0 : index
    %c1_112 = arith.constant 1 : index
    %c64 = arith.constant 64 : index
    %93 = vector.load %arg1[%c0_110, %c0_111, %c1_112, %c64] : memref<2x9x9x128xbf16, #tpu.memory_space<vmem>>, vector<2x8x8x32xbf16>
    %94 = arith.extf %93 : vector<2x8x8x32xbf16> to vector<2x8x8x32xf32>
    %95 = arith.addf %92, %94 : vector<2x8x8x32xf32>
    %c0_113 = arith.constant 0 : index
    %c1_114 = arith.constant 1 : index
    %c0_115 = arith.constant 0 : index
    %c32 = arith.constant 32 : index
    %96 = vector.load %arg1[%c0_113, %c1_114, %c0_115, %c32] : memref<2x9x9x128xbf16, #tpu.memory_space<vmem>>, vector<2x8x8x32xbf16>
    %97 = arith.extf %96 : vector<2x8x8x32xbf16> to vector<2x8x8x32xf32>
    %98 = arith.addf %95, %97 : vector<2x8x8x32xf32>
    %c0_116 = arith.constant 0 : index
    %c1_117 = arith.constant 1 : index
    %c1_118 = arith.constant 1 : index
    %c0_119 = arith.constant 0 : index
    %99 = vector.load %arg1[%c0_116, %c1_117, %c1_118, %c0_119] : memref<2x9x9x128xbf16, #tpu.memory_space<vmem>>, vector<2x8x8x32xbf16>
    %100 = arith.extf %99 : vector<2x8x8x32xbf16> to vector<2x8x8x32xf32>
    %101 = arith.addf %98, %100 : vector<2x8x8x32xf32>
    %cst_120 = arith.constant 2.500000e-01 : f32
    %102 = vector.broadcast %cst_120 : f32 to vector<2x8x8x32xf32>
    %103 = arith.mulf %102, %101 : vector<2x8x8x32xf32>
    %104 = vector.shape_cast %103 : vector<2x8x8x32xf32> to vector<128x32xf32>
    %105 = arith.truncf %104 : vector<128x32xf32> to vector<128x32xbf16>
    %c0_121 = arith.constant 0 : index
    %c0_122 = arith.constant 0 : index
    %106 = vector.load %arg4[%c0_121, %c0_122] : memref<32x64xbf16, #tpu.memory_space<vmem>>, vector<32x64xbf16>
    %cst_123 = arith.constant dense<0.000000e+00> : vector<128x64xf32>
    %107 = tpu.matmul %105, %106, %cst_123 {dimension_numbers = #tpu.dot_dimension_numbers<[1], [0], [0], [1], [0, 0, 1, 1], [], []>} : vector<128x32xbf16>, vector<32x64xbf16>, vector<128x64xf32> -> vector<128x64xf32>
    %c0_124 = arith.constant 0 : index
    %c0_125 = arith.constant 0 : index
    %108 = vector.load %arg5[%c0_124, %c0_125] : memref<1x64xf32, #tpu.memory_space<vmem>>, vector<1x64xf32>
    %109 = vector.broadcast %108 : vector<1x64xf32> to vector<128x64xf32>
    %110 = arith.addf %107, %109 : vector<128x64xf32>
    %c0_126 = arith.constant 0 : index
    %111 = memref.load %arg6[%c0_126] : memref<1xf32, #tpu.memory_space<smem>>
    %112 = vector.broadcast %111 : f32 to vector<128x64xf32>
    %113 = arith.mulf %112, %90 : vector<128x64xf32>
    %114 = arith.addf %110, %113 : vector<128x64xf32>
    %115 = vector.shape_cast %114 : vector<128x64xf32> to vector<2x64x64xf32>
    %c0_127 = arith.constant 0 : index
    %c0_128 = arith.constant 0 : index
    %c0_129 = arith.constant 0 : index
    %116 = vector.load %arg7[%c0_127, %c0_128, %c0_129] : memref<2x64x64xf32, #tpu.memory_space<vmem>>, vector<2x64x64xf32>
    tpu.vector_store %arg7[%c0_127, %c0_128, %c0_129], %115 {strides = array<i32>} : memref<2x64x64xf32, #tpu.memory_space<vmem>>, vector<2x64x64xf32>,
    return
  }
  func.func @transform_0(%arg0: i32) -> (i32, i32, i32, i32) {
    %c0_i32 = arith.constant 0 : i32
    %c0_i32_0 = arith.constant 0 : i32
    %c0_i32_1 = arith.constant 0 : i32
    %c0_i32_2 = arith.constant 0 : i32
    return %arg0, %c0_i32, %c0_i32_0, %c0_i32_1 : i32, i32, i32, i32
  }
  func.func @transform_1(%arg0: i32) -> (i32, i32, i32) {
    %c0_i32 = arith.constant 0 : i32
    %c0_i32_0 = arith.constant 0 : i32
    %c0_i32_1 = arith.constant 0 : i32
    %c0_i32_2 = arith.constant 0 : i32
    return %c0_i32, %c0_i32_0, %c0_i32_1 : i32, i32, i32
  }
  func.func @transform_2(%arg0: i32) -> (i32, i32, i32) {
    %c0_i32 = arith.constant 0 : i32
    %c0_i32_0 = arith.constant 0 : i32
    %c0_i32_1 = arith.constant 0 : i32
    %c0_i32_2 = arith.constant 0 : i32
    return %c0_i32, %c0_i32_0, %c0_i32_1 : i32, i32, i32
  }
  func.func @transform_3(%arg0: i32) -> (i32, i32) {
    %c0_i32 = arith.constant 0 : i32
    %c0_i32_0 = arith.constant 0 : i32
    %c0_i32_1 = arith.constant 0 : i32
    return %c0_i32, %c0_i32_0 : i32, i32
  }
  func.func @transform_4(%arg0: i32) -> (i32, i32) {
    %c0_i32 = arith.constant 0 : i32
    %c0_i32_0 = arith.constant 0 : i32
    %c0_i32_1 = arith.constant 0 : i32
    return %c0_i32, %c0_i32_0 : i32, i32
  }
  func.func @transform_5(%arg0: i32) -> i32 {
    %c0_i32 = arith.constant 0 : i32
    %c0_i32_0 = arith.constant 0 : i32
    return %c0_i32 : i32
  }
  func.func @transform_6(%arg0: i32) -> (i32, i32, i32) {
    %c0_i32 = arith.constant 0 : i32
    %c0_i32_0 = arith.constant 0 : i32
    %c0_i32_1 = arith.constant 0 : i32
    return %arg0, %c0_i32, %c0_i32_0 : i32, i32, i32
  }
}

</mosaic_0001>

<bundles_post_ra>
// kernel: tpu_custom_call.1
= control target key start
LH: loop header
LB: loop body
LE: loop exit
PB: predicated region body
PF: predicated region fallthrough
CT: control target
= control target key end

     0   :  { %vm74_vm0 = vsmask.f32 3328  ;;  %vm75_vm1 = vsmask.f32 7440  ;;  %vm4844_vm3 = vcmask 1046528   ;;  %s7070_s9 = smov 32   ;;  %s9013_s0 = inlined_call_operand.vmem [shape: bf16[2,9,9,128], index: 0, kind: input, shape index: {}]   ;;  %s9014_s1 = inlined_call_operand.vmem [shape: bf16[4,128,64], index: 1, kind: input, shape index: {}]   ;;  %s9015_s2 = inlined_call_operand.vmem [shape: bf16[9,64,64], index: 2, kind: input, shape index: {}]   ;;  %s9016_s3 = inlined_call_operand.vmem [shape: bf16[32,64], index: 3, kind: input, shape index: {}]   ;;  %s9017_s4 = inlined_call_operand.vmem [shape: f32[1,64], index: 4, kind: input, shape index: {}]   ;;  %s9018_s5 = inlined_call_operand.<no memory space> [shape: f32[1], index: 5, kind: input, shape index: {}]   ;;  %s9019_s6 = inlined_call_operand.hbm [shape: f32[2,64,64], index: 6, kind: output, shape index: {}]  }
   0x1   :  { %v6872_v0 = vld [vmem:[%s9014_s1 + $0x40] sm:$0xff]   ;;  %v6873_v1 = vld [vmem:[%s9014_s1 + $0x48] sm:$0xff]   ;;  %v6874_v2 = vld [vmem:[%s9014_s1 + $0x50] sm:$0xff]   ;;  %s7071_s12 = smov 64   ;;  %s7072_s16 = smov 96  }
   0x2   :  { %6197 = vmatprep.subr.bf16.mxu0 %v6872_v0  ;;  %v6875_v3 = vld [vmem:[%s9014_s1 + $0x58] sm:$0xff]   ;;  %v7127_v4 = vld [vmem:[%s9013_s0] sm:$0xf]  ;;  %v7132_v5 = vld [vmem:[%s9013_s0 + $0x8] sm:$0xf] }
   0x3   :  { %6198 = vmatpush3.bf16.msra.mxu0 %v6872_v0  ;;  %v58_v6 = vld [vmem:[%s9013_s0 + $0x4] sm:$0x1]  ;;  %v59_v7 = vld [vmem:[%s9013_s0 + $0xc] sm:$0x1]  ;;  %v78_v9 = vshrl.u32 %v7127_v4, 16  ;;  %v81_v10 = vshll.u32 %v7127_v4, 16  ;;  %vm7172_vm2 = vmor %vm74_vm0, %vm75_vm1 }
   0x4   :  { %6199 = vmatprep.subr.bf16.mxu0 %v6873_v1  ;;  %v6876_v8 = vld [vmem:[%s9014_s1 + $0x60] sm:$0xff]   ;;  %v87_v11 = vshll.u32 %v58_v6, 16  ;;  %v92_v12 = vshrl.u32 %v7132_v5, 16  ;;  %v7149_v13 = vld [vmem:[%s9013_s0 + $0x10] sm:$0xf]  ;;  %v95_v14 = vshll.u32 %v7132_v5, 16 }
   0x5   :  { %v101_v15 = vshll.u32 %v59_v7, 16  ;;  %v7155_v16 = vld [vmem:[%s9013_s0 + $0x18] sm:$0xf]  ;;  %v60_v17 = vld [vmem:[%s9013_s0 + $0x14] sm:$0x1]  ;;  %v80_v18 = vrot.slane %v78_v9, 4 }
   0x6   :  { %v83_v19 = vrot.slane %v81_v10, 5  ;;  %v89_v20 = vrot.slane %v87_v11, 5  ;;  %v94_v21 = vrot.slane %v92_v12, 4  ;;  %v61_v22 = vld [vmem:[%s9013_s0 + $0x1c] sm:$0x1]  ;;  %v97_v23 = vrot.slane %v95_v14, 5 }
   0x7   :  { %6200 = vmatpush3.bf16.msra.mxu0 %v6873_v1  ;;  %v103_v24 = vrot.slane %v101_v15, 5  ;;  %v106_v25 = vshrl.u32 %v7149_v13, 16  ;;  %v109_v26 = vshll.u32 %v7149_v13, 16  ;;  %v115_v28 = vshll.u32 %v60_v17, 16  ;;  %v6877_v31 = vld [vmem:[%s9014_s1 + $0x68] sm:$0xff]   ;;  %v6878_v57 = vld [vmem:[%s9014_s1 + $0x70] sm:$0xff]  }
   0x8   :  { %6201 = vmatprep.subr.bf16.mxu0 %v6874_v2  ;;  %v84_v27 = vor.u32 %v83_v19, %v80_v18  ;;  %v120_v29 = vshrl.u32 %v7155_v16, 16  ;;  %v123_v30 = vshll.u32 %v7155_v16, 16  ;;  %v98_v33 = vor.u32 %v97_v23, %v94_v21  ;;  %v7183_v44 = vld [vmem:[%s9013_s0 + $0x20] sm:$0xf]  ;;  %v7188_v45 = vld [vmem:[%s9013_s0 + $0x28] sm:$0xf] }
   0x9   :  { %v108_v34 = vrot.slane %v106_v25, 4  ;;  %v111_v35 = vrot.slane %v109_v26, 5  ;;  %v129_v36 = vshll.u32 %v61_v22, 16  ;;  %v7176_v38 = vrot.slane %v115_v28, 5  ;;  %v62_v48 = vld [vmem:[%s9013_s0 + $0x24] sm:$0x1] }
   0xa   :  { %v85_v37 = vrot.slane %v84_v27, 4  ;;  %v122_v39 = vrot.slane %v120_v29, 4  ;;  %v125_v40 = vrot.slane %v123_v30, 5  ;;  %v99_v41 = vrot.slane %v98_v33, 4  ;;  %v63_v49 = vld [vmem:[%s9013_s0 + $0x2c] sm:$0x1] }
   0xb   :  { %6202 = vmatpush3.bf16.msra.mxu0 %v6874_v2  ;;  %v112_v42 = vor.u32 %v111_v35, %v108_v34  ;;  %v7178_v43 = vrot.slane %v129_v36, 5  ;;  %v134_v50 = vshrl.u32 %v7183_v44, 16  ;;  %v137_v51 = vshll.u32 %v7183_v44, 16  ;;  %v7206_v56 = vld [vmem:[%s9013_s0 + $0x30] sm:$0xf]  ;;  %v6879_v2 = vld [vmem:[%s9014_s1 + $0x78] sm:$0xff]  }
   0xc   :  { %6203 = vmatprep.subr.bf16.mxu0 %v6875_v3  ;;  %v90_v46 = vsel %vm7172_vm2, %v85_v37, %v89_v20  ;;  %v126_v47 = vor.u32 %v125_v40, %v122_v39  ;;  %v104_v52 = vsel %vm7172_vm2, %v99_v41, %v103_v24  ;;  %v143_v54 = vshll.u32 %v62_v48, 16  ;;  %v7215_v0 = vld [vmem:[%s9013_s0 + $0x38] sm:$0xf]  ;;  %v64_v1 = vld [vmem:[%s9013_s0 + $0x34] sm:$0x1]  ;;  %v6880_v35 = vld [vmem:[%s9014_s1] sm:$0xff]  }
   0xd   :  { %v113_v53 = vrot.slane %v112_v42, 4  ;;  %v148_v55 = vshrl.u32 %v7188_v45, 16  ;;  %v5504_v58 = vcombine.low %v90_v46, %v104_v52  ;;  %v136_v60 = vrot.slane %v134_v50, 4  ;;  %v65_v7 = vld [vmem:[%s9013_s0 + $0x3c] sm:$0x1] }
   0xe   :  { %v127_v59 = vrot.slane %v126_v47, 4  ;;  %v139_v61 = vrot.slane %v137_v51, 5  ;;  %v151_v63 = vshll.u32 %v7188_v45, 16  ;;  %v157_v6 = vshll.u32 %v63_v49, 16  ;;  %v7239_v27 = vld [vmem:[%s9013_s0 + $0x48] sm:$0xf] }
   0xf   :  { %6204 = vmatpush3.bf16.msra.mxu0 %v6875_v3  ;;  %v150_v62 = vrot.slane %v148_v55, 4  ;;  %6213 = vmatprep.mubr.bf16.mxu0 %v5504_v58  ;;  %v145_v9 = vrot.slane %v143_v54, 5  ;;  %v165_v11 = vshll.u32 %v7206_v56, 16  ;;  %v171_v12 = vshll.u32 %v64_v1, 16  ;;  %v7244_v28 = vld [vmem:[%s9013_s0 + $0x50] sm:$0xf] }
  0x10   :  { %6205 = vmatprep.subr.bf16.mxu0 %v6876_v8  ;;  %v140_v3 = vor.u32 %v139_v61, %v136_v60  ;;  %v153_v10 = vrot.slane %v151_v63, 5  ;;  %v159_v15 = vrot.slane %v157_v6, 5  ;;  %v176_v18 = vshrl.u32 %v7215_v0, 16  ;;  %v66_v34 = vld [vmem:[%s9013_s0 + $0x4c] sm:$0x1] }
  0x11   :  { %v167_v20 = vrot.slane %v165_v11, 5  ;;  %v173_v21 = vrot.slane %v171_v12, 5  ;;  %v179_v22 = vshll.u32 %v7215_v0, 16  ;;  %v118_v23 = vsel %vm7172_vm2, %v113_v53, %v7176_v38  ;;  %v7265_v47 = vld [vmem:[%s9013_s0 + $0x58] sm:$0xf]  ;;  %v6882_v11 = vld [vmem:[%s9014_s1 + $0x10] sm:$0xff]  }
  0x12   :  { %v141_v14 = vrot.slane %v140_v3, 4  ;;  %v154_v19 = vor.u32 %v153_v10, %v150_v62  ;;  %v132_v24 = vsel %vm7172_vm2, %v127_v59, %v7178_v43  ;;  %v178_v25 = vrot.slane %v176_v18, 4  ;;  %v67_v43 = vld [vmem:[%s9013_s0 + $0x54] sm:$0x1]  ;;  %v7270_v52 = vld [vmem:[%s9013_s0 + $0x60] sm:$0xf] }
  0x13   :  { %6206 = vmatpush3.bf16.msra.mxu0 %v6876_v8  ;;  %v162_v8 = vshrl.u32 %v7206_v56, 16  ;;  %v185_v26 = vshll.u32 %v65_v7, 16  ;;  %v181_v33 = vrot.slane %v179_v22, 5  ;;  %v190_v37 = vshrl.u32 %v7239_v27, 16  ;;  %v68_v53 = vld [vmem:[%s9013_s0 + $0x5c] sm:$0x1] }
  0x14   :  { %6207 = vmatprep.subr.bf16.mxu0 %v6877_v31  ;;  %v146_v29 = vsel %vm7172_vm2, %v141_v14, %v145_v9  ;;  %v155_v30 = vrot.slane %v154_v19, 4  ;;  %v193_v38 = vshll.u32 %v7239_v27, 16  ;;  %v199_v39 = vshll.u32 %v66_v34, 16  ;;  %v6881_v59 = vld [vmem:[%s9014_s1 + $0x8] sm:$0xff]   ;;  %v69_v6 = vld [vmem:[%s9013_s0 + $0x64] sm:$0x1] }
  0x15   :  { %v164_v17 = vrot.slane %v162_v8, 4  ;;  %v187_v36 = vrot.slane %v185_v26, 5  ;;  %v182_v42 = vor.u32 %v181_v33, %v178_v25  ;;  %v204_v46 = vshrl.u32 %v7244_v28, 16  ;;  %v7295_v18 = vld [vmem:[%s9013_s0 + $0x68] sm:$0xf] }
  0x16   :  { %v160_v40 = vsel %vm7172_vm2, %v155_v30, %v159_v15  ;;  %v5505_v48 = vcombine.low %v118_v23, %v132_v24  ;;  %v192_v50 = vrot.slane %v190_v37, 4  ;;  %v195_v51 = vrot.slane %v193_v38, 5  ;;  %v7303_v23 = vld [vmem:[%s9013_s0 + $0x70] sm:$0xf]  ;;  %v70_v24 = vld [vmem:[%s9013_s0 + $0x6c] sm:$0x1] }
  0x17   :  { %6208 = vmatpush3.bf16.msra.mxu0 %v6877_v31  ;;  %v168_v31 = vor.u32 %v167_v20, %v164_v17  ;;  %v5506_v49 = vcombine.low %v146_v29, %v160_v40  ;;  %v183_v54 = vrot.slane %v182_v42, 4  ;;  %v201_v55 = vrot.slane %v199_v39, 5  ;;  %v71_v34 = vld [vmem:[%s9013_s0 + $0x74] sm:$0x1]  ;;  %v6883_v37 = vld [vmem:[%s9014_s1 + $0x18] sm:$0xff]  }
  0x18   :  { %6209 = vmatprep.subr.bf16.mxu0 %v6878_v57  ;;  %v207_v58 = vshll.u32 %v7244_v28, 16  ;;  %v196_v60 = vor.u32 %v195_v51, %v192_v50  ;;  %v213_v61 = vshll.u32 %v67_v43, 16  ;;  %v218_v62 = vshrl.u32 %v7265_v47, 16  ;;  %v7322_v42 = vld [vmem:[%s9013_s0 + $0x78] sm:$0xf] }
  0x19   :  { %v169_v41 = vrot.slane %v168_v31, 4  ;;  %v221_v63 = vshll.u32 %v7265_v47, 16  ;;  %v232_v7 = vshrl.u32 %v7270_v52, 16  ;;  %v227_v10 = vshll.u32 %v68_v53, 16  ;;  %v7327_v50 = vld [vmem:[%s9013_s0 + $0x80] sm:$0xf] }
  0x1a   :  { %v209_v3 = vrot.slane %v207_v58, 5  ;;  %v197_v8 = vrot.slane %v196_v60, 4  ;;  %v220_v9 = vrot.slane %v218_v62, 4  ;;  %v215_v14 = vrot.slane %v213_v61, 5  ;;  %v72_v51 = vld [vmem:[%s9013_s0 + $0x7c] sm:$0x1] }
  0x1b   :  { %6210 = vmatpush3.bf16.msra.mxu0 %v6878_v57  ;;  %v206_v57 = vrot.slane %v204_v46, 4  ;;  %v174_v1 = vsel %vm7172_vm2, %v169_v41, %v173_v21  ;;  %v223_v15 = vrot.slane %v221_v63, 5  ;;  %v234_v17 = vrot.slane %v232_v7, 4 }
  0x1c   :  { %6211 = vmatprep.subr.bf16.mxu0 %v6879_v2  ;;  %v202_v20 = vsel %vm7172_vm2, %v197_v8, %v201_v55  ;;  %v235_v21 = vshll.u32 %v7270_v52, 16  ;;  %v241_v22 = vshll.u32 %v69_v6, 16  ;;  %v246_v29 = vshrl.u32 %v7295_v18, 16  ;;  %v6884_v6 = vld [vmem:[%s9014_s1 + $0x20] sm:$0xff]  }
  0x1d   :  { %v210_v12 = vor.u32 %v209_v3, %v206_v57  ;;  %v224_v26 = vor.u32 %v223_v15, %v220_v9  ;;  %v249_v30 = vshll.u32 %v7295_v18, 16  ;;  %v229_v31 = vrot.slane %v227_v10, 5  ;;  %v73_v57 = vld [vmem:[%s9013_s0 + $0x84] sm:$0x1] }
  0x1e   :  { %v237_v33 = vrot.slane %v235_v21, 5  ;;  %v248_v40 = vrot.slane %v246_v29, 4  ;;  %v269_v55 = vshll.u32 %v71_v34, 16  ;;  %v274_v60 = vshrl.u32 %v7322_v42, 16 }
  0x1f   :  { %6212 = vmatpush3.bf16.msra.mxu0 %v6879_v2  ;;  %v188_v2 = vsel %vm7172_vm2, %v183_v54, %v187_v36  ;;  %v211_v25 = vrot.slane %v210_v12, 4  ;;  %v260_v36 = vshrl.u32 %v7303_v23, 16  ;;  %v225_v39 = vrot.slane %v224_v26, 4 }
  0x20   :  { %6229 = vmatprep.subr.bf16.mxu0 %v6880_v35  ;;  %v5507_v19 = vcombine.low %v174_v1, %v188_v2  ;;  %v251_v41 = vrot.slane %v249_v30, 5  ;;  %v238_v46 = vor.u32 %v237_v33, %v234_v17  ;;  %v263_v54 = vshll.u32 %v7303_v23, 16 }
  0x21   :  { %v216_v38 = vsel %vm7172_vm2, %v211_v25, %v215_v14  ;;  %v277_v61 = vshll.u32 %v7322_v42, 16  ;;  %v230_v62 = vsel %vm7172_vm2, %v225_v39, %v229_v31  ;;  %v288_v2 = vshrl.u32 %v7327_v50, 16 }
  0x22   :  { %6214 = vmatmul.mubr.bf16.vlgmr.msra.gmra.mrb[0].mxu0 %v5505_v48  ;;  %v5508_v43 = vcombine.low %v202_v20, %v216_v38  ;;  %v243_v48 = vrot.slane %v241_v22, 5  ;;  %v252_v53 = vor.u32 %v251_v41, %v248_v40  ;;  %v239_v58 = vrot.slane %v238_v46, 4  ;;  %v6885_v20 = vld [vmem:[%s9014_s1 + $0x28] sm:$0xff]   ;;  %v6887_v40 = vld [vmem:[%s9014_s1 + $0x38] sm:$0xff]   ;;  %v6890_v41 = vld [vmem:[%s9014_s1 + $0x80] sm:$0xff]  }
  0x23   :  { %6230 = vmatpush3.bf16.msra.mxu0 %v6880_v35  ;;  %6217 = vmatprep.mubr.bf16.mxu0 %v5506_v49  ;;  %v255_v35 = vshll.u32 %v70_v24, 16  ;;  %v262_v49 = vrot.slane %v260_v36, 4  ;;  %v265_v1 = vrot.slane %v263_v54, 5  ;;  %v276_v7 = vrot.slane %v274_v60, 4  ;;  %v6886_v36 = vld [vmem:[%s9014_s1 + $0x30] sm:$0xff]  }
  0x24   :  { %6231 = vmatprep.subr.bf16.mxu0 %v6881_v59  ;;  %v253_v63 = vrot.slane %v252_v53, 4  ;;  %v244_v3 = vsel %vm7172_vm2, %v239_v58, %v243_v48  ;;  %v279_v8 = vrot.slane %v277_v61, 5  ;;  %v283_v9 = vshll.u32 %v72_v51, 16  ;;  %v5584_v46 = vld [vmem:[%s9013_s0 + $0x8] sm:$0xf] }
  0x25   :  { %v266_v10 = vor.u32 %v265_v1, %v262_v49  ;;  %v290_v12 = vrot.slane %v288_v2, 4  ;;  %v5509_v14 = vcombine.low %v230_v62, %v244_v3  ;;  %v291_v17 = vshll.u32 %v7327_v50, 16  ;;  %v5588_v49 = vld [vmem:[%s9013_s0 + $0x18] sm:$0xf]  ;;  %v5590_v53 = vld [vmem:[%s9013_s0 + $0x20] sm:$0xf] }
  0x26   :  { %v280_v15 = vor.u32 %v279_v8, %v276_v7  ;;  %v285_v25 = vrot.slane %v283_v9, 5  ;;  %v5520_v39 = vcombine.low %v7127_v4, %v7132_v5  ;;  %v5522_v4 = vcombine.low %v7183_v44, %v7188_v45  ;;  %v6891_v5 = vld [vmem:[%s9014_s1 + $0x88] sm:$0xff]   ;;  %v5587_v61 = vld [vmem:[%s9013_s0 + $0x14] sm:$0x1]  ;;  %v5589_v1 = vld [vmem:[%s9013_s0 + $0x1c] sm:$0x1] }
  0x27   :  { %6232 = vmatpush3.bf16.msra.mxu0 %v6881_v59  ;;  %v257_v59 = vrot.slane %v255_v35, 5  ;;  %v267_v22 = vrot.slane %v266_v10, 4  ;;  %v293_v26 = vrot.slane %v291_v17, 5  ;;  %v964_v44 = vshrl.u32 %v5584_v46, 16  ;;  %v5585_v60 = vld [vmem:[%s9013_s0 + $0xc] sm:$0x1] }
  0x28   :  { %6233 = vmatprep.subr.bf16.mxu0 %v6882_v11  ;;  %v281_v24 = vrot.slane %v280_v15, 4  ;;  %v967_v45 = vshll.u32 %v5584_v46, 16  ;;  %v5523_v54 = vcombine.low %v7206_v56, %v7215_v0  ;;  %v992_v62 = vshrl.u32 %v5588_v49, 16  ;;  %v5592_v7 = vld [vmem:[%s9013_s0 + $0x28] sm:$0xf]  ;;  %v6898_v15 = vld [vmem:[%s9014_s1 + $0xa0] sm:$0xff]  }
  0x29   :  { %v258_v21 = vsel %vm7172_vm2, %v253_v63, %v257_v59  ;;  %v294_v33 = vor.u32 %v293_v26, %v290_v12  ;;  %v5524_v59 = vcombine.low %v7239_v27, %v7244_v28  ;;  %v995_v56 = vshll.u32 %v5588_v49, 16  ;;  %v5594_v12 = vld [vmem:[%s9013_s0 + $0x30] sm:$0xf]  ;;  %v5596_v26 = vld [vmem:[%s9013_s0 + $0x38] sm:$0xf] }
  0x2a   :  { %6218 = vmatmul.mubr.bf16.gmra.mrb[4].mxu0 %v5507_v19  ;;  %v297_v19 = vshll.u32 %v73_v57, 16  ;;  %v286_v34 = vsel %vm7172_vm2, %v281_v24, %v285_v25  ;;  %v966_v57 = vrot.slane %v964_v44, 4  ;;  %v969_v58 = vrot.slane %v967_v45, 5  ;;  %v5597_v49 = vld [vmem:[%s9013_s0 + $0x3c] sm:$0x1] }
  0x2b   :  { %6234 = vmatpush3.bf16.msra.mxu0 %v6882_v11  ;;  %6221 = vmatprep.mubr.bf16.mxu0 %v5508_v43  ;;  %v271_v11 = vrot.slane %v269_v55, 5  ;;  %v295_v35 = vrot.slane %v294_v33, 4  ;;  %v5521_v43 = vcombine.low %v7149_v13, %v7155_v16  ;;  %v5586_v13 = vld [vmem:[%s9013_s0 + $0x10] sm:$0xf]  ;;  %v6895_v55 = vld [vmem:[%s9014_s1 + $0x98] sm:$0xff]   ;;  %v1006_v2 = vshrl.u32 %v5590_v53, 16 }
  0x2c   :  { %6235 = vmatprep.subr.bf16.mxu0 %v6883_v37  ;;  %v299_v29 = vrot.slane %v297_v19, 5  ;;  %v6894_v16 = vld [vmem:[%s9014_s1 + $0x90] sm:$0xff]   ;;  %v978_v48 = vshrl.u32 %v5586_v13, 16  ;;  %v981_v51 = vshll.u32 %v5586_v13, 16  ;;  %v1009_v3 = vshll.u32 %v5590_v53, 16 }
  0x2d   :  { %v272_v30 = vsel %vm7172_vm2, %v267_v22, %v271_v11  ;;  %v970_v27 = vor.u32 %v969_v58, %v966_v57  ;;  %v973_v28 = vshll.u32 %v5585_v60, 16  ;;  %v987_v8 = vshll.u32 %v5587_v61, 16  ;;  %v5600_v13 = vld [vmem:[%s9013_s0 + $0x50] sm:$0xf]  ;;  %v5602_v58 = vld [vmem:[%s9013_s0 + $0x58] sm:$0xf] }
  0x2e   :  { %v5510_v31 = vcombine.low %v258_v21, %v272_v30  ;;  %v980_v0 = vrot.slane %v978_v48, 4  ;;  %v983_v63 = vrot.slane %v981_v51, 5  ;;  %v994_v9 = vrot.slane %v992_v62, 4  ;;  %v5593_v30 = vld [vmem:[%s9013_s0 + $0x2c] sm:$0x1] }
  0x2f   :  { %6236 = vmatpush3.bf16.msra.mxu0 %v6883_v37  ;;  %v300_v37 = vsel %vm7172_vm2, %v295_v35, %v299_v29  ;;  %v997_v10 = vrot.slane %v995_v56, 5  ;;  %v1001_v11 = vshll.u32 %v5589_v1, 16  ;;  %v1008_v19 = vrot.slane %v1006_v2, 4  ;;  %v5598_v35 = vld [vmem:[%s9013_s0 + $0x40] sm:$0xf] }
  0x30   :  { %6237 = vmatprep.subr.bf16.mxu0 %v6884_v6  ;;  %v5511_v38 = vcombine.low %v286_v34, %v300_v37  ;;  %v984_v17 = vor.u32 %v983_v63, %v980_v0  ;;  %v5526_v21 = vcombine.low %v7295_v18, %v7303_v23  ;;  %v1020_v24 = vshrl.u32 %v5592_v7, 16  ;;  %v5599_v61 = vld [vmem:[%s9013_s0 + $0x44] sm:$0x1]  ;;  %v6904_v0 = vld [vmem:[%s9013_s0 + $0x8] ss:$8 sps:$4 sm:$0xff]  }
  0x31   :  { %v1023_v25 = vshll.u32 %v5592_v7, 16  ;;  %v7430_v29 = vrot.slane %v973_v28, 5  ;;  %v7435_v18 = vrot.slane %v987_v8, 5  ;;  %v998_v23 = vor.u32 %v997_v10, %v994_v9  ;;  %v5603_v7 = vld [vmem:[%s9013_s0 + $0x5c] sm:$0x1] }
  0x32   :  { %6222 = vmatmul.mubr.bf16.gmra.mrb[8].mxu0 %v5509_v14  ;;  %v5525_v14 = vcombine.low %v7265_v47, %v7270_v52  ;;  %v5527_v47 = vcombine.low %v7322_v42, %v7327_v50  ;;  %v7428_v52 = vrot.slane %v970_v27, 4  ;;  %v7437_v33 = vrot.slane %v1001_v11, 5  ;;  %v5608_v42 = vld [vmem:[%s9013_s0 + $0x70] sm:$0xf]  ;;  %v6905_v50 = vld [vmem:[%s9013_s0 + $0x18] ss:$8 sps:$4 sm:$0xff]  }
  0x33   :  { %6238 = vmatpush3.bf16.msra.mxu0 %v6884_v6  ;;  %6225 = vmatprep.mubr.bf16.mxu0 %v5510_v31  ;;  %v5591_v6 = vld [vmem:[%s9013_s0 + $0x24] sm:$0x1]  ;;  %v1034_v31 = vshrl.u32 %v5594_v12, 16  ;;  %v1037_v34 = vshll.u32 %v5594_v12, 16  ;;  %v7445_v37 = vrot.slane %v984_v17, 4  ;;  %v1029_v46 = vshll.u32 %v5593_v30, 16 }
  0x34   :  { %6239 = vmatprep.subr.bf16.mxu0 %v6885_v20  ;;  %v1015_v22 = vshll.u32 %v5591_v6, 16  ;;  %v976_v44 = vsel %vm7172_vm2, %v7428_v52, %v7430_v29  ;;  %v1062_v51 = vshrl.u32 %v5598_v35, 16  ;;  %v7465_v53 = vrot.slane %v998_v23, 4  ;;  %v6903_v17 = vld [vmem:[%s9014_s1 + $0xb8] sm:$0xff]   ;;  %v5614_v52 = vld [vmem:[%s9013_s0 + $0x88] sm:$0xf] }
  0x35   :  { %v1036_v45 = vrot.slane %v1034_v31, 4  ;;  %v1039_v48 = vrot.slane %v1037_v34, 5  ;;  %v1065_v57 = vshll.u32 %v5598_v35, 16  ;;  %v1076_v56 = vshrl.u32 %v5600_v13, 16 }
  0x36   :  { %v1064_v62 = vrot.slane %v1062_v51, 4  ;;  %v7478_v1 = vrot.slane %v1029_v46, 5  ;;  %v1079_v27 = vshll.u32 %v5600_v13, 16  ;;  %v1057_v6 = vshll.u32 %v5597_v49, 16 }
  0x37   :  { %6240 = vmatpush3.bf16.msra.mxu0 %v6885_v20  ;;  %v1011_v20 = vrot.slane %v1009_v3, 5  ;;  %v1067_v2 = vrot.slane %v1065_v57, 5  ;;  %v5601_v3 = vld [vmem:[%s9013_s0 + $0x54] sm:$0x1]  ;;  %v1040_v28 = vor.u32 %v1039_v48, %v1036_v45  ;;  %v1078_v8 = vrot.slane %v1076_v56, 4 }
  0x38   :  { %6241 = vmatprep.subr.bf16.mxu0 %v6886_v36  ;;  %v1090_v9 = vshrl.u32 %v5602_v58, 16  ;;  %v1071_v11 = vshll.u32 %v5599_v61, 16  ;;  %v1081_v12 = vrot.slane %v1079_v27, 5  ;;  %v1099_v31 = vshll.u32 %v5603_v7, 16  ;;  %v5605_v45 = vld [vmem:[%s9013_s0 + $0x64] sm:$0x1] }
  0x39   :  { %v7502_v23 = vrot.slane %v1040_v28, 4  ;;  %v7504_v34 = vrot.slane %v1057_v6, 5  ;;  %v1004_v57 = vsel %vm7172_vm2, %v7465_v53, %v7437_v33  ;;  %v1135_v61 = vshll.u32 %v5608_v42, 16  ;;  %v5609_v33 = vld [vmem:[%s9013_s0 + $0x74] sm:$0x1] }
  0x3a   :  { %6226 = vmatmul.mubr.bf16.gmra.mrb[12].mxu0 %v5511_v38  ;;  %v1012_v38 = vor.u32 %v1011_v20, %v1008_v19  ;;  %v1068_v20 = vor.u32 %v1067_v2, %v1064_v62  ;;  %v1101_v13 = vrot.slane %v1099_v31, 5  ;;  %v5610_v53 = vld [vmem:[%s9013_s0 + $0x78] sm:$0xf]  ;;  %v5612_v6 = vld [vmem:[%s9013_s0 + $0x80] sm:$0xf] }
  0x3b   :  { %6242 = vmatpush3.bf16.msra.mxu0 %v6886_v36  ;;  %6245 = vmatprep.mubr.bf16.mxu0 %v5520_v39  ;;  %v6899_v36 = vld [vmem:[%s9014_s1 + $0xa8] sm:$0xff]   ;;  %v5595_v39 = vld [vmem:[%s9013_s0 + $0x34] sm:$0x1]  ;;  %v5611_v7 = vld [vmem:[%s9013_s0 + $0x7c] sm:$0x1]  ;;  %v1160_v29 = vshrl.u32 %v5612_v6, 16 }
  0x3c   :  { %6243 = vmatprep.subr.bf16.mxu0 %v6887_v40  ;;  %v1043_v60 = vshll.u32 %v5595_v39, 16 }
  0x3e   :  { %v7492_v19 = vrot.slane %v1043_v60, 5  ;;  %v1132_v60 = vshrl.u32 %v5608_v42, 16 }
  0x3f   :  { %6244 = vmatpush3.bf16.msra.mxu0 %v6887_v40  ;;  %v1048_v40 = vshrl.u32 %v5596_v26, 16 }
  0x40   :  { %6261 = vmatprep.subr.bf16.mxu0 %v6890_v41 }
  0x42   :  { %6246 = vmatmul.mubr.bf16.vlgmr.msra.gmra.mrb[0].mxu0 %v5521_v43  ;;  %v7450_v43 = vrot.slane %v1015_v22, 5  ;;  %v1092_v22 = vrot.slane %v1090_v9, 4  ;;  %v1137_v9 = vrot.slane %v1135_v61, 5  ;;  %v1177_v61 = vshll.u32 %v5614_v52, 16 }
  0x43   :  { %6262 = vmatpush3.bf16.msra.mxu0 %v6890_v41  ;;  %6249 = vmatprep.mubr.bf16.mxu0 %v5522_v4  ;;  %v1051_v41 = vshll.u32 %v5596_v26, 16  ;;  %v1022_v4 = vrot.slane %v1020_v24, 4  ;;  %v5606_v24 = vld [vmem:[%s9013_s0 + $0x68] sm:$0xf]  ;;  %v1082_v26 = vor.u32 %v1081_v12, %v1078_v8  ;;  %v1134_v8 = vrot.slane %v1132_v60, 4  ;;  %v6910_v12 = vld [vmem:[%s9014_s1 + $0xd0] sm:$0xff]  }
  0x44   :  { %6263 = vmatprep.subr.bf16.mxu0 %v6891_v5  ;;  %v1121_v51 = vshll.u32 %v5606_v24, 16 }
  0x46   :  { %v1123_v56 = vrot.slane %v1121_v51, 5 }
  0x47   :  { %6264 = vmatpush3.bf16.msra.mxu0 %v6891_v5  ;;  %v1025_v5 = vrot.slane %v1023_v25, 5 }
  0x48   :  { %6265 = vmatprep.subr.bf16.mxu0 %v6894_v16 }
  0x49   :  { %v1026_v63 = vor.u32 %v1025_v5, %v1022_v4  ;;  %v1118_v4 = vshrl.u32 %v5606_v24, 16  ;;  %v1083_v5 = vrot.slane %v1082_v26, 4  ;;  %v7590_v24 = vld [vmem:[%s9013_s0 + $0x84] sm:$0x1] }
  0x4a   :  { %6250 = vmatmul.mubr.bf16.gmra.mrb[4].mxu0 %v5523_v54  ;;  %v1050_v54 = vrot.slane %v1048_v40, 4  ;;  %v1073_v40 = vrot.slane %v1071_v11, 5  ;;  %v1146_v11 = vshrl.u32 %v5610_v53, 16 }
  0x4b   :  { %6266 = vmatpush3.bf16.msra.mxu0 %v6894_v16  ;;  %6253 = vmatprep.mubr.bf16.mxu0 %v5524_v59  ;;  %v6902_v16 = vld [vmem:[%s9014_s1 + $0xb0] sm:$0xff]   ;;  %v7470_v59 = vrot.slane %v1012_v38, 4  ;;  %v7497_v25 = vrot.slane %v1026_v63, 4  ;;  %v6906_v38 = vld [vmem:[%s9014_s1 + $0xc0] sm:$0xff]  }
  0x4c   :  { %6267 = vmatprep.subr.bf16.mxu0 %v6895_v55 }
  0x4d   :  { %v1018_v62 = vsel %vm7172_vm2, %v7470_v59, %v7450_v43  ;;  %v6907_v43 = vld [vmem:[%s9014_s1 + $0xc8] sm:$0xff]   ;;  %v1046_v59 = vsel %vm7172_vm2, %v7502_v23, %v7492_v19  ;;  %v1149_v19 = vshll.u32 %v5610_v53, 16  ;;  %v1155_v23 = vshll.u32 %v5611_v7, 16 }
  0x4f   :  { %6268 = vmatpush3.bf16.msra.mxu0 %v6895_v55  ;;  %v1053_v55 = vrot.slane %v1051_v41, 5  ;;  %v7642_v51 = vrot.slane %v1155_v23, 5 }
  0x50   :  { %6269 = vmatprep.subr.bf16.mxu0 %v6898_v15 }
  0x51   :  { %v1054_v10 = vor.u32 %v1053_v55, %v1050_v54  ;;  %v6908_v54 = vld [vmem:[%s9013_s0 + $0x28] ss:$8 sps:$4 sm:$0xff]   ;;  %v990_v55 = vsel %vm7172_vm2, %v7445_v37, %v7435_v18  ;;  %v1032_v18 = vsel %vm7172_vm2, %v7497_v25, %v7478_v1  ;;  %v1120_v37 = vrot.slane %v1118_v4, 4 }
  0x52   :  { %6254 = vmatmul.mubr.bf16.gmra.mrb[8].mxu0 %v5525_v14  ;;  %v1093_v14 = vshll.u32 %v5602_v58, 16  ;;  %v5607_v58 = vld [vmem:[%s9013_s0 + $0x6c] sm:$0x1]  ;;  %v1113_v1 = vshll.u32 %v5605_v45, 16  ;;  %v7598_v25 = vld [vmem:[%s9013_s0] ss:$8 sps:$4 sm:$0xff]  }
  0x53   :  { %6270 = vmatpush3.bf16.msra.mxu0 %v6898_v15  ;;  %6257 = vmatprep.mubr.bf16.mxu0 %v5526_v21  ;;  %v5604_v15 = vld [vmem:[%s9013_s0 + $0x60] sm:$0xf]  ;;  %v1085_v21 = vshll.u32 %v5601_v3, 16  ;;  %v1055_v39 = vrot.slane %v1054_v10, 4  ;;  %v1127_v28 = vshll.u32 %v5607_v58, 16  ;;  %v1141_v10 = vshll.u32 %v5609_v33, 16 }
  0x54   :  { %6271 = vmatprep.subr.bf16.mxu0 %v6899_v36  ;;  %v1095_v30 = vrot.slane %v1093_v14, 5  ;;  %v1104_v35 = vshrl.u32 %v5604_v15, 16  ;;  %v7576_v14 = vcombine.low %v976_v44, %v990_v55  ;;  %v1163_v44 = vshll.u32 %v5612_v6, 16  ;;  %v6912_v4 = vld [vmem:[%s9013_s0 + $0x50] ss:$8 sps:$4 sm:$0xff]  }
  0x55   :  { %v1087_v46 = vrot.slane %v1085_v21, 5  ;;  %v7583_v21 = vcombine.low %v1032_v18, %v1046_v59  ;;  %v7604_v31 = vrot.slane %v1113_v1, 5  ;;  %v4765_v45 = vunpack.c.h.bf16 %v7598_v25  ;;  %v7650_v58 = vld [vmem:[%s9013_s0 + $0x10] ss:$8 sps:$4 sm:$0xff]   ;;  %v6913_v59 = vld [vmem:[%s9013_s0 + $0x60] ss:$8 sps:$4 sm:$0xff]  }
  0x56   :  { %v1096_v41 = vor.u32 %v1095_v30, %v1092_v22  ;;  %v1106_v48 = vrot.slane %v1104_v35, 4  ;;  %v7609_v35 = vrot.slane %v1127_v28, 5  ;;  %v5958_v28 = vld [vmem:[%s9013_s0 + $0x18] ss:$8 sps:$4 sm:$0xff]  }
  0x57   :  { %6272 = vmatpush3.bf16.msra.mxu0 %v6899_v36  ;;  %v1107_v36 = vshll.u32 %v5604_v15, 16  ;;  %v1088_v2 = vsel %vm7172_vm2, %v1083_v5, %v1087_v46  ;;  %v7578_v15 = vcombine.low %v1004_v57, %v1018_v62  ;;  %v4764_v5 = vunpack.c.l.bf16 %v7598_v25  ;;  %v7632_v46 = vld [vmem:[%s9013_s0 + $0x8c] sm:$0x1]  ;;  %v6916_v6 = vld [vmem:[%s9013_s0 + $0x70] ss:$8 sps:$4 sm:$0xff]  }
  0x58   :  { %6273 = vmatprep.subr.bf16.mxu0 %v6902_v16  ;;  %v4848_v18 = vrot.slane %v4765_v45, 1  ;;  %v1183_v7 = vshll.u32 %v7632_v46, 16 }
  0x59   :  { %v1109_v49 = vrot.slane %v1107_v36, 5  ;;  %v1138_v36 = vor.u32 %v1137_v9, %v1134_v8  ;;  %v4845_v57 = vrot.slane %v4764_v5, 1  ;;  %v4767_v9 = vunpack.c.h.bf16 %v7650_v58 }
  0x5a   :  { %6258 = vmatmul.mubr.bf16.gmra.mrb[12].mxu0 %v5527_v47  ;;  %v1069_v47 = vrot.slane %v1068_v20, 4  ;;  %v6909_v20 = vld [vmem:[%s9013_s0 + $0x38] ss:$8 sps:$4 sm:$0xff]  }
  0x5b   :  { %6274 = vmatpush3.bf16.msra.mxu0 %v6902_v16  ;;  %6277 = vmatprep.mubr.bf16.mxu0 %v6904_v0  ;;  %v1097_v16 = vrot.slane %v1096_v41, 4  ;;  %v1060_v0 = vsel %vm7172_vm2, %v1055_v39, %v7504_v34  ;;  %v1110_v27 = vor.u32 %v1109_v49, %v1106_v48  ;;  %v4780_v34 = vld [vmem:[%s9013_s0 + $0x4] sm:$0x1]  ;;  %v7613_v39 = vrot.slane %v1146_v11, 4  ;;  %v6911_v41 = vld [vmem:[%s9014_s1 + $0xd8] sm:$0xff]  }
  0x5c   :  { %6275 = vmatprep.subr.bf16.mxu0 %v6903_v17  ;;  %v1074_v63 = vsel %vm7172_vm2, %v1069_v47, %v1073_v40  ;;  %v4781_v40 = vld [vmem:[%s9013_s0 + $0xc] sm:$0x1]  ;;  %v1174_v47 = vshrl.u32 %v5614_v52, 16  ;;  %v4796_v48 = vunpack.c.l.bf16 %v4780_v34  ;;  %v5956_v49 = vld [vmem:[%s9013_s0 + $0x8] ss:$8 sps:$4 sm:$0xff]   ;;  %v7652_v60 = vrot.slane %v1138_v36, 4 }
  0x5d   :  { %v1102_v3 = vsel %vm7172_vm2, %v1097_v16, %v1101_v13  ;;  %v7585_v22 = vcombine.low %v1060_v0, %v1074_v63  ;;  %v7602_v30 = vrot.slane %v1110_v27, 4  ;;  %v7634_v13 = vrot.slane %v1160_v29, 4  ;;  %v6914_v0 = vld [vmem:[%s9014_s1 + $0xe0] sm:$0xff]   ;;  %v4783_v27 = vld [vmem:[%s9013_s0 + $0x1c] sm:$0x1] }
  0x5e   :  { %v7600_v26 = vcombine.low %v1088_v2, %v1102_v3  ;;  %v7636_v16 = vrot.slane %v1163_v44, 5  ;;  %v4797_v55 = vunpack.c.l.bf16 %v4781_v40  ;;  %v4846_v62 = vrot.slane %v4796_v48, 1  ;;  %v5972_v11 = vld [vmem:[%s9013_s0 + $0xc] sm:$0x1]  ;;  %v5974_v29 = vld [vmem:[%s9013_s0 + $0x1c] sm:$0x1] }
  0x5f   :  { %6276 = vmatpush3.bf16.msra.mxu0 %v6903_v17  ;;  %v1124_v17 = vor.u32 %v1123_v56, %v1120_v37  ;;  %v4782_v37 = vld [vmem:[%s9013_s0 + $0x14] sm:$0x1]  ;;  %v7661_v33 = vrot.slane %v1174_v47, 4  ;;  %v4974_v2 = vunpack.c.h.bf16 %v5956_v49  ;;  %v4766_v3 = vunpack.c.l.bf16 %v7650_v58  ;;  %v5975_v44 = vld [vmem:[%s9013_s0 + $0x24] sm:$0x1]  ;;  %v6915_v47 = vld [vmem:[%s9014_s1 + $0xe8] sm:$0xff]  }
  0x60   :  { %6293 = vmatprep.subr.bf16.mxu0 %v6906_v38  ;;  %v4849_v53 = vrot.slane %v4797_v55, 1  ;;  %v1166_v63 = vor.u32 %v7636_v16, %v7634_v13  ;;  %v4847_v1 = vsel %vm4844_vm3, %v4845_v57, %v4846_v62  ;;  %v4799_v34 = vunpack.c.l.bf16 %v4783_v27  ;;  %v4784_v57 = vld [vmem:[%s9013_s0 + $0x24] sm:$0x1] }
  0x61   :  { %v7624_v42 = vrot.slane %v1124_v17, 4  ;;  %v7691_v17 = vrot.slane %v1177_v61, 5  ;;  %v5120_v23 = vrot.slane %v4974_v2, 1  ;;  %v4851_v36 = vrot.slane %v4766_v3, 1 }
  0x62   :  { %6278 = vmatmul.mubr.bf16.vlgmr.msra.gmra.mrb[0].mxu0 %v6905_v50  ;;  %v7626_v50 = vrot.slane %v1149_v19, 5  ;;  %v4850_v8 = vsel %vm4844_vm3, %v4848_v18, %v4849_v53  ;;  %v4975_v48 = vunpack.c.l.bf16 %v5958_v28  ;;  %v5085_v55 = vunpack.c.l.bf16 %v5972_v11  ;;  %v4785_v53 = vld [vmem:[%s9013_s0 + $0x2c] sm:$0x1] }
  0x63   :  { %6294 = vmatpush3.bf16.msra.mxu0 %v6906_v38  ;;  %6281 = vmatprep.mubr.bf16.mxu0 %v6908_v54  ;;  %v7611_v38 = vrot.slane %v1141_v10, 5  ;;  %v1169_v54 = vshll.u32 %v7590_v24, 16  ;;  %v4798_v10 = vunpack.c.l.bf16 %v4782_v37  ;;  %v6762_v19 = vpack.i.bf16 %v4850_v8, %v4847_v1  ;;  %v7726_v8 = vld [vmem:[%s9013_s0 + $0x30] ss:$8 sps:$4 sm:$0xff]  }
  0x64   :  { %6295 = vmatprep.subr.bf16.mxu0 %v6907_v43  ;;  %v1152_v56 = vor.u32 %v7626_v50, %v7613_v39  ;;  %v4855_v62 = vrot.slane %v4799_v34, 1  ;;  %v5087_v37 = vunpack.c.l.bf16 %v5974_v29  ;;  %v5123_v27 = vrot.slane %v4975_v48, 1  ;;  %v6917_v29 = vld [vmem:[%s9013_s0 + $0x80] ss:$8 sps:$4 sm:$0xff]  }
  0x65   :  { %v4852_v40 = vrot.slane %v4798_v10, 1  ;;  %6763 = vrot.lane.b32.xlu0 %v6762_v19, %s7070_s9  ;;  %v4786_v19 = vld [vmem:[%s9013_s0 + $0x34] sm:$0x1]  ;;  %v1167_v24 = vrot.slane %v1166_v63, 4  ;;  %v1116_v46 = vsel %vm7172_vm2, %v7602_v30, %v7604_v31  ;;  %v1130_v13 = vsel %vm7172_vm2, %v7624_v42, %v7609_v35 }
  0x67   :  { %6296 = vmatpush3.bf16.msra.mxu0 %v6907_v43  ;;  %v4973_v43 = vunpack.c.l.bf16 %v5956_v49  ;;  %v4976_v49 = vunpack.c.h.bf16 %v5958_v28  ;;  %v4853_v61 = vsel %vm4844_vm3, %v4851_v36, %v4852_v40  ;;  %v5118_v28 = vrot.slane %v5085_v55, 1  ;;  %v5960_v36 = vld [vmem:[%s9013_s0 + $0x28] ss:$8 sps:$4 sm:$0xff]  }
  0x68   :  { %6297 = vmatprep.subr.bf16.mxu0 %v6910_v12 }
  0x69   :  { %v5117_v52 = vrot.slane %v4973_v43, 1  ;;  %v5126_v1 = vrot.slane %v4976_v49, 1 }
  0x6a   :  { %6282 = vmatmul.mubr.bf16.gmra.mrb[4].mxu0 %v6909_v20  ;;  %v6752_v20 = vpack.i.bf16 %v4974_v2, %v4973_v43  ;;  %v6918_v43 = vld [vmem:[%s9014_s1 + $0xf0] sm:$0xff]   ;;  %v6757_v2 = vpack.i.bf16 %v4976_v49, %v4975_v48  ;;  %v4800_v49 = vunpack.c.l.bf16 %v4784_v57  ;;  %v9020_v57 = vunpack.c.l.bf16 %v7726_v8 }
  0x6b   :  { %6298 = vmatpush3.bf16.msra.mxu0 %v6910_v12  ;;  %6285 = vmatprep.mubr.bf16.mxu0 %v6912_v4  ;;  %v5973_v12 = vld [vmem:[%s9013_s0 + $0x14] sm:$0x1]  ;;  %v7704_v4 = vld [vmem:[%s9013_s0 + $0x20] ss:$8 sps:$4 sm:$0xff]  }
  0x6c   :  { %6299 = vmatprep.subr.bf16.mxu0 %v6911_v41  ;;  %6753 = vrot.lane.b32.xlu1 %v6752_v20, %s7071_s12  ;;  %v5086_v18 = vunpack.c.l.bf16 %v5973_v12  ;;  %v5088_v12 = vunpack.c.l.bf16 %v5975_v44  ;;  %v4787_v20 = vld [vmem:[%s9013_s0 + $0x3c] sm:$0x1]  ;;  %v9022_v34 = vunpack.c.l.bf16 %v7704_v4  ;;  %v9023_v44 = vunpack.c.h.bf16 %v7704_v4 }
  0x6e   :  { %v5121_v11 = vrot.slane %v5086_v18, 1  ;;  %v5127_v48 = vrot.slane %v5088_v12, 1  ;;  %v5962_v18 = vld [vmem:[%s9013_s0 + $0x38] ss:$8 sps:$4 sm:$0xff]  }
  0x6f   :  { %6300 = vmatpush3.bf16.msra.mxu0 %v6911_v41  ;;  %v4854_v41 = vrot.slane %v4767_v9, 1 }
  0x70   :  { %6301 = vmatprep.subr.bf16.mxu0 %v6914_v0  ;;  %6758 = vrot.lane.b32.xlu1 %v6757_v2, %s7071_s12  ;;  %v5122_v40 = vsel %vm4844_vm3, %v5120_v23, %v5121_v11  ;;  %v5128_v23 = vsel %vm4844_vm3, %v5126_v1, %v5127_v48  ;;  %v9021_v2 = vunpack.c.h.bf16 %v7726_v8  ;;  %v4803_v11 = vunpack.c.l.bf16 %v4787_v20  ;;  %v5979_v20 = vld [vmem:[%s9013_s0 + $0x44] sm:$0x1] }
  0x71   :  { %v4856_v10 = vsel %vm4844_vm3, %v4854_v41, %v4855_v62  ;;  %v4860_v62 = vrot.slane %v9023_v44, 1 }
  0x72   :  { %6286 = vmatmul.mubr.bf16.gmra.mrb[8].mxu0 %v6913_v59  ;;  %v5124_v59 = vrot.slane %v5087_v37, 1  ;;  %v4858_v37 = vrot.slane %v4800_v49, 1  ;;  %v4866_v1 = vrot.slane %v9021_v2, 1  ;;  %v4867_v48 = vrot.slane %v4803_v11, 1 }
  0x73   :  { %6302 = vmatpush3.bf16.msra.mxu0 %v6914_v0  ;;  %6289 = vmatprep.mubr.bf16.mxu0 %v6916_v6  ;;  %v6767_v0 = vpack.i.bf16 %v4856_v10, %v4853_v61  ;;  %v5119_v6 = vsel %vm4844_vm3, %v5117_v52, %v5118_v28  ;;  %v4801_v52 = vunpack.c.l.bf16 %v4785_v53  ;;  %v4857_v61 = vrot.slane %v9022_v34, 1  ;;  %v6919_v53 = vld [vmem:[%s9014_s1 + $0xf8] sm:$0xff]  }
  0x74   :  { %6303 = vmatprep.subr.bf16.mxu0 %v6915_v47  ;;  %v5125_v41 = vsel %vm4844_vm3, %v5123_v27, %v5124_v59  ;;  %v6772_v55 = vpack.i.bf16 %v5122_v40, %v5119_v6  ;;  %v4802_v10 = vunpack.c.l.bf16 %v4786_v19  ;;  %v4977_v59 = vunpack.c.l.bf16 %v5960_v36  ;;  %v5977_v6 = vld [vmem:[%s9013_s0 + $0x34] sm:$0x1]  ;;  %v5978_v19 = vld [vmem:[%s9013_s0 + $0x3c] sm:$0x1] }
  0x75   :  { %6768 = vrot.lane.b32.xlu0 %v6767_v0, %s7070_s9  ;;  %v6777_v27 = vpack.i.bf16 %v5128_v23, %v5125_v41  ;;  %v4861_v28 = vrot.slane %v4801_v52, 1  ;;  %v4859_v12 = vsel %vm4844_vm3, %v4857_v61, %v4858_v37  ;;  %v5976_v0 = vld [vmem:[%s9013_s0 + $0x2c] sm:$0x1]  ;;  %v4978_v49 = vunpack.c.h.bf16 %v5960_v36  ;;  %v7783_v52 = vld [vmem:[%s9013_s0 + $0x48] ss:$8 sps:$4 sm:$0xff]  }
  0x76   :  { %v4864_v41 = vrot.slane %v4802_v10, 1  ;;  %v4788_v61 = vld [vmem:[%s9013_s0 + $0x4c] sm:$0x1]  ;;  %v4979_v23 = vunpack.c.l.bf16 %v5962_v18  ;;  %v4980_v36 = vunpack.c.h.bf16 %v5962_v18  ;;  %v5090_v18 = vunpack.c.l.bf16 %v5977_v6 }
  0x77   :  { %6304 = vmatpush3.bf16.msra.mxu0 %v6915_v47  ;;  %v4863_v47 = vrot.slane %v9020_v57, 1  ;;  %v4862_v40 = vsel %vm4844_vm3, %v4860_v62, %v4861_v28  ;;  %v5129_v62 = vrot.slane %v4977_v59, 1  ;;  %6778 = vrot.lane.b32.xlu1 %v6777_v27, %s7072_s16  ;;  %v4868_v28 = vsel %vm4844_vm3, %v4866_v1, %v4867_v48 }
  0x78   :  { %6305 = vmatprep.subr.bf16.mxu0 %v6918_v43  ;;  %v5132_v10 = vrot.slane %v4978_v49, 1  ;;  %v6792_v11 = vpack.i.bf16 %v4978_v49, %v4977_v59  ;;  %v5138_v2 = vrot.slane %v4980_v36, 1  ;;  %v6797_v34 = vpack.i.bf16 %v4980_v36, %v4979_v23 }
  0x79   :  { %6773 = vrot.lane.b32.xlu0 %v6772_v55, %s7072_s16  ;;  %v6782_v55 = vpack.i.bf16 %v4862_v40, %v4859_v12  ;;  %v4865_v37 = vsel %vm4844_vm3, %v4863_v47, %v4864_v41  ;;  %v5135_v44 = vrot.slane %v4979_v23, 1  ;;  %v5091_v27 = vunpack.c.l.bf16 %v5978_v19  ;;  %v4790_v41 = vld [vmem:[%s9013_s0 + $0x5c] sm:$0x1] }
  0x7a   :  { %6290 = vmatmul.mubr.bf16.gmra.mrb[12].mxu0 %v6917_v29  ;;  %v4789_v29 = vld [vmem:[%s9013_s0 + $0x54] sm:$0x1]  ;;  %v6787_v57 = vpack.i.bf16 %v4868_v28, %v4865_v37  ;;  %v5092_v12 = vunpack.c.l.bf16 %v5979_v20  ;;  %v9030_v47 = vunpack.c.l.bf16 %v7783_v52  ;;  %v9031_v1 = vunpack.c.h.bf16 %v7783_v52 }
  0x7b   :  { %6306 = vmatpush3.bf16.msra.mxu0 %v6918_v43  ;;  %6309 = vmatprep.mubr.bf16.mxu0 %v7576_v14  ;;  %v7798_v14 = vld [vmem:[%s9013_s0 + $0x58] ss:$8 sps:$4 sm:$0xff]   ;;  %v5089_v43 = vunpack.c.l.bf16 %v5976_v0  ;;  %v4804_v59 = vunpack.c.l.bf16 %v4788_v61  ;;  %v4805_v40 = vunpack.c.l.bf16 %v4789_v29  ;;  %v5133_v49 = vrot.slane %v5090_v18, 1 }
  0x7c   :  { %6307 = vmatprep.subr.bf16.mxu0 %v6919_v53  ;;  %6788 = vrot.lane.b32.xlu1 %v6787_v57, %s7070_s9  ;;  %v5139_v0 = vrot.slane %v5092_v12, 1  ;;  %v4869_v6 = vrot.slane %v9030_v47, 1  ;;  %v4872_v20 = vrot.slane %v9031_v1, 1  ;;  %v5964_v57 = vld [vmem:[%s9013_s0 + $0x50] ss:$8 sps:$4 sm:$0xff]   ;;  %v9028_v37 = vunpack.c.l.bf16 %v7798_v14 }
  0x7d   :  { %6783 = vrot.lane.b32.xlu0 %v6782_v55, %s7070_s9  ;;  %v5130_v48 = vrot.slane %v5089_v43, 1  ;;  %v5136_v55 = vrot.slane %v5091_v27, 1  ;;  %v4870_v19 = vrot.slane %v4804_v59, 1  ;;  %v4873_v61 = vrot.slane %v4805_v40, 1 }
  0x7e   :  { %v5134_v23 = vsel %vm4844_vm3, %v5132_v10, %v5133_v49  ;;  %v5140_v43 = vsel %vm4844_vm3, %v5138_v2, %v5139_v0  ;;  %v9029_v10 = vunpack.c.h.bf16 %v7798_v14  ;;  %v1171_v2 = vrot.slane %v1169_v54, 5 }
  0x7f   :  { %6308 = vmatpush3.bf16.msra.mxu0 %v6919_v53  ;;  %v4791_v53 = vld [vmem:[%s9013_s0 + $0x64] sm:$0x1]  ;;  %v5131_v29 = vsel %vm4844_vm3, %v5129_v62, %v5130_v48  ;;  %v5137_v36 = vsel %vm4844_vm3, %v5135_v44, %v5136_v55  ;;  %v4871_v18 = vsel %vm4844_vm3, %v4869_v6, %v4870_v19  ;;  %v4874_v27 = vsel %vm4844_vm3, %v4872_v20, %v4873_v61 }
  0x80   :  { %v6802_v28 = vpack.i.bf16 %v5134_v23, %v5131_v29  ;;  %v1180_v62 = vor.u32 %v7691_v17, %v7661_v33  ;;  %6798 = vrot.lane.b32.xlu1 %v6797_v34, %s7071_s12  ;;  %v6807_v44 = vpack.i.bf16 %v5140_v43, %v5137_v36  ;;  %v4807_v12 = vunpack.c.l.bf16 %v4791_v53 }
  0x81   :  { %6793 = vrot.lane.b32.xlu0 %v6792_v11, %s7071_s12  ;;  %v6812_v11 = vpack.i.bf16 %v4874_v27, %v4871_v18  ;;  %v4875_v59 = vrot.slane %v9028_v37, 1  ;;  %v4878_v33 = vrot.slane %v9029_v10, 1  ;;  %v4981_v17 = vunpack.c.l.bf16 %v5964_v57 }
  0x82   :  { %6310 = vmatmul.mubr.bf16.vlgmr.msra.gmra.mrb[0].mxu0 %v7578_v15  ;;  %v5966_v15 = vld [vmem:[%s9013_s0 + $0x60] ss:$8 sps:$4 sm:$0xff]   ;;  %v4982_v34 = vunpack.c.h.bf16 %v5964_v57  ;;  %v1185_v54 = vrot.slane %v1183_v7, 5  ;;  %v4879_v48 = vrot.slane %v4807_v12, 1  ;;  %v1181_v49 = vrot.slane %v1180_v62, 4 }
  0x83   :  { %6313 = vmatprep.mubr.bf16.mxu0 %v7583_v21  ;;  %v4806_v21 = vunpack.c.l.bf16 %v4790_v41  ;;  %v1153_v41 = vrot.slane %v1152_v56, 4  ;;  %v4983_v0 = vunpack.c.l.bf16 %v5966_v15  ;;  %v4984_v53 = vunpack.c.h.bf16 %v5966_v15 }
  0x84   :  { %6808 = vrot.lane.b32.xlu1 %v6807_v44, %s7072_s16  ;;  %v4880_v6 = vsel %vm4844_vm3, %v4878_v33, %v4879_v48  ;;  %v6822_v50 = vpack.i.bf16 %v4982_v34, %v4981_v17  ;;  %v5637_v56 = vcombine.low %v1116_v46, %v1130_v13 }
  0x85   :  { %6803 = vrot.lane.b32.xlu0 %v6802_v28, %s7072_s16  ;;  %v4876_v40 = vrot.slane %v4806_v21, 1  ;;  %v1158_v16 = vsel %vm7172_vm2, %v1153_v41, %v7642_v51 }
  0x87   :  { %v4877_v55 = vsel %vm4844_vm3, %v4875_v59, %v4876_v40 }
  0x88   :  { %v6817_v39 = vpack.i.bf16 %v4880_v6, %v4877_v55 }
  0x89   :  { %6813 = vrot.lane.b32.xlu0 %v6812_v11, %s7070_s9 }
  0x8a   :  { %6314 = vmatmul.mubr.bf16.gmra.mrb[4].mxu0 %v7585_v22  ;;  %v1144_v22 = vsel %vm7172_vm2, %v7652_v60, %v7611_v38  ;;  %6818 = vrot.lane.b32.xlu1 %v6817_v39, %s7070_s9 }
  0x8b   :  { %6317 = vmatprep.mubr.bf16.mxu0 %v7600_v26  ;;  %v6827_v26 = vpack.i.bf16 %v4984_v53, %v4983_v0  ;;  %v5638_v30 = vcombine.low %v1144_v22, %v1158_v16 }
  0x8d   :  { %6823 = vrot.lane.b32.xlu0 %v6822_v50, %s7071_s12 }
  0x8e   :  { %6828 = vrot.lane.b32.xlu1 %v6827_v26, %s7071_s12 }
  0x8f   :  { %12 = vsyncpa [#allocation5], 0  ;;  %v1172_v31 = vsel %vm7172_vm2, %v1167_v24, %v1171_v2  ;;  %v1186_v35 = vsel %vm7172_vm2, %v1181_v49, %v1185_v54  ;;  %v5980_v42 = vld [vmem:[%s9013_s0 + $0x54] sm:$0x1]  ;;  %v5981_v51 = vld [vmem:[%s9013_s0 + $0x5c] sm:$0x1] }
  0x90   :  { %v5639_v38 = vcombine.low %v1172_v31, %v1186_v35  ;;  %v5144_v60 = vrot.slane %v4982_v34, 1  ;;  %v5141_v63 = vrot.slane %v4981_v17, 1  ;;  %v5093_v7 = vunpack.c.l.bf16 %v5980_v42  ;;  %v5982_v20 = vld [vmem:[%s9013_s0 + $0x64] sm:$0x1]  ;;  %v5983_v61 = vld [vmem:[%s9013_s0 + $0x6c] sm:$0x1] }
  0x91   :  { %v5094_v19 = vunpack.c.l.bf16 %v5981_v51  ;;  %v5150_v57 = vrot.slane %v4984_v53, 1  ;;  %v5147_v29 = vrot.slane %v4983_v0, 1  ;;  %v5095_v23 = vunpack.c.l.bf16 %v5982_v20  ;;  %v7892_v15 = vld [vmem:[%s9013_s0 + $0x68] ss:$8 sps:$4 sm:$0xff]   ;;  %v4792_v62 = vld [vmem:[%s9013_s0 + $0x6c] sm:$0x1] }
  0x92   :  { %6318 = vmatmul.mubr.bf16.gmra.mrb[8].mxu0 %v5637_v56  ;;  %v5096_v36 = vunpack.c.l.bf16 %v5983_v61  ;;  %v5142_v28 = vrot.slane %v5093_v7, 1  ;;  %v9026_v2 = vunpack.c.l.bf16 %v7892_v15  ;;  %v9027_v11 = vunpack.c.h.bf16 %v7892_v15  ;;  %v4793_v12 = vld [vmem:[%s9013_s0 + $0x74] sm:$0x1]  ;;  %v7907_v59 = vld [vmem:[%s9013_s0 + $0x78] ss:$8 sps:$4 sm:$0xff]  }
  0x93   :  { %6321 = vmatprep.mubr.bf16.mxu0 %v5638_v30  ;;  %v5145_v43 = vrot.slane %v5094_v19, 1  ;;  %v5148_v18 = vrot.slane %v5095_v23, 1  ;;  %v7912_v40 = vld [vmem:[%s9013_s0 + $0x7c] sm:$0x1]  ;;  %v4808_v41 = vunpack.c.l.bf16 %v4792_v62  ;;  %v4795_v24 = vld [vmem:[%s9013_s0 + $0x84] sm:$0x1]  ;;  %v4809_v48 = vunpack.c.l.bf16 %v4793_v12 }
  0x94   :  { %v5151_v27 = vrot.slane %v5096_v36, 1  ;;  %v5143_v44 = vsel %vm4844_vm3, %v5141_v63, %v5142_v28  ;;  %v4881_v49 = vrot.slane %v9026_v2, 1  ;;  %v4884_v55 = vrot.slane %v9027_v11, 1  ;;  %v5970_v20 = vld [vmem:[%s9013_s0 + $0x80] ss:$8 sps:$4 sm:$0xff]  }
  0x95   :  { %v5146_v21 = vsel %vm4844_vm3, %v5144_v60, %v5145_v43  ;;  %v5149_v17 = vsel %vm4844_vm3, %v5147_v29, %v5148_v18  ;;  %v4882_v0 = vrot.slane %v4808_v41, 1  ;;  %v9024_v53 = vunpack.c.l.bf16 %v7907_v59  ;;  %v5968_v60 = vld [vmem:[%s9013_s0 + $0x70] ss:$8 sps:$4 sm:$0xff]   ;;  %v5984_v36 = vld [vmem:[%s9013_s0 + $0x74] sm:$0x1]  ;;  %v6921_v41 = vld [vmem:[%s9015_s2 + $0x8] sm:$0xff]  }
  0x96   :  { %v6832_v33 = vpack.i.bf16 %v5146_v21, %v5143_v44  ;;  %v5152_v34 = vsel %vm4844_vm3, %v5150_v57, %v5151_v27  ;;  %v9025_v6 = vunpack.c.h.bf16 %v7907_v59  ;;  %v4810_v39 = vunpack.c.l.bf16 %v7912_v40  ;;  %v6920_v57 = vld [vmem:[%s9015_s2] sm:$0xff]   ;;  %v5985_v28 = vld [vmem:[%s9013_s0 + $0x7c] sm:$0x1]  ;;  %v5987_v21 = vld [vmem:[%s9013_s0 + $0x8c] sm:$0x1] }
  0x97   :  { %v6837_v54 = vpack.i.bf16 %v5152_v34, %v5149_v17  ;;  %v4885_v50 = vrot.slane %v4809_v48, 1  ;;  %v4811_v46 = vunpack.c.l.bf16 %v4795_v24  ;;  %vm1445_vm4 = vcmask 519168   ;;  %v5986_v43 = vld [vmem:[%s9013_s0 + $0x84] sm:$0x1]  ;;  %6349 = vmatprep.subr.bf16.mxu1 %v6920_v57 }
  0x98   :  { %6833 = vrot.lane.b32.xlu0 %v6832_v33, %s7072_s16  ;;  %vm1447_vm5 = vcmask 516096   ;;  %v4883_v13 = vsel %vm4844_vm3, %v4881_v49, %v4882_v0  ;;  %v7073_v22 = vmov 0   ;;  %v4887_v26 = vrot.slane %v9024_v53, 1  ;;  %6350 = vmatpush3.bf16.msra.mxu1 %v6920_v57 }
  0x99   :  { %6838 = vrot.lane.b32.xlu1 %v6837_v54, %s7072_s16  ;;  %1453 = vst.msk [vmem:[#allocation2 + $0x18] sm:$0xf] %vm1445_vm4, %v7073_v22  ;;  %1446 = vst.msk [vmem:[#allocation2] sm:$0xf] %vm1445_vm4, %v7073_v22  ;;  %v4886_v16 = vsel %vm4844_vm3, %v4884_v55, %v4885_v50  ;;  %v4888_v56 = vrot.slane %v4810_v39, 1  ;;  %v4890_v30 = vrot.slane %v9025_v6, 1  ;;  %v4985_v63 = vunpack.c.l.bf16 %v5968_v60  ;;  %6351 = vmatprep.subr.bf16.mxu1 %v6921_v41 }
  0x9a   :  { %6322 = vmatmul.mubr.bf16.gmra.mrb[12].mxu0 %v5639_v38  ;;  %1454 = vst.msk [vmem:[#allocation2 + $0x1c] sm:$0x1] %vm1447_vm5, %v7073_v22  ;;  %1448 = vst.msk [vmem:[#allocation2 + $0x4] sm:$0x1] %vm1447_vm5, %v7073_v22  ;;  %v6842_v31 = vpack.i.bf16 %v4886_v16, %v4883_v13  ;;  %v4891_v35 = vrot.slane %v4811_v46, 1  ;;  %v4986_v7 = vunpack.c.h.bf16 %v5968_v60  ;;  %v4987_v29 = vunpack.c.l.bf16 %v5970_v20  ;;  %v6922_v13 = vld [vmem:[%s9015_s2 + $0x10] sm:$0xff]  }
  0x9b   :  { %1449 = vst.msk [vmem:[#allocation2 + $0x8] sm:$0xf] %vm1445_vm4, %v7073_v22  ;;  %1451 = vst.msk [vmem:[#allocation2 + $0x10] sm:$0xf] %vm1445_vm4, %v7073_v22  ;;  %v4889_v38 = vsel %vm4844_vm3, %v4887_v26, %v4888_v56  ;;  %v4988_v23 = vunpack.c.h.bf16 %v5970_v20  ;;  %v5153_v18 = vrot.slane %v4985_v63, 1  ;;  %v5097_v44 = vunpack.c.l.bf16 %v5984_v36  ;;  %v6924_v16 = vld [vmem:[%s9015_s2 + $0x18] sm:$0xff]  }
  0x9c   :  { %1450 = vst.msk [vmem:[#allocation2 + $0xc] sm:$0x1] %vm1447_vm5, %v7073_v22  ;;  %1452 = vst.msk [vmem:[#allocation2 + $0x14] sm:$0x1] %vm1447_vm5, %v7073_v22  ;;  %6843 = vrot.lane.b32.xlu0 %v6842_v31, %s7070_s9  ;;  %v4892_v42 = vsel %vm4844_vm3, %v4890_v30, %v4891_v35  ;;  %v6852_v19 = vpack.i.bf16 %v4986_v7, %v4985_v63  ;;  %v5156_v61 = vrot.slane %v4986_v7, 1  ;;  %v5159_v12 = vrot.slane %v4987_v29, 1 }
  0x9d   :  { %1455 = vst.msk [vmem:[#allocation2 + $0x20] sm:$0xf] %vm1445_vm4, %v7073_v22  ;;  %1457 = vst.msk [vmem:[#allocation2 + $0x28] sm:$0xf] %vm1445_vm4, %v7073_v22  ;;  %v6847_v51 = vpack.i.bf16 %v4892_v42, %v4889_v38  ;;  %v5162_v27 = vrot.slane %v4988_v23, 1  ;;  %v6857_v62 = vpack.i.bf16 %v4988_v23, %v4987_v29  ;;  %v5098_v40 = vunpack.c.l.bf16 %v5985_v28  ;;  %6352 = vmatpush3.bf16.msra.mxu1 %v6921_v41  ;;  %v6925_v26 = vld [vmem:[%s9015_s2 + $0x28] sm:$0xff]  }
  0x9e   :  { %1456 = vst.msk [vmem:[#allocation2 + $0x24] sm:$0x1] %vm1447_vm5, %v7073_v22  ;;  %1458 = vst.msk [vmem:[#allocation2 + $0x2c] sm:$0x1] %vm1447_vm5, %v7073_v22  ;;  %v5099_v33 = vunpack.c.l.bf16 %v5986_v43  ;;  %v5100_v17 = vunpack.c.l.bf16 %v5987_v21  ;;  %v5154_v34 = vrot.slane %v5097_v44, 1  ;;  %6353 = vmatprep.subr.bf16.mxu1 %v6922_v13  ;;  %v6929_v56 = vld [vmem:[%s9015_s2 + $0x30] sm:$0xff]  }
  0x9f   :  { %1459 = vst.msk [vmem:[#allocation2 + $0x30] sm:$0xf] %vm1445_vm4, %v7073_v22  ;;  %1461 = vst.msk [vmem:[#allocation2 + $0x38] sm:$0xf] %vm1445_vm4, %v7073_v22  ;;  %6848 = vrot.lane.b32.xlu1 %v6847_v51, %s7070_s9  ;;  %v5157_v24 = vrot.slane %v5098_v40, 1  ;;  %v8028_v30 = vld [vmem:[%s9015_s2 + $0x40] sm:$0xff]  }
  0xa0   :  { %1460 = vst.msk [vmem:[#allocation2 + $0x34] sm:$0x1] %vm1447_vm5, %v7073_v22  ;;  %1462 = vst.msk [vmem:[#allocation2 + $0x3c] sm:$0x1] %vm1447_vm5, %v7073_v22  ;;  %6853 = vrot.lane.b32.xlu0 %v6852_v19, %s7071_s12  ;;  %v5160_v54 = vrot.slane %v5099_v33, 1  ;;  %v5163_v48 = vrot.slane %v5100_v17, 1  ;;  %v5155_v49 = vsel %vm4844_vm3, %v5153_v18, %v5154_v34 }
  0xa1   :  { %1463 = vst.msk [vmem:[#allocation2 + $0x40] sm:$0xf] %vm1445_vm4, %v7073_v22  ;;  %1465 = vst.msk [vmem:[#allocation2 + $0x48] sm:$0xf] %vm1445_vm4, %v7073_v22  ;;  %v5158_v55 = vsel %vm4844_vm3, %v5156_v61, %v5157_v24  ;;  %6354 = vmatpush3.bf16.msra.mxu1 %v6922_v13  ;;  %v6930_v31 = vld [vmem:[%s9015_s2 + $0x38] sm:$0xff]   ;;  %v8037_v35 = vld [vmem:[%s9015_s2 + $0x100] sm:$0xff]  }
  0xa2   :  { %1464 = vst.msk [vmem:[#allocation2 + $0x44] sm:$0x1] %vm1447_vm5, %v7073_v22  ;;  %1466 = vst.msk [vmem:[#allocation2 + $0x4c] sm:$0x1] %vm1447_vm5, %v7073_v22  ;;  %v5161_v0 = vsel %vm4844_vm3, %v5159_v12, %v5160_v54  ;;  %v5164_v39 = vsel %vm4844_vm3, %v5162_v27, %v5163_v48  ;;  %v6862_v50 = vpack.i.bf16 %v5158_v55, %v5155_v49  ;;  %6355 = vmatprep.subr.bf16.mxu1 %v6924_v16  ;;  %v8040_v38 = vld [vmem:[#allocation2] sm:$0xf] }
  0xa3   :  { %1467 = vst.msk [vmem:[#allocation2 + $0x50] sm:$0xf] %vm1445_vm4, %v7073_v22  ;;  %1469 = vst.msk [vmem:[#allocation2 + $0x58] sm:$0xf] %vm1445_vm4, %v7073_v22  ;;  %6858 = vrot.lane.b32.xlu1 %v6857_v62, %s7071_s12  ;;  %v6867_v46 = vpack.i.bf16 %v5164_v39, %v5161_v0  ;;  %v1839_v42 = vshrl.u32 %v8040_v38, 16  ;;  %v1842_v51 = vshll.u32 %v8040_v38, 16 }
  0xa4   :  { %1468 = vst.msk [vmem:[#allocation2 + $0x54] sm:$0x1] %vm1447_vm5, %v7073_v22  ;;  %1470 = vst.msk [vmem:[#allocation2 + $0x5c] sm:$0x1] %vm1447_vm5, %v7073_v22  ;;  %6863 = vrot.lane.b32.xlu0 %v6862_v50, %s7072_s16  ;;  %v1822_v61 = vld [vmem:[#allocation2 + $0x4] sm:$0x1] }
  0xa5   :  { %1471 = vst.msk [vmem:[#allocation2 + $0x60] sm:$0xf] %vm1445_vm4, %v7073_v22  ;;  %1473 = vst.msk [vmem:[#allocation2 + $0x68] sm:$0xf] %vm1445_vm4, %v7073_v22  ;;  %6356 = vmatpush3.bf16.msra.mxu1 %v6924_v16  ;;  %v1841_v63 = vrot.slane %v1839_v42, 4  ;;  %v1844_v7 = vrot.slane %v1842_v51, 5 }
  0xa6   :  { %1472 = vst.msk [vmem:[#allocation2 + $0x64] sm:$0x1] %vm1447_vm5, %v7073_v22  ;;  %1474 = vst.msk [vmem:[#allocation2 + $0x6c] sm:$0x1] %vm1447_vm5, %v7073_v22  ;;  %6373 = vmatprep.subr.bf16.mxu1 %v8028_v30  ;;  %v1848_v29 = vshll.u32 %v1822_v61, 16  ;;  %vm2474_vm6 = vcmask 1042432  }
  0xa7   :  { %1475 = vst.msk [vmem:[#allocation2 + $0x70] sm:$0xf] %vm1445_vm4, %v7073_v22  ;;  %1477 = vst.msk [vmem:[#allocation2 + $0x78] sm:$0xf] %vm1445_vm4, %v7073_v22  ;;  %6868 = vrot.lane.b32.xlu1 %v6867_v46, %s7072_s16  ;;  %v1845_v57 = vor.u32 %v1844_v7, %v1841_v63  ;;  %v2426_v27 = vld [vmem:[#allocation2] sm:$0xe] }
  0xa8   :  { %1476 = vst.msk [vmem:[#allocation2 + $0x74] sm:$0x1] %vm1447_vm5, %v7073_v22  ;;  %1478 = vst.msk [vmem:[#allocation2 + $0x7c] sm:$0x1] %vm1447_vm5, %v7073_v22  ;;  %v8050_v44 = vrot.slane %v1848_v29, 5  ;;  %vm2475_vm7 = vcmask 1046532  }
  0xa9   :  { %1479 = vst.msk [vmem:[#allocation2 + $0x80] sm:$0xf] %vm1445_vm4, %v7073_v22  ;;  %1481 = vst.msk [vmem:[#allocation2 + $0x88] sm:$0xf] %vm1445_vm4, %v7073_v22  ;;  %v8048_v62 = vrot.slane %v1845_v57, 4  ;;  %v5712_v17 = vrot.slane %v2426_v27, 9 }
  0xaa   :  { %1480 = vst.msk [vmem:[#allocation2 + $0x84] sm:$0x1] %vm1447_vm5, %v7073_v22  ;;  %1482 = vst.msk [vmem:[#allocation2 + $0x8c] sm:$0x1] %vm1447_vm5, %v7073_v22  ;;  %v8044_v60 = vld [vmem:[#allocation2 + $0x50] sm:$0xf] }
  0xab   :  { %1483 = vst.msk [vmem:[#allocation2 + $0x90] sm:$0xf] %vm1445_vm4, %v7073_v22  ;;  %1485 = vst.msk [vmem:[#allocation2 + $0x98] sm:$0xf] %vm1445_vm4, %v7073_v22  ;;  %v1951_v19 = vshrl.u32 %v8044_v60, 16  ;;  %v1954_v20 = vshll.u32 %v8044_v60, 16  ;;  %v1851_v58 = vsel %vm7172_vm2, %v8048_v62, %v8050_v44 }
  0xac   :  { %1484 = vst.msk [vmem:[#allocation2 + $0x94] sm:$0x1] %vm1447_vm5, %v7073_v22  ;;  %1486 = vst.msk [vmem:[#allocation2 + $0x9c] sm:$0x1] %vm1447_vm5, %v7073_v22  ;;  %v6923_v22 = vld [vmem:[%s9015_s2 + $0x20] sm:$0xff]   ;;  %v2479_v34 = vrot.slane %v1822_v61, 5 }
  0xad   :  { %6325 = vmatprep.subr.bf16.mxu0 %v6923_v22  ;;  %v1953_v23 = vrot.slane %v1951_v19, 4  ;;  %v1956_v36 = vrot.slane %v1954_v20, 5  ;;  %v1830_v18 = vld [vmem:[#allocation2 + $0x54] sm:$0x1]  ;;  %v2434_v54 = vld [vmem:[#allocation2 + $0x50] sm:$0xe]  ;;  %vm8066_vm8 = vmor %vm2474_vm6, %vm2475_vm7 }
  0xae   :  { %6326 = vmatpush3.bf16.msra.mxu0 %v6923_v22  ;;  %v1960_v12 = vshll.u32 %v1830_v18, 16  ;;  %v3959_v48 = vld [vmem:[#allocation2 + $0x4c] sm:$0x1]  ;;  %v4401_v49 = vld [vmem:[#allocation2 + $0x48] sm:$0xe]  ;;  %v2511_v46 = vrot.slane %v1830_v18, 5  ;;  %v8080_v63 = vsel %vm8066_vm8, %v5712_v17, %v2479_v34  ;;  %v9037_v34 = vunpack.c.l.bf16 %v7704_v4 }
  0xaf   :  { %6327 = vmatprep.subr.bf16.mxu0 %v6925_v26  ;;  %v1957_v21 = vor.u32 %v1956_v36, %v1953_v23  ;;  %v5919_v13 = vrot.slane %v4401_v49, 9  ;;  %v4472_v22 = vrot.slane %v3959_v48, 5  ;;  %vm1697_vm9 = vsmask.f32 7938  ;;  %v1708_v37 = vld [vmem:[#allocation2 + $0x10] sm:$0xf] }
  0xb0   :  { %v8058_v0 = vrot.slane %v1960_v12, 5  ;;  %vm1703_vm10 = vsmask.f32 256  ;;  %vm8120_vm15 = vmand %vm1445_vm4, %vm1697_vm9 }
  0xb1   :  { %v8056_v55 = vrot.slane %v1957_v21, 4  ;;  %v8088_v57 = vsel %vm8066_vm8, %v5919_v13, %v4472_v22  ;;  %vm8126_vm0 = vmand %vm1447_vm5, %vm1703_vm10  ;;  %vm2119_vm10 = vcmask 523264  }
  0xb2   :  { %6328 = vmatpush3.bf16.msra.mxu0 %v6925_v26 }
  0xb3   :  { %6329 = vmatprep.subr.bf16.mxu0 %v6929_v56  ;;  %v1963_v51 = vsel %vm7172_vm2, %v8056_v55, %v8058_v0 }
  0xb6   :  { %6330 = vmatpush3.bf16.msra.mxu0 %v6929_v56 }
  0xb7   :  { %6331 = vmatprep.subr.bf16.mxu0 %v6930_v31 }
  0xba   :  { %6332 = vmatpush3.bf16.msra.mxu0 %v6930_v31 }
  0xbb   :  { %6517 = vmatprep.subr.bf16.mxu0 %v8037_v35 }
  0xd7   :  { %v6764_v28 = vpop.permute.xlu0 %6763 }
  0xd8   :  { %v6998_v40 = vadd.high.f32.bf16 %v4765_v45, %v6764_v28  ;;  %v6999_v33 = vadd.low.f32.bf16 %v4764_v5, %v6764_v28  ;;  %v5720_v5 = vrot.slane %v2434_v54, 9 }
  0xda   :  { %v8084_v61 = vsel %vm8066_vm8, %v5720_v5, %v2511_v46  ;;  %v9038_v46 = vunpack.c.h.bf16 %v7726_v8 }
  0xde   :  { %v6754_v43 = vpop.permute.xlu1 %6753 }
  0xdf   :  { %v7000_v39 = vadd.low.f32.bf16 %v6999_v33, %v6754_v43  ;;  %v7001_v50 = vadd.high.f32.bf16 %v6998_v40, %v6754_v43  ;;  %v9036_v33 = vunpack.c.h.bf16 %v7704_v4  ;;  %v9039_v4 = vunpack.c.l.bf16 %v7726_v8 }
  0xe2   :  { %v6759_v24 = vpop.permute.xlu1 %6758 }
  0xe7   :  { %v6769_v41 = vpop.permute.xlu0 %6768 }
  0xe8   :  { %v7002_v45 = vadd.high.f32.bf16 %v4767_v9, %v6769_v41  ;;  %v7003_v25 = vadd.low.f32.bf16 %v4766_v3, %v6769_v41 }
  0xe9   :  { %v6779_v26 = vpop.permute.xlu1 %6778 }
  0xea   :  { %v7004_v31 = vadd.low.f32.bf16 %v7003_v25, %v6759_v24  ;;  %v7005_v42 = vadd.high.f32.bf16 %v7002_v45, %v6759_v24 }
  0xeb   :  { %v6774_v16 = vpop.permute.xlu0 %6773 }
  0xec   :  { %v7006_v3 = vadd.low.f32.bf16 %v7000_v39, %v6774_v16  ;;  %v7007_v9 = vadd.high.f32.bf16 %v7001_v50, %v6774_v16  ;;  %v7008_v7 = vadd.low.f32.bf16 %v7004_v31, %v6779_v26  ;;  %v7009_v19 = vadd.high.f32.bf16 %v7005_v42, %v6779_v26 }
  0xee   :  { %v8090_v23 = vmul.f32 0.25, %v7006_v3  ;;  %v8092_v36 = vmul.f32 0.25, %v7007_v9  ;;  %v8094_v28 = vmul.f32 0.25, %v7008_v7  ;;  %v8096_v43 = vmul.f32 0.25, %v7009_v19  ;;  %v6789_v18 = vpop.permute.xlu1 %6788  ;;  %v1714_v3 = vld [vmem:[#allocation2 + $0x18] sm:$0xf] }
  0xef   :  { %v6784_v20 = vpop.permute.xlu0 %6783  ;;  %v8110_v13 = vadd.high.f32.bf16 %v9038_v46, %v6789_v18  ;;  %v8114_v22 = vadd.low.f32.bf16 %v9039_v4, %v6789_v18  ;;  %v1717_v9 = vld [vmem:[#allocation2 + $0x1c] sm:$0x1]  ;;  %v1699_v18 = vld [vmem:[#allocation2 + $0x8] sm:$0xf] }
  0xf0   :  { %v8100_v17 = vadd.high.f32.bf16 %v9036_v33, %v6784_v20  ;;  %v8104_v41 = vadd.low.f32.bf16 %v9037_v34, %v6784_v20 }
  0xf3   :  { %v8106_v24 = vpop.permute.xlu0 %6793 }
 0x155   :  { %v6311_v29 = vpop.f32.mrb[0].mxu0 }
 0x156   :  { %vm1399_vm11 = vcmp.gt.f32.partialorder %v6311_v29, 0.0  ;;  %v1415_v27 = vmul.f32 0.2, %v6311_v29  ;;  %v1318_v21 = vpop.f32.mrb[1].mxu0 }
 0x157   :  { %vm1397_vm12 = vcmp.gt.f32.partialorder %v1318_v21, 0.0  ;;  %v1413_v12 = vmul.f32 0.2, %v1318_v21  ;;  %v6312_v40 = vpop.f32.mrb[2].mxu0 }
 0x158   :  { %v1431_v54 = vsel %vm1399_vm11, %v6311_v29, %v1415_v27  ;;  %vm1400_vm13 = vcmp.gt.f32.partialorder %v6312_v40, 0.0  ;;  %v1416_v48 = vmul.f32 0.2, %v6312_v40  ;;  %v1321_v49 = vpop.f32.mrb[3].mxu0 }
 0x159   :  { %v6001_v39 = vpack.c.bf16 %v1431_v54, %v1431_v54  ;;  %v1429_v50 = vsel %vm1397_vm12, %v1318_v21, %v1413_v12  ;;  %vm1398_vm14 = vcmp.gt.f32.partialorder %v1321_v49, 0.0  ;;  %v1414_v45 = vmul.f32 0.2, %v1321_v49  ;;  %v1705_v21 = vld [vmem:[#allocation2 + $0xc] sm:$0x1] }
 0x15a   :  { %v5999_v25 = vpack.c.bf16 %v1429_v50, %v1429_v50  ;;  %v1432_v5 = vsel %vm1400_vm13, %v6312_v40, %v1416_v48  ;;  %v1720_v48 = vld [vmem:[#allocation2 + $0x20] sm:$0xf] }
 0x15b   :  { %v1552_v16 = vshrl.u32 %v6001_v39, 16  ;;  %v6002_v26 = vpack.c.bf16 %v1432_v5, %v1432_v5  ;;  %v1430_v31 = vsel %vm1398_vm14, %v1321_v49, %v1414_v45  ;;  %v1555_v42 = vshll.u32 %v6001_v39, 16 }
 0x15c   :  { %v1536_v7 = vshrl.u32 %v5999_v25, 16  ;;  %v6000_v19 = vpack.c.bf16 %v1430_v31, %v1430_v31  ;;  %v1539_v8 = vshll.u32 %v5999_v25, 16  ;;  %v1723_v31 = vld [vmem:[#allocation2 + $0x24] sm:$0x1] }
 0x15d   :  { %v1554_v29 = vrot.slane %v1552_v16, 7  ;;  %v1560_v12 = vshrl.u32 %v6002_v26, 16  ;;  %v1563_v40 = vshll.u32 %v6002_v26, 16  ;;  %v6315_v33 = vpop.f32.mrb[4].mxu0 }
 0x15e   :  { %v1538_v54 = vrot.slane %v1536_v7, 7  ;;  %v1544_v49 = vshrl.u32 %v6000_v19, 16  ;;  %v1547_v39 = vshll.u32 %v6000_v19, 16  ;;  %vm1403_vm1 = vcmp.gt.f32.partialorder %v6315_v33, 0.0  ;;  %v1334_v50 = vpop.f32.mrb[5].mxu0 }
 0x15f   :  { %v1557_v45 = vor.u32 %v1555_v42, %v1554_v29  ;;  %v1558_v5 = vrot.slane %v1554_v29, 4  ;;  %v1562_v25 = vrot.slane %v1560_v12, 7  ;;  %v1419_v46 = vmul.f32 0.2, %v6315_v33  ;;  %v6316_v4 = vpop.f32.mrb[6].mxu0 }
 0x160   :  { %v1541_v16 = vor.u32 %v1539_v8, %v1538_v54  ;;  %v1542_v26 = vrot.slane %v1538_v54, 4  ;;  %v1546_v53 = vrot.slane %v1544_v49, 7  ;;  %vm1401_vm3 = vcmp.gt.f32.partialorder %v1334_v50, 0.0  ;;  %v1337_v6 = vpop.f32.mrb[7].mxu0  ;;  %v1711_v42 = vld [vmem:[#allocation2 + $0x14] sm:$0x1] }
 0x161   :  { %v1715_v2 = vsel %vm8120_vm15, %v1557_v45, %v1714_v3  ;;  %v1718_v7 = vsel %vm8126_vm0, %v1558_v5, %v1717_v9  ;;  %v1565_v19 = vor.u32 %v1563_v40, %v1562_v25  ;;  %v1566_v11 = vrot.slane %v1562_v25, 4 }
 0x162   :  { %1716 = vst [vmem:[#allocation2 + $0x18] sm:$0xf] %v1715_v2  ;;  %1719 = vst [vmem:[#allocation2 + $0x1c] sm:$0x1] %v1718_v7  ;;  %v1700_v29 = vsel %vm8120_vm15, %v1541_v16, %v1699_v18  ;;  %v1706_v8 = vsel %vm8126_vm0, %v1542_v26, %v1705_v21  ;;  %v1549_v12 = vor.u32 %v1547_v39, %v1546_v53  ;;  %v1550_v54 = vrot.slane %v1546_v53, 4 }
 0x163   :  { %1701 = vst [vmem:[#allocation2 + $0x8] sm:$0xf] %v1700_v29  ;;  %1707 = vst [vmem:[#allocation2 + $0xc] sm:$0x1] %v1706_v8  ;;  %v1721_v3 = vsel %vm8120_vm15, %v1565_v19, %v1720_v48  ;;  %v1724_v9 = vsel %vm8126_vm0, %v1566_v11, %v1723_v31  ;;  %v1435_v40 = vsel %vm1403_vm1, %v6315_v33, %v1419_v46  ;;  %v1417_v2 = vmul.f32 0.2, %v1334_v50 }
 0x164   :  { %1722 = vst [vmem:[#allocation2 + $0x20] sm:$0xf] %v1721_v3  ;;  %1725 = vst [vmem:[#allocation2 + $0x24] sm:$0x1] %v1724_v9  ;;  %v1709_v18 = vsel %vm8120_vm15, %v1549_v12, %v1708_v37  ;;  %v1712_v21 = vsel %vm8126_vm0, %v1550_v54, %v1711_v42  ;;  %v6005_v53 = vpack.c.bf16 %v1435_v40, %v1435_v40  ;;  %vm1404_vm4 = vcmp.gt.f32.partialorder %v6316_v4, 0.0 }
 0x165   :  { %1710 = vst [vmem:[#allocation2 + $0x10] sm:$0xf] %v1709_v18  ;;  %1713 = vst [vmem:[#allocation2 + $0x14] sm:$0x1] %v1712_v21  ;;  %v1433_v48 = vsel %vm1401_vm3, %v1334_v50, %v1417_v2  ;;  %v1420_v49 = vmul.f32 0.2, %v6316_v4 }
 0x166   :  { %vm1402_vm5 = vcmp.gt.f32.partialorder %v1337_v6, 0.0  ;;  %v1418_v11 = vmul.f32 0.2, %v1337_v6  ;;  %v6319_v39 = vpop.f32.mrb[8].mxu0  ;;  %v1584_v33 = vshrl.u32 %v6005_v53, 16  ;;  %v1587_v45 = vshll.u32 %v6005_v53, 16 }
 0x167   :  { %v6003_v5 = vpack.c.bf16 %v1433_v48, %v1433_v48  ;;  %vm1407_vm6 = vcmp.gt.f32.partialorder %v6319_v39, 0.0  ;;  %v1350_v25 = vpop.f32.mrb[9].mxu0  ;;  %v1436_v46 = vsel %vm1404_vm4, %v6316_v4, %v1420_v49  ;;  %v1423_v16 = vmul.f32 0.2, %v6319_v39  ;;  %v1738_v7 = vld [vmem:[#allocation2 + $0x38] sm:$0xf] }
 0x168   :  { %v1434_v37 = vsel %vm1402_vm5, %v1337_v6, %v1418_v11  ;;  %vm1405_vm7 = vcmp.gt.f32.partialorder %v1350_v25, 0.0  ;;  %v6320_v26 = vpop.f32.mrb[10].mxu0  ;;  %v1586_v31 = vrot.slane %v1584_v33, 7  ;;  %v6006_v29 = vpack.c.bf16 %v1436_v46, %v1436_v46  ;;  %v1741_v8 = vld [vmem:[#allocation2 + $0x3c] sm:$0x1] }
 0x169   :  { %v1568_v19 = vshrl.u32 %v6003_v5, 16  ;;  %v1571_v42 = vshll.u32 %v6003_v5, 16  ;;  %v8148_v50 = vpop.f32.mrb[11].mxu0  ;;  %v6004_v12 = vpack.c.bf16 %v1434_v37, %v1434_v37  ;;  %v1439_v54 = vsel %vm1407_vm6, %v6319_v39, %v1423_v16  ;;  %v1726_v4 = vld [vmem:[#allocation2 + $0x28] sm:$0xf] }
 0x16a   :  { %v1421_v3 = vmul.f32 0.2, %v1350_v25  ;;  %vm1408_vm9 = vcmp.gt.f32.partialorder %v6320_v26, 0.0  ;;  %v1589_v9 = vor.u32 %v1587_v45, %v1586_v31  ;;  %v1590_v40 = vrot.slane %v1586_v31, 4  ;;  %v1729_v18 = vld [vmem:[#allocation2 + $0x2c] sm:$0x1] }
 0x16b   :  { %v1570_v2 = vrot.slane %v1568_v19, 7  ;;  %v1592_v6 = vshrl.u32 %v6006_v29, 16  ;;  %v1595_v21 = vshll.u32 %v6006_v29, 16  ;;  %v1576_v53 = vshrl.u32 %v6004_v12, 16  ;;  %v1744_v46 = vld [vmem:[#allocation2 + $0x40] sm:$0xf] }
 0x16c   :  { %v1579_v48 = vshll.u32 %v6004_v12, 16  ;;  %v6009_v49 = vpack.c.bf16 %v1439_v54, %v1439_v54  ;;  %v1739_v11 = vsel %vm8120_vm15, %v1589_v9, %v1738_v7  ;;  %v1742_v33 = vsel %vm8126_vm0, %v1590_v40, %v1741_v8  ;;  %v1747_v37 = vld [vmem:[#allocation2 + $0x44] sm:$0x1]  ;;  %v1732_v45 = vld [vmem:[#allocation2 + $0x30] sm:$0xf] }
 0x16d   :  { %v1573_v5 = vor.u32 %v1571_v42, %v1570_v2  ;;  %v1574_v39 = vrot.slane %v1570_v2, 4  ;;  %1740 = vst [vmem:[#allocation2 + $0x38] sm:$0xf] %v1739_v11  ;;  %1743 = vst [vmem:[#allocation2 + $0x3c] sm:$0x1] %v1742_v33  ;;  %v1594_v16 = vrot.slane %v1592_v6, 7  ;;  %v1437_v42 = vsel %vm1405_vm7, %v1350_v25, %v1421_v3 }
 0x16e   :  { %v1578_v31 = vrot.slane %v1576_v53, 7  ;;  %v1616_v19 = vshrl.u32 %v6009_v49, 16  ;;  %v1619_v29 = vshll.u32 %v6009_v49, 16  ;;  %v6323_v10 = vpop.f32.mrb[12].mxu0  ;;  %v1735_v54 = vld [vmem:[#allocation2 + $0x34] sm:$0x1] }
 0x16f   :  { %v1727_v12 = vsel %vm8120_vm15, %v1573_v5, %v1726_v4  ;;  %v1730_v7 = vsel %vm8126_vm0, %v1574_v39, %v1729_v18  ;;  %v1424_v8 = vmul.f32 0.2, %v6320_v26  ;;  %v8159_v9 = vpop.f32.mrb[13].mxu0  ;;  %v1597_v40 = vor.u32 %v1595_v21, %v1594_v16  ;;  %v1762_v5 = vld [vmem:[#allocation2 + $0x68] sm:$0xf] }
 0x170   :  { %1728 = vst [vmem:[#allocation2 + $0x28] sm:$0xf] %v1727_v12  ;;  %1731 = vst [vmem:[#allocation2 + $0x2c] sm:$0x1] %v1730_v7  ;;  %v1598_v2 = vrot.slane %v1594_v16, 4  ;;  %v1581_v6 = vor.u32 %v1579_v48, %v1578_v31  ;;  %v1582_v53 = vrot.slane %v1578_v31, 4  ;;  %v6007_v4 = vpack.c.bf16 %v1437_v42, %v1437_v42 }
 0x171   :  { %v8161_v49 = vpop.f32.mrb[14].mxu0  ;;  %v1618_v11 = vrot.slane %v1616_v19, 7  ;;  %v1440_v33 = vsel %vm1408_vm9, %v6320_v26, %v1424_v8  ;;  %vm1406_vm11 = vcmp.gt.f32.partialorder %v8148_v50, 0.0  ;;  %v1745_v25 = vsel %vm8120_vm15, %v1597_v40, %v1744_v46  ;;  %v1765_v39 = vld [vmem:[#allocation2 + $0x6c] sm:$0x1] }
 0x172   :  { %v8165_v18 = vpop.f32.mrb[15].mxu0  ;;  %v1748_v3 = vsel %vm8126_vm0, %v1598_v2, %v1747_v37  ;;  %v1733_v21 = vsel %vm8120_vm15, %v1581_v6, %v1732_v45  ;;  %v1736_v48 = vsel %vm8126_vm0, %v1582_v53, %v1735_v54  ;;  %v1799_v16 = vld [vmem:[#allocation2 + $0x8] sm:$0xf]  ;;  %1746 = vst [vmem:[#allocation2 + $0x40] sm:$0xf] %v1745_v25  ;;  %v1600_v19 = vshrl.u32 %v6007_v4, 16 }
 0x173   :  { %1749 = vst [vmem:[#allocation2 + $0x44] sm:$0x1] %v1748_v3  ;;  %1734 = vst [vmem:[#allocation2 + $0x30] sm:$0xf] %v1733_v21  ;;  %v1621_v26 = vor.u32 %v1619_v29, %v1618_v11  ;;  %v1622_v31 = vrot.slane %v1618_v11, 4  ;;  %v1603_v46 = vshll.u32 %v6007_v4, 16  ;;  %v6010_v12 = vpack.c.bf16 %v1440_v33, %v1440_v33 }
 0x174   :  { %1737 = vst [vmem:[#allocation2 + $0x34] sm:$0x1] %v1736_v48  ;;  %v1422_v37 = vmul.f32 0.2, %v8148_v50  ;;  %vm1411_vm12 = vcmp.gt.f32.partialorder %v6323_v10, 0.0  ;;  %v1602_v42 = vrot.slane %v1600_v19, 7 }
 0x175   :  { %v1427_v7 = vmul.f32 0.2, %v6323_v10  ;;  %v1763_v45 = vsel %vm8120_vm15, %v1621_v26, %v1762_v5  ;;  %v1766_v54 = vsel %vm8126_vm0, %v1622_v31, %v1765_v39  ;;  %v1853_v8 = vshrl.u32 %v1799_v16, 16  ;;  %v1750_v40 = vld [vmem:[#allocation2 + $0x58] sm:$0xf] }
 0x176   :  { %1764 = vst [vmem:[#allocation2 + $0x68] sm:$0xf] %v1763_v45  ;;  %1767 = vst [vmem:[#allocation2 + $0x6c] sm:$0x1] %v1766_v54  ;;  %v1753_v29 = vld [vmem:[#allocation2 + $0x5c] sm:$0x1]  ;;  %v1438_v53 = vsel %vm1406_vm11, %v8148_v50, %v1422_v37  ;;  %v1605_v4 = vor.u32 %v1603_v46, %v1602_v42  ;;  %v5692_v39 = vcombine.low %v8040_v38, %v1799_v16 }
 0x177   :  { %v1624_v2 = vshrl.u32 %v6010_v12, 16  ;;  %v1627_v6 = vshll.u32 %v6010_v12, 16  ;;  %v1443_v11 = vsel %vm1411_vm12, %v6323_v10, %v1427_v7  ;;  %v1606_v33 = vrot.slane %v1602_v42, 4  ;;  %v1768_v19 = vld [vmem:[#allocation2 + $0x70] sm:$0xf] }
 0x178   :  { %v6008_v25 = vpack.c.bf16 %v1438_v53, %v1438_v53  ;;  %v6013_v3 = vpack.c.bf16 %v1443_v11, %v1443_v11  ;;  %v1855_v48 = vrot.slane %v1853_v8, 4  ;;  %v1856_v5 = vshll.u32 %v1799_v16, 16  ;;  %v1771_v12 = vld [vmem:[#allocation2 + $0x74] sm:$0x1]  ;;  %v1756_v37 = vld [vmem:[#allocation2 + $0x60] sm:$0xf]  ;;  %6357 = vmatprep.mubr.msk.bf16.mxu1 %vm2119_vm10, %v5692_v39 }
 0x179   :  { %v1626_v21 = vrot.slane %v1624_v2, 7  ;;  %v1751_v26 = vsel %vm8120_vm15, %v1605_v4, %v1750_v40  ;;  %v1754_v31 = vsel %vm8126_vm0, %v1606_v33, %v1753_v29  ;;  %vm1409_vm13 = vcmp.gt.f32.partialorder %v8159_v9, 0.0  ;;  %v1759_v29 = vld [vmem:[#allocation2 + $0x64] sm:$0x1]  ;;  %v1786_v4 = vld [vmem:[#allocation2 + $0x88] sm:$0xf] }
 0x17a   :  { %v1608_v45 = vshrl.u32 %v6008_v25, 16  ;;  %v1611_v50 = vshll.u32 %v6008_v25, 16  ;;  %1752 = vst [vmem:[#allocation2 + $0x58] sm:$0xf] %v1751_v26  ;;  %1755 = vst [vmem:[#allocation2 + $0x5c] sm:$0x1] %v1754_v31 }
 0x17b   :  { %v1629_v10 = vor.u32 %v1627_v6, %v1626_v21  ;;  %v1630_v46 = vrot.slane %v1626_v21, 4  ;;  %v1648_v7 = vshrl.u32 %v6013_v3, 16  ;;  %v1651_v54 = vshll.u32 %v6013_v3, 16  ;;  %v1800_v6 = vld [vmem:[#allocation2 + $0x10] sm:$0xf] }
 0x17c   :  { %v1610_v38 = vrot.slane %v1608_v45, 7  ;;  %v1858_v16 = vrot.slane %v1856_v5, 5  ;;  %v1425_v42 = vmul.f32 0.2, %v8159_v9  ;;  %vm1412_vm14 = vcmp.gt.f32.partialorder %v8161_v49, 0.0 }
 0x17d   :  { %v1769_v8 = vsel %vm8120_vm15, %v1629_v10, %v1768_v19  ;;  %v1772_v40 = vsel %vm8126_vm0, %v1630_v46, %v1771_v12  ;;  %v1650_v2 = vrot.slane %v1648_v7, 7  ;;  %v1789_v33 = vld [vmem:[#allocation2 + $0x8c] sm:$0x1]  ;;  %v1428_v26 = vmul.f32 0.2, %v8161_v49 }
 0x17e   :  { %1770 = vst [vmem:[#allocation2 + $0x70] sm:$0xf] %v1769_v8  ;;  %1773 = vst [vmem:[#allocation2 + $0x74] sm:$0x1] %v1772_v40  ;;  %v1613_v53 = vor.u32 %v1611_v50, %v1610_v38  ;;  %v1614_v11 = vrot.slane %v1610_v38, 4  ;;  %v1859_v25 = vor.u32 %v1858_v16, %v1855_v48  ;;  %v1441_v3 = vsel %vm1409_vm13, %v8159_v9, %v1425_v42 }
 0x17f   :  { %v1653_v21 = vor.u32 %v1651_v54, %v1650_v2  ;;  %v1654_v5 = vrot.slane %v1650_v2, 4  ;;  %v6011_v39 = vpack.c.bf16 %v1441_v3, %v1441_v3  ;;  %v1801_v31 = vld [vmem:[#allocation2 + $0x18] sm:$0xf]  ;;  %v1867_v50 = vshrl.u32 %v1800_v6, 16  ;;  %v1809_v44 = vld [vmem:[#allocation2 + $0x68] sm:$0xf] }
 0x180   :  { %v1757_v19 = vsel %vm8120_vm15, %v1613_v53, %v1756_v37  ;;  %v1760_v12 = vsel %vm8126_vm0, %v1614_v11, %v1759_v29  ;;  %v8202_v45 = vrot.slane %v1859_v25, 4  ;;  %v1774_v7 = vld [vmem:[#allocation2 + $0x78] sm:$0xf]  ;;  %v1777_v37 = vld [vmem:[#allocation2 + $0x7c] sm:$0x1]  ;;  %v1444_v54 = vsel %vm1412_vm14, %v8161_v49, %v1428_v26  ;;  %v6933_v11 = vld [vmem:[%s9015_s2 + $0x48] sm:$0xff]  }
 0x181   :  { %1758 = vst [vmem:[#allocation2 + $0x60] sm:$0xf] %v1757_v19  ;;  %1761 = vst [vmem:[#allocation2 + $0x64] sm:$0x1] %v1760_v12  ;;  %v1787_v9 = vsel %vm8120_vm15, %v1653_v21, %v1786_v4  ;;  %v1790_v48 = vsel %vm8126_vm0, %v1654_v5, %v1789_v33  ;;  %v1632_v10 = vshrl.u32 %v6011_v39, 16  ;;  %v1635_v46 = vshll.u32 %v6011_v39, 16 }
 0x182   :  { %1788 = vst [vmem:[#allocation2 + $0x88] sm:$0xf] %v1787_v9  ;;  %1791 = vst [vmem:[#allocation2 + $0x8c] sm:$0x1] %v1790_v48  ;;  %v1869_v38 = vrot.slane %v1867_v50, 4  ;;  %v1870_v16 = vshll.u32 %v1800_v6, 16  ;;  %v6014_v40 = vpack.c.bf16 %v1444_v54, %v1444_v54  ;;  %v5693_v2 = vcombine.low %v1800_v6, %v1801_v31 }
 0x183   :  { %v1881_v42 = vshrl.u32 %v1801_v31, 16  ;;  %v1634_v8 = vrot.slane %v1632_v10, 7  ;;  %v1884_v29 = vshll.u32 %v1801_v31, 16  ;;  %v1802_v53 = vld [vmem:[#allocation2 + $0x20] sm:$0xf]  ;;  %vm1410_vm1 = vcmp.gt.f32.partialorder %v8165_v18, 0.0 }
 0x184   :  { %v1872_v4 = vrot.slane %v1870_v16, 5  ;;  %v1426_v25 = vmul.f32 0.2, %v8165_v18  ;;  %v1656_v21 = vshrl.u32 %v6014_v40, 16  ;;  %v1659_v5 = vshll.u32 %v6014_v40, 16  ;;  %6358 = vmatmul.mubr.msk.bf16.vlgmr.msra.gmra.mrb[0].mxu1 %vm2119_vm10, %v5693_v2  ;;  %v6936_v54 = vld [vmem:[%s9015_s2 + $0x50] sm:$0xff]  }
 0x185   :  { %v1883_v33 = vrot.slane %v1881_v42, 4  ;;  %v1637_v3 = vor.u32 %v1635_v46, %v1634_v8  ;;  %v1638_v49 = vrot.slane %v1634_v8, 4  ;;  %v1792_v39 = vld [vmem:[#allocation2 + $0x90] sm:$0xf]  ;;  %v1886_v6 = vrot.slane %v1884_v29, 5  ;;  %6374 = vmatpush3.bf16.msra.mxu1 %v8028_v30 }
 0x186   :  { %v1873_v26 = vor.u32 %v1872_v4, %v1869_v38  ;;  %v1442_v31 = vsel %vm1410_vm1, %v8165_v18, %v1426_v25  ;;  %v1895_v19 = vshrl.u32 %v1802_v53, 16  ;;  %v1658_v9 = vrot.slane %v1656_v21, 7  ;;  %v1795_v48 = vld [vmem:[#allocation2 + $0x94] sm:$0x1]  ;;  %v1803_v46 = vld [vmem:[#allocation2 + $0x28] sm:$0xf]  ;;  %6375 = vmatprep.subr.bf16.mxu1 %v6933_v11 }
 0x187   :  { %v1775_v12 = vsel %vm8120_vm15, %v1637_v3, %v1774_v7  ;;  %v1778_v50 = vsel %vm8126_vm0, %v1638_v49, %v1777_v37  ;;  %v6012_v10 = vpack.c.bf16 %v1442_v31, %v1442_v31  ;;  %v1887_v30 = vor.u32 %v1886_v6, %v1883_v33  ;;  %v8230_v16 = vld [vmem:[#allocation2 + $0xc] sm:$0x1]  ;;  %v1804_v29 = vld [vmem:[#allocation2 + $0x30] sm:$0xf]  ;;  %v1805_v49 = vld [vmem:[#allocation2 + $0x38] sm:$0xf] }
 0x188   :  { %1776 = vst [vmem:[#allocation2 + $0x78] sm:$0xf] %v1775_v12  ;;  %1779 = vst [vmem:[#allocation2 + $0x7c] sm:$0x1] %v1778_v50  ;;  %v8226_v18 = vrot.slane %v1873_v26, 4  ;;  %v8228_v38 = vrot.slane %v1895_v19, 4  ;;  %v1661_v37 = vor.u32 %v1659_v5, %v1658_v9  ;;  %v5694_v31 = vcombine.low %v1802_v53, %v1803_v46 }
 0x189   :  { %v1898_v7 = vshll.u32 %v1802_v53, 16  ;;  %v1662_v42 = vrot.slane %v1658_v9, 4  ;;  %v1640_v8 = vshrl.u32 %v6012_v10, 16  ;;  %v1643_v40 = vshll.u32 %v6012_v10, 16  ;;  %6376 = vmatpush3.bf16.msra.mxu1 %v6933_v11  ;;  %v1780_v5 = vld [vmem:[#allocation2 + $0x80] sm:$0xf] }
 0x18a   :  { %v8232_v2 = vrot.slane %v1887_v30, 4  ;;  %v1909_v25 = vshrl.u32 %v1803_v46, 16  ;;  %v1912_v3 = vshll.u32 %v1803_v46, 16  ;;  %v1793_v33 = vsel %vm8120_vm15, %v1661_v37, %v1792_v39  ;;  %v1783_v6 = vld [vmem:[#allocation2 + $0x84] sm:$0x1]  ;;  %6377 = vmatprep.subr.bf16.mxu1 %v6936_v54  ;;  %v6939_v19 = vld [vmem:[%s9015_s2 + $0x58] sm:$0xff]   ;;  %6361 = vmatprep.mubr.msk.bf16.mxu1 %vm2119_vm10, %v5694_v31 }
 0x18b   :  { %v8234_v4 = vrot.slane %v1898_v7, 5  ;;  %v1796_v21 = vsel %vm8126_vm0, %v1662_v42, %v1795_v48  ;;  %v1642_v26 = vrot.slane %v1640_v8, 7  ;;  %1794 = vst [vmem:[#allocation2 + $0x90] sm:$0xf] %v1793_v33  ;;  %v1862_v11 = vshll.u32 %v8230_v16, 16 }
 0x18c   :  { %1797 = vst [vmem:[#allocation2 + $0x94] sm:$0x1] %v1796_v21  ;;  %v1911_v12 = vrot.slane %v1909_v25, 4  ;;  %v1914_v50 = vrot.slane %v1912_v3, 5  ;;  %v1923_v9 = vshrl.u32 %v1804_v29, 16  ;;  %v1926_v30 = vshll.u32 %v1804_v29, 16 }
 0x18d   :  { %v8244_v39 = vld [vmem:[#allocation2 + $0x14] sm:$0x1]  ;;  %v1645_v10 = vor.u32 %v1643_v40, %v1642_v26  ;;  %v1646_v48 = vrot.slane %v1642_v26, 4  ;;  %v1937_v53 = vshrl.u32 %v1805_v49, 16  ;;  %v8247_v46 = vld [vmem:[#allocation2 + $0x1c] sm:$0x1]  ;;  %v5695_v8 = vcombine.low %v1804_v29, %v1805_v49  ;;  %6378 = vmatpush3.bf16.msra.mxu1 %v6936_v54 }
 0x18e   :  { %v1864_v7 = vrot.slane %v1862_v11, 5  ;;  %v8249_v37 = vrot.slane %v1923_v9, 4  ;;  %v1940_v42 = vshll.u32 %v1805_v49, 16  ;;  %v1807_v25 = vld [vmem:[#allocation2 + $0x58] sm:$0xf]  ;;  %v1928_v33 = vrot.slane %v1926_v30, 5  ;;  %6379 = vmatprep.subr.bf16.mxu1 %v6939_v19 }
 0x18f   :  { %v1781_v3 = vsel %vm8120_vm15, %v1645_v10, %v1780_v5  ;;  %v1784_v40 = vsel %vm8126_vm0, %v1646_v48, %v1783_v6  ;;  %v8255_v21 = vrot.slane %v1937_v53, 4  ;;  %v8257_v26 = vld [vmem:[#allocation2 + $0x24] sm:$0x1]  ;;  %6362 = vmatmul.mubr.msk.bf16.gmra.mrb[4].mxu1 %vm2119_vm10, %v5695_v8  ;;  %v1876_v27 = vshll.u32 %v8244_v39, 16  ;;  %v8267_v54 = vld [vmem:[#allocation2 + $0x2c] sm:$0x1] }
 0x190   :  { %1782 = vst [vmem:[#allocation2 + $0x80] sm:$0xf] %v1781_v3  ;;  %1785 = vst [vmem:[#allocation2 + $0x84] sm:$0x1] %v1784_v40  ;;  %v1865_v29 = vsel %vm7172_vm2, %v8202_v45, %v1864_v7  ;;  %v8262_v49 = vrot.slane %v1940_v42, 5  ;;  %v1890_v34 = vshll.u32 %v8247_v46, 16  ;;  %v5696_v11 = vcombine.low %v8044_v60, %v1807_v25 }
 0x191   :  { %v8272_v5 = vld [vmem:[%s9015_s2 + $0x60] sm:$0xff]   ;;  %v5672_v45 = vcombine.low %v1851_v58, %v1865_v29  ;;  %v1965_v6 = vshrl.u32 %v1807_v25, 16  ;;  %v1968_v31 = vshll.u32 %v1807_v25, 16  ;;  %v1878_v9 = vrot.slane %v1876_v27, 5  ;;  %6380 = vmatpush3.bf16.msra.mxu1 %v6939_v19  ;;  %v8296_v8 = vld [vmem:[#allocation2 + $0x3c] sm:$0x1] }
 0x192   :  { %v1892_v10 = vrot.slane %v1890_v34, 5  ;;  %v1901_v48 = vor.u32 %v8234_v4, %v8228_v38  ;;  %v1904_v30 = vshll.u32 %v8257_v26, 16  ;;  %v1808_v53 = vld [vmem:[#allocation2 + $0x60] sm:$0xf]  ;;  %6365 = vmatprep.mubr.msk.bf16.mxu1 %vm2119_vm10, %v5696_v11  ;;  %v1915_v62 = vor.u32 %v1914_v50, %v1911_v12  ;;  %6397 = vmatprep.subr.bf16.mxu1 %v8272_v5  ;;  %v8299_v40 = vld [vmem:[#allocation2 + $0x34] sm:$0x1] }
 0x193   :  { %6333 = vmatprep.mubr.msk.bf16.mxu0 %vm2119_vm10, %v5672_v45  ;;  %v8284_v7 = vrot.slane %v1965_v6, 4  ;;  %v8286_v42 = vrot.slane %v1968_v31, 5  ;;  %v1918_v60 = vshll.u32 %v8267_v54, 16  ;;  %v1879_v58 = vsel %vm7172_vm2, %v8226_v18, %v1878_v9  ;;  %v6941_v18 = vld [vmem:[%s9015_s2 + $0x108] sm:$0xff]   ;;  %v1810_v9 = vld [vmem:[#allocation2 + $0x70] sm:$0xf] }
 0x194   :  { %v1893_v38 = vsel %vm7172_vm2, %v8232_v2, %v1892_v10  ;;  %v1902_v4 = vrot.slane %v1901_v48, 4  ;;  %v1906_v19 = vrot.slane %v1904_v30, 5  ;;  %v1916_v3 = vrot.slane %v1915_v62, 4  ;;  %v1811_v10 = vld [vmem:[#allocation2 + $0x78] sm:$0xf] }
 0x195   :  { %v5673_v25 = vcombine.low %v1879_v58, %v1893_v38  ;;  %v1920_v12 = vrot.slane %v1918_v60, 5  ;;  %v1979_v50 = vshrl.u32 %v1808_v53, 16  ;;  %v1982_v2 = vshll.u32 %v1808_v53, 16  ;;  %v8316_v58 = vld [vmem:[#allocation2 + $0x5c] sm:$0x1] }
 0x196   :  { %v1907_v29 = vsel %vm7172_vm2, %v1902_v4, %v1906_v19  ;;  %v1993_v27 = vshrl.u32 %v1809_v44, 16  ;;  %v1996_v34 = vshll.u32 %v1809_v44, 16  ;;  %v5697_v31 = vcombine.low %v1808_v53, %v1809_v44  ;;  %v6943_v53 = vld [vmem:[%s9015_s2 + $0x110] sm:$0xff]  }
 0x197   :  { %6334 = vmatmul.mubr.msk.bf16.vlgmr.msra.gmra.mrb[16].mxu0 %vm2119_vm10, %v5673_v25  ;;  %v1921_v45 = vsel %vm7172_vm2, %v1916_v3, %v1920_v12  ;;  %v8309_v6 = vrot.slane %v1979_v50, 4  ;;  %v1929_v11 = vor.u32 %v1928_v33, %v8249_v37  ;;  %v1984_v30 = vrot.slane %v1982_v2, 5  ;;  %v1813_v3 = vld [vmem:[#allocation2 + $0x88] sm:$0xf]  ;;  %v2428_v47 = vld [vmem:[#allocation2 + $0x10] sm:$0xe] }
 0x198   :  { %v5674_v48 = vcombine.low %v1907_v29, %v1921_v45  ;;  %v8312_v62 = vrot.slane %v1993_v27, 4  ;;  %v8314_v60 = vrot.slane %v1996_v34, 5  ;;  %6518 = vmatpush3.bf16.msra.mxu0 %v8037_v35  ;;  %6366 = vmatmul.mubr.msk.bf16.gmra.mrb[8].mxu1 %vm2119_vm10, %v5697_v31  ;;  %v1932_v4 = vshll.u32 %v8299_v40, 16  ;;  %v1812_v27 = vld [vmem:[#allocation2 + $0x80] sm:$0xf] }
 0x199   :  { %v1930_v38 = vrot.slane %v1929_v11, 4  ;;  %v1943_v37 = vor.u32 %v8262_v49, %v8255_v21  ;;  %v1946_v33 = vshll.u32 %v8296_v8, 16  ;;  %6519 = vmatprep.subr.bf16.mxu0 %v6941_v18  ;;  %v2007_v44 = vshrl.u32 %v1810_v9, 16 }
 0x19a   :  { %6337 = vmatprep.mubr.msk.bf16.mxu0 %vm2119_vm10, %v5674_v48  ;;  %v2010_v19 = vshll.u32 %v1810_v9, 16  ;;  %v2021_v35 = vshrl.u32 %v1811_v10, 16  ;;  %v2024_v25 = vshll.u32 %v1811_v10, 16  ;;  %v1934_v12 = vrot.slane %v1932_v4, 5 }
 0x19b   :  { %v1944_v50 = vrot.slane %v1943_v37, 4  ;;  %v1948_v29 = vrot.slane %v1946_v33, 5  ;;  %v5698_v2 = vcombine.low %v1810_v9, %v1811_v10  ;;  %v2009_v21 = vrot.slane %v2007_v44, 4  ;;  %v8336_v9 = vld [vmem:[#allocation2 + $0x64] sm:$0x1] }
 0x19c   :  { %v2012_v49 = vrot.slane %v2010_v19, 5  ;;  %v2023_v34 = vrot.slane %v2021_v35, 4  ;;  %v2026_v45 = vrot.slane %v2024_v25, 5  ;;  %6520 = vmatpush3.bf16.msra.mxu0 %v6941_v18  ;;  %v1935_v31 = vsel %vm7172_vm2, %v1930_v38, %v1934_v12  ;;  %v8338_v10 = vld [vmem:[#allocation2 + $0x6c] sm:$0x1]  ;;  %v6944_v19 = vld [vmem:[%s9015_s2 + $0x118] sm:$0xff]  }
 0x19d   :  { %v1949_v11 = vsel %vm7172_vm2, %v1944_v50, %v1948_v29  ;;  %6369 = vmatprep.mubr.msk.bf16.mxu1 %vm2119_vm10, %v5698_v2  ;;  %v1971_v48 = vor.u32 %v8286_v42, %v8284_v7  ;;  %v1974_v4 = vshll.u32 %v8316_v58, 16  ;;  %v2427_v37 = vld [vmem:[#allocation2 + $0x8] sm:$0xe]  ;;  %6521 = vmatprep.subr.bf16.mxu0 %v6943_v53  ;;  %v2035_v33 = vshrl.u32 %v1812_v27, 16  ;;  %v8343_v42 = vld [vmem:[#allocation2 + $0x74] sm:$0x1] }
 0x19e   :  { %v5675_v18 = vcombine.low %v1935_v31, %v1949_v11  ;;  %v2038_v44 = vshll.u32 %v1812_v27, 16  ;;  %v2049_v38 = vshrl.u32 %v1813_v3, 16  ;;  %v2052_v12 = vshll.u32 %v1813_v3, 16  ;;  %v8347_v11 = vld [vmem:[#allocation2 + $0x7c] sm:$0x1] }
 0x19f   :  { %v1972_v35 = vrot.slane %v1971_v48, 4  ;;  %v1976_v25 = vrot.slane %v1974_v4, 5  ;;  %v5699_v7 = vcombine.low %v1812_v27, %v1813_v3  ;;  %v2037_v50 = vrot.slane %v2035_v33, 4 }
 0x1a0   :  { %6338 = vmatmul.mubr.msk.bf16.gmra.mrb[20].mxu0 %vm2119_vm10, %v5675_v18  ;;  %v2040_v29 = vrot.slane %v2038_v44, 5  ;;  %v2051_v2 = vrot.slane %v2049_v38, 4  ;;  %v1985_v31 = vor.u32 %v1984_v30, %v8309_v6  ;;  %v2054_v20 = vrot.slane %v2052_v12, 5  ;;  %v2429_v18 = vld [vmem:[#allocation2 + $0x18] sm:$0xe] }
 0x1a1   :  { %v1977_v1 = vsel %vm7172_vm2, %v1972_v35, %v1976_v25  ;;  %6370 = vmatmul.mubr.msk.bf16.gmra.mrb[12].mxu1 %vm2119_vm10, %v5699_v7  ;;  %v1988_v3 = vshll.u32 %v8336_v9, 16  ;;  %v1999_v27 = vor.u32 %v8314_v60, %v8312_v62  ;;  %6522 = vmatpush3.bf16.msra.mxu0 %v6943_v53  ;;  %v2002_v48 = vshll.u32 %v8338_v10, 16  ;;  %v8369_v25 = vld [vmem:[#allocation2 + $0x84] sm:$0x1]  ;;  %v2430_v12 = vld [vmem:[#allocation2 + $0x20] sm:$0xe] }
 0x1a2   :  { %v5676_v6 = vcombine.low %v1963_v51, %v1977_v1  ;;  %v1986_v30 = vrot.slane %v1985_v31, 4  ;;  %v5713_v4 = vrot.slane %v2427_v37, 9  ;;  %6523 = vmatprep.subr.bf16.mxu0 %v6944_v19  ;;  %v2483_v38 = vrot.slane %v8230_v16, 5 }
 0x1a3   :  { %v1990_v33 = vrot.slane %v1988_v3, 5  ;;  %v2000_v44 = vrot.slane %v1999_v27, 4  ;;  %v2013_v35 = vor.u32 %v2012_v49, %v2009_v21  ;;  %v2004_v62 = vrot.slane %v2002_v48, 5  ;;  %v3945_v48 = vld [vmem:[#allocation2 + $0x14] sm:$0x1] }
 0x1a4   :  { %6341 = vmatprep.mubr.msk.bf16.mxu0 %vm2119_vm10, %v5676_v6  ;;  %v2016_v60 = vshll.u32 %v8343_v42, 16  ;;  %v2027_v53 = vor.u32 %v2026_v45, %v2023_v34  ;;  %v2030_v55 = vshll.u32 %v8347_v11, 16  ;;  %v2484_v0 = vsel %vm8066_vm8, %v5713_v4, %v2483_v38  ;;  %v8374_v45 = vld [vmem:[#allocation2 + $0x8c] sm:$0x1]  ;;  %v2431_v6 = vld [vmem:[#allocation2 + $0x28] sm:$0xe] }
 0x1a5   :  { %v1991_v1 = vsel %vm7172_vm2, %v1986_v30, %v1990_v33  ;;  %v2014_v51 = vrot.slane %v2013_v35, 4  ;;  %v5714_v37 = vrot.slane %v2428_v47, 9  ;;  %6524 = vmatpush3.bf16.msra.mxu0 %v6944_v19  ;;  %v2005_v16 = vsel %vm7172_vm2, %v2000_v44, %v2004_v62  ;;  %v4394_v4 = vld [vmem:[#allocation2 + $0x10] sm:$0xe]  ;;  %v4395_v33 = vld [vmem:[#allocation2 + $0x18] sm:$0xe] }
 0x1a6   :  { %v5736_v21 = vcombine.low %v8080_v63, %v2484_v0  ;;  %v2018_v49 = vrot.slane %v2016_v60, 5  ;;  %v2028_v34 = vrot.slane %v2027_v53, 4  ;;  %v5677_v7 = vcombine.low %v1991_v1, %v2005_v16  ;;  %v3947_v35 = vld [vmem:[#allocation2 + $0x1c] sm:$0x1]  ;;  %v2432_v60 = vld [vmem:[#allocation2 + $0x30] sm:$0xe] }
 0x1a7   :  { %v2032_v31 = vrot.slane %v2030_v55, 5  ;;  %v2487_v3 = vrot.slane %v8244_v39, 5  ;;  %v5715_v27 = vrot.slane %v2429_v18, 9  ;;  %v2491_v19 = vrot.slane %v8247_v46, 5 }
 0x1a8   :  { %6381 = vmatprep.mubr.msk.bf16.mxu1 %vm2119_vm10, %v5736_v21  ;;  %v2019_v47 = vsel %vm7172_vm2, %v2014_v51, %v2018_v49  ;;  %v2041_v30 = vor.u32 %v2040_v29, %v2037_v50  ;;  %v2044_v63 = vshll.u32 %v8369_v25, 16  ;;  %6342 = vmatmul.mubr.msk.bf16.gmra.mrb[24].mxu0 %vm2119_vm10, %v5677_v7  ;;  %v2055_v44 = vor.u32 %v2054_v20, %v2051_v2  ;;  %v6945_v51 = vld [vmem:[%s9015_s2 + $0x68] sm:$0xff]   ;;  %v2433_v21 = vld [vmem:[#allocation2 + $0x38] sm:$0xe] }
 0x1a9   :  { %v2033_v39 = vsel %vm7172_vm2, %v2028_v34, %v2032_v31  ;;  %v2488_v18 = vsel %vm8066_vm8, %v5714_v37, %v2487_v3  ;;  %v2058_v38 = vshll.u32 %v8374_v45, 16  ;;  %v2492_v46 = vsel %vm8066_vm8, %v5715_v27, %v2491_v19  ;;  %v2435_v31 = vld [vmem:[#allocation2 + $0x58] sm:$0xe]  ;;  %v3949_v3 = vld [vmem:[#allocation2 + $0x24] sm:$0x1] }
 0x1aa   :  { %v5678_v62 = vcombine.low %v2019_v47, %v2033_v39  ;;  %v2042_v50 = vrot.slane %v2041_v30, 4  ;;  %v2046_v29 = vrot.slane %v2044_v63, 5  ;;  %v5737_v53 = vcombine.low %v2488_v18, %v2492_v46  ;;  %v4396_v19 = vld [vmem:[#allocation2 + $0x20] sm:$0xe]  ;;  %v6946_v30 = vld [vmem:[%s9015_s2 + $0x70] sm:$0xff]  }
 0x1ab   :  { %v2056_v55 = vrot.slane %v2055_v44, 4  ;;  %v2060_v1 = vrot.slane %v2058_v38, 5  ;;  %v5716_v0 = vrot.slane %v2430_v12, 9  ;;  %v2495_v2 = vrot.slane %v8257_v26, 5  ;;  %v4397_v39 = vld [vmem:[#allocation2 + $0x28] sm:$0xe] }
 0x1ac   :  { %6345 = vmatprep.mubr.msk.bf16.mxu0 %vm2119_vm10, %v5678_v62  ;;  %v2047_v20 = vsel %vm7172_vm2, %v2042_v50, %v2046_v29  ;;  %v5717_v37 = vrot.slane %v2431_v6, 9  ;;  %v2499_v16 = vrot.slane %v8267_v54, 5  ;;  %6382 = vmatmul.mubr.msk.bf16.vlgmr.msra.gmra.mrb[0].mxu1 %vm2119_vm10, %v5737_v53  ;;  %v5912_v34 = vrot.slane %v4394_v4, 9  ;;  %v3951_v6 = vld [vmem:[#allocation2 + $0x2c] sm:$0x1] }
 0x1ad   :  { %v2061_v49 = vsel %vm7172_vm2, %v2056_v55, %v2060_v1  ;;  %v4444_v12 = vrot.slane %v3945_v48, 5  ;;  %v5913_v7 = vrot.slane %v4395_v33, 9  ;;  %v2496_v47 = vsel %vm8066_vm8, %v5716_v0, %v2495_v2  ;;  %6398 = vmatpush3.bf16.msra.mxu1 %v8272_v5  ;;  %v3953_v18 = vld [vmem:[#allocation2 + $0x34] sm:$0x1]  ;;  %v4398_v62 = vld [vmem:[#allocation2 + $0x30] sm:$0xe]  ;;  %v8420_v55 = vpop.permute.xlu1 %6798 }
 0x1ae   :  { %v5679_v27 = vcombine.low %v2047_v20, %v2061_v49  ;;  %v2500_v26 = vsel %vm8066_vm8, %v5717_v37, %v2499_v16  ;;  %v4448_v54 = vrot.slane %v3947_v35, 5  ;;  %v5718_v4 = vrot.slane %v2432_v60, 9  ;;  %6399 = vmatprep.subr.bf16.mxu1 %v6945_v51  ;;  %v3955_v60 = vld [vmem:[#allocation2 + $0x3c] sm:$0x1]  ;;  %v4399_v53 = vld [vmem:[#allocation2 + $0x38] sm:$0xe] }
 0x1af   :  { %v5738_v63 = vcombine.low %v2496_v47, %v2500_v26  ;;  %v4445_v48 = vsel %vm8066_vm8, %v5912_v34, %v4444_v12  ;;  %v2503_v33 = vrot.slane %v8299_v40, 5  ;;  %v5719_v44 = vrot.slane %v2433_v21, 9  ;;  %v2436_v2 = vld [vmem:[#allocation2 + $0x60] sm:$0xe]  ;;  %v6947_v37 = vld [vmem:[%s9015_s2 + $0x78] sm:$0xff]  }
 0x1b0   :  { %v4449_v5 = vsel %vm8066_vm8, %v5913_v7, %v4448_v54  ;;  %v2507_v38 = vrot.slane %v8296_v8, 5  ;;  %v5721_v35 = vrot.slane %v2435_v31, 9  ;;  %6346 = vmatmul.mubr.msk.bf16.gmra.mrb[28].mxu0 %vm2119_vm10, %v5679_v27  ;;  %v2515_v40 = vrot.slane %v8316_v58, 5  ;;  %v2437_v34 = vld [vmem:[#allocation2 + $0x68] sm:$0xe] }
 0x1b1   :  { %6385 = vmatprep.mubr.msk.bf16.mxu1 %vm2119_vm10, %v5738_v63  ;;  %v5936_v46 = vcombine.low %v4445_v48, %v4449_v5  ;;  %v2504_v50 = vsel %vm8066_vm8, %v5718_v4, %v2503_v33  ;;  %v5914_v29 = vrot.slane %v4396_v19, 9  ;;  %6400 = vmatpush3.bf16.msra.mxu1 %v6945_v51  ;;  %v4452_v1 = vrot.slane %v3949_v3, 5  ;;  %v2438_v12 = vld [vmem:[#allocation2 + $0x70] sm:$0xe]  ;;  %v2439_v27 = vld [vmem:[#allocation2 + $0x78] sm:$0xe] }
 0x1b2   :  { %v2508_v8 = vsel %vm8066_vm8, %v5719_v44, %v2507_v38  ;;  %v5915_v0 = vrot.slane %v4397_v39, 9  ;;  %v4456_v20 = vrot.slane %v3951_v6, 5  ;;  %v2516_v16 = vsel %vm8066_vm8, %v5721_v35, %v2515_v40  ;;  %6401 = vmatprep.subr.bf16.mxu1 %v6946_v30  ;;  %v3957_v47 = vld [vmem:[#allocation2 + $0x44] sm:$0x1]  ;;  %v4400_v63 = vld [vmem:[#allocation2 + $0x40] sm:$0xe] }
 0x1b3   :  { %6525 = vmatprep.mubr.msk.bf16.mxu0 %vm2119_vm10, %v5936_v46  ;;  %v5739_v58 = vcombine.low %v2504_v50, %v2508_v8  ;;  %v5916_v21 = vrot.slane %v4398_v62, 9  ;;  %v4460_v49 = vrot.slane %v3953_v18, 5  ;;  %v5740_v51 = vcombine.low %v8084_v61, %v2516_v16  ;;  %v3961_v48 = vld [vmem:[#allocation2 + $0x64] sm:$0x1]  ;;  %v8438_v61 = vpop.permute.xlu0 %6803  ;;  %v3963_v5 = vld [vmem:[#allocation2 + $0x6c] sm:$0x1] }
 0x1b4   :  { %v4453_v7 = vsel %vm8066_vm8, %v5914_v29, %v4452_v1  ;;  %v4457_v31 = vsel %vm8066_vm8, %v5915_v0, %v4456_v20  ;;  %v5917_v3 = vrot.slane %v4399_v53, 9  ;;  %v4464_v6 = vrot.slane %v3955_v60, 5  ;;  %v4402_v44 = vld [vmem:[#allocation2 + $0x60] sm:$0xe]  ;;  %v4403_v50 = vld [vmem:[#allocation2 + $0x68] sm:$0xe] }
 0x1b5   :  { %6386 = vmatmul.mubr.msk.bf16.gmra.mrb[4].mxu1 %vm2119_vm10, %v5739_v58  ;;  %v5937_v26 = vcombine.low %v4453_v7, %v4457_v31  ;;  %v4461_v54 = vsel %vm8066_vm8, %v5916_v21, %v4460_v49  ;;  %v5722_v19 = vrot.slane %v2436_v2, 9  ;;  %v2519_v4 = vrot.slane %v8336_v9, 5  ;;  %v8450_v9 = vld [vmem:[%s9015_s2 + $0x80] sm:$0xff]   ;;  %v2441_v53 = vld [vmem:[#allocation2 + $0x88] sm:$0xe] }
 0x1b6   :  { %6389 = vmatprep.mubr.msk.bf16.mxu1 %vm2119_vm10, %v5740_v51  ;;  %v5723_v33 = vrot.slane %v2437_v34, 9  ;;  %v2523_v39 = vrot.slane %v8338_v10, 5  ;;  %v5724_v18 = vrot.slane %v2438_v12, 9  ;;  %6402 = vmatpush3.bf16.msra.mxu1 %v6946_v30  ;;  %v4465_v38 = vsel %vm8066_vm8, %v5917_v3, %v4464_v6  ;;  %v8452_v10 = vpop.permute.xlu1 %6808  ;;  %v2440_v60 = vld [vmem:[#allocation2 + $0x80] sm:$0xe] }
 0x1b7   :  { %v2527_v35 = vrot.slane %v8343_v42, 5  ;;  %v5725_v62 = vrot.slane %v2439_v27, 9  ;;  %v2531_v46 = vrot.slane %v8347_v11, 5  ;;  %6403 = vmatprep.subr.bf16.mxu1 %v6947_v37  ;;  %v5938_v30 = vcombine.low %v4461_v54, %v4465_v38  ;;  %v3965_v0 = vld [vmem:[#allocation2 + $0x74] sm:$0x1]  ;;  %v6814_v3 = vpop.permute.xlu0 %6813 }
 0x1b8   :  { %v2520_v40 = vsel %vm8066_vm8, %v5722_v19, %v2519_v4  ;;  %v2524_v29 = vsel %vm8066_vm8, %v5723_v33, %v2523_v39  ;;  %v5918_v42 = vrot.slane %v4400_v63, 9  ;;  %6526 = vmatmul.mubr.msk.bf16.vlgmr.msra.gmra.mrb[32].mxu0 %vm2119_vm10, %v5937_v26  ;;  %v4468_v1 = vrot.slane %v3957_v47, 5  ;;  %v3967_v20 = vld [vmem:[#allocation2 + $0x7c] sm:$0x1]  ;;  %v4404_v49 = vld [vmem:[#allocation2 + $0x70] sm:$0xe] }
 0x1b9   :  { %v5741_v11 = vcombine.low %v2520_v40, %v2524_v29  ;;  %v2532_v8 = vsel %vm8066_vm8, %v5725_v62, %v2531_v46  ;;  %6529 = vmatprep.mubr.msk.bf16.mxu0 %vm2119_vm10, %v5938_v30  ;;  %v2528_v2 = vsel %vm8066_vm8, %v5724_v18, %v2527_v35  ;;  %v5920_v58 = vrot.slane %v4402_v44, 9  ;;  %v4405_v31 = vld [vmem:[#allocation2 + $0x78] sm:$0xe]  ;;  %v2961_v29 = vld [vmem:[#allocation2 + $0x8] sm:$0xf] }
 0x1ba   :  { %v4476_v16 = vrot.slane %v3961_v48, 5  ;;  %v5921_v21 = vrot.slane %v4403_v50, 9  ;;  %6404 = vmatpush3.bf16.msra.mxu1 %v6947_v37  ;;  %v4469_v34 = vsel %vm8066_vm8, %v5918_v42, %v4468_v1  ;;  %v4480_v12 = vrot.slane %v3963_v5, 5  ;;  %v6819_v63 = vpop.permute.xlu1 %6818 }
 0x1bb   :  { %v5726_v51 = vrot.slane %v2440_v60, 9  ;;  %v2535_v7 = vrot.slane %v8369_v25, 5  ;;  %6421 = vmatprep.subr.bf16.mxu1 %v8450_v9  ;;  %v5742_v27 = vcombine.low %v2528_v2, %v2532_v8  ;;  %v5727_v26 = vrot.slane %v2441_v53, 9  ;;  %v8493_v62 = vpop.permute.xlu0 %6823 }
 0x1bc   :  { %v4477_v47 = vsel %vm8066_vm8, %v5920_v58, %v4476_v16  ;;  %v2539_v54 = vrot.slane %v8374_v45, 5  ;;  %v5939_v37 = vcombine.low %v4469_v34, %v8088_v57  ;;  %v4481_v6 = vsel %vm8066_vm8, %v5921_v21, %v4480_v12  ;;  %v8517_v16 = vld [vmem:[#allocation2 + $0xc] sm:$0x1] }
 0x1bd   :  { %6390 = vmatmul.mubr.msk.bf16.gmra.mrb[8].mxu1 %vm2119_vm10, %v5741_v11  ;;  %v2536_v25 = vsel %vm8066_vm8, %v5726_v51, %v2535_v7  ;;  %v7015_v19 = vadd.low.f32.bf16 %v8104_v41, %v8106_v24  ;;  %v5922_v48 = vrot.slane %v4404_v49, 9  ;;  %v4484_v4 = vrot.slane %v3965_v0, 5  ;;  %v2963_v0 = vld [vmem:[#allocation2 + $0x10] sm:$0xf]  ;;  %v6980_v51 = vld [vmem:[%s9016_s3] sm:$0xff]   ;;  %v6953_v7 = vld [vmem:[%s9015_s2 + $0x88] sm:$0xff]  }
 0x1be   :  { %6393 = vmatprep.mubr.msk.bf16.mxu1 %vm2119_vm10, %v5742_v27  ;;  %v5923_v33 = vrot.slane %v4405_v31, 9  ;;  %v4488_v45 = vrot.slane %v3967_v20, 5  ;;  %v5940_v39 = vcombine.low %v4477_v47, %v4481_v6  ;;  %v2540_v57 = vsel %vm8066_vm8, %v5727_v26, %v2539_v54  ;;  %v6981_v47 = vld [vmem:[%s9016_s3 + $0x8] sm:$0xff]   ;;  %v6949_v26 = vld [vmem:[#allocation2 + $0x18] ss:$8 sps:$4 sm:$0xff]   ;;  %6541 = vmatprep.subr.bf16.mxu0 %v6980_v51 }
 0x1bf   :  { %v7016_v18 = vadd.high.f32.bf16 %v8110_v13, %v8420_v55  ;;  %v5743_v5 = vcombine.low %v2536_v25, %v2540_v57  ;;  %v5245_v44 = vpack.c.bf16 %v8092_v36, %v8090_v23  ;;  %v7017_v38 = vadd.low.f32.bf16 %v8114_v22, %v8420_v55  ;;  %v6948_v22 = vld [vmem:[#allocation2 + $0x8] ss:$8 sps:$4 sm:$0xff]   ;;  %v6834_v2 = vpop.permute.xlu0 %6833  ;;  %6542 = vmatpush3.bf16.msra.mxu0 %v6980_v51 }
 0x1c0   :  { %6530 = vmatmul.mubr.msk.bf16.gmra.mrb[36].mxu0 %vm2119_vm10, %v5939_v37  ;;  %v4489_v41 = vsel %vm8066_vm8, %v5923_v33, %v4488_v45  ;;  %v5246_v35 = vpack.c.bf16 %v8096_v43, %v8094_v28  ;;  %v7018_v13 = vadd.low.f32.bf16 %v7015_v19, %v8438_v61  ;;  %v9044_v23 = vadd.high.f32.bf16 %v8100_v17, %v8106_v24  ;;  %v8506_v43 = vpop.permute.xlu1 %6828  ;;  %v6951_v54 = vld [vmem:[#allocation2 + $0x28] ss:$8 sps:$4 sm:$0xff]   ;;  %v2965_v45 = vld [vmem:[#allocation2 + $0x18] sm:$0xf] }
 0x1c1   :  { %6533 = vmatprep.mubr.msk.bf16.mxu0 %vm2119_vm10, %v5940_v39  ;;  %5272 = vrot.lane.b32.xlu0 %v5245_v44, %s7070_s9  ;;  %v4485_v46 = vsel %vm8066_vm8, %v5922_v48, %v4484_v4  ;;  %v7020_v28 = vadd.high.f32.bf16 %v7016_v18, %v8452_v10  ;;  %v7021_v40 = vadd.low.f32.bf16 %v7017_v38, %v8452_v10  ;;  %v9045_v24 = vunpack.c.h.bf16 %v7783_v52 }
 0x1c2   :  { %v7019_v36 = vadd.high.f32.bf16 %v9044_v23, %v8438_v61  ;;  %5274 = vrot.lane.b32.xlu1 %v5246_v35, %s7070_s9  ;;  %v5941_v55 = vcombine.low %v4485_v46, %v4489_v41  ;;  %v5233_v50 = vmul.f32 0.25, %v7018_v13  ;;  %v9046_v42 = vunpack.c.l.bf16 %v7783_v52  ;;  %6543 = vmatprep.subr.bf16.mxu0 %v6981_v47  ;;  %v8547_v35 = vld [vmem:[#allocation2 + $0x1c] sm:$0x1]  ;;  %v2967_v23 = vld [vmem:[#allocation2 + $0x20] sm:$0xf] }
 0x1c3   :  { %v5236_v17 = vmul.f32 0.25, %v7020_v28  ;;  %v7022_v61 = vadd.high.f32.bf16 %v9045_v24, %v6814_v3  ;;  %v5235_v53 = vmul.f32 0.25, %v7021_v40  ;;  %v9047_v11 = vunpack.c.h.bf16 %v7798_v14  ;;  %v6844_v41 = vpop.permute.xlu0 %6843  ;;  %6544 = vmatpush3.bf16.msra.mxu0 %v6981_v47  ;;  %v8553_v40 = vld [vmem:[#allocation2 + $0x24] sm:$0x1] }
 0x1c4   :  { %v5234_v30 = vmul.f32 0.25, %v7019_v36  ;;  %v7023_v60 = vadd.low.f32.bf16 %v9046_v42, %v6814_v3  ;;  %v2994_v20 = vshrl.u32 %v2961_v29, 16  ;;  %v2997_v10 = vshll.u32 %v2961_v29, 16  ;;  %v6839_v12 = vpop.permute.xlu1 %6838  ;;  %v8531_v3 = vld [vmem:[#allocation2 + $0x14] sm:$0x1]  ;;  %v6959_v29 = vld [vmem:[%s9015_s2 + $0x98] sm:$0xff]  }
 0x1c5   :  { %6394 = vmatmul.mubr.msk.bf16.gmra.mrb[12].mxu1 %vm2119_vm10, %v5743_v5  ;;  %v7024_v8 = vadd.high.f32.bf16 %v9047_v11, %v6819_v63  ;;  %v5248_v58 = vpack.c.bf16 %v5236_v17, %v5235_v53  ;;  %v9048_v21 = vunpack.c.l.bf16 %v7798_v14  ;;  %v7026_v31 = vadd.high.f32.bf16 %v7022_v61, %v8493_v62  ;;  %v6956_v5 = vld [vmem:[%s9015_s2 + $0x90] sm:$0xff]   ;;  %v6952_v36 = vld [vmem:[#allocation2 + $0x38] ss:$8 sps:$4 sm:$0xff]  }
 0x1c6   :  { %6405 = vmatprep.mubr.msk.bf16.mxu1 %vm2119_vm10, %v6948_v22  ;;  %v5247_v1 = vpack.c.bf16 %v5234_v30, %v5233_v50  ;;  %v2996_v49 = vrot.slane %v2994_v20, 4  ;;  %v2999_v34 = vrot.slane %v2997_v10, 5  ;;  %v3008_v14 = vshrl.u32 %v2963_v0, 16  ;;  %v2971_v42 = vld [vmem:[#allocation2 + $0x30] sm:$0xf] }
 0x1c7   :  { %v7025_v52 = vadd.low.f32.bf16 %v9048_v21, %v6819_v63  ;;  %5278 = vrot.lane.b32.xlu1 %v5248_v58, %s7070_s9  ;;  %v3011_v27 = vshll.u32 %v2963_v0, 16  ;;  %v7027_v37 = vadd.low.f32.bf16 %v7023_v60, %v8493_v62  ;;  %v7028_v6 = vadd.high.f32.bf16 %v7024_v8, %v8506_v43  ;;  %v2969_v8 = vld [vmem:[#allocation2 + $0x28] sm:$0xf]  ;;  %v6854_v21 = vpop.permute.xlu0 %6853 }
 0x1c8   :  { %6534 = vmatmul.mubr.msk.bf16.gmra.mrb[40].mxu0 %vm2119_vm10, %v5941_v55  ;;  %5276 = vrot.lane.b32.xlu0 %v5247_v1, %s7070_s9  ;;  %v3000_v25 = vor.u32 %v2999_v34, %v2996_v49  ;;  %v3003_v19 = vshll.u32 %v8517_v16, 16  ;;  %v3010_v63 = vrot.slane %v3008_v14, 4  ;;  %v3017_v33 = vshll.u32 %v8531_v3, 16  ;;  %v6849_v38 = vpop.permute.xlu1 %6848 }
 0x1c9   :  { %v3013_v48 = vrot.slane %v3011_v27, 5  ;;  %v7029_v4 = vadd.low.f32.bf16 %v7025_v52, %v8506_v43  ;;  %v7030_v18 = vadd.high.f32.bf16 %v7026_v31, %v6834_v2  ;;  %v7031_v44 = vadd.low.f32.bf16 %v7027_v37, %v6834_v2  ;;  %v6954_v43 = vld [vmem:[#allocation2 + $0x58] ss:$8 sps:$4 sm:$0xff]  }
 0x1ca   :  { %v3001_v39 = vrot.slane %v3000_v25, 4  ;;  %v3005_v62 = vrot.slane %v3003_v19, 5  ;;  %v7032_v13 = vadd.high.f32.bf16 %v7028_v6, %v6839_v12  ;;  %v3025_v28 = vshll.u32 %v2965_v45, 16 }
 0x1cb   :  { %v3014_v57 = vor.u32 %v3013_v48, %v3010_v63  ;;  %v3019_v55 = vrot.slane %v3017_v33, 5  ;;  %v8551_v50 = vmul.f32 0.25, %v7030_v18  ;;  %v7033_v30 = vadd.low.f32.bf16 %v7029_v4, %v6839_v12  ;;  %v8568_v12 = vld [vmem:[#allocation2 + $0x2c] sm:$0x1]  ;;  %v8586_v33 = vld [vmem:[#allocation2 + $0x34] sm:$0x1] }
 0x1cc   :  { %v3006_v22 = vsel %vm7172_vm2, %v3001_v39, %v3005_v62  ;;  %v5237_v17 = vmul.f32 0.25, %v7031_v44  ;;  %v3027_v61 = vrot.slane %v3025_v28, 5  ;;  %v5240_v60 = vmul.f32 0.25, %v7032_v13  ;;  %v6859_v52 = vpop.permute.xlu1 %6858  ;;  %v6864_v44 = vpop.permute.xlu0 %6863 }
 0x1cd   :  { %6406 = vmatmul.mubr.msk.bf16.vlgmr.msra.gmra.mrb[0].mxu1 %vm2119_vm10, %v6949_v26  ;;  %v3015_v46 = vrot.slane %v3014_v57, 4  ;;  %v3031_v53 = vshll.u32 %v8547_v35, 16  ;;  %v3036_v11 = vshrl.u32 %v2967_v23, 16  ;;  %v9049_v0 = vunpack.c.h.bf16 %v7892_v15  ;;  %v6955_v57 = vld [vmem:[#allocation2 + $0x68] ss:$8 sps:$4 sm:$0xff]  }
 0x1ce   :  { %6409 = vmatprep.mubr.msk.bf16.mxu1 %vm2119_vm10, %v6951_v54  ;;  %6422 = vmatpush3.bf16.msra.mxu1 %v8450_v9  ;;  %v3022_v9 = vshrl.u32 %v2965_v45, 16  ;;  %v9050_v10 = vunpack.c.l.bf16 %v7892_v15  ;;  %v3039_v58 = vshll.u32 %v2967_v23, 16  ;;  %v5239_v49 = vmul.f32 0.25, %v7033_v30  ;;  %v8575_v15 = vld [vmem:[%s9015_s2 + $0xa0] sm:$0xff]  }
 0x1cf   :  { %6423 = vmatprep.subr.bf16.mxu1 %v6953_v7  ;;  %v3020_v1 = vsel %vm7172_vm2, %v3015_v46, %v3019_v55  ;;  %v7034_v20 = vadd.high.f32.bf16 %v9049_v0, %v6844_v41  ;;  %v3045_v34 = vshll.u32 %v8553_v40, 16  ;;  %v3064_v51 = vshrl.u32 %v2971_v42, 16  ;;  %v2973_v46 = vld [vmem:[#allocation2 + $0x38] sm:$0xf]  ;;  %v2975_v30 = vld [vmem:[#allocation2 + $0x40] sm:$0xf] }
 0x1d0   :  { %v3024_v24 = vrot.slane %v3022_v9, 4  ;;  %v7035_v2 = vadd.low.f32.bf16 %v9050_v10, %v6844_v41  ;;  %v9051_v31 = vunpack.c.h.bf16 %v7907_v59  ;;  %v3050_v47 = vshrl.u32 %v2969_v8, 16  ;;  %v6869_v41 = vpop.permute.xlu1 %6868 }
 0x1d1   :  { %v3053_v26 = vshll.u32 %v2969_v8, 16  ;;  %v8577_v54 = vcombine.low %v3006_v22, %v3020_v1  ;;  %v9052_v37 = vunpack.c.l.bf16 %v7907_v59  ;;  %v8581_v25 = vrot.slane %v3031_v53, 5  ;;  %v6958_v53 = vld [vmem:[#allocation2 + $0x88] ss:$8 sps:$4 sm:$0xff]  }
 0x1d2   :  { %6424 = vmatpush3.bf16.msra.mxu1 %v6953_v7  ;;  %v3067_v7 = vshll.u32 %v2971_v42, 16  ;;  %v7036_v14 = vadd.high.f32.bf16 %v9051_v31, %v6849_v38  ;;  %v3028_v27 = vor.u32 %v3027_v61, %v3024_v24  ;;  %v3038_v19 = vrot.slane %v3036_v11, 4 }
 0x1d3   :  { %6425 = vmatprep.subr.bf16.mxu1 %v6956_v5  ;;  %v7037_v6 = vadd.low.f32.bf16 %v9052_v37, %v6849_v38  ;;  %v3041_v63 = vrot.slane %v3039_v58, 5  ;;  %v3059_v48 = vshll.u32 %v8568_v12, 16  ;;  %v8584_v4 = vrot.slane %v3045_v34, 5  ;;  %v6957_v38 = vld [vmem:[#allocation2 + $0x78] ss:$8 sps:$4 sm:$0xff]  }
 0x1d4   :  { %v3066_v45 = vrot.slane %v3064_v51, 4  ;;  %v3069_v39 = vrot.slane %v3067_v7, 5  ;;  %v8588_v18 = vrot.slane %v3028_v27, 4  ;;  %v3052_v59 = vrot.slane %v3050_v47, 4  ;;  %v8603_v51 = vld [vmem:[#allocation2 + $0x44] sm:$0x1] }
 0x1d5   :  { %6410 = vmatmul.mubr.msk.bf16.gmra.mrb[4].mxu1 %vm2119_vm10, %v6952_v36  ;;  %v7038_v62 = vadd.low.f32.bf16 %v7035_v2, %v6854_v21  ;;  %v7039_v13 = vadd.high.f32.bf16 %v7034_v20, %v6854_v21  ;;  %v7040_v23 = vadd.high.f32.bf16 %v7036_v14, %v6859_v52  ;;  %v5249_v36 = vpack.c.bf16 %v8551_v50, %v5237_v17  ;;  %v2977_v20 = vld [vmem:[#allocation2 + $0x58] sm:$0xf] }
 0x1d6   :  { %6413 = vmatprep.mubr.msk.bf16.mxu1 %vm2119_vm10, %v6954_v43  ;;  %6426 = vmatpush3.bf16.msra.mxu1 %v6956_v5  ;;  %v3055_v5 = vrot.slane %v3053_v26, 5  ;;  %v3042_v9 = vor.u32 %v3041_v63, %v3038_v19  ;;  %v3073_v28 = vshll.u32 %v8586_v33, 16  ;;  %v7041_v43 = vadd.low.f32.bf16 %v7037_v6, %v6859_v52  ;;  %v2979_v52 = vld [vmem:[#allocation2 + $0x60] sm:$0xf]  ;;  %v8606_v6 = vld [vmem:[#allocation2 + $0x3c] sm:$0x1] }
 0x1d7   :  { %6427 = vmatprep.subr.bf16.mxu1 %v6959_v29  ;;  %v5250_v22 = vpack.c.bf16 %v5240_v60, %v5239_v49  ;;  %v3070_v55 = vor.u32 %v3069_v39, %v3066_v45  ;;  %5280 = vrot.lane.b32.xlu0 %v5249_v36, %s7070_s9  ;;  %v3078_v24 = vshrl.u32 %v2973_v46, 16  ;;  %v3081_v50 = vshll.u32 %v2973_v46, 16 }
 0x1d8   :  { %v3034_v17 = vsel %vm7172_vm2, %v8588_v18, %v8581_v25  ;;  %v7042_v61 = vadd.low.f32.bf16 %v7038_v62, %v6864_v44  ;;  %v7043_v42 = vadd.high.f32.bf16 %v7039_v13, %v6864_v44  ;;  %v7044_v60 = vadd.high.f32.bf16 %v7040_v23, %v6869_v41  ;;  %v2983_v62 = vld [vmem:[#allocation2 + $0x70] sm:$0xf]  ;;  %v8619_v23 = vld [vmem:[#allocation2 + $0x64] sm:$0x1] }
 0x1d9   :  { %5282 = vrot.lane.b32.xlu1 %v5250_v22, %s7070_s9  ;;  %v3043_v11 = vrot.slane %v3042_v9, 4  ;;  %v3056_v8 = vor.u32 %v3055_v5, %v3052_v59  ;;  %v7045_v1 = vadd.low.f32.bf16 %v7041_v43, %v6869_v41  ;;  %v3092_v0 = vshrl.u32 %v2975_v30, 16  ;;  %v2981_v59 = vld [vmem:[#allocation2 + $0x68] sm:$0xf] }
 0x1da   :  { %6428 = vmatpush3.bf16.msra.mxu1 %v6959_v29  ;;  %v8596_v29 = vrot.slane %v3059_v48, 5  ;;  %v3071_v10 = vrot.slane %v3070_v55, 4  ;;  %v3075_v2 = vrot.slane %v3073_v28, 5  ;;  %v3080_v58 = vrot.slane %v3078_v24, 4 }
 0x1db   :  { %6445 = vmatprep.subr.bf16.mxu1 %v8575_v15  ;;  %v3083_v21 = vrot.slane %v3081_v50, 5  ;;  %v5241_v49 = vmul.f32 0.25, %v7042_v61  ;;  %v5242_v34 = vmul.f32 0.25, %v7043_v42  ;;  %v3094_v7 = vrot.slane %v3092_v0, 4  ;;  %v6961_v42 = vld [vmem:[%s9015_s2 + $0xa8] sm:$0xff]  }
 0x1dc   :  { %v3095_v31 = vshll.u32 %v2975_v30, 16  ;;  %v5243_v14 = vmul.f32 0.25, %v7045_v1  ;;  %v5244_v27 = vmul.f32 0.25, %v7044_v60  ;;  %v3106_v47 = vshrl.u32 %v2977_v20, 16 }
 0x1dd   :  { %6414 = vmatmul.mubr.msk.bf16.gmra.mrb[8].mxu1 %vm2119_vm10, %v6955_v57  ;;  %v3109_v26 = vshll.u32 %v2977_v20, 16  ;;  %v3057_v37 = vrot.slane %v3056_v8, 4  ;;  %v3120_v19 = vshrl.u32 %v2979_v52, 16  ;;  %v3123_v63 = vshll.u32 %v2979_v52, 16  ;;  %v8614_v57 = vld [vmem:[#allocation2 + $0x5c] sm:$0x1] }
 0x1de   :  { %6417 = vmatprep.mubr.msk.bf16.mxu1 %vm2119_vm10, %v6957_v38  ;;  %v3097_v25 = vrot.slane %v3095_v31, 5  ;;  %v3048_v48 = vsel %vm7172_vm2, %v3043_v11, %v8584_v4  ;;  %v3084_v45 = vor.u32 %v3083_v21, %v3080_v58  ;;  %v3101_v39 = vshll.u32 %v8603_v51, 16  ;;  %v2985_v11 = vld [vmem:[#allocation2 + $0x78] sm:$0xf] }
 0x1df   :  { %v3108_v18 = vrot.slane %v3106_v47, 4  ;;  %v3111_v44 = vrot.slane %v3109_v26, 5  ;;  %v3122_v41 = vrot.slane %v3120_v19, 4  ;;  %v3125_v38 = vrot.slane %v3123_v63, 5 }
 0x1e0   :  { %v3098_v5 = vor.u32 %v3097_v25, %v3094_v7  ;;  %v3076_v13 = vsel %vm7172_vm2, %v3071_v10, %v3075_v2  ;;  %v5251_v4 = vpack.c.bf16 %v5242_v34, %v5241_v49  ;;  %v5252_v36 = vpack.c.bf16 %v5244_v27, %v5243_v14  ;;  %v2987_v10 = vld [vmem:[#allocation2 + $0x80] sm:$0xf]  ;;  %v6962_v34 = vld [vmem:[%s9015_s2 + $0xb0] sm:$0xff]   ;;  %v8643_v7 = vld [vmem:[#allocation2 + $0x84] sm:$0x1] }
 0x1e1   :  { %v3126_v9 = vor.u32 %v3125_v38, %v3122_v41  ;;  %v3134_v28 = vshrl.u32 %v2981_v59, 16  ;;  %v3137_v43 = vshll.u32 %v2981_v59, 16  ;;  %v3085_v22 = vrot.slane %v3084_v45, 4  ;;  %v2989_v25 = vld [vmem:[#allocation2 + $0x88] sm:$0xf] }
 0x1e2   :  { %v3099_v46 = vrot.slane %v3098_v5, 4  ;;  %v3103_v55 = vrot.slane %v3101_v39, 5  ;;  %v3115_v30 = vshll.u32 %v8614_v57, 16  ;;  %5284 = vrot.lane.b32.xlu0 %v5251_v4, %s7070_s9  ;;  %5286 = vrot.lane.b32.xlu1 %v5252_v36, %s7070_s9  ;;  %v3148_v24 = vshrl.u32 %v2983_v62, 16  ;;  %v2991_v45 = vld [vmem:[#allocation2 + $0x90] sm:$0xf] }
 0x1e3   :  { %v5793_v50 = vcombine.low %v3034_v17, %v3048_v48  ;;  %v3062_v61 = vsel %vm7172_vm2, %v3057_v37, %v8596_v29  ;;  %v3112_v60 = vor.u32 %v3111_v44, %v3108_v18  ;;  %v3127_v20 = vrot.slane %v3126_v9, 4  ;;  %v8634_v17 = vld [vmem:[#allocation2 + $0x74] sm:$0x1]  ;;  %v8647_v18 = vld [vmem:[#allocation2 + $0x6c] sm:$0x1] }
 0x1e4   :  { %v5794_v8 = vcombine.low %v3062_v61, %v3076_v13  ;;  %v3104_v0 = vsel %vm7172_vm2, %v3099_v46, %v3103_v55  ;;  %v3136_v29 = vrot.slane %v3134_v28, 4  ;;  %v3139_v2 = vrot.slane %v3137_v43, 5  ;;  %v8650_v38 = vld [vmem:[#allocation2 + $0x7c] sm:$0x1] }
 0x1e5   :  { %6418 = vmatmul.mubr.msk.bf16.gmra.mrb[12].mxu1 %vm2119_vm10, %v6958_v53  ;;  %v3129_v53 = vshll.u32 %v8619_v23, 16  ;;  %v3150_v58 = vrot.slane %v3148_v24, 4  ;;  %v3151_v21 = vshll.u32 %v2983_v62, 16  ;;  %v3117_v49 = vrot.slane %v3115_v30, 5  ;;  %v6963_v28 = vld [vmem:[%s9015_s2 + $0xb8] sm:$0xff]  }
 0x1e6   :  { %6429 = vmatprep.mubr.msk.bf16.mxu1 %vm2119_vm10, %v8577_v54  ;;  %v3087_v54 = vshll.u32 %v8606_v6, 16  ;;  %v3162_v31 = vshrl.u32 %v2985_v11, 16  ;;  %v3165_v14 = vshll.u32 %v2985_v11, 16  ;;  %v3113_v27 = vrot.slane %v3112_v60, 4 }
 0x1e7   :  { %v3131_v47 = vrot.slane %v3129_v53, 5  ;;  %v3153_v26 = vrot.slane %v3151_v21, 5  ;;  %v3176_v37 = vshrl.u32 %v2987_v10, 16  ;;  %v3179_v48 = vshll.u32 %v2987_v10, 16 }
 0x1e8   :  { %v3089_v1 = vrot.slane %v3087_v54, 5  ;;  %v3167_v63 = vrot.slane %v3165_v14, 5  ;;  %v3140_v59 = vor.u32 %v3139_v2, %v3136_v29  ;;  %v3157_v41 = vshll.u32 %v8634_v17, 16  ;;  %v8667_v29 = vld [vmem:[%s9015_s2 + $0xc0] sm:$0xff]  }
 0x1e9   :  { %v3132_v39 = vsel %vm7172_vm2, %v3127_v20, %v3131_v47  ;;  %v3154_v5 = vor.u32 %v3153_v26, %v3150_v58  ;;  %v3178_v44 = vrot.slane %v3176_v37, 4  ;;  %v3181_v62 = vrot.slane %v3179_v48, 5  ;;  %v8662_v20 = vld [vmem:[#allocation2 + $0x94] sm:$0x1]  ;;  %v3412_v47 = vld [vmem:[#allocation2 + $0x10] sm:$0xe] }
 0x1ea   :  { %v3090_v52 = vsel %vm7172_vm2, %v3085_v22, %v3089_v1  ;;  %v3190_v13 = vshrl.u32 %v2989_v25, 16  ;;  %v3193_v54 = vshll.u32 %v2989_v25, 16  ;;  %v3118_v4 = vsel %vm7172_vm2, %v3113_v27, %v3117_v49  ;;  %v8673_v49 = vld [vmem:[#allocation2 + $0x8c] sm:$0x1] }
 0x1eb   :  { %v5795_v19 = vcombine.low %v3090_v52, %v3104_v0  ;;  %v3185_v46 = vshll.u32 %v8643_v7, 16  ;;  %v3204_v9 = vshrl.u32 %v2991_v45, 16  ;;  %v5796_v43 = vcombine.low %v3118_v4, %v3132_v39 }
 0x1ec   :  { %v3143_v22 = vshll.u32 %v8647_v18, 16  ;;  %v3155_v55 = vrot.slane %v3154_v5, 4  ;;  %v3182_v30 = vor.u32 %v3181_v62, %v3178_v44  ;;  %v3141_v24 = vrot.slane %v3140_v59, 4 }
 0x1ed   :  { %6430 = vmatmul.mubr.msk.bf16.vlgmr.msra.gmra.mrb[0].mxu1 %vm2119_vm10, %v5793_v50  ;;  %v3171_v50 = vshll.u32 %v8650_v38, 16  ;;  %v3206_v61 = vrot.slane %v3204_v9, 4  ;;  %v3159_v60 = vrot.slane %v3157_v41, 5  ;;  %v3192_v11 = vrot.slane %v3190_v13, 4  ;;  %v3413_v9 = vld [vmem:[#allocation2 + $0x18] sm:$0xe] }
 0x1ee   :  { %6433 = vmatprep.mubr.msk.bf16.mxu1 %vm2119_vm10, %v5794_v8  ;;  %6446 = vmatpush3.bf16.msra.mxu1 %v8575_v15  ;;  %v3164_v15 = vrot.slane %v3162_v31, 4  ;;  %v3183_v53 = vrot.slane %v3182_v30, 4  ;;  %v3195_v8 = vrot.slane %v3193_v54, 5  ;;  %v3187_v0 = vrot.slane %v3185_v46, 5  ;;  %v3414_v54 = vld [vmem:[#allocation2 + $0x20] sm:$0xe] }
 0x1ef   :  { %6447 = vmatprep.subr.bf16.mxu1 %v6961_v42  ;;  %v3145_v2 = vrot.slane %v3143_v22, 5  ;;  %v3160_v58 = vsel %vm7172_vm2, %v3155_v55, %v3159_v60  ;;  %v3173_v21 = vrot.slane %v3171_v50, 5  ;;  %v3213_v27 = vshll.u32 %v8662_v20, 16  ;;  %v3415_v22 = vld [vmem:[#allocation2 + $0x28] sm:$0xe] }
 0x1f0   :  { %v3168_v36 = vor.u32 %v3167_v63, %v3164_v15  ;;  %v3188_v52 = vsel %vm7172_vm2, %v3183_v53, %v3187_v0  ;;  %v3196_v14 = vor.u32 %v3195_v8, %v3192_v11  ;;  %v3411_v63 = vld [vmem:[#allocation2 + $0x8] sm:$0xe]  ;;  %v5813_v48 = vrot.slane %v3412_v47, 9  ;;  %v3418_v53 = vld [vmem:[#allocation2 + $0x40] sm:$0xe] }
 0x1f1   :  { %v3146_v31 = vsel %vm7172_vm2, %v3141_v24, %v3145_v2  ;;  %v3215_v59 = vrot.slane %v3213_v27, 5  ;;  %v5812_v5 = vrot.slane %v3411_v63, 9  ;;  %v3461_v44 = vrot.slane %v8517_v16, 5  ;;  %v3420_v8 = vld [vmem:[#allocation2 + $0x60] sm:$0xe] }
 0x1f2   :  { %6448 = vmatpush3.bf16.msra.mxu1 %v6961_v42  ;;  %v3207_v42 = vshll.u32 %v2991_v45, 16  ;;  %v3169_v1 = vrot.slane %v3168_v36, 4  ;;  %v5797_v26 = vcombine.low %v3146_v31, %v3160_v58  ;;  %v3465_v45 = vrot.slane %v8531_v3, 5  ;;  %v3416_v36 = vld [vmem:[#allocation2 + $0x30] sm:$0xe] }
 0x1f3   :  { %6449 = vmatprep.subr.bf16.mxu1 %v6962_v34  ;;  %v3197_v39 = vrot.slane %v3196_v14, 4  ;;  %v3462_v46 = vsel %vm8066_vm8, %v5812_v5, %v3461_v44  ;;  %v3473_v16 = vrot.slane %v8553_v40, 5  ;;  %v5817_v55 = vrot.slane %v3416_v36, 9  ;;  %v3417_v0 = vld [vmem:[#allocation2 + $0x38] sm:$0xe] }
 0x1f4   :  { %v3209_v10 = vrot.slane %v3207_v42, 5  ;;  %v3174_v37 = vsel %vm7172_vm2, %v3169_v1, %v3173_v21  ;;  %v3466_v13 = vsel %vm8066_vm8, %v5813_v48, %v3465_v45  ;;  %v3481_v30 = vrot.slane %v8586_v33, 5  ;;  %v3419_v58 = vld [vmem:[#allocation2 + $0x58] sm:$0xe]  ;;  %v3425_v36 = vld [vmem:[#allocation2 + $0x88] sm:$0xe] }
 0x1f5   :  { %6434 = vmatmul.mubr.msk.bf16.gmra.mrb[4].mxu1 %vm2119_vm10, %v5795_v19  ;;  %v5798_v25 = vcombine.low %v3174_v37, %v3188_v52  ;;  %v3199_v19 = vshll.u32 %v8673_v49, 16  ;;  %v5814_v24 = vrot.slane %v3413_v9, 9  ;;  %v3469_v50 = vrot.slane %v8547_v35, 5  ;;  %v6965_v35 = vld [vmem:[%s9015_s2 + $0xc8] sm:$0xff]   ;;  %v3423_v45 = vld [vmem:[#allocation2 + $0x78] sm:$0xe] }
 0x1f6   :  { %6437 = vmatprep.mubr.msk.bf16.mxu1 %vm2119_vm10, %v5796_v43  ;;  %6450 = vmatpush3.bf16.msra.mxu1 %v6962_v34  ;;  %v3210_v34 = vor.u32 %v3209_v10, %v3206_v61  ;;  %v5815_v43 = vrot.slane %v3414_v54, 9  ;;  %v5816_v61 = vrot.slane %v3415_v22, 9  ;;  %v3477_v42 = vrot.slane %v8568_v12, 5  ;;  %v3426_v54 = vld [vmem:[#allocation2 + $0x90] sm:$0xe] }
 0x1f7   :  { %6451 = vmatprep.subr.bf16.mxu1 %v6963_v28  ;;  %v3201_v41 = vrot.slane %v3199_v19, 5  ;;  %v3482_v40 = vsel %vm8066_vm8, %v5817_v55, %v3481_v30  ;;  %v3470_v11 = vsel %vm8066_vm8, %v5814_v24, %v3469_v50  ;;  %v5819_v10 = vrot.slane %v3418_v53, 9  ;;  %v6967_v19 = vld [vmem:[%s9015_s2 + $0xd8] sm:$0xff]   ;;  %v6969_v24 = vld [vmem:[#allocation2 + $0x20] ss:$8 sps:$4 sm:$0xff]  }
 0x1f8   :  { %v3211_v15 = vrot.slane %v3210_v34, 4  ;;  %v3474_v60 = vsel %vm8066_vm8, %v5815_v43, %v3473_v16  ;;  %v3478_v1 = vsel %vm8066_vm8, %v5816_v61, %v3477_v42  ;;  %v3489_v2 = vrot.slane %v8603_v51, 5  ;;  %v6966_v51 = vld [vmem:[%s9015_s2 + $0xd0] sm:$0xff]   ;;  %v6973_v50 = vld [vmem:[%s9015_s2 + $0xe8] sm:$0xff]   ;;  %v3946_v61 = vld [vmem:[#allocation2 + $0x18] sm:$0xf] }
 0x1f9   :  { %v3202_v4 = vsel %vm7172_vm2, %v3197_v39, %v3201_v41  ;;  %v5837_v33 = vcombine.low %v3470_v11, %v3474_v60  ;;  %v5838_v12 = vcombine.low %v3478_v1, %v3482_v40  ;;  %v5821_v21 = vrot.slane %v3420_v8, 9  ;;  %v6968_v30 = vld [vmem:[#allocation2 + $0x10] ss:$8 sps:$4 sm:$0xff]   ;;  %v3950_v11 = vld [vmem:[#allocation2 + $0x28] sm:$0xf] }
 0x1fa   :  { %6452 = vmatpush3.bf16.msra.mxu1 %v6963_v28  ;;  %v3216_v62 = vsel %vm7172_vm2, %v3211_v15, %v3215_v59  ;;  %v5836_v28 = vcombine.low %v3462_v46, %v3466_v13  ;;  %v3497_v52 = vrot.slane %v8619_v23, 5  ;;  %v5818_v34 = vrot.slane %v3417_v0, 9  ;;  %v6976_v8 = vld [vmem:[%s9015_s2 + $0xf0] sm:$0xff]  }
 0x1fb   :  { %6469 = vmatprep.subr.bf16.mxu1 %v8667_v29  ;;  %v5799_v3 = vcombine.low %v3202_v4, %v3216_v62  ;;  %v3485_v31 = vrot.slane %v8606_v6, 5  ;;  %v5820_v14 = vrot.slane %v3419_v58, 9  ;;  %v3493_v27 = vrot.slane %v8614_v57, 5  ;;  %v3424_v6 = vld [vmem:[#allocation2 + $0x80] sm:$0xe] }
 0x1fc   :  { %v3490_v47 = vsel %vm8066_vm8, %v5819_v10, %v3489_v2  ;;  %v3498_v23 = vsel %vm8066_vm8, %v5821_v21, %v3497_v52  ;;  %v3505_v48 = vrot.slane %v8634_v17, 5  ;;  %v5825_v39 = vrot.slane %v3424_v6, 9  ;;  %v6970_v17 = vld [vmem:[%s9015_s2 + $0xe0] sm:$0xff]   ;;  %v6979_v21 = vld [vmem:[%s9015_s2 + $0xf8] sm:$0xff]   ;;  %v6982_v6 = vld [vmem:[#allocation2 + $0x14] sm:$0x1] }
 0x1fd   :  { %6438 = vmatmul.mubr.msk.bf16.gmra.mrb[8].mxu1 %vm2119_vm10, %v5797_v26  ;;  %v3422_v26 = vld [vmem:[#allocation2 + $0x70] sm:$0xe]  ;;  %v3494_v57 = vsel %vm8066_vm8, %v5820_v14, %v3493_v27  ;;  %v3513_v59 = vrot.slane %v8643_v7, 5  ;;  %v3501_v44 = vrot.slane %v8647_v18, 5  ;;  %v5824_v41 = vrot.slane %v3423_v45, 9 }
 0x1fe   :  { %6441 = vmatprep.mubr.msk.bf16.mxu1 %vm2119_vm10, %v5798_v25  ;;  %v3421_v25 = vld [vmem:[#allocation2 + $0x68] sm:$0xe]  ;;  %v5840_v15 = vcombine.low %v3494_v57, %v3498_v23  ;;  %v5823_v63 = vrot.slane %v3422_v26, 9  ;;  %v3509_v62 = vrot.slane %v8650_v38, 5  ;;  %v5827_v46 = vrot.slane %v3426_v54, 9 }
 0x1ff   :  { %v5822_v5 = vrot.slane %v3421_v25, 9  ;;  %v3514_v7 = vsel %vm8066_vm8, %v5825_v39, %v3513_v59  ;;  %v3521_v9 = vrot.slane %v8662_v20, 5  ;;  %v3517_v43 = vrot.slane %v8673_v49, 5  ;;  %v3944_v20 = vld [vmem:[#allocation2 + $0x10] sm:$0xf] }
 0x200   :  { %v3506_v13 = vsel %vm8066_vm8, %v5823_v63, %v3505_v48  ;;  %v3510_v38 = vsel %vm8066_vm8, %v5824_v41, %v3509_v62  ;;  %v6971_v49 = vld [vmem:[#allocation2 + $0x30] ss:$8 sps:$4 sm:$0xff]   ;;  %v3977_v42 = vshrl.u32 %v3944_v20, 16  ;;  %v3980_v60 = vshll.u32 %v3944_v20, 16  ;;  %v6972_v58 = vld [vmem:[#allocation2 + $0x40] ss:$8 sps:$4 sm:$0xff]  }
 0x201   :  { %v3502_v4 = vsel %vm8066_vm8, %v5822_v5, %v3501_v44  ;;  %v3522_v16 = vsel %vm8066_vm8, %v5827_v46, %v3521_v9  ;;  %v3991_v40 = vshrl.u32 %v3946_v61, 16  ;;  %v3994_v53 = vshll.u32 %v3946_v61, 16  ;;  %v3952_v27 = vld [vmem:[#allocation2 + $0x30] sm:$0xf]  ;;  %v3954_v26 = vld [vmem:[#allocation2 + $0x38] sm:$0xf] }
 0x202   :  { %v5841_v18 = vcombine.low %v3502_v4, %v3506_v13  ;;  %v3979_v1 = vrot.slane %v3977_v42, 4  ;;  %v4019_v0 = vshrl.u32 %v3950_v11, 16  ;;  %vm5300_vm15 = vcmask 261120   ;;  %v6975_v39 = vld [vmem:[#allocation2 + $0x70] ss:$8 sps:$4 sm:$0xff]  }
 0x203   :  { %v3993_v10 = vrot.slane %v3991_v40, 4  ;;  %v3996_v2 = vrot.slane %v3994_v53, 5  ;;  %v4036_v63 = vshll.u32 %v3952_v27, 16  ;;  %v4047_v48 = vshrl.u32 %v3954_v26, 16  ;;  %v6983_v59 = vld [vmem:[#allocation2 + $0x1c] sm:$0x1] }
 0x204   :  { %v4050_v45 = vshll.u32 %v3954_v26, 16  ;;  %v4000_v5 = vshll.u32 %v6983_v59, 16  ;;  %v3956_v41 = vld [vmem:[#allocation2 + $0x40] sm:$0xf]  ;;  %v6984_v13 = vld [vmem:[#allocation2 + $0x24] sm:$0x1] }
 0x205   :  { %6442 = vmatmul.mubr.msk.bf16.gmra.mrb[12].mxu1 %vm2119_vm10, %v5799_v3  ;;  %v5842_v3 = vcombine.low %v3510_v38, %v3514_v7  ;;  %v3997_v57 = vor.u32 %v3996_v2, %v3993_v10  ;;  %v4014_v7 = vshll.u32 %v6984_v13, 16  ;;  %v6985_v54 = vld [vmem:[#allocation2 + $0x2c] sm:$0x1]  ;;  %v4038_v9 = vrot.slane %v4036_v63, 5 }
 0x206   :  { %6453 = vmatprep.mubr.msk.bf16.mxu1 %vm2119_vm10, %v5836_v28  ;;  %v5826_v28 = vrot.slane %v3425_v36, 9  ;;  %v4028_v4 = vshll.u32 %v6985_v54, 16  ;;  %v4064_v20 = vshll.u32 %v3956_v41, 16 }
 0x207   :  { %v3998_v38 = vrot.slane %v3997_v57, 4  ;;  %v4016_v40 = vrot.slane %v4014_v7, 5  ;;  %v6989_v57 = vld [vmem:[#allocation2 + $0x44] sm:$0x1]  ;;  %v3968_v7 = vld [vmem:[#allocation2 + $0x80] sm:$0xf] }
 0x208   :  { %v3518_v22 = vsel %vm8066_vm8, %v5826_v28, %v3517_v43  ;;  %v3960_v43 = vld [vmem:[#allocation2 + $0x60] sm:$0xf] }
 0x209   :  { %v5843_v55 = vcombine.low %v3518_v22, %v3522_v16  ;;  %v6977_v16 = vld [vmem:[#allocation2 + $0x80] ss:$8 sps:$4 sm:$0xff]   ;;  %v4049_v22 = vrot.slane %v4047_v48, 4  ;;  %v4089_v53 = vshrl.u32 %v3960_v43, 16  ;;  %v6990_v48 = vld [vmem:[#allocation2 + $0x4c] sm:$0x1] }
 0x20d   :  { %6454 = vmatmul.mubr.msk.bf16.vlgmr.msra.gmra.mrb[0].mxu1 %vm2119_vm10, %v5837_v33  ;;  %v3948_v33 = vld [vmem:[#allocation2 + $0x20] sm:$0xf] }
 0x20e   :  { %6457 = vmatprep.mubr.msk.bf16.mxu1 %vm2119_vm10, %v5838_v12  ;;  %6470 = vmatpush3.bf16.msra.mxu1 %v8667_v29  ;;  %v3486_v29 = vsel %vm8066_vm8, %v5818_v34, %v3485_v31  ;;  %v3982_v12 = vrot.slane %v3980_v60, 5  ;;  %v4005_v52 = vshrl.u32 %v3948_v33, 16  ;;  %v4008_v34 = vshll.u32 %v3948_v33, 16  ;;  %v6974_v31 = vld [vmem:[#allocation2 + $0x60] ss:$8 sps:$4 sm:$0xff]  }
 0x20f   :  { %6471 = vmatprep.subr.bf16.mxu1 %v6965_v35  ;;  %v5839_v37 = vcombine.low %v3486_v29, %v3490_v47  ;;  %v4021_v47 = vrot.slane %v4019_v0, 4 }
 0x210   :  { %v3983_v29 = vor.u32 %v3982_v12, %v3979_v1  ;;  %v4007_v25 = vrot.slane %v4005_v52, 4  ;;  %v4030_v1 = vrot.slane %v4028_v4, 5  ;;  %v6987_v12 = vld [vmem:[#allocation2 + $0x34] sm:$0x1] }
 0x211   :  { %v4042_v10 = vshll.u32 %v6987_v12, 16 }
 0x212   :  { %6472 = vmatpush3.bf16.msra.mxu1 %v6965_v35  ;;  %v4022_v35 = vshll.u32 %v3950_v11, 16  ;;  %v3984_v62 = vrot.slane %v3983_v29, 4  ;;  %v4092_v11 = vshll.u32 %v3960_v43, 16  ;;  %v6978_v29 = vld [vmem:[#allocation2 + $0x90] ss:$8 sps:$4 sm:$0xff]  }
 0x213   :  { %6473 = vmatprep.subr.bf16.mxu1 %v6966_v51  ;;  %v6991_v43 = vld [vmem:[#allocation2 + $0x64] sm:$0x1] }
 0x214   :  { %v4024_v23 = vrot.slane %v4022_v35, 5  ;;  %v3962_v35 = vld [vmem:[#allocation2 + $0x68] sm:$0xf] }
 0x215   :  { %6458 = vmatmul.mubr.msk.bf16.gmra.mrb[4].mxu1 %vm2119_vm10, %v5839_v37  ;;  %v3986_v37 = vshll.u32 %v6982_v6, 16  ;;  %v4106_v26 = vshll.u32 %v3962_v35, 16 }
 0x216   :  { %6461 = vmatprep.mubr.msk.bf16.mxu1 %vm2119_vm10, %v5840_v15  ;;  %6474 = vmatpush3.bf16.msra.mxu1 %v6966_v51  ;;  %v4033_v15 = vshrl.u32 %v3952_v27, 16  ;;  %v4025_v44 = vor.u32 %v4024_v23, %v4021_v47  ;;  %v4094_v47 = vrot.slane %v4092_v11, 5  ;;  %v4103_v23 = vshrl.u32 %v3962_v35, 16 }
 0x217   :  { %6475 = vmatprep.subr.bf16.mxu1 %v6967_v19  ;;  %v4108_v13 = vrot.slane %v4106_v26, 5  ;;  %v8810_v26 = vld [vmem:[#allocation2 + $0x84] sm:$0x1] }
 0x218   :  { %v4035_v46 = vrot.slane %v4033_v15, 4  ;;  %v4026_v61 = vrot.slane %v4025_v44, 4 }
 0x21a   :  { %6476 = vmatpush3.bf16.msra.mxu1 %v6967_v19  ;;  %v4010_v19 = vrot.slane %v4008_v34, 5  ;;  %v4039_v0 = vor.u32 %v4038_v9, %v4035_v46  ;;  %v4031_v52 = vsel %vm7172_vm2, %v4026_v61, %v4030_v1  ;;  %v6988_v34 = vld [vmem:[#allocation2 + $0x3c] sm:$0x1] }
 0x21b   :  { %6493 = vmatprep.subr.bf16.mxu1 %v6970_v17 }
 0x21c   :  { %v4011_v36 = vor.u32 %v4010_v19, %v4007_v25  ;;  %v4070_v25 = vshll.u32 %v6989_v57, 16 }
 0x21d   :  { %6462 = vmatmul.mubr.msk.bf16.gmra.mrb[8].mxu1 %vm2119_vm10, %v5841_v18  ;;  %v3958_v18 = vld [vmem:[#allocation2 + $0x48] sm:$0xf] }
 0x21e   :  { %6465 = vmatprep.mubr.msk.bf16.mxu1 %vm2119_vm10, %v5842_v3  ;;  %v8777_v3 = vld [vmem:[%s9015_s2 + $0x100] sm:$0xff]   ;;  %v4078_v42 = vshll.u32 %v3958_v18, 16  ;;  %v4012_v33 = vrot.slane %v4011_v36, 4  ;;  %v4072_v4 = vrot.slane %v4070_v25, 5  ;;  %v6994_v25 = vld [vmem:[#allocation2 + $0x74] sm:$0x1] }
 0x220   :  { %v4080_v27 = vrot.slane %v4078_v42, 5  ;;  %v4017_v19 = vsel %vm7172_vm2, %v4012_v33, %v4016_v40 }
 0x221   :  { %v5893_v59 = vcombine.low %v4017_v19, %v4031_v52  ;;  %v4126_v19 = vshll.u32 %v6994_v25, 16 }
 0x225   :  { %6466 = vmatmul.mubr.msk.bf16.gmra.mrb[12].mxu1 %vm2119_vm10, %v5843_v55  ;;  %v4052_v55 = vrot.slane %v4050_v45, 5  ;;  %v4084_v45 = vshll.u32 %v6990_v48, 16 }
 0x226   :  { %6477 = vmatprep.mubr.msk.bf16.mxu1 %vm2119_vm10, %v6968_v30  ;;  %v4061_v30 = vshrl.u32 %v3956_v41, 16 }
 0x227   :  { %v4053_v2 = vor.u32 %v4052_v55, %v4049_v22  ;;  %v3970_v22 = vld [vmem:[#allocation2 + $0x88] sm:$0xf] }
 0x228   :  { %v4159_v11 = vshrl.u32 %v3970_v22, 16 }
 0x229   :  { %v4054_v15 = vrot.slane %v4053_v2, 4 }
 0x22d   :  { %6478 = vmatmul.mubr.msk.bf16.vlgmr.msra.gmra.mrb[0].mxu1 %vm2119_vm10, %v6969_v24 }
 0x22e   :  { %6481 = vmatprep.mubr.msk.bf16.mxu1 %vm2119_vm10, %v6971_v49  ;;  %6494 = vmatpush3.bf16.msra.mxu1 %v6970_v17  ;;  %v3988_v17 = vrot.slane %v3986_v37, 5  ;;  %v4075_v49 = vshrl.u32 %v3958_v18, 16  ;;  %v4040_v37 = vrot.slane %v4039_v0, 4  ;;  %v3964_v18 = vld [vmem:[#allocation2 + $0x70] sm:$0xf] }
 0x22f   :  { %6495 = vmatprep.subr.bf16.mxu1 %v6973_v50  ;;  %v4117_v42 = vshrl.u32 %v3964_v18, 16  ;;  %v3972_v0 = vld [vmem:[#allocation2 + $0x90] sm:$0xf] }
 0x230   :  { %v3989_v60 = vsel %vm7172_vm2, %v3984_v62, %v3988_v17  ;;  %v4105_v17 = vrot.slane %v4103_v23, 4 }
 0x232   :  { %6496 = vmatpush3.bf16.msra.mxu1 %v6973_v50  ;;  %v4002_v50 = vrot.slane %v4000_v5, 5  ;;  %v4044_v5 = vrot.slane %v4042_v10, 5 }
 0x233   :  { %6497 = vmatprep.subr.bf16.mxu1 %v6976_v8  ;;  %v5273_v14 = vpop.permute.xlu0 %5272 }
 0x234   :  { %v5275_v51 = vpop.permute.xlu1 %5274  ;;  %6545 = vmatprep.mubr.msk.bf16.mxu0 %vm5300_vm15, %v5273_v14  ;;  %v4077_v14 = vrot.slane %v4075_v49, 4  ;;  %v4045_v54 = vsel %vm7172_vm2, %v4040_v37, %v4044_v5  ;;  %v4109_v49 = vor.u32 %v4108_v13, %v4105_v17  ;;  %v4154_v17 = vshll.u32 %v8810_v26, 16 }
 0x235   :  { %6482 = vmatmul.mubr.msk.bf16.gmra.mrb[4].mxu1 %vm2119_vm10, %v6972_v58  ;;  %6546 = vmatmul.mubr.msk.bf16.vlgmr.msra.gmra.mrb[44].mxu0 %vm5300_vm15, %v5275_v51  ;;  %v4063_v58 = vrot.slane %v4061_v30, 4  ;;  %v4091_v51 = vrot.slane %v4089_v53, 4  ;;  %v6992_v30 = vld [vmem:[#allocation2 + $0x6c] sm:$0x1] }
 0x236   :  { %6485 = vmatprep.mubr.msk.bf16.mxu1 %vm2119_vm10, %v6974_v31  ;;  %6498 = vmatpush3.bf16.msra.mxu1 %v6976_v8  ;;  %v4003_v8 = vsel %vm7172_vm2, %v3998_v38, %v4002_v50  ;;  %v4056_v31 = vshll.u32 %v6988_v34, 16  ;;  %v4081_v44 = vor.u32 %v4080_v27, %v4077_v14  ;;  %v4148_v50 = vshll.u32 %v3968_v7, 16  ;;  %v6993_v27 = vld [vmem:[%s9015_s2 + $0x108] sm:$0xff]  }
 0x237   :  { %6499 = vmatprep.subr.bf16.mxu1 %v6979_v21  ;;  %v5892_v6 = vcombine.low %v3989_v60, %v4003_v8  ;;  %v4095_v62 = vor.u32 %v4094_v47, %v4091_v51  ;;  %v4120_v60 = vshll.u32 %v3964_v18, 16  ;;  %v4162_v8 = vshll.u32 %v3970_v22, 16 }
 0x238   :  { %v4058_v41 = vrot.slane %v4056_v31, 5  ;;  %v4082_v55 = vrot.slane %v4081_v44, 4  ;;  %v4150_v2 = vrot.slane %v4148_v50, 5  ;;  %v4110_v52 = vrot.slane %v4109_v49, 4  ;;  %v3971_v44 = vld [vmem:[#allocation2 + $0x8c] sm:$0x1] }
 0x239   :  { %v5279_v24 = vpop.permute.xlu1 %5278  ;;  %v4096_v61 = vrot.slane %v4095_v62, 4  ;;  %v4119_v34 = vrot.slane %v4117_v42, 4  ;;  %v4122_v31 = vrot.slane %v4120_v60, 5  ;;  %v4161_v47 = vrot.slane %v4159_v11, 4  ;;  %v4406_v11 = vld [vmem:[#allocation2 + $0x80] sm:$0xe] }
 0x23a   :  { %6500 = vmatpush3.bf16.msra.mxu1 %v6979_v21  ;;  %v5277_v28 = vpop.permute.xlu0 %5276  ;;  %v4066_v21 = vrot.slane %v4064_v20, 5  ;;  %v4059_v46 = vsel %vm7172_vm2, %v4054_v15, %v4058_v41  ;;  %v4112_v20 = vshll.u32 %v6992_v30, 16  ;;  %v4164_v23 = vrot.slane %v4162_v8, 5  ;;  %v3975_v30 = vld [vmem:[#allocation2 + $0x9c] sm:$0x1] }
 0x23b   :  { %6561 = vmatprep.subr.bf16.mxu1 %v8777_v3  ;;  %6549 = vmatprep.mubr.msk.bf16.mxu0 %vm5300_vm15, %v5277_v28  ;;  %v4086_v28 = vrot.slane %v4084_v45, 5  ;;  %v5894_v33 = vcombine.low %v4045_v54, %v4059_v46  ;;  %v4168_v46 = vshll.u32 %v3971_v44, 16  ;;  %v4156_v22 = vrot.slane %v4154_v17, 5 }
 0x23c   :  { %v4067_v63 = vor.u32 %v4066_v21, %v4063_v58  ;;  %v4114_v12 = vrot.slane %v4112_v20, 5  ;;  %v3974_v58 = vld [vmem:[#allocation2 + $0x98] sm:$0xf]  ;;  %v4165_v13 = vor.u32 %v4164_v23, %v4161_v47  ;;  %v4196_v49 = vshll.u32 %v3975_v30, 16 }
 0x23d   :  { %6486 = vmatmul.mubr.msk.bf16.gmra.mrb[8].mxu1 %vm2119_vm10, %v6975_v39  ;;  %6550 = vmatmul.mubr.msk.bf16.gmra.mrb[48].mxu0 %vm5300_vm15, %v5279_v24  ;;  %v3966_v39 = vld [vmem:[#allocation2 + $0x78] sm:$0xf]  ;;  %v4145_v24 = vshrl.u32 %v3968_v7, 16  ;;  %v4087_v21 = vsel %vm7172_vm2, %v4082_v55, %v4086_v28  ;;  %v4187_v37 = vshrl.u32 %v3974_v58, 16  ;;  %v4190_v57 = vshll.u32 %v3974_v58, 16  ;;  %v6996_v7 = vld [vmem:[%s9015_s2 + $0x110] sm:$0xff]  }
 0x23e   :  { %6489 = vmatprep.mubr.msk.bf16.mxu1 %vm2119_vm10, %v6977_v16  ;;  %v4131_v38 = vshrl.u32 %v3966_v39, 16  ;;  %v4134_v36 = vshll.u32 %v3966_v39, 16  ;;  %v4068_v9 = vrot.slane %v4067_v63, 4  ;;  %v4098_v16 = vshll.u32 %v6991_v43, 16  ;;  %v3973_v43 = vld [vmem:[#allocation2 + $0x94] sm:$0x1] }
 0x23f   :  { %v4147_v10 = vrot.slane %v4145_v24, 4  ;;  %v4115_v45 = vsel %vm7172_vm2, %v4110_v52, %v4114_v12  ;;  %v4123_v39 = vor.u32 %v4122_v31, %v4119_v34  ;;  %v4189_v18 = vrot.slane %v4187_v37, 4  ;;  %v6997_v20 = vld [vmem:[%s9015_s2 + $0x118] sm:$0xff]  }
 0x240   :  { %v4133_v40 = vrot.slane %v4131_v38, 4  ;;  %v4136_v53 = vrot.slane %v4134_v36, 5  ;;  %v4100_v1 = vrot.slane %v4098_v16, 5  ;;  %v4073_v35 = vsel %vm7172_vm2, %v4068_v9, %v4072_v4 }
 0x241   :  { %v4151_v15 = vor.u32 %v4150_v2, %v4147_v10  ;;  %v5895_v48 = vcombine.low %v4073_v35, %v4087_v21  ;;  %v4192_v38 = vrot.slane %v4190_v57, 5  ;;  %v4124_v9 = vrot.slane %v4123_v39, 4  ;;  %v4407_v10 = vld [vmem:[#allocation2 + $0x88] sm:$0xe] }
 0x242   :  { %v4101_v14 = vsel %vm7172_vm2, %v4096_v61, %v4100_v1  ;;  %v4137_v51 = vor.u32 %v4136_v53, %v4133_v40  ;;  %v4128_v16 = vrot.slane %v4126_v19, 5  ;;  %v4166_v55 = vrot.slane %v4165_v13, 4 }
 0x243   :  { %v5896_v41 = vcombine.low %v4101_v14, %v4115_v45  ;;  %v4152_v36 = vrot.slane %v4151_v15, 4  ;;  %v4193_v61 = vor.u32 %v4192_v38, %v4189_v18  ;;  %v4170_v60 = vrot.slane %v4168_v46, 5 }
 0x244   :  { %v4138_v62 = vrot.slane %v4137_v51, 4  ;;  %v4129_v40 = vsel %vm7172_vm2, %v4124_v9, %v4128_v16  ;;  %v4182_v53 = vshll.u32 %v3973_v43, 16  ;;  %v4198_v12 = vrot.slane %v4196_v49, 5 }
 0x245   :  { %6490 = vmatmul.mubr.msk.bf16.gmra.mrb[12].mxu1 %vm2119_vm10, %v6978_v29  ;;  %v4173_v29 = vshrl.u32 %v3972_v0, 16  ;;  %v4157_v42 = vsel %vm7172_vm2, %v4152_v36, %v4156_v22  ;;  %v4194_v35 = vrot.slane %v4193_v61, 4  ;;  %v5924_v21 = vrot.slane %v4406_v11, 9 }
 0x246   :  { %6501 = vmatprep.mubr.msk.bf16.mxu1 %vm2119_vm10, %v5892_v6  ;;  %v4176_v6 = vshll.u32 %v3972_v0, 16  ;;  %v4492_v52 = vrot.slane %v8810_v26, 5  ;;  %v4184_v34 = vrot.slane %v4182_v53, 5  ;;  %v5925_v31 = vrot.slane %v4407_v10, 9 }
 0x247   :  { %v4175_v54 = vrot.slane %v4173_v29, 4  ;;  %v4496_v14 = vrot.slane %v3971_v44, 5  ;;  %v4199_v51 = vsel %vm7172_vm2, %v4194_v35, %v4198_v12  ;;  %v4408_v29 = vld [vmem:[#allocation2 + $0x90] sm:$0xe]  ;;  %v4500_v37 = vrot.slane %v3973_v43, 5 }
 0x248   :  { %v4178_v4 = vrot.slane %v4176_v6, 5  ;;  %v4493_v47 = vsel %vm8066_vm8, %v5924_v21, %v4492_v52  ;;  %v4409_v6 = vld [vmem:[#allocation2 + $0x98] sm:$0xe]  ;;  %v4504_v57 = vrot.slane %v3975_v30, 5  ;;  %v5926_v25 = vrot.slane %v4408_v29, 9 }
 0x249   :  { %v4497_v26 = vsel %vm8066_vm8, %v5925_v31, %v4496_v14  ;;  %v5927_v19 = vrot.slane %v4409_v6, 9  ;;  %v8900_v12 = vld [vmem:[%s9017_s4] ss:$0 sm:$0xff]  ;;  %s7074_s4 = smov [#allocation4]  }
 0x24a   :  { %v4179_v50 = vor.u32 %v4178_v4, %v4175_v54 }
 0x24b   :  { %v5283_v63 = vpop.permute.xlu1 %5282  ;;  %v4505_v45 = vsel %vm8066_vm8, %v5927_v19, %v4504_v57 }
 0x24c   :  { %v4180_v0 = vrot.slane %v4179_v50, 4 }
 0x24d   :  { %6502 = vmatmul.mubr.msk.bf16.vlgmr.msra.gmra.mrb[0].mxu1 %vm2119_vm10, %v5893_v59  ;;  %v6995_v59 = vld [vmem:[#allocation2 + $0x7c] sm:$0x1] }
 0x24e   :  { %6505 = vmatprep.mubr.msk.bf16.mxu1 %vm2119_vm10, %v5894_v33  ;;  %6565 = vmatpush3.bf16.msra.mxu1 %v8777_v3  ;;  %v5281_v3 = vpop.permute.xlu0 %5280  ;;  %v4140_v5 = vshll.u32 %v6995_v59, 16  ;;  %v4171_v33 = vsel %vm7172_vm2, %v4166_v55, %v4170_v60 }
 0x24f   :  { %6562 = vmatprep.subr.bf16.mxu1 %v6993_v27  ;;  %6553 = vmatprep.mubr.msk.bf16.mxu0 %vm5300_vm15, %v5281_v3  ;;  %v5898_v1 = vcombine.low %v4157_v42, %v4171_v33  ;;  %v5942_v3 = vcombine.low %v4493_v47, %v4497_v26 }
 0x250   :  { %6554 = vmatmul.mubr.msk.bf16.gmra.mrb[52].mxu0 %vm5300_vm15, %v5283_v63  ;;  %v4142_v28 = vrot.slane %v4140_v5, 5 }
 0x252   :  { %6566 = vmatpush3.bf16.msra.mxu1 %v6993_v27  ;;  %v4143_v24 = vsel %vm7172_vm2, %v4138_v62, %v4142_v28  ;;  %v4185_v27 = vsel %vm7172_vm2, %v4180_v0, %v4184_v34  ;;  %v8905_v34 = vstv %s9018_s5  ;;  %s5477_s5 = sshll.u32 %s7074_s4, 4  ;;  %s5478_s5 = int_to_ptr.vmem [resolvable:$true] %s5477_s5 }
 0x253   :  { %6563 = vmatprep.subr.bf16.mxu1 %v6996_v7  ;;  %v5897_v8 = vcombine.low %v4129_v40, %v4143_v24  ;;  %v5899_v23 = vcombine.low %v4185_v27, %v4199_v51  ;;  %s7046_s27 = scalar_lea.vmem %s5478_s5, 2048  ;;  %p7051_p1 = scmp.lt.s32.totalorder %s5478_s5, %s5478_s5 }
 0x254   :  { %v5285_v2 = vpop.permute.xlu0 %5284  ;;  %v5287_v58 = vpop.permute.xlu1 %5286  ;;  %p7047_p0 = scmp.ne.s32.totalorder %s5478_s5, %s7046_s27  ;;  %p7052_p2 = scmp.lt.s32.totalorder %s7046_s27, %s7046_s27 }
 0x255   :  { %6506 = vmatmul.mubr.msk.bf16.gmra.mrb[4].mxu1 %vm2119_vm10, %v5895_v48  ;;  %6557 = vmatprep.mubr.msk.bf16.mxu0 %vm5300_vm15, %v5285_v2  ;;  %v4501_v48 = vsel %vm8066_vm8, %v5926_v25, %v4500_v37 }
 0x256   :  { %6509 = vmatprep.mubr.msk.bf16.mxu1 %vm2119_vm10, %v5896_v41  ;;  %6567 = vmatpush3.bf16.msra.mxu1 %v6996_v7  ;;  %v5943_v59 = vcombine.low %v4501_v48, %v4505_v45  ;;  %p7053_p3 = por %p7052_p2, %p7051_p1 }
 0x257   :  { %6564 = vmatprep.subr.bf16.mxu1 %v6997_v20 }
 0x258   :  { %6558 = vmatmul.mubr.msk.bf16.gmra.mrb[56].mxu0 %vm5300_vm15, %v5287_v58  ;;  %p7054_p4 = pnand %p7053_p3, %p7047_p0 }
 0x25a   :  { %6568 = vmatpush3.bf16.msra.mxu1 %v6997_v20 }
 0x25d   :  { %6510 = vmatmul.mubr.msk.bf16.gmra.mrb[8].mxu1 %vm2119_vm10, %v5897_v8 }
 0x25e   :  { %6513 = vmatprep.mubr.msk.bf16.mxu1 %vm2119_vm10, %v5898_v1 }
 0x265   :  { %6514 = vmatmul.mubr.msk.bf16.gmra.mrb[12].mxu1 %vm2119_vm10, %v5899_v23 }
 0x266   :  { %6537 = vmatprep.mubr.msk.bf16.mxu1 %vm2119_vm10, %v5942_v3 }
 0x26a   :  { %v6335_v32 = vpop.f32.mrb[16].mxu0 }
 0x26b   :  { %v2178_v15 = vpop.f32.mrb[17].mxu0 }
 0x26c   :  { %v6336_v63 = vpop.f32.mrb[18].mxu0 }
 0x26d   :  { %v2181_v39 = vpop.f32.mrb[19].mxu0 }
 0x271   :  { %6538 = vmatmul.mubr.msk.bf16.vlgmr.msra.gmra.mrb[12].mxu1 %vm2119_vm10, %v5943_v59 }
 0x273   :  { %v8853_v5 = vpop.f32.mrb[20].mxu0 }
 0x274   :  { %v8855_v44 = vpop.f32.mrb[21].mxu0 }
 0x275   :  { %v8857_v41 = vpop.f32.mrb[22].mxu0 }
 0x276   :  { %v8859_v62 = vpop.f32.mrb[23].mxu0 }
 0x27b   :  { %v8861_v17 = vpop.f32.mrb[24].mxu0 }
 0x27c   :  { %v8863_v13 = vpop.f32.mrb[25].mxu0 }
 0x27d   :  { %v8865_v7 = vpop.f32.mrb[26].mxu0 }
 0x27e   :  { %v8867_v56 = vpop.f32.mrb[27].mxu0 }
 0x283   :  { %v8869_v54 = vpop.f32.mrb[28].mxu0 }
 0x284   :  { %v8871_v4 = vpop.f32.mrb[29].mxu0 }
 0x285   :  { %v8873_v18 = vpop.f32.mrb[30].mxu0 }
 0x286   :  { %v8875_v38 = vpop.f32.mrb[31].mxu0 }
 0x28b   :  { %v6527_v36 = vpop.f32.mrb[32].mxu0 }
 0x28c   :  { %v4621_v46 = vpop.f32.mrb[33].mxu0 }
 0x28d   :  { %v6528_v9 = vpop.f32.mrb[34].mxu0 }
 0x28e   :  { %v4624_v28 = vpop.f32.mrb[35].mxu0 }
 0x293   :  { %v6531_v43 = vpop.f32.mrb[36].mxu0 }
 0x294   :  { %v8877_v16 = vpop.f32.mrb[37].mxu0 }
 0x295   :  { %v8879_v22 = vpop.f32.mrb[38].mxu0 }
 0x296   :  { %v8881_v55 = vpop.f32.mrb[39].mxu0 }
 0x29b   :  { %v8883_v30 = vpop.f32.mrb[40].mxu0 }
 0x29c   :  { %v8885_v20 = vpop.f32.mrb[41].mxu0 }
 0x29d   :  { %v8887_v24 = vpop.f32.mrb[42].mxu0 }
 0x29e   :  { %v8889_v50 = vpop.f32.mrb[43].mxu0 }
 0x308   :  { %v6547_v61 = vpop.f32.mrb[44].mxu0 }
 0x309   :  { %v5359_v49 = vpop.f32.mrb[45].mxu0  ;;  %v5368_v27 = vadd.f32 %v6547_v61, %v8900_v12 }
 0x30a   :  { %v6548_v42 = vpop.f32.mrb[46].mxu0  ;;  %v5360_v26 = vadd.f32 %v8900_v12, %v5359_v49 }
 0x30b   :  { %v5362_v60 = vpop.f32.mrb[47].mxu0  ;;  %v5371_v57 = vadd.f32 %v6548_v42, %v8900_v12 }
 0x30c   :  { %v5363_v59 = vadd.f32 %v8900_v12, %v5362_v60 }
 0x310   :  { %v6551_v40 = vpop.f32.mrb[48].mxu0 }
 0x311   :  { %v8891_v53 = vpop.f32.mrb[49].mxu0 }
 0x312   :  { %v8893_v11 = vpop.f32.mrb[50].mxu0 }
 0x313   :  { %v8895_v8 = vpop.f32.mrb[51].mxu0 }
 0x320   :  { %v6503_v33 = vpop.f32.mrb[0].mxu1 }
 0x321   :  { %v6569_v1 = vadd.f32 %v6503_v33, %v6335_v32  ;;  %v4315_v0 = vpop.f32.mrb[1].mxu1 }
 0x322   :  { %v6571_v35 = vadd.f32 %v4315_v0, %v2178_v15  ;;  %v6504_v10 = vpop.f32.mrb[2].mxu1 }
 0x323   :  { %v6570_v2 = vadd.f32 %v6569_v1, %v6527_v36  ;;  %v6573_v58 = vadd.f32 %v6504_v10, %v6336_v63  ;;  %v4318_v21 = vpop.f32.mrb[3].mxu1  ;;  %v8908_v47 = vpop.f32.mrb[52].mxu0 }
 0x324   :  { %v6572_v52 = vadd.f32 %v6571_v35, %v4621_v46  ;;  %v6575_v31 = vadd.f32 %v4318_v21, %v2181_v39  ;;  %v8911_v29 = vpop.f32.mrb[53].mxu0 }
 0x325   :  { %vm4702_vm2 = vcmp.gt.f32.partialorder %v6570_v2, 0.0  ;;  %v4718_v14 = vmul.f32 0.2, %v6570_v2  ;;  %v6574_v51 = vadd.f32 %v6573_v58, %v6528_v9  ;;  %v8914_v25 = vpop.f32.mrb[54].mxu0  ;;  %v5384_v58 = vadd.f32 %v6551_v40, %v8900_v12 }
 0x326   :  { %vm4700_vm8 = vcmp.gt.f32.partialorder %v6572_v52, 0.0  ;;  %v4716_v23 = vmul.f32 0.2, %v6572_v52  ;;  %v6576_v3 = vadd.f32 %v6575_v31, %v4624_v28  ;;  %v8917_v48 = vpop.f32.mrb[55].mxu0  ;;  %v5387_v31 = vadd.f32 %v8893_v11, %v8900_v12 }
 0x327   :  { %v4734_v6 = vsel %vm4702_vm2, %v6570_v2, %v4718_v14  ;;  %vm4703_vm0 = vcmp.gt.f32.partialorder %v6574_v51, 0.0  ;;  %v4719_v37 = vmul.f32 0.2, %v6574_v51 }
 0x328   :  { %v5426_v19 = vmul.f32 %v8905_v34, %v4734_v6  ;;  %v4732_v32 = vsel %vm4700_vm8, %v6572_v52, %v4716_v23  ;;  %vm4701_vm3 = vcmp.gt.f32.partialorder %v6576_v3, 0.0  ;;  %v4717_v15 = vmul.f32 0.2, %v6576_v3  ;;  %v6507_v63 = vpop.f32.mrb[4].mxu1 }
 0x329   :  { %v5424_v45 = vmul.f32 %v8905_v34, %v4732_v32  ;;  %v4735_v39 = vsel %vm4703_vm0, %v6574_v51, %v4719_v37  ;;  %v6577_v36 = vadd.f32 %v6507_v63, %v8853_v5  ;;  %v4331_v46 = vpop.f32.mrb[5].mxu1 }
 0x32a   :  { %v5442_v9 = vadd.f32 %v5426_v19, %v5368_v27  ;;  %v5427_v28 = vmul.f32 %v8905_v34, %v4735_v39  ;;  %v4733_v61 = vsel %vm4701_vm3, %v6576_v3, %v4717_v15  ;;  %v6579_v49 = vadd.f32 %v4331_v46, %v8855_v44  ;;  %v6508_v42 = vpop.f32.mrb[6].mxu1 }
 0x32b   :  { %v5440_v33 = vadd.f32 %v5424_v45, %v5360_v26  ;;  %v5425_v1 = vmul.f32 %v8905_v34, %v4733_v61  ;;  %v6578_v0 = vadd.f32 %v6577_v36, %v6531_v43  ;;  %v6581_v35 = vadd.f32 %v6508_v42, %v8857_v41  ;;  %v4334_v10 = vpop.f32.mrb[7].mxu1  ;;  %v8944_v6 = vpop.f32.mrb[56].mxu0 }
 0x32c   :  { %5458 = vst.msk [vmem:[#allocation4 + $0x10] sm:$0xff] %vm2119_vm10, %v5442_v9  ;;  %v5443_v60 = vadd.f32 %v5427_v28, %v5371_v57  ;;  %v6580_v5 = vadd.f32 %v6579_v49, %v8877_v16  ;;  %v6583_v2 = vadd.f32 %v4334_v10, %v8859_v62  ;;  %v5376_v16 = vadd.f32 %v8900_v12, %v8891_v53  ;;  %v8948_v15 = vpop.f32.mrb[57].mxu0 }
 0x32d   :  { %5456 = vst.msk [vmem:[#allocation4] sm:$0xff] %vm2119_vm10, %v5440_v33  ;;  %v5441_v44 = vadd.f32 %v5425_v1, %v5363_v59  ;;  %vm4706_vm4 = vcmp.gt.f32.partialorder %v6578_v0, 0.0  ;;  %v4722_v21 = vmul.f32 0.2, %v6578_v0  ;;  %v6582_v52 = vadd.f32 %v6581_v35, %v8879_v22  ;;  %v8953_v59 = vpop.f32.mrb[58].mxu0 }
 0x32e   :  { %5459 = vst.msk [vmem:[#allocation4 + $0x18] sm:$0xff] %vm2119_vm10, %v5443_v60  ;;  %vm4704_vm5 = vcmp.gt.f32.partialorder %v6580_v5, 0.0  ;;  %v4720_v41 = vmul.f32 0.2, %v6580_v5  ;;  %v6584_v43 = vadd.f32 %v6583_v2, %v8881_v55  ;;  %v5379_v53 = vadd.f32 %v8900_v12, %v8895_v8  ;;  %v8960_v28 = vpop.f32.mrb[59].mxu0 }
 0x32f   :  { %5457 = vst.msk [vmem:[#allocation4 + $0x8] sm:$0xff] %vm2119_vm10, %v5441_v44  ;;  %vm4707_vm6 = vcmp.gt.f32.partialorder %v6582_v52, 0.0  ;;  %v4723_v62 = vmul.f32 0.2, %v6582_v52  ;;  %v4738_v40 = vsel %vm4706_vm4, %v6578_v0, %v4722_v21  ;;  %v5400_v9 = vadd.f32 %v8908_v47, %v8900_v12 }
 0x330   :  { %vm4705_vm7 = vcmp.gt.f32.partialorder %v6584_v43, 0.0  ;;  %v4721_v14 = vmul.f32 0.2, %v6584_v43  ;;  %v5430_v22 = vmul.f32 %v8905_v34, %v4738_v40  ;;  %v4736_v27 = vsel %vm4704_vm5, %v6580_v5, %v4720_v41  ;;  %v6511_v51 = vpop.f32.mrb[8].mxu1 }
 0x331   :  { %v5428_v23 = vmul.f32 %v8905_v34, %v4736_v27  ;;  %v4739_v55 = vsel %vm4707_vm6, %v6582_v52, %v4723_v62  ;;  %v6585_v26 = vadd.f32 %v6511_v51, %v8861_v17  ;;  %v4347_v3 = vpop.f32.mrb[9].mxu1  ;;  %v5403_v33 = vadd.f32 %v8914_v25, %v8900_v12 }
 0x332   :  { %v5446_v37 = vadd.f32 %v5430_v22, %v5384_v58  ;;  %v5431_v11 = vmul.f32 %v8905_v34, %v4739_v55  ;;  %v4737_v57 = vsel %vm4705_vm7, %v6584_v43, %v4721_v14  ;;  %v6587_v19 = vadd.f32 %v4347_v3, %v8863_v13  ;;  %v6512_v32 = vpop.f32.mrb[10].mxu1 }
 0x333   :  { %v5444_v63 = vadd.f32 %v5428_v23, %v5376_v16  ;;  %v5429_v45 = vmul.f32 %v8905_v34, %v4737_v57  ;;  %v6586_v39 = vadd.f32 %v6585_v26, %v8883_v30  ;;  %v6589_v8 = vadd.f32 %v6512_v32, %v8865_v7  ;;  %v4350_v17 = vpop.f32.mrb[11].mxu1 }
 0x334   :  { %5462 = vst.msk [vmem:[#allocation4 + $0x30] sm:$0xff] %vm2119_vm10, %v5446_v37  ;;  %v5447_v36 = vadd.f32 %v5431_v11, %v5387_v31  ;;  %v6588_v46 = vadd.f32 %v6587_v19, %v8885_v20  ;;  %v6591_v13 = vadd.f32 %v4350_v17, %v8867_v56  ;;  %v5392_v56 = vadd.f32 %v8900_v12, %v8911_v29 }
 0x335   :  { %5460 = vst.msk [vmem:[#allocation4 + $0x20] sm:$0xff] %vm2119_vm10, %v5444_v63  ;;  %v5445_v30 = vadd.f32 %v5429_v45, %v5379_v53  ;;  %vm4710_vm9 = vcmp.gt.f32.partialorder %v6586_v39, 0.0  ;;  %v4726_v7 = vmul.f32 0.2, %v6586_v39  ;;  %v6590_v61 = vadd.f32 %v6589_v8, %v8887_v24 }
 0x336   :  { %5463 = vst.msk [vmem:[#allocation4 + $0x38] sm:$0xff] %vm2119_vm10, %v5447_v36  ;;  %vm4708_vm11 = vcmp.gt.f32.partialorder %v6588_v46, 0.0  ;;  %v4724_v49 = vmul.f32 0.2, %v6588_v46  ;;  %v6592_v20 = vadd.f32 %v6591_v13, %v8889_v50  ;;  %v5395_v50 = vadd.f32 %v8900_v12, %v8917_v48 }
 0x337   :  { %5461 = vst.msk [vmem:[#allocation4 + $0x28] sm:$0xff] %vm2119_vm10, %v5445_v30  ;;  %vm4711_vm12 = vcmp.gt.f32.partialorder %v6590_v61, 0.0  ;;  %v4727_v47 = vmul.f32 0.2, %v6590_v61  ;;  %v4742_v42 = vsel %vm4710_vm9, %v6586_v39, %v4726_v7  ;;  %v5416_v22 = vadd.f32 %v8944_v6, %v8900_v12 }
 0x338   :  { %vm4709_vm13 = vcmp.gt.f32.partialorder %v6592_v20, 0.0  ;;  %v4725_v1 = vmul.f32 0.2, %v6592_v20  ;;  %v5434_v24 = vmul.f32 %v8905_v34, %v4742_v42  ;;  %v4740_v0 = vsel %vm4708_vm11, %v6588_v46, %v4724_v49 }
 0x339   :  { %v5432_v35 = vmul.f32 %v8905_v34, %v4740_v0  ;;  %v4743_v10 = vsel %vm4711_vm12, %v6590_v61, %v4727_v47  ;;  %v5408_v55 = vadd.f32 %v8900_v12, %v8948_v15  ;;  %v5411_v11 = vadd.f32 %v8900_v12, %v8960_v28 }
 0x33a   :  { %v5450_v29 = vadd.f32 %v5434_v24, %v5400_v9  ;;  %v5435_v60 = vmul.f32 %v8905_v34, %v4743_v10  ;;  %v4741_v5 = vsel %vm4709_vm13, %v6592_v20, %v4725_v1 }
 0x33b   :  { %v5448_v2 = vadd.f32 %v5432_v35, %v5392_v56  ;;  %v5433_v58 = vmul.f32 %v8905_v34, %v4741_v5 }
 0x33c   :  { %5466 = vst.msk [vmem:[#allocation4 + $0x50] sm:$0xff] %vm2119_vm10, %v5450_v29  ;;  %v5451_v25 = vadd.f32 %v5435_v60, %v5403_v33 }
 0x33d   :  { %5464 = vst.msk [vmem:[#allocation4 + $0x40] sm:$0xff] %vm2119_vm10, %v5448_v2  ;;  %v5449_v44 = vadd.f32 %v5433_v58, %v5395_v50 }
 0x33e   :  { %5467 = vst.msk [vmem:[#allocation4 + $0x58] sm:$0xff] %vm2119_vm10, %v5451_v25 }
 0x33f   :  { %5465 = vst.msk [vmem:[#allocation4 + $0x48] sm:$0xff] %vm2119_vm10, %v5449_v44 }
 0x344   :  { %v6539_v21 = vpop.f32.mrb[12].mxu1 }
 0x345   :  { %v6593_v48 = vadd.f32 %v6539_v21, %v8869_v54  ;;  %v4669_v52 = vpop.f32.mrb[13].mxu1 }
 0x346   :  { %v6594_v41 = vadd.f32 %v4669_v52, %v8871_v4  ;;  %v6540_v43 = vpop.f32.mrb[14].mxu1 }
 0x347   :  { %vm4714_vm14 = vcmp.gt.f32.partialorder %v6593_v48, 0.0  ;;  %v4730_v16 = vmul.f32 0.2, %v6593_v48  ;;  %v6595_v62 = vadd.f32 %v6540_v43, %v8873_v18  ;;  %v4672_v40 = vpop.f32.mrb[15].mxu1 }
 0x348   :  { %vm4712_vm1 = vcmp.gt.f32.partialorder %v6594_v41, 0.0  ;;  %v4728_v31 = vmul.f32 0.2, %v6594_v41  ;;  %v6596_v14 = vadd.f32 %v4672_v40, %v8875_v38  ;;  %v5419_v38 = vadd.f32 %v8953_v59, %v8900_v12 }
 0x349   :  { %v4746_v27 = vsel %vm4714_vm14, %v6593_v48, %v4730_v16  ;;  %vm4715_vm15 = vcmp.gt.f32.partialorder %v6595_v62, 0.0  ;;  %v4731_v51 = vmul.f32 0.2, %v6595_v62 }
 0x34a   :  { %v5438_v54 = vmul.f32 %v8905_v34, %v4746_v27  ;;  %v4744_v23 = vsel %vm4712_vm1, %v6594_v41, %v4728_v31  ;;  %vm4713_vm2 = vcmp.gt.f32.partialorder %v6596_v14, 0.0  ;;  %v4729_v4 = vmul.f32 0.2, %v6596_v14 }
 0x34b   :  { %v5436_v18 = vmul.f32 %v8905_v34, %v4744_v23  ;;  %v4747_v53 = vsel %vm4715_vm15, %v6595_v62, %v4731_v51 }
 0x34c   :  { %v5454_v26 = vadd.f32 %v5438_v54, %v5416_v22  ;;  %v5439_v3 = vmul.f32 %v8905_v34, %v4747_v53  ;;  %v4745_v6 = vsel %vm4713_vm2, %v6596_v14, %v4729_v4 }
 0x34d   :  { %v5452_v37 = vadd.f32 %v5436_v18, %v5408_v55  ;;  %v5437_v57 = vmul.f32 %v8905_v34, %v4745_v6 }
 0x34e   :  { %5470 = vst.msk [vmem:[#allocation4 + $0x70] sm:$0xff] %vm2119_vm10, %v5454_v26  ;;  %v5455_v19 = vadd.f32 %v5439_v3, %v5419_v38 }
 0x34f   :  { %5468 = vst.msk [vmem:[#allocation4 + $0x60] sm:$0xff] %vm2119_vm10, %v5452_v37  ;;  %v5453_v32 = vadd.f32 %v5437_v57, %v5411_v11 }
 0x350   :  { %5471 = vst.msk [vmem:[#allocation4 + $0x78] sm:$0xff] %vm2119_vm10, %v5455_v19 }
 0x351   :  { %5469 = vst.msk [vmem:[#allocation4 + $0x68] sm:$0xff] %vm2119_vm10, %v5453_v32 }
 0x352   :  { %7057 = shalt.err (!%p7054_p4)
}
 0x353   :  { %s7058_s30 = scalar_lea.hbm %s9019_s6, 2048 }
 0x354   :  { %p7059_p5 = scmp.ne.s32.totalorder %s9019_s6, %s7058_s30  ;;  %p7062_p6 = scmp.lt.u32.totalorder %s7058_s30, %s9019_s6 }
 0x356   :  { %p7064_p7 = pnand %p7062_p6, %p7059_p5 }
 0x358   :  { %7067 = shalt.err (!%p7064_p7)
}
 0x359   :  { %s7075_s11 = smov 128   ;;  %s7076_s1 = smov 8  }
 0x35a   :  { %5483 = dma.vmem_to_hbm [thread:$0]  %s5478_s5, 2048, %s9019_s6, [#allocation5], %s7075_s11, %s7075_s11, %s7076_s1  }
 0x35b   :  { %7068 = dma.done.wait [#allocation5], 2048  }
 0x35c   :  { %7069 = vsyncadd [#allocation5], 4294965248 }
 0x35d   :  { %5487 = vsyncpa [#allocation5], 1 }

// kernel: tpu_custom_call.1
= control target key start
LH: loop header
LB: loop body
LE: loop exit
PB: predicated region body
PF: predicated region fallthrough
CT: control target
= control target key end

     0   :  { %vm74_vm0 = vsmask.f32 3328  ;;  %vm75_vm1 = vsmask.f32 7440  ;;  %vm4844_vm3 = vcmask 1046528   ;;  %s7070_s9 = smov 32   ;;  %s9013_s0 = inlined_call_operand.vmem [shape: bf16[2,9,9,128], index: 0, kind: input, shape index: {}]   ;;  %s9014_s1 = inlined_call_operand.vmem [shape: bf16[4,128,64], index: 1, kind: input, shape index: {}]   ;;  %s9015_s2 = inlined_call_operand.vmem [shape: bf16[9,64,64], index: 2, kind: input, shape index: {}]   ;;  %s9016_s3 = inlined_call_operand.vmem [shape: bf16[32,64], index: 3, kind: input, shape index: {}]   ;;  %s9017_s4 = inlined_call_operand.vmem [shape: f32[1,64], index: 4, kind: input, shape index: {}]   ;;  %s9018_s5 = inlined_call_operand.<no memory space> [shape: f32[1], index: 5, kind: input, shape index: {}]   ;;  %s9019_s6 = inlined_call_operand.hbm [shape: f32[2,64,64], index: 6, kind: output, shape index: {}]  }
   0x1   :  { %v6872_v0 = vld [vmem:[%s9014_s1 + $0x40] sm:$0xff]   ;;  %v6873_v1 = vld [vmem:[%s9014_s1 + $0x48] sm:$0xff]   ;;  %v6874_v2 = vld [vmem:[%s9014_s1 + $0x50] sm:$0xff]   ;;  %s7071_s12 = smov 64   ;;  %s7072_s16 = smov 96  }
   0x2   :  { %6197 = vmatprep.subr.bf16.mxu0 %v6872_v0  ;;  %v6875_v3 = vld [vmem:[%s9014_s1 + $0x58] sm:$0xff]   ;;  %v7127_v4 = vld [vmem:[%s9013_s0] sm:$0xf]  ;;  %v7132_v5 = vld [vmem:[%s9013_s0 + $0x8] sm:$0xf] }
   0x3   :  { %6198 = vmatpush3.bf16.msra.mxu0 %v6872_v0  ;;  %v58_v6 = vld [vmem:[%s9013_s0 + $0x4] sm:$0x1]  ;;  %v59_v7 = vld [vmem:[%s9013_s0 + $0xc] sm:$0x1]  ;;  %v78_v9 = vshrl.u32 %v7127_v4, 16  ;;  %v81_v10 = vshll.u32 %v7127_v4, 16  ;;  %vm7172_vm2 = vmor %vm74_vm0, %vm75_vm1 }
   0x4   :  { %6199 = vmatprep.subr.bf16.mxu0 %v6873_v1  ;;  %v6876_v8 = vld [vmem:[%s9014_s1 + $0x60] sm:$0xff]   ;;  %v87_v11 = vshll.u32 %v58_v6, 16  ;;  %v92_v12 = vshrl.u32 %v7132_v5, 16  ;;  %v7149_v13 = vld [vmem:[%s9013_s0 + $0x10] sm:$0xf]  ;;  %v95_v14 = vshll.u32 %v7132_v5, 16 }
   0x5   :  { %v101_v15 = vshll.u32 %v59_v7, 16  ;;  %v7155_v16 = vld [vmem:[%s9013_s0 + $0x18] sm:$0xf]  ;;  %v60_v17 = vld [vmem:[%s9013_s0 + $0x14] sm:$0x1]  ;;  %v80_v18 = vrot.slane %v78_v9, 4 }
   0x6   :  { %v83_v19 = vrot.slane %v81_v10, 5  ;;  %v89_v20 = vrot.slane %v87_v11, 5  ;;  %v94_v21 = vrot.slane %v92_v12, 4  ;;  %v61_v22 = vld [vmem:[%s9013_s0 + $0x1c] sm:$0x1]  ;;  %v97_v23 = vrot.slane %v95_v14, 5 }
   0x7   :  { %6200 = vmatpush3.bf16.msra.mxu0 %v6873_v1  ;;  %v103_v24 = vrot.slane %v101_v15, 5  ;;  %v106_v25 = vshrl.u32 %v7149_v13, 16  ;;  %v109_v26 = vshll.u32 %v7149_v13, 16  ;;  %v115_v28 = vshll.u32 %v60_v17, 16  ;;  %v6877_v31 = vld [vmem:[%s9014_s1 + $0x68] sm:$0xff]   ;;  %v6878_v57 = vld [vmem:[%s9014_s1 + $0x70] sm:$0xff]  }
   0x8   :  { %6201 = vmatprep.subr.bf16.mxu0 %v6874_v2  ;;  %v84_v27 = vor.u32 %v83_v19, %v80_v18  ;;  %v120_v29 = vshrl.u32 %v7155_v16, 16  ;;  %v123_v30 = vshll.u32 %v7155_v16, 16  ;;  %v98_v33 = vor.u32 %v97_v23, %v94_v21  ;;  %v7183_v44 = vld [vmem:[%s9013_s0 + $0x20] sm:$0xf]  ;;  %v7188_v45 = vld [vmem:[%s9013_s0 + $0x28] sm:$0xf] }
   0x9   :  { %v108_v34 = vrot.slane %v106_v25, 4  ;;  %v111_v35 = vrot.slane %v109_v26, 5  ;;  %v129_v36 = vshll.u32 %v61_v22, 16  ;;  %v7176_v38 = vrot.slane %v115_v28, 5  ;;  %v62_v48 = vld [vmem:[%s9013_s0 + $0x24] sm:$0x1] }
   0xa   :  { %v85_v37 = vrot.slane %v84_v27, 4  ;;  %v122_v39 = vrot.slane %v120_v29, 4  ;;  %v125_v40 = vrot.slane %v123_v30, 5  ;;  %v99_v41 = vrot.slane %v98_v33, 4  ;;  %v63_v49 = vld [vmem:[%s9013_s0 + $0x2c] sm:$0x1] }
   0xb   :  { %6202 = vmatpush3.bf16.msra.mxu0 %v6874_v2  ;;  %v112_v42 = vor.u32 %v111_v35, %v108_v34  ;;  %v7178_v43 = vrot.slane %v129_v36, 5  ;;  %v134_v50 = vshrl.u32 %v7183_v44, 16  ;;  %v137_v51 = vshll.u32 %v7183_v44, 16  ;;  %v7206_v56 = vld [vmem:[%s9013_s0 + $0x30] sm:$0xf]  ;;  %v6879_v2 = vld [vmem:[%s9014_s1 + $0x78] sm:$0xff]  }
   0xc   :  { %6203 = vmatprep.subr.bf16.mxu0 %v6875_v3  ;;  %v90_v46 = vsel %vm7172_vm2, %v85_v37, %v89_v20  ;;  %v126_v47 = vor.u32 %v125_v40, %v122_v39  ;;  %v104_v52 = vsel %vm7172_vm2, %v99_v41, %v103_v24  ;;  %v143_v54 = vshll.u32 %v62_v48, 16  ;;  %v7215_v0 = vld [vmem:[%s9013_s0 + $0x38] sm:$0xf]  ;;  %v64_v1 = vld [vmem:[%s9013_s0 + $0x34] sm:$0x1]  ;;  %v6880_v35 = vld [vmem:[%s9014_s1] sm:$0xff]  }
   0xd   :  { %v113_v53 = vrot.slane %v112_v42, 4  ;;  %v148_v55 = vshrl.u32 %v7188_v45, 16  ;;  %v5504_v58 = vcombine.low %v90_v46, %v104_v52  ;;  %v136_v60 = vrot.slane %v134_v50, 4  ;;  %v65_v7 = vld [vmem:[%s9013_s0 + $0x3c] sm:$0x1] }
   0xe   :  { %v127_v59 = vrot.slane %v126_v47, 4  ;;  %v139_v61 = vrot.slane %v137_v51, 5  ;;  %v151_v63 = vshll.u32 %v7188_v45, 16  ;;  %v157_v6 = vshll.u32 %v63_v49, 16  ;;  %v7239_v27 = vld [vmem:[%s9013_s0 + $0x48] sm:$0xf] }
   0xf   :  { %6204 = vmatpush3.bf16.msra.mxu0 %v6875_v3  ;;  %v150_v62 = vrot.slane %v148_v55, 4  ;;  %6213 = vmatprep.mubr.bf16.mxu0 %v5504_v58  ;;  %v145_v9 = vrot.slane %v143_v54, 5  ;;  %v165_v11 = vshll.u32 %v7206_v56, 16  ;;  %v171_v12 = vshll.u32 %v64_v1, 16  ;;  %v7244_v28 = vld [vmem:[%s9013_s0 + $0x50] sm:$0xf] }
  0x10   :  { %6205 = vmatprep.subr.bf16.mxu0 %v6876_v8  ;;  %v140_v3 = vor.u32 %v139_v61, %v136_v60  ;;  %v153_v10 = vrot.slane %v151_v63, 5  ;;  %v159_v15 = vrot.slane %v157_v6, 5  ;;  %v176_v18 = vshrl.u32 %v7215_v0, 16  ;;  %v66_v34 = vld [vmem:[%s9013_s0 + $0x4c] sm:$0x1] }
  0x11   :  { %v167_v20 = vrot.slane %v165_v11, 5  ;;  %v173_v21 = vrot.slane %v171_v12, 5  ;;  %v179_v22 = vshll.u32 %v7215_v0, 16  ;;  %v118_v23 = vsel %vm7172_vm2, %v113_v53, %v7176_v38  ;;  %v7265_v47 = vld [vmem:[%s9013_s0 + $0x58] sm:$0xf]  ;;  %v6882_v11 = vld [vmem:[%s9014_s1 + $0x10] sm:$0xff]  }
  0x12   :  { %v141_v14 = vrot.slane %v140_v3, 4  ;;  %v154_v19 = vor.u32 %v153_v10, %v150_v62  ;;  %v132_v24 = vsel %vm7172_vm2, %v127_v59, %v7178_v43  ;;  %v178_v25 = vrot.slane %v176_v18, 4  ;;  %v67_v43 = vld [vmem:[%s9013_s0 + $0x54] sm:$0x1]  ;;  %v7270_v52 = vld [vmem:[%s9013_s0 + $0x60] sm:$0xf] }
  0x13   :  { %6206 = vmatpush3.bf16.msra.mxu0 %v6876_v8  ;;  %v162_v8 = vshrl.u32 %v7206_v56, 16  ;;  %v185_v26 = vshll.u32 %v65_v7, 16  ;;  %v181_v33 = vrot.slane %v179_v22, 5  ;;  %v190_v37 = vshrl.u32 %v7239_v27, 16  ;;  %v68_v53 = vld [vmem:[%s9013_s0 + $0x5c] sm:$0x1] }
  0x14   :  { %6207 = vmatprep.subr.bf16.mxu0 %v6877_v31  ;;  %v146_v29 = vsel %vm7172_vm2, %v141_v14, %v145_v9  ;;  %v155_v30 = vrot.slane %v154_v19, 4  ;;  %v193_v38 = vshll.u32 %v7239_v27, 16  ;;  %v199_v39 = vshll.u32 %v66_v34, 16  ;;  %v6881_v59 = vld [vmem:[%s9014_s1 + $0x8] sm:$0xff]   ;;  %v69_v6 = vld [vmem:[%s9013_s0 + $0x64] sm:$0x1] }
  0x15   :  { %v164_v17 = vrot.slane %v162_v8, 4  ;;  %v187_v36 = vrot.slane %v185_v26, 5  ;;  %v182_v42 = vor.u32 %v181_v33, %v178_v25  ;;  %v204_v46 = vshrl.u32 %v7244_v28, 16  ;;  %v7295_v18 = vld [vmem:[%s9013_s0 + $0x68] sm:$0xf] }
  0x16   :  { %v160_v40 = vsel %vm7172_vm2, %v155_v30, %v159_v15  ;;  %v5505_v48 = vcombine.low %v118_v23, %v132_v24  ;;  %v192_v50 = vrot.slane %v190_v37, 4  ;;  %v195_v51 = vrot.slane %v193_v38, 5  ;;  %v7303_v23 = vld [vmem:[%s9013_s0 + $0x70] sm:$0xf]  ;;  %v70_v24 = vld [vmem:[%s9013_s0 + $0x6c] sm:$0x1] }
  0x17   :  { %6208 = vmatpush3.bf16.msra.mxu0 %v6877_v31  ;;  %v168_v31 = vor.u32 %v167_v20, %v164_v17  ;;  %v5506_v49 = vcombine.low %v146_v29, %v160_v40  ;;  %v183_v54 = vrot.slane %v182_v42, 4  ;;  %v201_v55 = vrot.slane %v199_v39, 5  ;;  %v71_v34 = vld [vmem:[%s9013_s0 + $0x74] sm:$0x1]  ;;  %v6883_v37 = vld [vmem:[%s9014_s1 + $0x18] sm:$0xff]  }
  0x18   :  { %6209 = vmatprep.subr.bf16.mxu0 %v6878_v57  ;;  %v207_v58 = vshll.u32 %v7244_v28, 16  ;;  %v196_v60 = vor.u32 %v195_v51, %v192_v50  ;;  %v213_v61 = vshll.u32 %v67_v43, 16  ;;  %v218_v62 = vshrl.u32 %v7265_v47, 16  ;;  %v7322_v42 = vld [vmem:[%s9013_s0 + $0x78] sm:$0xf] }
  0x19   :  { %v169_v41 = vrot.slane %v168_v31, 4  ;;  %v221_v63 = vshll.u32 %v7265_v47, 16  ;;  %v232_v7 = vshrl.u32 %v7270_v52, 16  ;;  %v227_v10 = vshll.u32 %v68_v53, 16  ;;  %v7327_v50 = vld [vmem:[%s9013_s0 + $0x80] sm:$0xf] }
  0x1a   :  { %v209_v3 = vrot.slane %v207_v58, 5  ;;  %v197_v8 = vrot.slane %v196_v60, 4  ;;  %v220_v9 = vrot.slane %v218_v62, 4  ;;  %v215_v14 = vrot.slane %v213_v61, 5  ;;  %v72_v51 = vld [vmem:[%s9013_s0 + $0x7c] sm:$0x1] }
  0x1b   :  { %6210 = vmatpush3.bf16.msra.mxu0 %v6878_v57  ;;  %v206_v57 = vrot.slane %v204_v46, 4  ;;  %v174_v1 = vsel %vm7172_vm2, %v169_v41, %v173_v21  ;;  %v223_v15 = vrot.slane %v221_v63, 5  ;;  %v234_v17 = vrot.slane %v232_v7, 4 }
  0x1c   :  { %6211 = vmatprep.subr.bf16.mxu0 %v6879_v2  ;;  %v202_v20 = vsel %vm7172_vm2, %v197_v8, %v201_v55  ;;  %v235_v21 = vshll.u32 %v7270_v52, 16  ;;  %v241_v22 = vshll.u32 %v69_v6, 16  ;;  %v246_v29 = vshrl.u32 %v7295_v18, 16  ;;  %v6884_v6 = vld [vmem:[%s9014_s1 + $0x20] sm:$0xff]  }
  0x1d   :  { %v210_v12 = vor.u32 %v209_v3, %v206_v57  ;;  %v224_v26 = vor.u32 %v223_v15, %v220_v9  ;;  %v249_v30 = vshll.u32 %v7295_v18, 16  ;;  %v229_v31 = vrot.slane %v227_v10, 5  ;;  %v73_v57 = vld [vmem:[%s9013_s0 + $0x84] sm:$0x1] }
  0x1e   :  { %v237_v33 = vrot.slane %v235_v21, 5  ;;  %v248_v40 = vrot.slane %v246_v29, 4  ;;  %v269_v55 = vshll.u32 %v71_v34, 16  ;;  %v274_v60 = vshrl.u32 %v7322_v42, 16 }
  0x1f   :  { %6212 = vmatpush3.bf16.msra.mxu0 %v6879_v2  ;;  %v188_v2 = vsel %vm7172_vm2, %v183_v54, %v187_v36  ;;  %v211_v25 = vrot.slane %v210_v12, 4  ;;  %v260_v36 = vshrl.u32 %v7303_v23, 16  ;;  %v225_v39 = vrot.slane %v224_v26, 4 }
  0x20   :  { %6229 = vmatprep.subr.bf16.mxu0 %v6880_v35  ;;  %v5507_v19 = vcombine.low %v174_v1, %v188_v2  ;;  %v251_v41 = vrot.slane %v249_v30, 5  ;;  %v238_v46 = vor.u32 %v237_v33, %v234_v17  ;;  %v263_v54 = vshll.u32 %v7303_v23, 16 }
  0x21   :  { %v216_v38 = vsel %vm7172_vm2, %v211_v25, %v215_v14  ;;  %v277_v61 = vshll.u32 %v7322_v42, 16  ;;  %v230_v62 = vsel %vm7172_vm2, %v225_v39, %v229_v31  ;;  %v288_v2 = vshrl.u32 %v7327_v50, 16 }
  0x22   :  { %6214 = vmatmul.mubr.bf16.vlgmr.msra.gmra.mrb[0].mxu0 %v5505_v48  ;;  %v5508_v43 = vcombine.low %v202_v20, %v216_v38  ;;  %v243_v48 = vrot.slane %v241_v22, 5  ;;  %v252_v53 = vor.u32 %v251_v41, %v248_v40  ;;  %v239_v58 = vrot.slane %v238_v46, 4  ;;  %v6885_v20 = vld [vmem:[%s9014_s1 + $0x28] sm:$0xff]   ;;  %v6887_v40 = vld [vmem:[%s9014_s1 + $0x38] sm:$0xff]   ;;  %v6890_v41 = vld [vmem:[%s9014_s1 + $0x80] sm:$0xff]  }
  0x23   :  { %6230 = vmatpush3.bf16.msra.mxu0 %v6880_v35  ;;  %6217 = vmatprep.mubr.bf16.mxu0 %v5506_v49  ;;  %v255_v35 = vshll.u32 %v70_v24, 16  ;;  %v262_v49 = vrot.slane %v260_v36, 4  ;;  %v265_v1 = vrot.slane %v263_v54, 5  ;;  %v276_v7 = vrot.slane %v274_v60, 4  ;;  %v6886_v36 = vld [vmem:[%s9014_s1 + $0x30] sm:$0xff]  }
  0x24   :  { %6231 = vmatprep.subr.bf16.mxu0 %v6881_v59  ;;  %v253_v63 = vrot.slane %v252_v53, 4  ;;  %v244_v3 = vsel %vm7172_vm2, %v239_v58, %v243_v48  ;;  %v279_v8 = vrot.slane %v277_v61, 5  ;;  %v283_v9 = vshll.u32 %v72_v51, 16  ;;  %v5584_v46 = vld [vmem:[%s9013_s0 + $0x8] sm:$0xf] }
  0x25   :  { %v266_v10 = vor.u32 %v265_v1, %v262_v49  ;;  %v290_v12 = vrot.slane %v288_v2, 4  ;;  %v5509_v14 = vcombine.low %v230_v62, %v244_v3  ;;  %v291_v17 = vshll.u32 %v7327_v50, 16  ;;  %v5588_v49 = vld [vmem:[%s9013_s0 + $0x18] sm:$0xf]  ;;  %v5590_v53 = vld [vmem:[%s9013_s0 + $0x20] sm:$0xf] }
  0x26   :  { %v280_v15 = vor.u32 %v279_v8, %v276_v7  ;;  %v285_v25 = vrot.slane %v283_v9, 5  ;;  %v5520_v39 = vcombine.low %v7127_v4, %v7132_v5  ;;  %v5522_v4 = vcombine.low %v7183_v44, %v7188_v45  ;;  %v6891_v5 = vld [vmem:[%s9014_s1 + $0x88] sm:$0xff]   ;;  %v5587_v61 = vld [vmem:[%s9013_s0 + $0x14] sm:$0x1]  ;;  %v5589_v1 = vld [vmem:[%s9013_s0 + $0x1c] sm:$0x1] }
  0x27   :  { %6232 = vmatpush3.bf16.msra.mxu0 %v6881_v59  ;;  %v257_v59 = vrot.slane %v255_v35, 5  ;;  %v267_v22 = vrot.slane %v266_v10, 4  ;;  %v293_v26 = vrot.slane %v291_v17, 5  ;;  %v964_v44 = vshrl.u32 %v5584_v46, 16  ;;  %v5585_v60 = vld [vmem:[%s9013_s0 + $0xc] sm:$0x1] }
  0x28   :  { %6233 = vmatprep.subr.bf16.mxu0 %v6882_v11  ;;  %v281_v24 = vrot.slane %v280_v15, 4  ;;  %v967_v45 = vshll.u32 %v5584_v46, 16  ;;  %v5523_v54 = vcombine.low %v7206_v56, %v7215_v0  ;;  %v992_v62 = vshrl.u32 %v5588_v49, 16  ;;  %v5592_v7 = vld [vmem:[%s9013_s0 + $0x28] sm:$0xf]  ;;  %v6898_v15 = vld [vmem:[%s9014_s1 + $0xa0] sm:$0xff]  }
  0x29   :  { %v258_v21 = vsel %vm7172_vm2, %v253_v63, %v257_v59  ;;  %v294_v33 = vor.u32 %v293_v26, %v290_v12  ;;  %v5524_v59 = vcombine.low %v7239_v27, %v7244_v28  ;;  %v995_v56 = vshll.u32 %v5588_v49, 16  ;;  %v5594_v12 = vld [vmem:[%s9013_s0 + $0x30] sm:$0xf]  ;;  %v5596_v26 = vld [vmem:[%s9013_s0 + $0x38] sm:$0xf] }
  0x2a   :  { %6218 = vmatmul.mubr.bf16.gmra.mrb[4].mxu0 %v5507_v19  ;;  %v297_v19 = vshll.u32 %v73_v57, 16  ;;  %v286_v34 = vsel %vm7172_vm2, %v281_v24, %v285_v25  ;;  %v966_v57 = vrot.slane %v964_v44, 4  ;;  %v969_v58 = vrot.slane %v967_v45, 5  ;;  %v5597_v49 = vld [vmem:[%s9013_s0 + $0x3c] sm:$0x1] }
  0x2b   :  { %6234 = vmatpush3.bf16.msra.mxu0 %v6882_v11  ;;  %6221 = vmatprep.mubr.bf16.mxu0 %v5508_v43  ;;  %v271_v11 = vrot.slane %v269_v55, 5  ;;  %v295_v35 = vrot.slane %v294_v33, 4  ;;  %v5521_v43 = vcombine.low %v7149_v13, %v7155_v16  ;;  %v5586_v13 = vld [vmem:[%s9013_s0 + $0x10] sm:$0xf]  ;;  %v6895_v55 = vld [vmem:[%s9014_s1 + $0x98] sm:$0xff]   ;;  %v1006_v2 = vshrl.u32 %v5590_v53, 16 }
  0x2c   :  { %6235 = vmatprep.subr.bf16.mxu0 %v6883_v37  ;;  %v299_v29 = vrot.slane %v297_v19, 5  ;;  %v6894_v16 = vld [vmem:[%s9014_s1 + $0x90] sm:$0xff]   ;;  %v978_v48 = vshrl.u32 %v5586_v13, 16  ;;  %v981_v51 = vshll.u32 %v5586_v13, 16  ;;  %v1009_v3 = vshll.u32 %v5590_v53, 16 }
  0x2d   :  { %v272_v30 = vsel %vm7172_vm2, %v267_v22, %v271_v11  ;;  %v970_v27 = vor.u32 %v969_v58, %v966_v57  ;;  %v973_v28 = vshll.u32 %v5585_v60, 16  ;;  %v987_v8 = vshll.u32 %v5587_v61, 16  ;;  %v5600_v13 = vld [vmem:[%s9013_s0 + $0x50] sm:$0xf]  ;;  %v5602_v58 = vld [vmem:[%s9013_s0 + $0x58] sm:$0xf] }
  0x2e   :  { %v5510_v31 = vcombine.low %v258_v21, %v272_v30  ;;  %v980_v0 = vrot.slane %v978_v48, 4  ;;  %v983_v63 = vrot.slane %v981_v51, 5  ;;  %v994_v9 = vrot.slane %v992_v62, 4  ;;  %v5593_v30 = vld [vmem:[%s9013_s0 + $0x2c] sm:$0x1] }
  0x2f   :  { %6236 = vmatpush3.bf16.msra.mxu0 %v6883_v37  ;;  %v300_v37 = vsel %vm7172_vm2, %v295_v35, %v299_v29  ;;  %v997_v10 = vrot.slane %v995_v56, 5  ;;  %v1001_v11 = vshll.u32 %v5589_v1, 16  ;;  %v1008_v19 = vrot.slane %v1006_v2, 4  ;;  %v5598_v35 = vld [vmem:[%s9013_s0 + $0x40] sm:$0xf] }
  0x30   :  { %6237 = vmatprep.subr.bf16.mxu0 %v6884_v6  ;;  %v5511_v38 = vcombine.low %v286_v34, %v300_v37  ;;  %v984_v17 = vor.u32 %v983_v63, %v980_v0  ;;  %v5526_v21 = vcombine.low %v7295_v18, %v7303_v23  ;;  %v1020_v24 = vshrl.u32 %v5592_v7, 16  ;;  %v5599_v61 = vld [vmem:[%s9013_s0 + $0x44] sm:$0x1]  ;;  %v6904_v0 = vld [vmem:[%s9013_s0 + $0x8] ss:$8 sps:$4 sm:$0xff]  }
  0x31   :  { %v1023_v25 = vshll.u32 %v5592_v7, 16  ;;  %v7430_v29 = vrot.slane %v973_v28, 5  ;;  %v7435_v18 = vrot.slane %v987_v8, 5  ;;  %v998_v23 = vor.u32 %v997_v10, %v994_v9  ;;  %v5603_v7 = vld [vmem:[%s9013_s0 + $0x5c] sm:$0x1] }
  0x32   :  { %6222 = vmatmul.mubr.bf16.gmra.mrb[8].mxu0 %v5509_v14  ;;  %v5525_v14 = vcombine.low %v7265_v47, %v7270_v52  ;;  %v5527_v47 = vcombine.low %v7322_v42, %v7327_v50  ;;  %v7428_v52 = vrot.slane %v970_v27, 4  ;;  %v7437_v33 = vrot.slane %v1001_v11, 5  ;;  %v5608_v42 = vld [vmem:[%s9013_s0 + $0x70] sm:$0xf]  ;;  %v6905_v50 = vld [vmem:[%s9013_s0 + $0x18] ss:$8 sps:$4 sm:$0xff]  }
  0x33   :  { %6238 = vmatpush3.bf16.msra.mxu0 %v6884_v6  ;;  %6225 = vmatprep.mubr.bf16.mxu0 %v5510_v31  ;;  %v5591_v6 = vld [vmem:[%s9013_s0 + $0x24] sm:$0x1]  ;;  %v1034_v31 = vshrl.u32 %v5594_v12, 16  ;;  %v1037_v34 = vshll.u32 %v5594_v12, 16  ;;  %v7445_v37 = vrot.slane %v984_v17, 4  ;;  %v1029_v46 = vshll.u32 %v5593_v30, 16 }
  0x34   :  { %6239 = vmatprep.subr.bf16.mxu0 %v6885_v20  ;;  %v1015_v22 = vshll.u32 %v5591_v6, 16  ;;  %v976_v44 = vsel %vm7172_vm2, %v7428_v52, %v7430_v29  ;;  %v1062_v51 = vshrl.u32 %v5598_v35, 16  ;;  %v7465_v53 = vrot.slane %v998_v23, 4  ;;  %v6903_v17 = vld [vmem:[%s9014_s1 + $0xb8] sm:$0xff]   ;;  %v5614_v52 = vld [vmem:[%s9013_s0 + $0x88] sm:$0xf] }
  0x35   :  { %v1036_v45 = vrot.slane %v1034_v31, 4  ;;  %v1039_v48 = vrot.slane %v1037_v34, 5  ;;  %v1065_v57 = vshll.u32 %v5598_v35, 16  ;;  %v1076_v56 = vshrl.u32 %v5600_v13, 16 }
  0x36   :  { %v1064_v62 = vrot.slane %v1062_v51, 4  ;;  %v7478_v1 = vrot.slane %v1029_v46, 5  ;;  %v1079_v27 = vshll.u32 %v5600_v13, 16  ;;  %v1057_v6 = vshll.u32 %v5597_v49, 16 }
  0x37   :  { %6240 = vmatpush3.bf16.msra.mxu0 %v6885_v20  ;;  %v1011_v20 = vrot.slane %v1009_v3, 5  ;;  %v1067_v2 = vrot.slane %v1065_v57, 5  ;;  %v5601_v3 = vld [vmem:[%s9013_s0 + $0x54] sm:$0x1]  ;;  %v1040_v28 = vor.u32 %v1039_v48, %v1036_v45  ;;  %v1078_v8 = vrot.slane %v1076_v56, 4 }
  0x38   :  { %6241 = vmatprep.subr.bf16.mxu0 %v6886_v36  ;;  %v1090_v9 = vshrl.u32 %v5602_v58, 16  ;;  %v1071_v11 = vshll.u32 %v5599_v61, 16  ;;  %v1081_v12 = vrot.slane %v1079_v27, 5  ;;  %v1099_v31 = vshll.u32 %v5603_v7, 16  ;;  %v5605_v45 = vld [vmem:[%s9013_s0 + $0x64] sm:$0x1] }
  0x39   :  { %v7502_v23 = vrot.slane %v1040_v28, 4  ;;  %v7504_v34 = vrot.slane %v1057_v6, 5  ;;  %v1004_v57 = vsel %vm7172_vm2, %v7465_v53, %v7437_v33  ;;  %v1135_v61 = vshll.u32 %v5608_v42, 16  ;;  %v5609_v33 = vld [vmem:[%s9013_s0 + $0x74] sm:$0x1] }
  0x3a   :  { %6226 = vmatmul.mubr.bf16.gmra.mrb[12].mxu0 %v5511_v38  ;;  %v1012_v38 = vor.u32 %v1011_v20, %v1008_v19  ;;  %v1068_v20 = vor.u32 %v1067_v2, %v1064_v62  ;;  %v1101_v13 = vrot.slane %v1099_v31, 5  ;;  %v5610_v53 = vld [vmem:[%s9013_s0 + $0x78] sm:$0xf]  ;;  %v5612_v6 = vld [vmem:[%s9013_s0 + $0x80] sm:$0xf] }
  0x3b   :  { %6242 = vmatpush3.bf16.msra.mxu0 %v6886_v36  ;;  %6245 = vmatprep.mubr.bf16.mxu0 %v5520_v39  ;;  %v6899_v36 = vld [vmem:[%s9014_s1 + $0xa8] sm:$0xff]   ;;  %v5595_v39 = vld [vmem:[%s9013_s0 + $0x34] sm:$0x1]  ;;  %v5611_v7 = vld [vmem:[%s9013_s0 + $0x7c] sm:$0x1]  ;;  %v1160_v29 = vshrl.u32 %v5612_v6, 16 }
  0x3c   :  { %6243 = vmatprep.subr.bf16.mxu0 %v6887_v40  ;;  %v1043_v60 = vshll.u32 %v5595_v39, 16 }
  0x3e   :  { %v7492_v19 = vrot.slane %v1043_v60, 5  ;;  %v1132_v60 = vshrl.u32 %v5608_v42, 16 }
  0x3f   :  { %6244 = vmatpush3.bf16.msra.mxu0 %v6887_v40  ;;  %v1048_v40 = vshrl.u32 %v5596_v26, 16 }
  0x40   :  { %6261 = vmatprep.subr.bf16.mxu0 %v6890_v41 }
  0x42   :  { %6246 = vmatmul.mubr.bf16.vlgmr.msra.gmra.mrb[0].mxu0 %v5521_v43  ;;  %v7450_v43 = vrot.slane %v1015_v22, 5  ;;  %v1092_v22 = vrot.slane %v1090_v9, 4  ;;  %v1137_v9 = vrot.slane %v1135_v61, 5  ;;  %v1177_v61 = vshll.u32 %v5614_v52, 16 }
  0x43   :  { %6262 = vmatpush3.bf16.msra.mxu0 %v6890_v41  ;;  %6249 = vmatprep.mubr.bf16.mxu0 %v5522_v4  ;;  %v1051_v41 = vshll.u32 %v5596_v26, 16  ;;  %v1022_v4 = vrot.slane %v1020_v24, 4  ;;  %v5606_v24 = vld [vmem:[%s9013_s0 + $0x68] sm:$0xf]  ;;  %v1082_v26 = vor.u32 %v1081_v12, %v1078_v8  ;;  %v1134_v8 = vrot.slane %v1132_v60, 4  ;;  %v6910_v12 = vld [vmem:[%s9014_s1 + $0xd0] sm:$0xff]  }
  0x44   :  { %6263 = vmatprep.subr.bf16.mxu0 %v6891_v5  ;;  %v1121_v51 = vshll.u32 %v5606_v24, 16 }
  0x46   :  { %v1123_v56 = vrot.slane %v1121_v51, 5 }
  0x47   :  { %6264 = vmatpush3.bf16.msra.mxu0 %v6891_v5  ;;  %v1025_v5 = vrot.slane %v1023_v25, 5 }
  0x48   :  { %6265 = vmatprep.subr.bf16.mxu0 %v6894_v16 }
  0x49   :  { %v1026_v63 = vor.u32 %v1025_v5, %v1022_v4  ;;  %v1118_v4 = vshrl.u32 %v5606_v24, 16  ;;  %v1083_v5 = vrot.slane %v1082_v26, 4  ;;  %v7590_v24 = vld [vmem:[%s9013_s0 + $0x84] sm:$0x1] }
  0x4a   :  { %6250 = vmatmul.mubr.bf16.gmra.mrb[4].mxu0 %v5523_v54  ;;  %v1050_v54 = vrot.slane %v1048_v40, 4  ;;  %v1073_v40 = vrot.slane %v1071_v11, 5  ;;  %v1146_v11 = vshrl.u32 %v5610_v53, 16 }
  0x4b   :  { %6266 = vmatpush3.bf16.msra.mxu0 %v6894_v16  ;;  %6253 = vmatprep.mubr.bf16.mxu0 %v5524_v59  ;;  %v6902_v16 = vld [vmem:[%s9014_s1 + $0xb0] sm:$0xff]   ;;  %v7470_v59 = vrot.slane %v1012_v38, 4  ;;  %v7497_v25 = vrot.slane %v1026_v63, 4  ;;  %v6906_v38 = vld [vmem:[%s9014_s1 + $0xc0] sm:$0xff]  }
  0x4c   :  { %6267 = vmatprep.subr.bf16.mxu0 %v6895_v55 }
  0x4d   :  { %v1018_v62 = vsel %vm7172_vm2, %v7470_v59, %v7450_v43  ;;  %v6907_v43 = vld [vmem:[%s9014_s1 + $0xc8] sm:$0xff]   ;;  %v1046_v59 = vsel %vm7172_vm2, %v7502_v23, %v7492_v19  ;;  %v1149_v19 = vshll.u32 %v5610_v53, 16  ;;  %v1155_v23 = vshll.u32 %v5611_v7, 16 }
  0x4f   :  { %6268 = vmatpush3.bf16.msra.mxu0 %v6895_v55  ;;  %v1053_v55 = vrot.slane %v1051_v41, 5  ;;  %v7642_v51 = vrot.slane %v1155_v23, 5 }
  0x50   :  { %6269 = vmatprep.subr.bf16.mxu0 %v6898_v15 }
  0x51   :  { %v1054_v10 = vor.u32 %v1053_v55, %v1050_v54  ;;  %v6908_v54 = vld [vmem:[%s9013_s0 + $0x28] ss:$8 sps:$4 sm:$0xff]   ;;  %v990_v55 = vsel %vm7172_vm2, %v7445_v37, %v7435_v18  ;;  %v1032_v18 = vsel %vm7172_vm2, %v7497_v25, %v7478_v1  ;;  %v1120_v37 = vrot.slane %v1118_v4, 4 }
  0x52   :  { %6254 = vmatmul.mubr.bf16.gmra.mrb[8].mxu0 %v5525_v14  ;;  %v1093_v14 = vshll.u32 %v5602_v58, 16  ;;  %v5607_v58 = vld [vmem:[%s9013_s0 + $0x6c] sm:$0x1]  ;;  %v1113_v1 = vshll.u32 %v5605_v45, 16  ;;  %v7598_v25 = vld [vmem:[%s9013_s0] ss:$8 sps:$4 sm:$0xff]  }
  0x53   :  { %6270 = vmatpush3.bf16.msra.mxu0 %v6898_v15  ;;  %6257 = vmatprep.mubr.bf16.mxu0 %v5526_v21  ;;  %v5604_v15 = vld [vmem:[%s9013_s0 + $0x60] sm:$0xf]  ;;  %v1085_v21 = vshll.u32 %v5601_v3, 16  ;;  %v1055_v39 = vrot.slane %v1054_v10, 4  ;;  %v1127_v28 = vshll.u32 %v5607_v58, 16  ;;  %v1141_v10 = vshll.u32 %v5609_v33, 16 }
  0x54   :  { %6271 = vmatprep.subr.bf16.mxu0 %v6899_v36  ;;  %v1095_v30 = vrot.slane %v1093_v14, 5  ;;  %v1104_v35 = vshrl.u32 %v5604_v15, 16  ;;  %v7576_v14 = vcombine.low %v976_v44, %v990_v55  ;;  %v1163_v44 = vshll.u32 %v5612_v6, 16  ;;  %v6912_v4 = vld [vmem:[%s9013_s0 + $0x50] ss:$8 sps:$4 sm:$0xff]  }
  0x55   :  { %v1087_v46 = vrot.slane %v1085_v21, 5  ;;  %v7583_v21 = vcombine.low %v1032_v18, %v1046_v59  ;;  %v7604_v31 = vrot.slane %v1113_v1, 5  ;;  %v4765_v45 = vunpack.c.h.bf16 %v7598_v25  ;;  %v7650_v58 = vld [vmem:[%s9013_s0 + $0x10] ss:$8 sps:$4 sm:$0xff]   ;;  %v6913_v59 = vld [vmem:[%s9013_s0 + $0x60] ss:$8 sps:$4 sm:$0xff]  }
  0x56   :  { %v1096_v41 = vor.u32 %v1095_v30, %v1092_v22  ;;  %v1106_v48 = vrot.slane %v1104_v35, 4  ;;  %v7609_v35 = vrot.slane %v1127_v28, 5  ;;  %v5958_v28 = vld [vmem:[%s9013_s0 + $0x18] ss:$8 sps:$4 sm:$0xff]  }
  0x57   :  { %6272 = vmatpush3.bf16.msra.mxu0 %v6899_v36  ;;  %v1107_v36 = vshll.u32 %v5604_v15, 16  ;;  %v1088_v2 = vsel %vm7172_vm2, %v1083_v5, %v1087_v46  ;;  %v7578_v15 = vcombine.low %v1004_v57, %v1018_v62  ;;  %v4764_v5 = vunpack.c.l.bf16 %v7598_v25  ;;  %v7632_v46 = vld [vmem:[%s9013_s0 + $0x8c] sm:$0x1]  ;;  %v6916_v6 = vld [vmem:[%s9013_s0 + $0x70] ss:$8 sps:$4 sm:$0xff]  }
  0x58   :  { %6273 = vmatprep.subr.bf16.mxu0 %v6902_v16  ;;  %v4848_v18 = vrot.slane %v4765_v45, 1  ;;  %v1183_v7 = vshll.u32 %v7632_v46, 16 }
  0x59   :  { %v1109_v49 = vrot.slane %v1107_v36, 5  ;;  %v1138_v36 = vor.u32 %v1137_v9, %v1134_v8  ;;  %v4845_v57 = vrot.slane %v4764_v5, 1  ;;  %v4767_v9 = vunpack.c.h.bf16 %v7650_v58 }
  0x5a   :  { %6258 = vmatmul.mubr.bf16.gmra.mrb[12].mxu0 %v5527_v47  ;;  %v1069_v47 = vrot.slane %v1068_v20, 4  ;;  %v6909_v20 = vld [vmem:[%s9013_s0 + $0x38] ss:$8 sps:$4 sm:$0xff]  }
  0x5b   :  { %6274 = vmatpush3.bf16.msra.mxu0 %v6902_v16  ;;  %6277 = vmatprep.mubr.bf16.mxu0 %v6904_v0  ;;  %v1097_v16 = vrot.slane %v1096_v41, 4  ;;  %v1060_v0 = vsel %vm7172_vm2, %v1055_v39, %v7504_v34  ;;  %v1110_v27 = vor.u32 %v1109_v49, %v1106_v48  ;;  %v4780_v34 = vld [vmem:[%s9013_s0 + $0x4] sm:$0x1]  ;;  %v7613_v39 = vrot.slane %v1146_v11, 4  ;;  %v6911_v41 = vld [vmem:[%s9014_s1 + $0xd8] sm:$0xff]  }
  0x5c   :  { %6275 = vmatprep.subr.bf16.mxu0 %v6903_v17  ;;  %v1074_v63 = vsel %vm7172_vm2, %v1069_v47, %v1073_v40  ;;  %v4781_v40 = vld [vmem:[%s9013_s0 + $0xc] sm:$0x1]  ;;  %v1174_v47 = vshrl.u32 %v5614_v52, 16  ;;  %v4796_v48 = vunpack.c.l.bf16 %v4780_v34  ;;  %v5956_v49 = vld [vmem:[%s9013_s0 + $0x8] ss:$8 sps:$4 sm:$0xff]   ;;  %v7652_v60 = vrot.slane %v1138_v36, 4 }
  0x5d   :  { %v1102_v3 = vsel %vm7172_vm2, %v1097_v16, %v1101_v13  ;;  %v7585_v22 = vcombine.low %v1060_v0, %v1074_v63  ;;  %v7602_v30 = vrot.slane %v1110_v27, 4  ;;  %v7634_v13 = vrot.slane %v1160_v29, 4  ;;  %v6914_v0 = vld [vmem:[%s9014_s1 + $0xe0] sm:$0xff]   ;;  %v4783_v27 = vld [vmem:[%s9013_s0 + $0x1c] sm:$0x1] }
  0x5e   :  { %v7600_v26 = vcombine.low %v1088_v2, %v1102_v3  ;;  %v7636_v16 = vrot.slane %v1163_v44, 5  ;;  %v4797_v55 = vunpack.c.l.bf16 %v4781_v40  ;;  %v4846_v62 = vrot.slane %v4796_v48, 1  ;;  %v5972_v11 = vld [vmem:[%s9013_s0 + $0xc] sm:$0x1]  ;;  %v5974_v29 = vld [vmem:[%s9013_s0 + $0x1c] sm:$0x1] }
  0x5f   :  { %6276 = vmatpush3.bf16.msra.mxu0 %v6903_v17  ;;  %v1124_v17 = vor.u32 %v1123_v56, %v1120_v37  ;;  %v4782_v37 = vld [vmem:[%s9013_s0 + $0x14] sm:$0x1]  ;;  %v7661_v33 = vrot.slane %v1174_v47, 4  ;;  %v4974_v2 = vunpack.c.h.bf16 %v5956_v49  ;;  %v4766_v3 = vunpack.c.l.bf16 %v7650_v58  ;;  %v5975_v44 = vld [vmem:[%s9013_s0 + $0x24] sm:$0x1]  ;;  %v6915_v47 = vld [vmem:[%s9014_s1 + $0xe8] sm:$0xff]  }
  0x60   :  { %6293 = vmatprep.subr.bf16.mxu0 %v6906_v38  ;;  %v4849_v53 = vrot.slane %v4797_v55, 1  ;;  %v1166_v63 = vor.u32 %v7636_v16, %v7634_v13  ;;  %v4847_v1 = vsel %vm4844_vm3, %v4845_v57, %v4846_v62  ;;  %v4799_v34 = vunpack.c.l.bf16 %v4783_v27  ;;  %v4784_v57 = vld [vmem:[%s9013_s0 + $0x24] sm:$0x1] }
  0x61   :  { %v7624_v42 = vrot.slane %v1124_v17, 4  ;;  %v7691_v17 = vrot.slane %v1177_v61, 5  ;;  %v5120_v23 = vrot.slane %v4974_v2, 1  ;;  %v4851_v36 = vrot.slane %v4766_v3, 1 }
  0x62   :  { %6278 = vmatmul.mubr.bf16.vlgmr.msra.gmra.mrb[0].mxu0 %v6905_v50  ;;  %v7626_v50 = vrot.slane %v1149_v19, 5  ;;  %v4850_v8 = vsel %vm4844_vm3, %v4848_v18, %v4849_v53  ;;  %v4975_v48 = vunpack.c.l.bf16 %v5958_v28  ;;  %v5085_v55 = vunpack.c.l.bf16 %v5972_v11  ;;  %v4785_v53 = vld [vmem:[%s9013_s0 + $0x2c] sm:$0x1] }
  0x63   :  { %6294 = vmatpush3.bf16.msra.mxu0 %v6906_v38  ;;  %6281 = vmatprep.mubr.bf16.mxu0 %v6908_v54  ;;  %v7611_v38 = vrot.slane %v1141_v10, 5  ;;  %v1169_v54 = vshll.u32 %v7590_v24, 16  ;;  %v4798_v10 = vunpack.c.l.bf16 %v4782_v37  ;;  %v6762_v19 = vpack.i.bf16 %v4850_v8, %v4847_v1  ;;  %v7726_v8 = vld [vmem:[%s9013_s0 + $0x30] ss:$8 sps:$4 sm:$0xff]  }
  0x64   :  { %6295 = vmatprep.subr.bf16.mxu0 %v6907_v43  ;;  %v1152_v56 = vor.u32 %v7626_v50, %v7613_v39  ;;  %v4855_v62 = vrot.slane %v4799_v34, 1  ;;  %v5087_v37 = vunpack.c.l.bf16 %v5974_v29  ;;  %v5123_v27 = vrot.slane %v4975_v48, 1  ;;  %v6917_v29 = vld [vmem:[%s9013_s0 + $0x80] ss:$8 sps:$4 sm:$0xff]  }
  0x65   :  { %v4852_v40 = vrot.slane %v4798_v10, 1  ;;  %6763 = vrot.lane.b32.xlu0 %v6762_v19, %s7070_s9  ;;  %v4786_v19 = vld [vmem:[%s9013_s0 + $0x34] sm:$0x1]  ;;  %v1167_v24 = vrot.slane %v1166_v63, 4  ;;  %v1116_v46 = vsel %vm7172_vm2, %v7602_v30, %v7604_v31  ;;  %v1130_v13 = vsel %vm7172_vm2, %v7624_v42, %v7609_v35 }
  0x67   :  { %6296 = vmatpush3.bf16.msra.mxu0 %v6907_v43  ;;  %v4973_v43 = vunpack.c.l.bf16 %v5956_v49  ;;  %v4976_v49 = vunpack.c.h.bf16 %v5958_v28  ;;  %v4853_v61 = vsel %vm4844_vm3, %v4851_v36, %v4852_v40  ;;  %v5118_v28 = vrot.slane %v5085_v55, 1  ;;  %v5960_v36 = vld [vmem:[%s9013_s0 + $0x28] ss:$8 sps:$4 sm:$0xff]  }
  0x68   :  { %6297 = vmatprep.subr.bf16.mxu0 %v6910_v12 }
  0x69   :  { %v5117_v52 = vrot.slane %v4973_v43, 1  ;;  %v5126_v1 = vrot.slane %v4976_v49, 1 }
  0x6a   :  { %6282 = vmatmul.mubr.bf16.gmra.mrb[4].mxu0 %v6909_v20  ;;  %v6752_v20 = vpack.i.bf16 %v4974_v2, %v4973_v43  ;;  %v6918_v43 = vld [vmem:[%s9014_s1 + $0xf0] sm:$0xff]   ;;  %v6757_v2 = vpack.i.bf16 %v4976_v49, %v4975_v48  ;;  %v4800_v49 = vunpack.c.l.bf16 %v4784_v57  ;;  %v9020_v57 = vunpack.c.l.bf16 %v7726_v8 }
  0x6b   :  { %6298 = vmatpush3.bf16.msra.mxu0 %v6910_v12  ;;  %6285 = vmatprep.mubr.bf16.mxu0 %v6912_v4  ;;  %v5973_v12 = vld [vmem:[%s9013_s0 + $0x14] sm:$0x1]  ;;  %v7704_v4 = vld [vmem:[%s9013_s0 + $0x20] ss:$8 sps:$4 sm:$0xff]  }
  0x6c   :  { %6299 = vmatprep.subr.bf16.mxu0 %v6911_v41  ;;  %6753 = vrot.lane.b32.xlu1 %v6752_v20, %s7071_s12  ;;  %v5086_v18 = vunpack.c.l.bf16 %v5973_v12  ;;  %v5088_v12 = vunpack.c.l.bf16 %v5975_v44  ;;  %v4787_v20 = vld [vmem:[%s9013_s0 + $0x3c] sm:$0x1]  ;;  %v9022_v34 = vunpack.c.l.bf16 %v7704_v4  ;;  %v9023_v44 = vunpack.c.h.bf16 %v7704_v4 }
  0x6e   :  { %v5121_v11 = vrot.slane %v5086_v18, 1  ;;  %v5127_v48 = vrot.slane %v5088_v12, 1  ;;  %v5962_v18 = vld [vmem:[%s9013_s0 + $0x38] ss:$8 sps:$4 sm:$0xff]  }
  0x6f   :  { %6300 = vmatpush3.bf16.msra.mxu0 %v6911_v41  ;;  %v4854_v41 = vrot.slane %v4767_v9, 1 }
  0x70   :  { %6301 = vmatprep.subr.bf16.mxu0 %v6914_v0  ;;  %6758 = vrot.lane.b32.xlu1 %v6757_v2, %s7071_s12  ;;  %v5122_v40 = vsel %vm4844_vm3, %v5120_v23, %v5121_v11  ;;  %v5128_v23 = vsel %vm4844_vm3, %v5126_v1, %v5127_v48  ;;  %v9021_v2 = vunpack.c.h.bf16 %v7726_v8  ;;  %v4803_v11 = vunpack.c.l.bf16 %v4787_v20  ;;  %v5979_v20 = vld [vmem:[%s9013_s0 + $0x44] sm:$0x1] }
  0x71   :  { %v4856_v10 = vsel %vm4844_vm3, %v4854_v41, %v4855_v62  ;;  %v4860_v62 = vrot.slane %v9023_v44, 1 }
  0x72   :  { %6286 = vmatmul.mubr.bf16.gmra.mrb[8].mxu0 %v6913_v59  ;;  %v5124_v59 = vrot.slane %v5087_v37, 1  ;;  %v4858_v37 = vrot.slane %v4800_v49, 1  ;;  %v4866_v1 = vrot.slane %v9021_v2, 1  ;;  %v4867_v48 = vrot.slane %v4803_v11, 1 }
  0x73   :  { %6302 = vmatpush3.bf16.msra.mxu0 %v6914_v0  ;;  %6289 = vmatprep.mubr.bf16.mxu0 %v6916_v6  ;;  %v6767_v0 = vpack.i.bf16 %v4856_v10, %v4853_v61  ;;  %v5119_v6 = vsel %vm4844_vm3, %v5117_v52, %v5118_v28  ;;  %v4801_v52 = vunpack.c.l.bf16 %v4785_v53  ;;  %v4857_v61 = vrot.slane %v9022_v34, 1  ;;  %v6919_v53 = vld [vmem:[%s9014_s1 + $0xf8] sm:$0xff]  }
  0x74   :  { %6303 = vmatprep.subr.bf16.mxu0 %v6915_v47  ;;  %v5125_v41 = vsel %vm4844_vm3, %v5123_v27, %v5124_v59  ;;  %v6772_v55 = vpack.i.bf16 %v5122_v40, %v5119_v6  ;;  %v4802_v10 = vunpack.c.l.bf16 %v4786_v19  ;;  %v4977_v59 = vunpack.c.l.bf16 %v5960_v36  ;;  %v5977_v6 = vld [vmem:[%s9013_s0 + $0x34] sm:$0x1]  ;;  %v5978_v19 = vld [vmem:[%s9013_s0 + $0x3c] sm:$0x1] }
  0x75   :  { %6768 = vrot.lane.b32.xlu0 %v6767_v0, %s7070_s9  ;;  %v6777_v27 = vpack.i.bf16 %v5128_v23, %v5125_v41  ;;  %v4861_v28 = vrot.slane %v4801_v52, 1  ;;  %v4859_v12 = vsel %vm4844_vm3, %v4857_v61, %v4858_v37  ;;  %v5976_v0 = vld [vmem:[%s9013_s0 + $0x2c] sm:$0x1]  ;;  %v4978_v49 = vunpack.c.h.bf16 %v5960_v36  ;;  %v7783_v52 = vld [vmem:[%s9013_s0 + $0x48] ss:$8 sps:$4 sm:$0xff]  }
  0x76   :  { %v4864_v41 = vrot.slane %v4802_v10, 1  ;;  %v4788_v61 = vld [vmem:[%s9013_s0 + $0x4c] sm:$0x1]  ;;  %v4979_v23 = vunpack.c.l.bf16 %v5962_v18  ;;  %v4980_v36 = vunpack.c.h.bf16 %v5962_v18  ;;  %v5090_v18 = vunpack.c.l.bf16 %v5977_v6 }
  0x77   :  { %6304 = vmatpush3.bf16.msra.mxu0 %v6915_v47  ;;  %v4863_v47 = vrot.slane %v9020_v57, 1  ;;  %v4862_v40 = vsel %vm4844_vm3, %v4860_v62, %v4861_v28  ;;  %v5129_v62 = vrot.slane %v4977_v59, 1  ;;  %6778 = vrot.lane.b32.xlu1 %v6777_v27, %s7072_s16  ;;  %v4868_v28 = vsel %vm4844_vm3, %v4866_v1, %v4867_v48 }
  0x78   :  { %6305 = vmatprep.subr.bf16.mxu0 %v6918_v43  ;;  %v5132_v10 = vrot.slane %v4978_v49, 1  ;;  %v6792_v11 = vpack.i.bf16 %v4978_v49, %v4977_v59  ;;  %v5138_v2 = vrot.slane %v4980_v36, 1  ;;  %v6797_v34 = vpack.i.bf16 %v4980_v36, %v4979_v23 }
  0x79   :  { %6773 = vrot.lane.b32.xlu0 %v6772_v55, %s7072_s16  ;;  %v6782_v55 = vpack.i.bf16 %v4862_v40, %v4859_v12  ;;  %v4865_v37 = vsel %vm4844_vm3, %v4863_v47, %v4864_v41  ;;  %v5135_v44 = vrot.slane %v4979_v23, 1  ;;  %v5091_v27 = vunpack.c.l.bf16 %v5978_v19  ;;  %v4790_v41 = vld [vmem:[%s9013_s0 + $0x5c] sm:$0x1] }
  0x7a   :  { %6290 = vmatmul.mubr.bf16.gmra.mrb[12].mxu0 %v6917_v29  ;;  %v4789_v29 = vld [vmem:[%s9013_s0 + $0x54] sm:$0x1]  ;;  %v6787_v57 = vpack.i.bf16 %v4868_v28, %v4865_v37  ;;  %v5092_v12 = vunpack.c.l.bf16 %v5979_v20  ;;  %v9030_v47 = vunpack.c.l.bf16 %v7783_v52  ;;  %v9031_v1 = vunpack.c.h.bf16 %v7783_v52 }
  0x7b   :  { %6306 = vmatpush3.bf16.msra.mxu0 %v6918_v43  ;;  %6309 = vmatprep.mubr.bf16.mxu0 %v7576_v14  ;;  %v7798_v14 = vld [vmem:[%s9013_s0 + $0x58] ss:$8 sps:$4 sm:$0xff]   ;;  %v5089_v43 = vunpack.c.l.bf16 %v5976_v0  ;;  %v4804_v59 = vunpack.c.l.bf16 %v4788_v61  ;;  %v4805_v40 = vunpack.c.l.bf16 %v4789_v29  ;;  %v5133_v49 = vrot.slane %v5090_v18, 1 }
  0x7c   :  { %6307 = vmatprep.subr.bf16.mxu0 %v6919_v53  ;;  %6788 = vrot.lane.b32.xlu1 %v6787_v57, %s7070_s9  ;;  %v5139_v0 = vrot.slane %v5092_v12, 1  ;;  %v4869_v6 = vrot.slane %v9030_v47, 1  ;;  %v4872_v20 = vrot.slane %v9031_v1, 1  ;;  %v5964_v57 = vld [vmem:[%s9013_s0 + $0x50] ss:$8 sps:$4 sm:$0xff]   ;;  %v9028_v37 = vunpack.c.l.bf16 %v7798_v14 }
  0x7d   :  { %6783 = vrot.lane.b32.xlu0 %v6782_v55, %s7070_s9  ;;  %v5130_v48 = vrot.slane %v5089_v43, 1  ;;  %v5136_v55 = vrot.slane %v5091_v27, 1  ;;  %v4870_v19 = vrot.slane %v4804_v59, 1  ;;  %v4873_v61 = vrot.slane %v4805_v40, 1 }
  0x7e   :  { %v5134_v23 = vsel %vm4844_vm3, %v5132_v10, %v5133_v49  ;;  %v5140_v43 = vsel %vm4844_vm3, %v5138_v2, %v5139_v0  ;;  %v9029_v10 = vunpack.c.h.bf16 %v7798_v14  ;;  %v1171_v2 = vrot.slane %v1169_v54, 5 }
  0x7f   :  { %6308 = vmatpush3.bf16.msra.mxu0 %v6919_v53  ;;  %v4791_v53 = vld [vmem:[%s9013_s0 + $0x64] sm:$0x1]  ;;  %v5131_v29 = vsel %vm4844_vm3, %v5129_v62, %v5130_v48  ;;  %v5137_v36 = vsel %vm4844_vm3, %v5135_v44, %v5136_v55  ;;  %v4871_v18 = vsel %vm4844_vm3, %v4869_v6, %v4870_v19  ;;  %v4874_v27 = vsel %vm4844_vm3, %v4872_v20, %v4873_v61 }
  0x80   :  { %v6802_v28 = vpack.i.bf16 %v5134_v23, %v5131_v29  ;;  %v1180_v62 = vor.u32 %v7691_v17, %v7661_v33  ;;  %6798 = vrot.lane.b32.xlu1 %v6797_v34, %s7071_s12  ;;  %v6807_v44 = vpack.i.bf16 %v5140_v43, %v5137_v36  ;;  %v4807_v12 = vunpack.c.l.bf16 %v4791_v53 }
  0x81   :  { %6793 = vrot.lane.b32.xlu0 %v6792_v11, %s7071_s12  ;;  %v6812_v11 = vpack.i.bf16 %v4874_v27, %v4871_v18  ;;  %v4875_v59 = vrot.slane %v9028_v37, 1  ;;  %v4878_v33 = vrot.slane %v9029_v10, 1  ;;  %v4981_v17 = vunpack.c.l.bf16 %v5964_v57 }
  0x82   :  { %6310 = vmatmul.mubr.bf16.vlgmr.msra.gmra.mrb[0].mxu0 %v7578_v15  ;;  %v5966_v15 = vld [vmem:[%s9013_s0 + $0x60] ss:$8 sps:$4 sm:$0xff]   ;;  %v4982_v34 = vunpack.c.h.bf16 %v5964_v57  ;;  %v1185_v54 = vrot.slane %v1183_v7, 5  ;;  %v4879_v48 = vrot.slane %v4807_v12, 1  ;;  %v1181_v49 = vrot.slane %v1180_v62, 4 }
  0x83   :  { %6313 = vmatprep.mubr.bf16.mxu0 %v7583_v21  ;;  %v4806_v21 = vunpack.c.l.bf16 %v4790_v41  ;;  %v1153_v41 = vrot.slane %v1152_v56, 4  ;;  %v4983_v0 = vunpack.c.l.bf16 %v5966_v15  ;;  %v4984_v53 = vunpack.c.h.bf16 %v5966_v15 }
  0x84   :  { %6808 = vrot.lane.b32.xlu1 %v6807_v44, %s7072_s16  ;;  %v4880_v6 = vsel %vm4844_vm3, %v4878_v33, %v4879_v48  ;;  %v6822_v50 = vpack.i.bf16 %v4982_v34, %v4981_v17  ;;  %v5637_v56 = vcombine.low %v1116_v46, %v1130_v13 }
  0x85   :  { %6803 = vrot.lane.b32.xlu0 %v6802_v28, %s7072_s16  ;;  %v4876_v40 = vrot.slane %v4806_v21, 1  ;;  %v1158_v16 = vsel %vm7172_vm2, %v1153_v41, %v7642_v51 }
  0x87   :  { %v4877_v55 = vsel %vm4844_vm3, %v4875_v59, %v4876_v40 }
  0x88   :  { %v6817_v39 = vpack.i.bf16 %v4880_v6, %v4877_v55 }
  0x89   :  { %6813 = vrot.lane.b32.xlu0 %v6812_v11, %s7070_s9 }
  0x8a   :  { %6314 = vmatmul.mubr.bf16.gmra.mrb[4].mxu0 %v7585_v22  ;;  %v1144_v22 = vsel %vm7172_vm2, %v7652_v60, %v7611_v38  ;;  %6818 = vrot.lane.b32.xlu1 %v6817_v39, %s7070_s9 }
  0x8b   :  { %6317 = vmatprep.mubr.bf16.mxu0 %v7600_v26  ;;  %v6827_v26 = vpack.i.bf16 %v4984_v53, %v4983_v0  ;;  %v5638_v30 = vcombine.low %v1144_v22, %v1158_v16 }
  0x8d   :  { %6823 = vrot.lane.b32.xlu0 %v6822_v50, %s7071_s12 }
  0x8e   :  { %6828 = vrot.lane.b32.xlu1 %v6827_v26, %s7071_s12 }
  0x8f   :  { %12 = vsyncpa [#allocation5], 0  ;;  %v1172_v31 = vsel %vm7172_vm2, %v1167_v24, %v1171_v2  ;;  %v1186_v35 = vsel %vm7172_vm2, %v1181_v49, %v1185_v54  ;;  %v5980_v42 = vld [vmem:[%s9013_s0 + $0x54] sm:$0x1]  ;;  %v5981_v51 = vld [vmem:[%s9013_s0 + $0x5c] sm:$0x1] }
  0x90   :  { %v5639_v38 = vcombine.low %v1172_v31, %v1186_v35  ;;  %v5144_v60 = vrot.slane %v4982_v34, 1  ;;  %v5141_v63 = vrot.slane %v4981_v17, 1  ;;  %v5093_v7 = vunpack.c.l.bf16 %v5980_v42  ;;  %v5982_v20 = vld [vmem:[%s9013_s0 + $0x64] sm:$0x1]  ;;  %v5983_v61 = vld [vmem:[%s9013_s0 + $0x6c] sm:$0x1] }
  0x91   :  { %v5094_v19 = vunpack.c.l.bf16 %v5981_v51  ;;  %v5150_v57 = vrot.slane %v4984_v53, 1  ;;  %v5147_v29 = vrot.slane %v4983_v0, 1  ;;  %v5095_v23 = vunpack.c.l.bf16 %v5982_v20  ;;  %v7892_v15 = vld [vmem:[%s9013_s0 + $0x68] ss:$8 sps:$4 sm:$0xff]   ;;  %v4792_v62 = vld [vmem:[%s9013_s0 + $0x6c] sm:$0x1] }
  0x92   :  { %6318 = vmatmul.mubr.bf16.gmra.mrb[8].mxu0 %v5637_v56  ;;  %v5096_v36 = vunpack.c.l.bf16 %v5983_v61  ;;  %v5142_v28 = vrot.slane %v5093_v7, 1  ;;  %v9026_v2 = vunpack.c.l.bf16 %v7892_v15  ;;  %v9027_v11 = vunpack.c.h.bf16 %v7892_v15  ;;  %v4793_v12 = vld [vmem:[%s9013_s0 + $0x74] sm:$0x1]  ;;  %v7907_v59 = vld [vmem:[%s9013_s0 + $0x78] ss:$8 sps:$4 sm:$0xff]  }
  0x93   :  { %6321 = vmatprep.mubr.bf16.mxu0 %v5638_v30  ;;  %v5145_v43 = vrot.slane %v5094_v19, 1  ;;  %v5148_v18 = vrot.slane %v5095_v23, 1  ;;  %v7912_v40 = vld [vmem:[%s9013_s0 + $0x7c] sm:$0x1]  ;;  %v4808_v41 = vunpack.c.l.bf16 %v4792_v62  ;;  %v4795_v24 = vld [vmem:[%s9013_s0 + $0x84] sm:$0x1]  ;;  %v4809_v48 = vunpack.c.l.bf16 %v4793_v12 }
  0x94   :  { %v5151_v27 = vrot.slane %v5096_v36, 1  ;;  %v5143_v44 = vsel %vm4844_vm3, %v5141_v63, %v5142_v28  ;;  %v4881_v49 = vrot.slane %v9026_v2, 1  ;;  %v4884_v55 = vrot.slane %v9027_v11, 1  ;;  %v5970_v20 = vld [vmem:[%s9013_s0 + $0x80] ss:$8 sps:$4 sm:$0xff]  }
  0x95   :  { %v5146_v21 = vsel %vm4844_vm3, %v5144_v60, %v5145_v43  ;;  %v5149_v17 = vsel %vm4844_vm3, %v5147_v29, %v5148_v18  ;;  %v4882_v0 = vrot.slane %v4808_v41, 1  ;;  %v9024_v53 = vunpack.c.l.bf16 %v7907_v59  ;;  %v5968_v60 = vld [vmem:[%s9013_s0 + $0x70] ss:$8 sps:$4 sm:$0xff]   ;;  %v5984_v36 = vld [vmem:[%s9013_s0 + $0x74] sm:$0x1]  ;;  %v6921_v41 = vld [vmem:[%s9015_s2 + $0x8] sm:$0xff]  }
  0x96   :  { %v6832_v33 = vpack.i.bf16 %v5146_v21, %v5143_v44  ;;  %v5152_v34 = vsel %vm4844_vm3, %v5150_v57, %v5151_v27  ;;  %v9025_v6 = vunpack.c.h.bf16 %v7907_v59  ;;  %v4810_v39 = vunpack.c.l.bf16 %v7912_v40  ;;  %v6920_v57 = vld [vmem:[%s9015_s2] sm:$0xff]   ;;  %v5985_v28 = vld [vmem:[%s9013_s0 + $0x7c] sm:$0x1]  ;;  %v5987_v21 = vld [vmem:[%s9013_s0 + $0x8c] sm:$0x1] }
  0x97   :  { %v6837_v54 = vpack.i.bf16 %v5152_v34, %v5149_v17  ;;  %v4885_v50 = vrot.slane %v4809_v48, 1  ;;  %v4811_v46 = vunpack.c.l.bf16 %v4795_v24  ;;  %vm1445_vm4 = vcmask 519168   ;;  %v5986_v43 = vld [vmem:[%s9013_s0 + $0x84] sm:$0x1]  ;;  %6349 = vmatprep.subr.bf16.mxu1 %v6920_v57 }
  0x98   :  { %6833 = vrot.lane.b32.xlu0 %v6832_v33, %s7072_s16  ;;  %vm1447_vm5 = vcmask 516096   ;;  %v4883_v13 = vsel %vm4844_vm3, %v4881_v49, %v4882_v0  ;;  %v7073_v22 = vmov 0   ;;  %v4887_v26 = vrot.slane %v9024_v53, 1  ;;  %6350 = vmatpush3.bf16.msra.mxu1 %v6920_v57 }
  0x99   :  { %6838 = vrot.lane.b32.xlu1 %v6837_v54, %s7072_s16  ;;  %1453 = vst.msk [vmem:[#allocation2 + $0x18] sm:$0xf] %vm1445_vm4, %v7073_v22  ;;  %1446 = vst.msk [vmem:[#allocation2] sm:$0xf] %vm1445_vm4, %v7073_v22  ;;  %v4886_v16 = vsel %vm4844_vm3, %v4884_v55, %v4885_v50  ;;  %v4888_v56 = vrot.slane %v4810_v39, 1  ;;  %v4890_v30 = vrot.slane %v9025_v6, 1  ;;  %v4985_v63 = vunpack.c.l.bf16 %v5968_v60  ;;  %6351 = vmatprep.subr.bf16.mxu1 %v6921_v41 }
  0x9a   :  { %6322 = vmatmul.mubr.bf16.gmra.mrb[12].mxu0 %v5639_v38  ;;  %1454 = vst.msk [vmem:[#allocation2 + $0x1c] sm:$0x1] %vm1447_vm5, %v7073_v22  ;;  %1448 = vst.msk [vmem:[#allocation2 + $0x4] sm:$0x1] %vm1447_vm5, %v7073_v22  ;;  %v6842_v31 = vpack.i.bf16 %v4886_v16, %v4883_v13  ;;  %v4891_v35 = vrot.slane %v4811_v46, 1  ;;  %v4986_v7 = vunpack.c.h.bf16 %v5968_v60  ;;  %v4987_v29 = vunpack.c.l.bf16 %v5970_v20  ;;  %v6922_v13 = vld [vmem:[%s9015_s2 + $0x10] sm:$0xff]  }
  0x9b   :  { %1449 = vst.msk [vmem:[#allocation2 + $0x8] sm:$0xf] %vm1445_vm4, %v7073_v22  ;;  %1451 = vst.msk [vmem:[#allocation2 + $0x10] sm:$0xf] %vm1445_vm4, %v7073_v22  ;;  %v4889_v38 = vsel %vm4844_vm3, %v4887_v26, %v4888_v56  ;;  %v4988_v23 = vunpack.c.h.bf16 %v5970_v20  ;;  %v5153_v18 = vrot.slane %v4985_v63, 1  ;;  %v5097_v44 = vunpack.c.l.bf16 %v5984_v36  ;;  %v6924_v16 = vld [vmem:[%s9015_s2 + $0x18] sm:$0xff]  }
  0x9c   :  { %1450 = vst.msk [vmem:[#allocation2 + $0xc] sm:$0x1] %vm1447_vm5, %v7073_v22  ;;  %1452 = vst.msk [vmem:[#allocation2 + $0x14] sm:$0x1] %vm1447_vm5, %v7073_v22  ;;  %6843 = vrot.lane.b32.xlu0 %v6842_v31, %s7070_s9  ;;  %v4892_v42 = vsel %vm4844_vm3, %v4890_v30, %v4891_v35  ;;  %v6852_v19 = vpack.i.bf16 %v4986_v7, %v4985_v63  ;;  %v5156_v61 = vrot.slane %v4986_v7, 1  ;;  %v5159_v12 = vrot.slane %v4987_v29, 1 }
  0x9d   :  { %1455 = vst.msk [vmem:[#allocation2 + $0x20] sm:$0xf] %vm1445_vm4, %v7073_v22  ;;  %1457 = vst.msk [vmem:[#allocation2 + $0x28] sm:$0xf] %vm1445_vm4, %v7073_v22  ;;  %v6847_v51 = vpack.i.bf16 %v4892_v42, %v4889_v38  ;;  %v5162_v27 = vrot.slane %v4988_v23, 1  ;;  %v6857_v62 = vpack.i.bf16 %v4988_v23, %v4987_v29  ;;  %v5098_v40 = vunpack.c.l.bf16 %v5985_v28  ;;  %6352 = vmatpush3.bf16.msra.mxu1 %v6921_v41  ;;  %v6925_v26 = vld [vmem:[%s9015_s2 + $0x28] sm:$0xff]  }
  0x9e   :  { %1456 = vst.msk [vmem:[#allocation2 + $0x24] sm:$0x1] %vm1447_vm5, %v7073_v22  ;;  %1458 = vst.msk [vmem:[#allocation2 + $0x2c] sm:$0x1] %vm1447_vm5, %v7073_v22  ;;  %v5099_v33 = vunpack.c.l.bf16 %v5986_v43  ;;  %v5100_v17 = vunpack.c.l.bf16 %v5987_v21  ;;  %v5154_v34 = vrot.slane %v5097_v44, 1  ;;  %6353 = vmatprep.subr.bf16.mxu1 %v6922_v13  ;;  %v6929_v56 = vld [vmem:[%s9015_s2 + $0x30] sm:$0xff]  }
  0x9f   :  { %1459 = vst.msk [vmem:[#allocation2 + $0x30] sm:$0xf] %vm1445_vm4, %v7073_v22  ;;  %1461 = vst.msk [vmem:[#allocation2 + $0x38] sm:$0xf] %vm1445_vm4, %v7073_v22  ;;  %6848 = vrot.lane.b32.xlu1 %v6847_v51, %s7070_s9  ;;  %v5157_v24 = vrot.slane %v5098_v40, 1  ;;  %v8028_v30 = vld [vmem:[%s9015_s2 + $0x40] sm:$0xff]  }
  0xa0   :  { %1460 = vst.msk [vmem:[#allocation2 + $0x34] sm:$0x1] %vm1447_vm5, %v7073_v22  ;;  %1462 = vst.msk [vmem:[#allocation2 + $0x3c] sm:$0x1] %vm1447_vm5, %v7073_v22  ;;  %6853 = vrot.lane.b32.xlu0 %v6852_v19, %s7071_s12  ;;  %v5160_v54 = vrot.slane %v5099_v33, 1  ;;  %v5163_v48 = vrot.slane %v5100_v17, 1  ;;  %v5155_v49 = vsel %vm4844_vm3, %v5153_v18, %v5154_v34 }
  0xa1   :  { %1463 = vst.msk [vmem:[#allocation2 + $0x40] sm:$0xf] %vm1445_vm4, %v7073_v22  ;;  %1465 = vst.msk [vmem:[#allocation2 + $0x48] sm:$0xf] %vm1445_vm4, %v7073_v22  ;;  %v5158_v55 = vsel %vm4844_vm3, %v5156_v61, %v5157_v24  ;;  %6354 = vmatpush3.bf16.msra.mxu1 %v6922_v13  ;;  %v6930_v31 = vld [vmem:[%s9015_s2 + $0x38] sm:$0xff]   ;;  %v8037_v35 = vld [vmem:[%s9015_s2 + $0x100] sm:$0xff]  }
  0xa2   :  { %1464 = vst.msk [vmem:[#allocation2 + $0x44] sm:$0x1] %vm1447_vm5, %v7073_v22  ;;  %1466 = vst.msk [vmem:[#allocation2 + $0x4c] sm:$0x1] %vm1447_vm5, %v7073_v22  ;;  %v5161_v0 = vsel %vm4844_vm3, %v5159_v12, %v5160_v54  ;;  %v5164_v39 = vsel %vm4844_vm3, %v5162_v27, %v5163_v48  ;;  %v6862_v50 = vpack.i.bf16 %v5158_v55, %v5155_v49  ;;  %6355 = vmatprep.subr.bf16.mxu1 %v6924_v16  ;;  %v8040_v38 = vld [vmem:[#allocation2] sm:$0xf] }
  0xa3   :  { %1467 = vst.msk [vmem:[#allocation2 + $0x50] sm:$0xf] %vm1445_vm4, %v7073_v22  ;;  %1469 = vst.msk [vmem:[#allocation2 + $0x58] sm:$0xf] %vm1445_vm4, %v7073_v22  ;;  %6858 = vrot.lane.b32.xlu1 %v6857_v62, %s7071_s12  ;;  %v6867_v46 = vpack.i.bf16 %v5164_v39, %v5161_v0  ;;  %v1839_v42 = vshrl.u32 %v8040_v38, 16  ;;  %v1842_v51 = vshll.u32 %v8040_v38, 16 }
  0xa4   :  { %1468 = vst.msk [vmem:[#allocation2 + $0x54] sm:$0x1] %vm1447_vm5, %v7073_v22  ;;  %1470 = vst.msk [vmem:[#allocation2 + $0x5c] sm:$0x1] %vm1447_vm5, %v7073_v22  ;;  %6863 = vrot.lane.b32.xlu0 %v6862_v50, %s7072_s16  ;;  %v1822_v61 = vld [vmem:[#allocation2 + $0x4] sm:$0x1] }
  0xa5   :  { %1471 = vst.msk [vmem:[#allocation2 + $0x60] sm:$0xf] %vm1445_vm4, %v7073_v22  ;;  %1473 = vst.msk [vmem:[#allocation2 + $0x68] sm:$0xf] %vm1445_vm4, %v7073_v22  ;;  %6356 = vmatpush3.bf16.msra.mxu1 %v6924_v16  ;;  %v1841_v63 = vrot.slane %v1839_v42, 4  ;;  %v1844_v7 = vrot.slane %v1842_v51, 5 }
  0xa6   :  { %1472 = vst.msk [vmem:[#allocation2 + $0x64] sm:$0x1] %vm1447_vm5, %v7073_v22  ;;  %1474 = vst.msk [vmem:[#allocation2 + $0x6c] sm:$0x1] %vm1447_vm5, %v7073_v22  ;;  %6373 = vmatprep.subr.bf16.mxu1 %v8028_v30  ;;  %v1848_v29 = vshll.u32 %v1822_v61, 16  ;;  %vm2474_vm6 = vcmask 1042432  }
  0xa7   :  { %1475 = vst.msk [vmem:[#allocation2 + $0x70] sm:$0xf] %vm1445_vm4, %v7073_v22  ;;  %1477 = vst.msk [vmem:[#allocation2 + $0x78] sm:$0xf] %vm1445_vm4, %v7073_v22  ;;  %6868 = vrot.lane.b32.xlu1 %v6867_v46, %s7072_s16  ;;  %v1845_v57 = vor.u32 %v1844_v7, %v1841_v63  ;;  %v2426_v27 = vld [vmem:[#allocation2] sm:$0xe] }
  0xa8   :  { %1476 = vst.msk [vmem:[#allocation2 + $0x74] sm:$0x1] %vm1447_vm5, %v7073_v22  ;;  %1478 = vst.msk [vmem:[#allocation2 + $0x7c] sm:$0x1] %vm1447_vm5, %v7073_v22  ;;  %v8050_v44 = vrot.slane %v1848_v29, 5  ;;  %vm2475_vm7 = vcmask 1046532  }
  0xa9   :  { %1479 = vst.msk [vmem:[#allocation2 + $0x80] sm:$0xf] %vm1445_vm4, %v7073_v22  ;;  %1481 = vst.msk [vmem:[#allocation2 + $0x88] sm:$0xf] %vm1445_vm4, %v7073_v22  ;;  %v8048_v62 = vrot.slane %v1845_v57, 4  ;;  %v5712_v17 = vrot.slane %v2426_v27, 9 }
  0xaa   :  { %1480 = vst.msk [vmem:[#allocation2 + $0x84] sm:$0x1] %vm1447_vm5, %v7073_v22  ;;  %1482 = vst.msk [vmem:[#allocation2 + $0x8c] sm:$0x1] %vm1447_vm5, %v7073_v22  ;;  %v8044_v60 = vld [vmem:[#allocation2 + $0x50] sm:$0xf] }
  0xab   :  { %1483 = vst.msk [vmem:[#allocation2 + $0x90] sm:$0xf] %vm1445_vm4, %v7073_v22  ;;  %1485 = vst.msk [vmem:[#allocation2 + $0x98] sm:$0xf] %vm1445_vm4, %v7073_v22  ;;  %v1951_v19 = vshrl.u32 %v8044_v60, 16  ;;  %v1954_v20 = vshll.u32 %v8044_v60, 16  ;;  %v1851_v58 = vsel %vm7172_vm2, %v8048_v62, %v8050_v44 }
  0xac   :  { %1484 = vst.msk [vmem:[#allocation2 + $0x94] sm:$0x1] %vm1447_vm5, %v7073_v22  ;;  %1486 = vst.msk [vmem:[#allocation2 + $0x9c] sm:$0x1] %vm1447_vm5, %v7073_v22  ;;  %v6923_v22 = vld [vmem:[%s9015_s2 + $0x20] sm:$0xff]   ;;  %v2479_v34 = vrot.slane %v1822_v61, 5 }
  0xad   :  { %6325 = vmatprep.subr.bf16.mxu0 %v6923_v22  ;;  %v1953_v23 = vrot.slane %v1951_v19, 4  ;;  %v1956_v36 = vrot.slane %v1954_v20, 5  ;;  %v1830_v18 = vld [vmem:[#allocation2 + $0x54] sm:$0x1]  ;;  %v2434_v54 = vld [vmem:[#allocation2 + $0x50] sm:$0xe]  ;;  %vm8066_vm8 = vmor %vm2474_vm6, %vm2475_vm7 }
  0xae   :  { %6326 = vmatpush3.bf16.msra.mxu0 %v6923_v22  ;;  %v1960_v12 = vshll.u32 %v1830_v18, 16  ;;  %v3959_v48 = vld [vmem:[#allocation2 + $0x4c] sm:$0x1]  ;;  %v4401_v49 = vld [vmem:[#allocation2 + $0x48] sm:$0xe]  ;;  %v2511_v46 = vrot.slane %v1830_v18, 5  ;;  %v8080_v63 = vsel %vm8066_vm8, %v5712_v17, %v2479_v34  ;;  %v9037_v34 = vunpack.c.l.bf16 %v7704_v4 }
  0xaf   :  { %6327 = vmatprep.subr.bf16.mxu0 %v6925_v26  ;;  %v1957_v21 = vor.u32 %v1956_v36, %v1953_v23  ;;  %v5919_v13 = vrot.slane %v4401_v49, 9  ;;  %v4472_v22 = vrot.slane %v3959_v48, 5  ;;  %vm1697_vm9 = vsmask.f32 7938  ;;  %v1708_v37 = vld [vmem:[#allocation2 + $0x10] sm:$0xf] }
  0xb0   :  { %v8058_v0 = vrot.slane %v1960_v12, 5  ;;  %vm1703_vm10 = vsmask.f32 256  ;;  %vm8120_vm15 = vmand %vm1445_vm4, %vm1697_vm9 }
  0xb1   :  { %v8056_v55 = vrot.slane %v1957_v21, 4  ;;  %v8088_v57 = vsel %vm8066_vm8, %v5919_v13, %v4472_v22  ;;  %vm8126_vm0 = vmand %vm1447_vm5, %vm1703_vm10  ;;  %vm2119_vm10 = vcmask 523264  }
  0xb2   :  { %6328 = vmatpush3.bf16.msra.mxu0 %v6925_v26 }
  0xb3   :  { %6329 = vmatprep.subr.bf16.mxu0 %v6929_v56  ;;  %v1963_v51 = vsel %vm7172_vm2, %v8056_v55, %v8058_v0 }
  0xb6   :  { %6330 = vmatpush3.bf16.msra.mxu0 %v6929_v56 }
  0xb7   :  { %6331 = vmatprep.subr.bf16.mxu0 %v6930_v31 }
  0xba   :  { %6332 = vmatpush3.bf16.msra.mxu0 %v6930_v31 }
  0xbb   :  { %6517 = vmatprep.subr.bf16.mxu0 %v8037_v35 }
  0xd7   :  { %v6764_v28 = vpop.permute.xlu0 %6763 }
  0xd8   :  { %v6998_v40 = vadd.high.f32.bf16 %v4765_v45, %v6764_v28  ;;  %v6999_v33 = vadd.low.f32.bf16 %v4764_v5, %v6764_v28  ;;  %v5720_v5 = vrot.slane %v2434_v54, 9 }
  0xda   :  { %v8084_v61 = vsel %vm8066_vm8, %v5720_v5, %v2511_v46  ;;  %v9038_v46 = vunpack.c.h.bf16 %v7726_v8 }
  0xde   :  { %v6754_v43 = vpop.permute.xlu1 %6753 }
  0xdf   :  { %v7000_v39 = vadd.low.f32.bf16 %v6999_v33, %v6754_v43  ;;  %v7001_v50 = vadd.high.f32.bf16 %v6998_v40, %v6754_v43  ;;  %v9036_v33 = vunpack.c.h.bf16 %v7704_v4  ;;  %v9039_v4 = vunpack.c.l.bf16 %v7726_v8 }
  0xe2   :  { %v6759_v24 = vpop.permute.xlu1 %6758 }
  0xe7   :  { %v6769_v41 = vpop.permute.xlu0 %6768 }
  0xe8   :  { %v7002_v45 = vadd.high.f32.bf16 %v4767_v9, %v6769_v41  ;;  %v7003_v25 = vadd.low.f32.bf16 %v4766_v3, %v6769_v41 }
  0xe9   :  { %v6779_v26 = vpop.permute.xlu1 %6778 }
  0xea   :  { %v7004_v31 = vadd.low.f32.bf16 %v7003_v25, %v6759_v24  ;;  %v7005_v42 = vadd.high.f32.bf16 %v7002_v45, %v6759_v24 }
  0xeb   :  { %v6774_v16 = vpop.permute.xlu0 %6773 }
  0xec   :  { %v7006_v3 = vadd.low.f32.bf16 %v7000_v39, %v6774_v16  ;;  %v7007_v9 = vadd.high.f32.bf16 %v7001_v50, %v6774_v16  ;;  %v7008_v7 = vadd.low.f32.bf16 %v7004_v31, %v6779_v26  ;;  %v7009_v19 = vadd.high.f32.bf16 %v7005_v42, %v6779_v26 }
  0xee   :  { %v8090_v23 = vmul.f32 0.25, %v7006_v3  ;;  %v8092_v36 = vmul.f32 0.25, %v7007_v9  ;;  %v8094_v28 = vmul.f32 0.25, %v7008_v7  ;;  %v8096_v43 = vmul.f32 0.25, %v7009_v19  ;;  %v6789_v18 = vpop.permute.xlu1 %6788  ;;  %v1714_v3 = vld [vmem:[#allocation2 + $0x18] sm:$0xf] }
  0xef   :  { %v6784_v20 = vpop.permute.xlu0 %6783  ;;  %v8110_v13 = vadd.high.f32.bf16 %v9038_v46, %v6789_v18  ;;  %v8114_v22 = vadd.low.f32.bf16 %v9039_v4, %v6789_v18  ;;  %v1717_v9 = vld [vmem:[#allocation2 + $0x1c] sm:$0x1]  ;;  %v1699_v18 = vld [vmem:[#allocation2 + $0x8] sm:$0xf] }
  0xf0   :  { %v8100_v17 = vadd.high.f32.bf16 %v9036_v33, %v6784_v20  ;;  %v8104_v41 = vadd.low.f32.bf16 %v9037_v34, %v6784_v20 }
  0xf3   :  { %v8106_v24 = vpop.permute.xlu0 %6793 }
 0x155   :  { %v6311_v29 = vpop.f32.mrb[0].mxu0 }
 0x156   :  { %vm1399_vm11 = vcmp.gt.f32.partialorder %v6311_v29, 0.0  ;;  %v1415_v27 = vmul.f32 0.2, %v6311_v29  ;;  %v1318_v21 = vpop.f32.mrb[1].mxu0 }
 0x157   :  { %vm1397_vm12 = vcmp.gt.f32.partialorder %v1318_v21, 0.0  ;;  %v1413_v12 = vmul.f32 0.2, %v1318_v21  ;;  %v6312_v40 = vpop.f32.mrb[2].mxu0 }
 0x158   :  { %v1431_v54 = vsel %vm1399_vm11, %v6311_v29, %v1415_v27  ;;  %vm1400_vm13 = vcmp.gt.f32.partialorder %v6312_v40, 0.0  ;;  %v1416_v48 = vmul.f32 0.2, %v6312_v40  ;;  %v1321_v49 = vpop.f32.mrb[3].mxu0 }
 0x159   :  { %v6001_v39 = vpack.c.bf16 %v1431_v54, %v1431_v54  ;;  %v1429_v50 = vsel %vm1397_vm12, %v1318_v21, %v1413_v12  ;;  %vm1398_vm14 = vcmp.gt.f32.partialorder %v1321_v49, 0.0  ;;  %v1414_v45 = vmul.f32 0.2, %v1321_v49  ;;  %v1705_v21 = vld [vmem:[#allocation2 + $0xc] sm:$0x1] }
 0x15a   :  { %v5999_v25 = vpack.c.bf16 %v1429_v50, %v1429_v50  ;;  %v1432_v5 = vsel %vm1400_vm13, %v6312_v40, %v1416_v48  ;;  %v1720_v48 = vld [vmem:[#allocation2 + $0x20] sm:$0xf] }
 0x15b   :  { %v1552_v16 = vshrl.u32 %v6001_v39, 16  ;;  %v6002_v26 = vpack.c.bf16 %v1432_v5, %v1432_v5  ;;  %v1430_v31 = vsel %vm1398_vm14, %v1321_v49, %v1414_v45  ;;  %v1555_v42 = vshll.u32 %v6001_v39, 16 }
 0x15c   :  { %v1536_v7 = vshrl.u32 %v5999_v25, 16  ;;  %v6000_v19 = vpack.c.bf16 %v1430_v31, %v1430_v31  ;;  %v1539_v8 = vshll.u32 %v5999_v25, 16  ;;  %v1723_v31 = vld [vmem:[#allocation2 + $0x24] sm:$0x1] }
 0x15d   :  { %v1554_v29 = vrot.slane %v1552_v16, 7  ;;  %v1560_v12 = vshrl.u32 %v6002_v26, 16  ;;  %v1563_v40 = vshll.u32 %v6002_v26, 16  ;;  %v6315_v33 = vpop.f32.mrb[4].mxu0 }
 0x15e   :  { %v1538_v54 = vrot.slane %v1536_v7, 7  ;;  %v1544_v49 = vshrl.u32 %v6000_v19, 16  ;;  %v1547_v39 = vshll.u32 %v6000_v19, 16  ;;  %vm1403_vm1 = vcmp.gt.f32.partialorder %v6315_v33, 0.0  ;;  %v1334_v50 = vpop.f32.mrb[5].mxu0 }
 0x15f   :  { %v1557_v45 = vor.u32 %v1555_v42, %v1554_v29  ;;  %v1558_v5 = vrot.slane %v1554_v29, 4  ;;  %v1562_v25 = vrot.slane %v1560_v12, 7  ;;  %v1419_v46 = vmul.f32 0.2, %v6315_v33  ;;  %v6316_v4 = vpop.f32.mrb[6].mxu0 }
 0x160   :  { %v1541_v16 = vor.u32 %v1539_v8, %v1538_v54  ;;  %v1542_v26 = vrot.slane %v1538_v54, 4  ;;  %v1546_v53 = vrot.slane %v1544_v49, 7  ;;  %vm1401_vm3 = vcmp.gt.f32.partialorder %v1334_v50, 0.0  ;;  %v1337_v6 = vpop.f32.mrb[7].mxu0  ;;  %v1711_v42 = vld [vmem:[#allocation2 + $0x14] sm:$0x1] }
 0x161   :  { %v1715_v2 = vsel %vm8120_vm15, %v1557_v45, %v1714_v3  ;;  %v1718_v7 = vsel %vm8126_vm0, %v1558_v5, %v1717_v9  ;;  %v1565_v19 = vor.u32 %v1563_v40, %v1562_v25  ;;  %v1566_v11 = vrot.slane %v1562_v25, 4 }
 0x162   :  { %1716 = vst [vmem:[#allocation2 + $0x18] sm:$0xf] %v1715_v2  ;;  %1719 = vst [vmem:[#allocation2 + $0x1c] sm:$0x1] %v1718_v7  ;;  %v1700_v29 = vsel %vm8120_vm15, %v1541_v16, %v1699_v18  ;;  %v1706_v8 = vsel %vm8126_vm0, %v1542_v26, %v1705_v21  ;;  %v1549_v12 = vor.u32 %v1547_v39, %v1546_v53  ;;  %v1550_v54 = vrot.slane %v1546_v53, 4 }
 0x163   :  { %1701 = vst [vmem:[#allocation2 + $0x8] sm:$0xf] %v1700_v29  ;;  %1707 = vst [vmem:[#allocation2 + $0xc] sm:$0x1] %v1706_v8  ;;  %v1721_v3 = vsel %vm8120_vm15, %v1565_v19, %v1720_v48  ;;  %v1724_v9 = vsel %vm8126_vm0, %v1566_v11, %v1723_v31  ;;  %v1435_v40 = vsel %vm1403_vm1, %v6315_v33, %v1419_v46  ;;  %v1417_v2 = vmul.f32 0.2, %v1334_v50 }
 0x164   :  { %1722 = vst [vmem:[#allocation2 + $0x20] sm:$0xf] %v1721_v3  ;;  %1725 = vst [vmem:[#allocation2 + $0x24] sm:$0x1] %v1724_v9  ;;  %v1709_v18 = vsel %vm8120_vm15, %v1549_v12, %v1708_v37  ;;  %v1712_v21 = vsel %vm8126_vm0, %v1550_v54, %v1711_v42  ;;  %v6005_v53 = vpack.c.bf16 %v1435_v40, %v1435_v40  ;;  %vm1404_vm4 = vcmp.gt.f32.partialorder %v6316_v4, 0.0 }
 0x165   :  { %1710 = vst [vmem:[#allocation2 + $0x10] sm:$0xf] %v1709_v18  ;;  %1713 = vst [vmem:[#allocation2 + $0x14] sm:$0x1] %v1712_v21  ;;  %v1433_v48 = vsel %vm1401_vm3, %v1334_v50, %v1417_v2  ;;  %v1420_v49 = vmul.f32 0.2, %v6316_v4 }
 0x166   :  { %vm1402_vm5 = vcmp.gt.f32.partialorder %v1337_v6, 0.0  ;;  %v1418_v11 = vmul.f32 0.2, %v1337_v6  ;;  %v6319_v39 = vpop.f32.mrb[8].mxu0  ;;  %v1584_v33 = vshrl.u32 %v6005_v53, 16  ;;  %v1587_v45 = vshll.u32 %v6005_v53, 16 }
 0x167   :  { %v6003_v5 = vpack.c.bf16 %v1433_v48, %v1433_v48  ;;  %vm1407_vm6 = vcmp.gt.f32.partialorder %v6319_v39, 0.0  ;;  %v1350_v25 = vpop.f32.mrb[9].mxu0  ;;  %v1436_v46 = vsel %vm1404_vm4, %v6316_v4, %v1420_v49  ;;  %v1423_v16 = vmul.f32 0.2, %v6319_v39  ;;  %v1738_v7 = vld [vmem:[#allocation2 + $0x38] sm:$0xf] }
 0x168   :  { %v1434_v37 = vsel %vm1402_vm5, %v1337_v6, %v1418_v11  ;;  %vm1405_vm7 = vcmp.gt.f32.partialorder %v1350_v25, 0.0  ;;  %v6320_v26 = vpop.f32.mrb[10].mxu0  ;;  %v1586_v31 = vrot.slane %v1584_v33, 7  ;;  %v6006_v29 = vpack.c.bf16 %v1436_v46, %v1436_v46  ;;  %v1741_v8 = vld [vmem:[#allocation2 + $0x3c] sm:$0x1] }
 0x169   :  { %v1568_v19 = vshrl.u32 %v6003_v5, 16  ;;  %v1571_v42 = vshll.u32 %v6003_v5, 16  ;;  %v8148_v50 = vpop.f32.mrb[11].mxu0  ;;  %v6004_v12 = vpack.c.bf16 %v1434_v37, %v1434_v37  ;;  %v1439_v54 = vsel %vm1407_vm6, %v6319_v39, %v1423_v16  ;;  %v1726_v4 = vld [vmem:[#allocation2 + $0x28] sm:$0xf] }
 0x16a   :  { %v1421_v3 = vmul.f32 0.2, %v1350_v25  ;;  %vm1408_vm9 = vcmp.gt.f32.partialorder %v6320_v26, 0.0  ;;  %v1589_v9 = vor.u32 %v1587_v45, %v1586_v31  ;;  %v1590_v40 = vrot.slane %v1586_v31, 4  ;;  %v1729_v18 = vld [vmem:[#allocation2 + $0x2c] sm:$0x1] }
 0x16b   :  { %v1570_v2 = vrot.slane %v1568_v19, 7  ;;  %v1592_v6 = vshrl.u32 %v6006_v29, 16  ;;  %v1595_v21 = vshll.u32 %v6006_v29, 16  ;;  %v1576_v53 = vshrl.u32 %v6004_v12, 16  ;;  %v1744_v46 = vld [vmem:[#allocation2 + $0x40] sm:$0xf] }
 0x16c   :  { %v1579_v48 = vshll.u32 %v6004_v12, 16  ;;  %v6009_v49 = vpack.c.bf16 %v1439_v54, %v1439_v54  ;;  %v1739_v11 = vsel %vm8120_vm15, %v1589_v9, %v1738_v7  ;;  %v1742_v33 = vsel %vm8126_vm0, %v1590_v40, %v1741_v8  ;;  %v1747_v37 = vld [vmem:[#allocation2 + $0x44] sm:$0x1]  ;;  %v1732_v45 = vld [vmem:[#allocation2 + $0x30] sm:$0xf] }
 0x16d   :  { %v1573_v5 = vor.u32 %v1571_v42, %v1570_v2  ;;  %v1574_v39 = vrot.slane %v1570_v2, 4  ;;  %1740 = vst [vmem:[#allocation2 + $0x38] sm:$0xf] %v1739_v11  ;;  %1743 = vst [vmem:[#allocation2 + $0x3c] sm:$0x1] %v1742_v33  ;;  %v1594_v16 = vrot.slane %v1592_v6, 7  ;;  %v1437_v42 = vsel %vm1405_vm7, %v1350_v25, %v1421_v3 }
 0x16e   :  { %v1578_v31 = vrot.slane %v1576_v53, 7  ;;  %v1616_v19 = vshrl.u32 %v6009_v49, 16  ;;  %v1619_v29 = vshll.u32 %v6009_v49, 16  ;;  %v6323_v10 = vpop.f32.mrb[12].mxu0  ;;  %v1735_v54 = vld [vmem:[#allocation2 + $0x34] sm:$0x1] }
 0x16f   :  { %v1727_v12 = vsel %vm8120_vm15, %v1573_v5, %v1726_v4  ;;  %v1730_v7 = vsel %vm8126_vm0, %v1574_v39, %v1729_v18  ;;  %v1424_v8 = vmul.f32 0.2, %v6320_v26  ;;  %v8159_v9 = vpop.f32.mrb[13].mxu0  ;;  %v1597_v40 = vor.u32 %v1595_v21, %v1594_v16  ;;  %v1762_v5 = vld [vmem:[#allocation2 + $0x68] sm:$0xf] }
 0x170   :  { %1728 = vst [vmem:[#allocation2 + $0x28] sm:$0xf] %v1727_v12  ;;  %1731 = vst [vmem:[#allocation2 + $0x2c] sm:$0x1] %v1730_v7  ;;  %v1598_v2 = vrot.slane %v1594_v16, 4  ;;  %v1581_v6 = vor.u32 %v1579_v48, %v1578_v31  ;;  %v1582_v53 = vrot.slane %v1578_v31, 4  ;;  %v6007_v4 = vpack.c.bf16 %v1437_v42, %v1437_v42 }
 0x171   :  { %v8161_v49 = vpop.f32.mrb[14].mxu0  ;;  %v1618_v11 = vrot.slane %v1616_v19, 7  ;;  %v1440_v33 = vsel %vm1408_vm9, %v6320_v26, %v1424_v8  ;;  %vm1406_vm11 = vcmp.gt.f32.partialorder %v8148_v50, 0.0  ;;  %v1745_v25 = vsel %vm8120_vm15, %v1597_v40, %v1744_v46  ;;  %v1765_v39 = vld [vmem:[#allocation2 + $0x6c] sm:$0x1] }
 0x172   :  { %v8165_v18 = vpop.f32.mrb[15].mxu0  ;;  %v1748_v3 = vsel %vm8126_vm0, %v1598_v2, %v1747_v37  ;;  %v1733_v21 = vsel %vm8120_vm15, %v1581_v6, %v1732_v45  ;;  %v1736_v48 = vsel %vm8126_vm0, %v1582_v53, %v1735_v54  ;;  %v1799_v16 = vld [vmem:[#allocation2 + $0x8] sm:$0xf]  ;;  %1746 = vst [vmem:[#allocation2 + $0x40] sm:$0xf] %v1745_v25  ;;  %v1600_v19 = vshrl.u32 %v6007_v4, 16 }
 0x173   :  { %1749 = vst [vmem:[#allocation2 + $0x44] sm:$0x1] %v1748_v3  ;;  %1734 = vst [vmem:[#allocation2 + $0x30] sm:$0xf] %v1733_v21  ;;  %v1621_v26 = vor.u32 %v1619_v29, %v1618_v11  ;;  %v1622_v31 = vrot.slane %v1618_v11, 4  ;;  %v1603_v46 = vshll.u32 %v6007_v4, 16  ;;  %v6010_v12 = vpack.c.bf16 %v1440_v33, %v1440_v33 }
 0x174   :  { %1737 = vst [vmem:[#allocation2 + $0x34] sm:$0x1] %v1736_v48  ;;  %v1422_v37 = vmul.f32 0.2, %v8148_v50  ;;  %vm1411_vm12 = vcmp.gt.f32.partialorder %v6323_v10, 0.0  ;;  %v1602_v42 = vrot.slane %v1600_v19, 7 }
 0x175   :  { %v1427_v7 = vmul.f32 0.2, %v6323_v10  ;;  %v1763_v45 = vsel %vm8120_vm15, %v1621_v26, %v1762_v5  ;;  %v1766_v54 = vsel %vm8126_vm0, %v1622_v31, %v1765_v39  ;;  %v1853_v8 = vshrl.u32 %v1799_v16, 16  ;;  %v1750_v40 = vld [vmem:[#allocation2 + $0x58] sm:$0xf] }
 0x176   :  { %1764 = vst [vmem:[#allocation2 + $0x68] sm:$0xf] %v1763_v45  ;;  %1767 = vst [vmem:[#allocation2 + $0x6c] sm:$0x1] %v1766_v54  ;;  %v1753_v29 = vld [vmem:[#allocation2 + $0x5c] sm:$0x1]  ;;  %v1438_v53 = vsel %vm1406_vm11, %v8148_v50, %v1422_v37  ;;  %v1605_v4 = vor.u32 %v1603_v46, %v1602_v42  ;;  %v5692_v39 = vcombine.low %v8040_v38, %v1799_v16 }
 0x177   :  { %v1624_v2 = vshrl.u32 %v6010_v12, 16  ;;  %v1627_v6 = vshll.u32 %v6010_v12, 16  ;;  %v1443_v11 = vsel %vm1411_vm12, %v6323_v10, %v1427_v7  ;;  %v1606_v33 = vrot.slane %v1602_v42, 4  ;;  %v1768_v19 = vld [vmem:[#allocation2 + $0x70] sm:$0xf] }
 0x178   :  { %v6008_v25 = vpack.c.bf16 %v1438_v53, %v1438_v53  ;;  %v6013_v3 = vpack.c.bf16 %v1443_v11, %v1443_v11  ;;  %v1855_v48 = vrot.slane %v1853_v8, 4  ;;  %v1856_v5 = vshll.u32 %v1799_v16, 16  ;;  %v1771_v12 = vld [vmem:[#allocation2 + $0x74] sm:$0x1]  ;;  %v1756_v37 = vld [vmem:[#allocation2 + $0x60] sm:$0xf]  ;;  %6357 = vmatprep.mubr.msk.bf16.mxu1 %vm2119_vm10, %v5692_v39 }
 0x179   :  { %v1626_v21 = vrot.slane %v1624_v2, 7  ;;  %v1751_v26 = vsel %vm8120_vm15, %v1605_v4, %v1750_v40  ;;  %v1754_v31 = vsel %vm8126_vm0, %v1606_v33, %v1753_v29  ;;  %vm1409_vm13 = vcmp.gt.f32.partialorder %v8159_v9, 0.0  ;;  %v1759_v29 = vld [vmem:[#allocation2 + $0x64] sm:$0x1]  ;;  %v1786_v4 = vld [vmem:[#allocation2 + $0x88] sm:$0xf] }
 0x17a   :  { %v1608_v45 = vshrl.u32 %v6008_v25, 16  ;;  %v1611_v50 = vshll.u32 %v6008_v25, 16  ;;  %1752 = vst [vmem:[#allocation2 + $0x58] sm:$0xf] %v1751_v26  ;;  %1755 = vst [vmem:[#allocation2 + $0x5c] sm:$0x1] %v1754_v31 }
 0x17b   :  { %v1629_v10 = vor.u32 %v1627_v6, %v1626_v21  ;;  %v1630_v46 = vrot.slane %v1626_v21, 4  ;;  %v1648_v7 = vshrl.u32 %v6013_v3, 16  ;;  %v1651_v54 = vshll.u32 %v6013_v3, 16  ;;  %v1800_v6 = vld [vmem:[#allocation2 + $0x10] sm:$0xf] }
 0x17c   :  { %v1610_v38 = vrot.slane %v1608_v45, 7  ;;  %v1858_v16 = vrot.slane %v1856_v5, 5  ;;  %v1425_v42 = vmul.f32 0.2, %v8159_v9  ;;  %vm1412_vm14 = vcmp.gt.f32.partialorder %v8161_v49, 0.0 }
 0x17d   :  { %v1769_v8 = vsel %vm8120_vm15, %v1629_v10, %v1768_v19  ;;  %v1772_v40 = vsel %vm8126_vm0, %v1630_v46, %v1771_v12  ;;  %v1650_v2 = vrot.slane %v1648_v7, 7  ;;  %v1789_v33 = vld [vmem:[#allocation2 + $0x8c] sm:$0x1]  ;;  %v1428_v26 = vmul.f32 0.2, %v8161_v49 }
 0x17e   :  { %1770 = vst [vmem:[#allocation2 + $0x70] sm:$0xf] %v1769_v8  ;;  %1773 = vst [vmem:[#allocation2 + $0x74] sm:$0x1] %v1772_v40  ;;  %v1613_v53 = vor.u32 %v1611_v50, %v1610_v38  ;;  %v1614_v11 = vrot.slane %v1610_v38, 4  ;;  %v1859_v25 = vor.u32 %v1858_v16, %v1855_v48  ;;  %v1441_v3 = vsel %vm1409_vm13, %v8159_v9, %v1425_v42 }
 0x17f   :  { %v1653_v21 = vor.u32 %v1651_v54, %v1650_v2  ;;  %v1654_v5 = vrot.slane %v1650_v2, 4  ;;  %v6011_v39 = vpack.c.bf16 %v1441_v3, %v1441_v3  ;;  %v1801_v31 = vld [vmem:[#allocation2 + $0x18] sm:$0xf]  ;;  %v1867_v50 = vshrl.u32 %v1800_v6, 16  ;;  %v1809_v44 = vld [vmem:[#allocation2 + $0x68] sm:$0xf] }
 0x180   :  { %v1757_v19 = vsel %vm8120_vm15, %v1613_v53, %v1756_v37  ;;  %v1760_v12 = vsel %vm8126_vm0, %v1614_v11, %v1759_v29  ;;  %v8202_v45 = vrot.slane %v1859_v25, 4  ;;  %v1774_v7 = vld [vmem:[#allocation2 + $0x78] sm:$0xf]  ;;  %v1777_v37 = vld [vmem:[#allocation2 + $0x7c] sm:$0x1]  ;;  %v1444_v54 = vsel %vm1412_vm14, %v8161_v49, %v1428_v26  ;;  %v6933_v11 = vld [vmem:[%s9015_s2 + $0x48] sm:$0xff]  }
 0x181   :  { %1758 = vst [vmem:[#allocation2 + $0x60] sm:$0xf] %v1757_v19  ;;  %1761 = vst [vmem:[#allocation2 + $0x64] sm:$0x1] %v1760_v12  ;;  %v1787_v9 = vsel %vm8120_vm15, %v1653_v21, %v1786_v4  ;;  %v1790_v48 = vsel %vm8126_vm0, %v1654_v5, %v1789_v33  ;;  %v1632_v10 = vshrl.u32 %v6011_v39, 16  ;;  %v1635_v46 = vshll.u32 %v6011_v39, 16 }
 0x182   :  { %1788 = vst [vmem:[#allocation2 + $0x88] sm:$0xf] %v1787_v9  ;;  %1791 = vst [vmem:[#allocation2 + $0x8c] sm:$0x1] %v1790_v48  ;;  %v1869_v38 = vrot.slane %v1867_v50, 4  ;;  %v1870_v16 = vshll.u32 %v1800_v6, 16  ;;  %v6014_v40 = vpack.c.bf16 %v1444_v54, %v1444_v54  ;;  %v5693_v2 = vcombine.low %v1800_v6, %v1801_v31 }
 0x183   :  { %v1881_v42 = vshrl.u32 %v1801_v31, 16  ;;  %v1634_v8 = vrot.slane %v1632_v10, 7  ;;  %v1884_v29 = vshll.u32 %v1801_v31, 16  ;;  %v1802_v53 = vld [vmem:[#allocation2 + $0x20] sm:$0xf]  ;;  %vm1410_vm1 = vcmp.gt.f32.partialorder %v8165_v18, 0.0 }
 0x184   :  { %v1872_v4 = vrot.slane %v1870_v16, 5  ;;  %v1426_v25 = vmul.f32 0.2, %v8165_v18  ;;  %v1656_v21 = vshrl.u32 %v6014_v40, 16  ;;  %v1659_v5 = vshll.u32 %v6014_v40, 16  ;;  %6358 = vmatmul.mubr.msk.bf16.vlgmr.msra.gmra.mrb[0].mxu1 %vm2119_vm10, %v5693_v2  ;;  %v6936_v54 = vld [vmem:[%s9015_s2 + $0x50] sm:$0xff]  }
 0x185   :  { %v1883_v33 = vrot.slane %v1881_v42, 4  ;;  %v1637_v3 = vor.u32 %v1635_v46, %v1634_v8  ;;  %v1638_v49 = vrot.slane %v1634_v8, 4  ;;  %v1792_v39 = vld [vmem:[#allocation2 + $0x90] sm:$0xf]  ;;  %v1886_v6 = vrot.slane %v1884_v29, 5  ;;  %6374 = vmatpush3.bf16.msra.mxu1 %v8028_v30 }
 0x186   :  { %v1873_v26 = vor.u32 %v1872_v4, %v1869_v38  ;;  %v1442_v31 = vsel %vm1410_vm1, %v8165_v18, %v1426_v25  ;;  %v1895_v19 = vshrl.u32 %v1802_v53, 16  ;;  %v1658_v9 = vrot.slane %v1656_v21, 7  ;;  %v1795_v48 = vld [vmem:[#allocation2 + $0x94] sm:$0x1]  ;;  %v1803_v46 = vld [vmem:[#allocation2 + $0x28] sm:$0xf]  ;;  %6375 = vmatprep.subr.bf16.mxu1 %v6933_v11 }
 0x187   :  { %v1775_v12 = vsel %vm8120_vm15, %v1637_v3, %v1774_v7  ;;  %v1778_v50 = vsel %vm8126_vm0, %v1638_v49, %v1777_v37  ;;  %v6012_v10 = vpack.c.bf16 %v1442_v31, %v1442_v31  ;;  %v1887_v30 = vor.u32 %v1886_v6, %v1883_v33  ;;  %v8230_v16 = vld [vmem:[#allocation2 + $0xc] sm:$0x1]  ;;  %v1804_v29 = vld [vmem:[#allocation2 + $0x30] sm:$0xf]  ;;  %v1805_v49 = vld [vmem:[#allocation2 + $0x38] sm:$0xf] }
 0x188   :  { %1776 = vst [vmem:[#allocation2 + $0x78] sm:$0xf] %v1775_v12  ;;  %1779 = vst [vmem:[#allocation2 + $0x7c] sm:$0x1] %v1778_v50  ;;  %v8226_v18 = vrot.slane %v1873_v26, 4  ;;  %v8228_v38 = vrot.slane %v1895_v19, 4  ;;  %v1661_v37 = vor.u32 %v1659_v5, %v1658_v9  ;;  %v5694_v31 = vcombine.low %v1802_v53, %v1803_v46 }
 0x189   :  { %v1898_v7 = vshll.u32 %v1802_v53, 16  ;;  %v1662_v42 = vrot.slane %v1658_v9, 4  ;;  %v1640_v8 = vshrl.u32 %v6012_v10, 16  ;;  %v1643_v40 = vshll.u32 %v6012_v10, 16  ;;  %6376 = vmatpush3.bf16.msra.mxu1 %v6933_v11  ;;  %v1780_v5 = vld [vmem:[#allocation2 + $0x80] sm:$0xf] }
 0x18a   :  { %v8232_v2 = vrot.slane %v1887_v30, 4  ;;  %v1909_v25 = vshrl.u32 %v1803_v46, 16  ;;  %v1912_v3 = vshll.u32 %v1803_v46, 16  ;;  %v1793_v33 = vsel %vm8120_vm15, %v1661_v37, %v1792_v39  ;;  %v1783_v6 = vld [vmem:[#allocation2 + $0x84] sm:$0x1]  ;;  %6377 = vmatprep.subr.bf16.mxu1 %v6936_v54  ;;  %v6939_v19 = vld [vmem:[%s9015_s2 + $0x58] sm:$0xff]   ;;  %6361 = vmatprep.mubr.msk.bf16.mxu1 %vm2119_vm10, %v5694_v31 }
 0x18b   :  { %v8234_v4 = vrot.slane %v1898_v7, 5  ;;  %v1796_v21 = vsel %vm8126_vm0, %v1662_v42, %v1795_v48  ;;  %v1642_v26 = vrot.slane %v1640_v8, 7  ;;  %1794 = vst [vmem:[#allocation2 + $0x90] sm:$0xf] %v1793_v33  ;;  %v1862_v11 = vshll.u32 %v8230_v16, 16 }
 0x18c   :  { %1797 = vst [vmem:[#allocation2 + $0x94] sm:$0x1] %v1796_v21  ;;  %v1911_v12 = vrot.slane %v1909_v25, 4  ;;  %v1914_v50 = vrot.slane %v1912_v3, 5  ;;  %v1923_v9 = vshrl.u32 %v1804_v29, 16  ;;  %v1926_v30 = vshll.u32 %v1804_v29, 16 }
 0x18d   :  { %v8244_v39 = vld [vmem:[#allocation2 + $0x14] sm:$0x1]  ;;  %v1645_v10 = vor.u32 %v1643_v40, %v1642_v26  ;;  %v1646_v48 = vrot.slane %v1642_v26, 4  ;;  %v1937_v53 = vshrl.u32 %v1805_v49, 16  ;;  %v8247_v46 = vld [vmem:[#allocation2 + $0x1c] sm:$0x1]  ;;  %v5695_v8 = vcombine.low %v1804_v29, %v1805_v49  ;;  %6378 = vmatpush3.bf16.msra.mxu1 %v6936_v54 }
 0x18e   :  { %v1864_v7 = vrot.slane %v1862_v11, 5  ;;  %v8249_v37 = vrot.slane %v1923_v9, 4  ;;  %v1940_v42 = vshll.u32 %v1805_v49, 16  ;;  %v1807_v25 = vld [vmem:[#allocation2 + $0x58] sm:$0xf]  ;;  %v1928_v33 = vrot.slane %v1926_v30, 5  ;;  %6379 = vmatprep.subr.bf16.mxu1 %v6939_v19 }
 0x18f   :  { %v1781_v3 = vsel %vm8120_vm15, %v1645_v10, %v1780_v5  ;;  %v1784_v40 = vsel %vm8126_vm0, %v1646_v48, %v1783_v6  ;;  %v8255_v21 = vrot.slane %v1937_v53, 4  ;;  %v8257_v26 = vld [vmem:[#allocation2 + $0x24] sm:$0x1]  ;;  %6362 = vmatmul.mubr.msk.bf16.gmra.mrb[4].mxu1 %vm2119_vm10, %v5695_v8  ;;  %v1876_v27 = vshll.u32 %v8244_v39, 16  ;;  %v8267_v54 = vld [vmem:[#allocation2 + $0x2c] sm:$0x1] }
 0x190   :  { %1782 = vst [vmem:[#allocation2 + $0x80] sm:$0xf] %v1781_v3  ;;  %1785 = vst [vmem:[#allocation2 + $0x84] sm:$0x1] %v1784_v40  ;;  %v1865_v29 = vsel %vm7172_vm2, %v8202_v45, %v1864_v7  ;;  %v8262_v49 = vrot.slane %v1940_v42, 5  ;;  %v1890_v34 = vshll.u32 %v8247_v46, 16  ;;  %v5696_v11 = vcombine.low %v8044_v60, %v1807_v25 }
 0x191   :  { %v8272_v5 = vld [vmem:[%s9015_s2 + $0x60] sm:$0xff]   ;;  %v5672_v45 = vcombine.low %v1851_v58, %v1865_v29  ;;  %v1965_v6 = vshrl.u32 %v1807_v25, 16  ;;  %v1968_v31 = vshll.u32 %v1807_v25, 16  ;;  %v1878_v9 = vrot.slane %v1876_v27, 5  ;;  %6380 = vmatpush3.bf16.msra.mxu1 %v6939_v19  ;;  %v8296_v8 = vld [vmem:[#allocation2 + $0x3c] sm:$0x1] }
 0x192   :  { %v1892_v10 = vrot.slane %v1890_v34, 5  ;;  %v1901_v48 = vor.u32 %v8234_v4, %v8228_v38  ;;  %v1904_v30 = vshll.u32 %v8257_v26, 16  ;;  %v1808_v53 = vld [vmem:[#allocation2 + $0x60] sm:$0xf]  ;;  %6365 = vmatprep.mubr.msk.bf16.mxu1 %vm2119_vm10, %v5696_v11  ;;  %v1915_v62 = vor.u32 %v1914_v50, %v1911_v12  ;;  %6397 = vmatprep.subr.bf16.mxu1 %v8272_v5  ;;  %v8299_v40 = vld [vmem:[#allocation2 + $0x34] sm:$0x1] }
 0x193   :  { %6333 = vmatprep.mubr.msk.bf16.mxu0 %vm2119_vm10, %v5672_v45  ;;  %v8284_v7 = vrot.slane %v1965_v6, 4  ;;  %v8286_v42 = vrot.slane %v1968_v31, 5  ;;  %v1918_v60 = vshll.u32 %v8267_v54, 16  ;;  %v1879_v58 = vsel %vm7172_vm2, %v8226_v18, %v1878_v9  ;;  %v6941_v18 = vld [vmem:[%s9015_s2 + $0x108] sm:$0xff]   ;;  %v1810_v9 = vld [vmem:[#allocation2 + $0x70] sm:$0xf] }
 0x194   :  { %v1893_v38 = vsel %vm7172_vm2, %v8232_v2, %v1892_v10  ;;  %v1902_v4 = vrot.slane %v1901_v48, 4  ;;  %v1906_v19 = vrot.slane %v1904_v30, 5  ;;  %v1916_v3 = vrot.slane %v1915_v62, 4  ;;  %v1811_v10 = vld [vmem:[#allocation2 + $0x78] sm:$0xf] }
 0x195   :  { %v5673_v25 = vcombine.low %v1879_v58, %v1893_v38  ;;  %v1920_v12 = vrot.slane %v1918_v60, 5  ;;  %v1979_v50 = vshrl.u32 %v1808_v53, 16  ;;  %v1982_v2 = vshll.u32 %v1808_v53, 16  ;;  %v8316_v58 = vld [vmem:[#allocation2 + $0x5c] sm:$0x1] }
 0x196   :  { %v1907_v29 = vsel %vm7172_vm2, %v1902_v4, %v1906_v19  ;;  %v1993_v27 = vshrl.u32 %v1809_v44, 16  ;;  %v1996_v34 = vshll.u32 %v1809_v44, 16  ;;  %v5697_v31 = vcombine.low %v1808_v53, %v1809_v44  ;;  %v6943_v53 = vld [vmem:[%s9015_s2 + $0x110] sm:$0xff]  }
 0x197   :  { %6334 = vmatmul.mubr.msk.bf16.vlgmr.msra.gmra.mrb[16].mxu0 %vm2119_vm10, %v5673_v25  ;;  %v1921_v45 = vsel %vm7172_vm2, %v1916_v3, %v1920_v12  ;;  %v8309_v6 = vrot.slane %v1979_v50, 4  ;;  %v1929_v11 = vor.u32 %v1928_v33, %v8249_v37  ;;  %v1984_v30 = vrot.slane %v1982_v2, 5  ;;  %v1813_v3 = vld [vmem:[#allocation2 + $0x88] sm:$0xf]  ;;  %v2428_v47 = vld [vmem:[#allocation2 + $0x10] sm:$0xe] }
 0x198   :  { %v5674_v48 = vcombine.low %v1907_v29, %v1921_v45  ;;  %v8312_v62 = vrot.slane %v1993_v27, 4  ;;  %v8314_v60 = vrot.slane %v1996_v34, 5  ;;  %6518 = vmatpush3.bf16.msra.mxu0 %v8037_v35  ;;  %6366 = vmatmul.mubr.msk.bf16.gmra.mrb[8].mxu1 %vm2119_vm10, %v5697_v31  ;;  %v1932_v4 = vshll.u32 %v8299_v40, 16  ;;  %v1812_v27 = vld [vmem:[#allocation2 + $0x80] sm:$0xf] }
 0x199   :  { %v1930_v38 = vrot.slane %v1929_v11, 4  ;;  %v1943_v37 = vor.u32 %v8262_v49, %v8255_v21  ;;  %v1946_v33 = vshll.u32 %v8296_v8, 16  ;;  %6519 = vmatprep.subr.bf16.mxu0 %v6941_v18  ;;  %v2007_v44 = vshrl.u32 %v1810_v9, 16 }
 0x19a   :  { %6337 = vmatprep.mubr.msk.bf16.mxu0 %vm2119_vm10, %v5674_v48  ;;  %v2010_v19 = vshll.u32 %v1810_v9, 16  ;;  %v2021_v35 = vshrl.u32 %v1811_v10, 16  ;;  %v2024_v25 = vshll.u32 %v1811_v10, 16  ;;  %v1934_v12 = vrot.slane %v1932_v4, 5 }
 0x19b   :  { %v1944_v50 = vrot.slane %v1943_v37, 4  ;;  %v1948_v29 = vrot.slane %v1946_v33, 5  ;;  %v5698_v2 = vcombine.low %v1810_v9, %v1811_v10  ;;  %v2009_v21 = vrot.slane %v2007_v44, 4  ;;  %v8336_v9 = vld [vmem:[#allocation2 + $0x64] sm:$0x1] }
 0x19c   :  { %v2012_v49 = vrot.slane %v2010_v19, 5  ;;  %v2023_v34 = vrot.slane %v2021_v35, 4  ;;  %v2026_v45 = vrot.slane %v2024_v25, 5  ;;  %6520 = vmatpush3.bf16.msra.mxu0 %v6941_v18  ;;  %v1935_v31 = vsel %vm7172_vm2, %v1930_v38, %v1934_v12  ;;  %v8338_v10 = vld [vmem:[#allocation2 + $0x6c] sm:$0x1]  ;;  %v6944_v19 = vld [vmem:[%s9015_s2 + $0x118] sm:$0xff]  }
 0x19d   :  { %v1949_v11 = vsel %vm7172_vm2, %v1944_v50, %v1948_v29  ;;  %6369 = vmatprep.mubr.msk.bf16.mxu1 %vm2119_vm10, %v5698_v2  ;;  %v1971_v48 = vor.u32 %v8286_v42, %v8284_v7  ;;  %v1974_v4 = vshll.u32 %v8316_v58, 16  ;;  %v2427_v37 = vld [vmem:[#allocation2 + $0x8] sm:$0xe]  ;;  %6521 = vmatprep.subr.bf16.mxu0 %v6943_v53  ;;  %v2035_v33 = vshrl.u32 %v1812_v27, 16  ;;  %v8343_v42 = vld [vmem:[#allocation2 + $0x74] sm:$0x1] }
 0x19e   :  { %v5675_v18 = vcombine.low %v1935_v31, %v1949_v11  ;;  %v2038_v44 = vshll.u32 %v1812_v27, 16  ;;  %v2049_v38 = vshrl.u32 %v1813_v3, 16  ;;  %v2052_v12 = vshll.u32 %v1813_v3, 16  ;;  %v8347_v11 = vld [vmem:[#allocation2 + $0x7c] sm:$0x1] }
 0x19f   :  { %v1972_v35 = vrot.slane %v1971_v48, 4  ;;  %v1976_v25 = vrot.slane %v1974_v4, 5  ;;  %v5699_v7 = vcombine.low %v1812_v27, %v1813_v3  ;;  %v2037_v50 = vrot.slane %v2035_v33, 4 }
 0x1a0   :  { %6338 = vmatmul.mubr.msk.bf16.gmra.mrb[20].mxu0 %vm2119_vm10, %v5675_v18  ;;  %v2040_v29 = vrot.slane %v2038_v44, 5  ;;  %v2051_v2 = vrot.slane %v2049_v38, 4  ;;  %v1985_v31 = vor.u32 %v1984_v30, %v8309_v6  ;;  %v2054_v20 = vrot.slane %v2052_v12, 5  ;;  %v2429_v18 = vld [vmem:[#allocation2 + $0x18] sm:$0xe] }
 0x1a1   :  { %v1977_v1 = vsel %vm7172_vm2, %v1972_v35, %v1976_v25  ;;  %6370 = vmatmul.mubr.msk.bf16.gmra.mrb[12].mxu1 %vm2119_vm10, %v5699_v7  ;;  %v1988_v3 = vshll.u32 %v8336_v9, 16  ;;  %v1999_v27 = vor.u32 %v8314_v60, %v8312_v62  ;;  %6522 = vmatpush3.bf16.msra.mxu0 %v6943_v53  ;;  %v2002_v48 = vshll.u32 %v8338_v10, 16  ;;  %v8369_v25 = vld [vmem:[#allocation2 + $0x84] sm:$0x1]  ;;  %v2430_v12 = vld [vmem:[#allocation2 + $0x20] sm:$0xe] }
 0x1a2   :  { %v5676_v6 = vcombine.low %v1963_v51, %v1977_v1  ;;  %v1986_v30 = vrot.slane %v1985_v31, 4  ;;  %v5713_v4 = vrot.slane %v2427_v37, 9  ;;  %6523 = vmatprep.subr.bf16.mxu0 %v6944_v19  ;;  %v2483_v38 = vrot.slane %v8230_v16, 5 }
 0x1a3   :  { %v1990_v33 = vrot.slane %v1988_v3, 5  ;;  %v2000_v44 = vrot.slane %v1999_v27, 4  ;;  %v2013_v35 = vor.u32 %v2012_v49, %v2009_v21  ;;  %v2004_v62 = vrot.slane %v2002_v48, 5  ;;  %v3945_v48 = vld [vmem:[#allocation2 + $0x14] sm:$0x1] }
 0x1a4   :  { %6341 = vmatprep.mubr.msk.bf16.mxu0 %vm2119_vm10, %v5676_v6  ;;  %v2016_v60 = vshll.u32 %v8343_v42, 16  ;;  %v2027_v53 = vor.u32 %v2026_v45, %v2023_v34  ;;  %v2030_v55 = vshll.u32 %v8347_v11, 16  ;;  %v2484_v0 = vsel %vm8066_vm8, %v5713_v4, %v2483_v38  ;;  %v8374_v45 = vld [vmem:[#allocation2 + $0x8c] sm:$0x1]  ;;  %v2431_v6 = vld [vmem:[#allocation2 + $0x28] sm:$0xe] }
 0x1a5   :  { %v1991_v1 = vsel %vm7172_vm2, %v1986_v30, %v1990_v33  ;;  %v2014_v51 = vrot.slane %v2013_v35, 4  ;;  %v5714_v37 = vrot.slane %v2428_v47, 9  ;;  %6524 = vmatpush3.bf16.msra.mxu0 %v6944_v19  ;;  %v2005_v16 = vsel %vm7172_vm2, %v2000_v44, %v2004_v62  ;;  %v4394_v4 = vld [vmem:[#allocation2 + $0x10] sm:$0xe]  ;;  %v4395_v33 = vld [vmem:[#allocation2 + $0x18] sm:$0xe] }
 0x1a6   :  { %v5736_v21 = vcombine.low %v8080_v63, %v2484_v0  ;;  %v2018_v49 = vrot.slane %v2016_v60, 5  ;;  %v2028_v34 = vrot.slane %v2027_v53, 4  ;;  %v5677_v7 = vcombine.low %v1991_v1, %v2005_v16  ;;  %v3947_v35 = vld [vmem:[#allocation2 + $0x1c] sm:$0x1]  ;;  %v2432_v60 = vld [vmem:[#allocation2 + $0x30] sm:$0xe] }
 0x1a7   :  { %v2032_v31 = vrot.slane %v2030_v55, 5  ;;  %v2487_v3 = vrot.slane %v8244_v39, 5  ;;  %v5715_v27 = vrot.slane %v2429_v18, 9  ;;  %v2491_v19 = vrot.slane %v8247_v46, 5 }
 0x1a8   :  { %6381 = vmatprep.mubr.msk.bf16.mxu1 %vm2119_vm10, %v5736_v21  ;;  %v2019_v47 = vsel %vm7172_vm2, %v2014_v51, %v2018_v49  ;;  %v2041_v30 = vor.u32 %v2040_v29, %v2037_v50  ;;  %v2044_v63 = vshll.u32 %v8369_v25, 16  ;;  %6342 = vmatmul.mubr.msk.bf16.gmra.mrb[24].mxu0 %vm2119_vm10, %v5677_v7  ;;  %v2055_v44 = vor.u32 %v2054_v20, %v2051_v2  ;;  %v6945_v51 = vld [vmem:[%s9015_s2 + $0x68] sm:$0xff]   ;;  %v2433_v21 = vld [vmem:[#allocation2 + $0x38] sm:$0xe] }
 0x1a9   :  { %v2033_v39 = vsel %vm7172_vm2, %v2028_v34, %v2032_v31  ;;  %v2488_v18 = vsel %vm8066_vm8, %v5714_v37, %v2487_v3  ;;  %v2058_v38 = vshll.u32 %v8374_v45, 16  ;;  %v2492_v46 = vsel %vm8066_vm8, %v5715_v27, %v2491_v19  ;;  %v2435_v31 = vld [vmem:[#allocation2 + $0x58] sm:$0xe]  ;;  %v3949_v3 = vld [vmem:[#allocation2 + $0x24] sm:$0x1] }
 0x1aa   :  { %v5678_v62 = vcombine.low %v2019_v47, %v2033_v39  ;;  %v2042_v50 = vrot.slane %v2041_v30, 4  ;;  %v2046_v29 = vrot.slane %v2044_v63, 5  ;;  %v5737_v53 = vcombine.low %v2488_v18, %v2492_v46  ;;  %v4396_v19 = vld [vmem:[#allocation2 + $0x20] sm:$0xe]  ;;  %v6946_v30 = vld [vmem:[%s9015_s2 + $0x70] sm:$0xff]  }
 0x1ab   :  { %v2056_v55 = vrot.slane %v2055_v44, 4  ;;  %v2060_v1 = vrot.slane %v2058_v38, 5  ;;  %v5716_v0 = vrot.slane %v2430_v12, 9  ;;  %v2495_v2 = vrot.slane %v8257_v26, 5  ;;  %v4397_v39 = vld [vmem:[#allocation2 + $0x28] sm:$0xe] }
 0x1ac   :  { %6345 = vmatprep.mubr.msk.bf16.mxu0 %vm2119_vm10, %v5678_v62  ;;  %v2047_v20 = vsel %vm7172_vm2, %v2042_v50, %v2046_v29  ;;  %v5717_v37 = vrot.slane %v2431_v6, 9  ;;  %v2499_v16 = vrot.slane %v8267_v54, 5  ;;  %6382 = vmatmul.mubr.msk.bf16.vlgmr.msra.gmra.mrb[0].mxu1 %vm2119_vm10, %v5737_v53  ;;  %v5912_v34 = vrot.slane %v4394_v4, 9  ;;  %v3951_v6 = vld [vmem:[#allocation2 + $0x2c] sm:$0x1] }
 0x1ad   :  { %v2061_v49 = vsel %vm7172_vm2, %v2056_v55, %v2060_v1  ;;  %v4444_v12 = vrot.slane %v3945_v48, 5  ;;  %v5913_v7 = vrot.slane %v4395_v33, 9  ;;  %v2496_v47 = vsel %vm8066_vm8, %v5716_v0, %v2495_v2  ;;  %6398 = vmatpush3.bf16.msra.mxu1 %v8272_v5  ;;  %v3953_v18 = vld [vmem:[#allocation2 + $0x34] sm:$0x1]  ;;  %v4398_v62 = vld [vmem:[#allocation2 + $0x30] sm:$0xe]  ;;  %v8420_v55 = vpop.permute.xlu1 %6798 }
 0x1ae   :  { %v5679_v27 = vcombine.low %v2047_v20, %v2061_v49  ;;  %v2500_v26 = vsel %vm8066_vm8, %v5717_v37, %v2499_v16  ;;  %v4448_v54 = vrot.slane %v3947_v35, 5  ;;  %v5718_v4 = vrot.slane %v2432_v60, 9  ;;  %6399 = vmatprep.subr.bf16.mxu1 %v6945_v51  ;;  %v3955_v60 = vld [vmem:[#allocation2 + $0x3c] sm:$0x1]  ;;  %v4399_v53 = vld [vmem:[#allocation2 + $0x38] sm:$0xe] }
 0x1af   :  { %v5738_v63 = vcombine.low %v2496_v47, %v2500_v26  ;;  %v4445_v48 = vsel %vm8066_vm8, %v5912_v34, %v4444_v12  ;;  %v2503_v33 = vrot.slane %v8299_v40, 5  ;;  %v5719_v44 = vrot.slane %v2433_v21, 9  ;;  %v2436_v2 = vld [vmem:[#allocation2 + $0x60] sm:$0xe]  ;;  %v6947_v37 = vld [vmem:[%s9015_s2 + $0x78] sm:$0xff]  }
 0x1b0   :  { %v4449_v5 = vsel %vm8066_vm8, %v5913_v7, %v4448_v54  ;;  %v2507_v38 = vrot.slane %v8296_v8, 5  ;;  %v5721_v35 = vrot.slane %v2435_v31, 9  ;;  %6346 = vmatmul.mubr.msk.bf16.gmra.mrb[28].mxu0 %vm2119_vm10, %v5679_v27  ;;  %v2515_v40 = vrot.slane %v8316_v58, 5  ;;  %v2437_v34 = vld [vmem:[#allocation2 + $0x68] sm:$0xe] }
 0x1b1   :  { %6385 = vmatprep.mubr.msk.bf16.mxu1 %vm2119_vm10, %v5738_v63  ;;  %v5936_v46 = vcombine.low %v4445_v48, %v4449_v5  ;;  %v2504_v50 = vsel %vm8066_vm8, %v5718_v4, %v2503_v33  ;;  %v5914_v29 = vrot.slane %v4396_v19, 9  ;;  %6400 = vmatpush3.bf16.msra.mxu1 %v6945_v51  ;;  %v4452_v1 = vrot.slane %v3949_v3, 5  ;;  %v2438_v12 = vld [vmem:[#allocation2 + $0x70] sm:$0xe]  ;;  %v2439_v27 = vld [vmem:[#allocation2 + $0x78] sm:$0xe] }
 0x1b2   :  { %v2508_v8 = vsel %vm8066_vm8, %v5719_v44, %v2507_v38  ;;  %v5915_v0 = vrot.slane %v4397_v39, 9  ;;  %v4456_v20 = vrot.slane %v3951_v6, 5  ;;  %v2516_v16 = vsel %vm8066_vm8, %v5721_v35, %v2515_v40  ;;  %6401 = vmatprep.subr.bf16.mxu1 %v6946_v30  ;;  %v3957_v47 = vld [vmem:[#allocation2 + $0x44] sm:$0x1]  ;;  %v4400_v63 = vld [vmem:[#allocation2 + $0x40] sm:$0xe] }
 0x1b3   :  { %6525 = vmatprep.mubr.msk.bf16.mxu0 %vm2119_vm10, %v5936_v46  ;;  %v5739_v58 = vcombine.low %v2504_v50, %v2508_v8  ;;  %v5916_v21 = vrot.slane %v4398_v62, 9  ;;  %v4460_v49 = vrot.slane %v3953_v18, 5  ;;  %v5740_v51 = vcombine.low %v8084_v61, %v2516_v16  ;;  %v3961_v48 = vld [vmem:[#allocation2 + $0x64] sm:$0x1]  ;;  %v8438_v61 = vpop.permute.xlu0 %6803  ;;  %v3963_v5 = vld [vmem:[#allocation2 + $0x6c] sm:$0x1] }
 0x1b4   :  { %v4453_v7 = vsel %vm8066_vm8, %v5914_v29, %v4452_v1  ;;  %v4457_v31 = vsel %vm8066_vm8, %v5915_v0, %v4456_v20  ;;  %v5917_v3 = vrot.slane %v4399_v53, 9  ;;  %v4464_v6 = vrot.slane %v3955_v60, 5  ;;  %v4402_v44 = vld [vmem:[#allocation2 + $0x60] sm:$0xe]  ;;  %v4403_v50 = vld [vmem:[#allocation2 + $0x68] sm:$0xe] }
 0x1b5   :  { %6386 = vmatmul.mubr.msk.bf16.gmra.mrb[4].mxu1 %vm2119_vm10, %v5739_v58  ;;  %v5937_v26 = vcombine.low %v4453_v7, %v4457_v31  ;;  %v4461_v54 = vsel %vm8066_vm8, %v5916_v21, %v4460_v49  ;;  %v5722_v19 = vrot.slane %v2436_v2, 9  ;;  %v2519_v4 = vrot.slane %v8336_v9, 5  ;;  %v8450_v9 = vld [vmem:[%s9015_s2 + $0x80] sm:$0xff]   ;;  %v2441_v53 = vld [vmem:[#allocation2 + $0x88] sm:$0xe] }
 0x1b6   :  { %6389 = vmatprep.mubr.msk.bf16.mxu1 %vm2119_vm10, %v5740_v51  ;;  %v5723_v33 = vrot.slane %v2437_v34, 9  ;;  %v2523_v39 = vrot.slane %v8338_v10, 5  ;;  %v5724_v18 = vrot.slane %v2438_v12, 9  ;;  %6402 = vmatpush3.bf16.msra.mxu1 %v6946_v30  ;;  %v4465_v38 = vsel %vm8066_vm8, %v5917_v3, %v4464_v6  ;;  %v8452_v10 = vpop.permute.xlu1 %6808  ;;  %v2440_v60 = vld [vmem:[#allocation2 + $0x80] sm:$0xe] }
 0x1b7   :  { %v2527_v35 = vrot.slane %v8343_v42, 5  ;;  %v5725_v62 = vrot.slane %v2439_v27, 9  ;;  %v2531_v46 = vrot.slane %v8347_v11, 5  ;;  %6403 = vmatprep.subr.bf16.mxu1 %v6947_v37  ;;  %v5938_v30 = vcombine.low %v4461_v54, %v4465_v38  ;;  %v3965_v0 = vld [vmem:[#allocation2 + $0x74] sm:$0x1]  ;;  %v6814_v3 = vpop.permute.xlu0 %6813 }
 0x1b8   :  { %v2520_v40 = vsel %vm8066_vm8, %v5722_v19, %v2519_v4  ;;  %v2524_v29 = vsel %vm8066_vm8, %v5723_v33, %v2523_v39  ;;  %v5918_v42 = vrot.slane %v4400_v63, 9  ;;  %6526 = vmatmul.mubr.msk.bf16.vlgmr.msra.gmra.mrb[32].mxu0 %vm2119_vm10, %v5937_v26  ;;  %v4468_v1 = vrot.slane %v3957_v47, 5  ;;  %v3967_v20 = vld [vmem:[#allocation2 + $0x7c] sm:$0x1]  ;;  %v4404_v49 = vld [vmem:[#allocation2 + $0x70] sm:$0xe] }
 0x1b9   :  { %v5741_v11 = vcombine.low %v2520_v40, %v2524_v29  ;;  %v2532_v8 = vsel %vm8066_vm8, %v5725_v62, %v2531_v46  ;;  %6529 = vmatprep.mubr.msk.bf16.mxu0 %vm2119_vm10, %v5938_v30  ;;  %v2528_v2 = vsel %vm8066_vm8, %v5724_v18, %v2527_v35  ;;  %v5920_v58 = vrot.slane %v4402_v44, 9  ;;  %v4405_v31 = vld [vmem:[#allocation2 + $0x78] sm:$0xe]  ;;  %v2961_v29 = vld [vmem:[#allocation2 + $0x8] sm:$0xf] }
 0x1ba   :  { %v4476_v16 = vrot.slane %v3961_v48, 5  ;;  %v5921_v21 = vrot.slane %v4403_v50, 9  ;;  %6404 = vmatpush3.bf16.msra.mxu1 %v6947_v37  ;;  %v4469_v34 = vsel %vm8066_vm8, %v5918_v42, %v4468_v1  ;;  %v4480_v12 = vrot.slane %v3963_v5, 5  ;;  %v6819_v63 = vpop.permute.xlu1 %6818 }
 0x1bb   :  { %v5726_v51 = vrot.slane %v2440_v60, 9  ;;  %v2535_v7 = vrot.slane %v8369_v25, 5  ;;  %6421 = vmatprep.subr.bf16.mxu1 %v8450_v9  ;;  %v5742_v27 = vcombine.low %v2528_v2, %v2532_v8  ;;  %v5727_v26 = vrot.slane %v2441_v53, 9  ;;  %v8493_v62 = vpop.permute.xlu0 %6823 }
 0x1bc   :  { %v4477_v47 = vsel %vm8066_vm8, %v5920_v58, %v4476_v16  ;;  %v2539_v54 = vrot.slane %v8374_v45, 5  ;;  %v5939_v37 = vcombine.low %v4469_v34, %v8088_v57  ;;  %v4481_v6 = vsel %vm8066_vm8, %v5921_v21, %v4480_v12  ;;  %v8517_v16 = vld [vmem:[#allocation2 + $0xc] sm:$0x1] }
 0x1bd   :  { %6390 = vmatmul.mubr.msk.bf16.gmra.mrb[8].mxu1 %vm2119_vm10, %v5741_v11  ;;  %v2536_v25 = vsel %vm8066_vm8, %v5726_v51, %v2535_v7  ;;  %v7015_v19 = vadd.low.f32.bf16 %v8104_v41, %v8106_v24  ;;  %v5922_v48 = vrot.slane %v4404_v49, 9  ;;  %v4484_v4 = vrot.slane %v3965_v0, 5  ;;  %v2963_v0 = vld [vmem:[#allocation2 + $0x10] sm:$0xf]  ;;  %v6980_v51 = vld [vmem:[%s9016_s3] sm:$0xff]   ;;  %v6953_v7 = vld [vmem:[%s9015_s2 + $0x88] sm:$0xff]  }
 0x1be   :  { %6393 = vmatprep.mubr.msk.bf16.mxu1 %vm2119_vm10, %v5742_v27  ;;  %v5923_v33 = vrot.slane %v4405_v31, 9  ;;  %v4488_v45 = vrot.slane %v3967_v20, 5  ;;  %v5940_v39 = vcombine.low %v4477_v47, %v4481_v6  ;;  %v2540_v57 = vsel %vm8066_vm8, %v5727_v26, %v2539_v54  ;;  %v6981_v47 = vld [vmem:[%s9016_s3 + $0x8] sm:$0xff]   ;;  %v6949_v26 = vld [vmem:[#allocation2 + $0x18] ss:$8 sps:$4 sm:$0xff]   ;;  %6541 = vmatprep.subr.bf16.mxu0 %v6980_v51 }
 0x1bf   :  { %v7016_v18 = vadd.high.f32.bf16 %v8110_v13, %v8420_v55  ;;  %v5743_v5 = vcombine.low %v2536_v25, %v2540_v57  ;;  %v5245_v44 = vpack.c.bf16 %v8092_v36, %v8090_v23  ;;  %v7017_v38 = vadd.low.f32.bf16 %v8114_v22, %v8420_v55  ;;  %v6948_v22 = vld [vmem:[#allocation2 + $0x8] ss:$8 sps:$4 sm:$0xff]   ;;  %v6834_v2 = vpop.permute.xlu0 %6833  ;;  %6542 = vmatpush3.bf16.msra.mxu0 %v6980_v51 }
 0x1c0   :  { %6530 = vmatmul.mubr.msk.bf16.gmra.mrb[36].mxu0 %vm2119_vm10, %v5939_v37  ;;  %v4489_v41 = vsel %vm8066_vm8, %v5923_v33, %v4488_v45  ;;  %v5246_v35 = vpack.c.bf16 %v8096_v43, %v8094_v28  ;;  %v7018_v13 = vadd.low.f32.bf16 %v7015_v19, %v8438_v61  ;;  %v9044_v23 = vadd.high.f32.bf16 %v8100_v17, %v8106_v24  ;;  %v8506_v43 = vpop.permute.xlu1 %6828  ;;  %v6951_v54 = vld [vmem:[#allocation2 + $0x28] ss:$8 sps:$4 sm:$0xff]   ;;  %v2965_v45 = vld [vmem:[#allocation2 + $0x18] sm:$0xf] }
 0x1c1   :  { %6533 = vmatprep.mubr.msk.bf16.mxu0 %vm2119_vm10, %v5940_v39  ;;  %5272 = vrot.lane.b32.xlu0 %v5245_v44, %s7070_s9  ;;  %v4485_v46 = vsel %vm8066_vm8, %v5922_v48, %v4484_v4  ;;  %v7020_v28 = vadd.high.f32.bf16 %v7016_v18, %v8452_v10  ;;  %v7021_v40 = vadd.low.f32.bf16 %v7017_v38, %v8452_v10  ;;  %v9045_v24 = vunpack.c.h.bf16 %v7783_v52 }
 0x1c2   :  { %v7019_v36 = vadd.high.f32.bf16 %v9044_v23, %v8438_v61  ;;  %5274 = vrot.lane.b32.xlu1 %v5246_v35, %s7070_s9  ;;  %v5941_v55 = vcombine.low %v4485_v46, %v4489_v41  ;;  %v5233_v50 = vmul.f32 0.25, %v7018_v13  ;;  %v9046_v42 = vunpack.c.l.bf16 %v7783_v52  ;;  %6543 = vmatprep.subr.bf16.mxu0 %v6981_v47  ;;  %v8547_v35 = vld [vmem:[#allocation2 + $0x1c] sm:$0x1]  ;;  %v2967_v23 = vld [vmem:[#allocation2 + $0x20] sm:$0xf] }
 0x1c3   :  { %v5236_v17 = vmul.f32 0.25, %v7020_v28  ;;  %v7022_v61 = vadd.high.f32.bf16 %v9045_v24, %v6814_v3  ;;  %v5235_v53 = vmul.f32 0.25, %v7021_v40  ;;  %v9047_v11 = vunpack.c.h.bf16 %v7798_v14  ;;  %v6844_v41 = vpop.permute.xlu0 %6843  ;;  %6544 = vmatpush3.bf16.msra.mxu0 %v6981_v47  ;;  %v8553_v40 = vld [vmem:[#allocation2 + $0x24] sm:$0x1] }
 0x1c4   :  { %v5234_v30 = vmul.f32 0.25, %v7019_v36  ;;  %v7023_v60 = vadd.low.f32.bf16 %v9046_v42, %v6814_v3  ;;  %v2994_v20 = vshrl.u32 %v2961_v29, 16  ;;  %v2997_v10 = vshll.u32 %v2961_v29, 16  ;;  %v6839_v12 = vpop.permute.xlu1 %6838  ;;  %v8531_v3 = vld [vmem:[#allocation2 + $0x14] sm:$0x1]  ;;  %v6959_v29 = vld [vmem:[%s9015_s2 + $0x98] sm:$0xff]  }
 0x1c5   :  { %6394 = vmatmul.mubr.msk.bf16.gmra.mrb[12].mxu1 %vm2119_vm10, %v5743_v5  ;;  %v7024_v8 = vadd.high.f32.bf16 %v9047_v11, %v6819_v63  ;;  %v5248_v58 = vpack.c.bf16 %v5236_v17, %v5235_v53  ;;  %v9048_v21 = vunpack.c.l.bf16 %v7798_v14  ;;  %v7026_v31 = vadd.high.f32.bf16 %v7022_v61, %v8493_v62  ;;  %v6956_v5 = vld [vmem:[%s9015_s2 + $0x90] sm:$0xff]   ;;  %v6952_v36 = vld [vmem:[#allocation2 + $0x38] ss:$8 sps:$4 sm:$0xff]  }
 0x1c6   :  { %6405 = vmatprep.mubr.msk.bf16.mxu1 %vm2119_vm10, %v6948_v22  ;;  %v5247_v1 = vpack.c.bf16 %v5234_v30, %v5233_v50  ;;  %v2996_v49 = vrot.slane %v2994_v20, 4  ;;  %v2999_v34 = vrot.slane %v2997_v10, 5  ;;  %v3008_v14 = vshrl.u32 %v2963_v0, 16  ;;  %v2971_v42 = vld [vmem:[#allocation2 + $0x30] sm:$0xf] }
 0x1c7   :  { %v7025_v52 = vadd.low.f32.bf16 %v9048_v21, %v6819_v63  ;;  %5278 = vrot.lane.b32.xlu1 %v5248_v58, %s7070_s9  ;;  %v3011_v27 = vshll.u32 %v2963_v0, 16  ;;  %v7027_v37 = vadd.low.f32.bf16 %v7023_v60, %v8493_v62  ;;  %v7028_v6 = vadd.high.f32.bf16 %v7024_v8, %v8506_v43  ;;  %v2969_v8 = vld [vmem:[#allocation2 + $0x28] sm:$0xf]  ;;  %v6854_v21 = vpop.permute.xlu0 %6853 }
 0x1c8   :  { %6534 = vmatmul.mubr.msk.bf16.gmra.mrb[40].mxu0 %vm2119_vm10, %v5941_v55  ;;  %5276 = vrot.lane.b32.xlu0 %v5247_v1, %s7070_s9  ;;  %v3000_v25 = vor.u32 %v2999_v34, %v2996_v49  ;;  %v3003_v19 = vshll.u32 %v8517_v16, 16  ;;  %v3010_v63 = vrot.slane %v3008_v14, 4  ;;  %v3017_v33 = vshll.u32 %v8531_v3, 16  ;;  %v6849_v38 = vpop.permute.xlu1 %6848 }
 0x1c9   :  { %v3013_v48 = vrot.slane %v3011_v27, 5  ;;  %v7029_v4 = vadd.low.f32.bf16 %v7025_v52, %v8506_v43  ;;  %v7030_v18 = vadd.high.f32.bf16 %v7026_v31, %v6834_v2  ;;  %v7031_v44 = vadd.low.f32.bf16 %v7027_v37, %v6834_v2  ;;  %v6954_v43 = vld [vmem:[#allocation2 + $0x58] ss:$8 sps:$4 sm:$0xff]  }
 0x1ca   :  { %v3001_v39 = vrot.slane %v3000_v25, 4  ;;  %v3005_v62 = vrot.slane %v3003_v19, 5  ;;  %v7032_v13 = vadd.high.f32.bf16 %v7028_v6, %v6839_v12  ;;  %v3025_v28 = vshll.u32 %v2965_v45, 16 }
 0x1cb   :  { %v3014_v57 = vor.u32 %v3013_v48, %v3010_v63  ;;  %v3019_v55 = vrot.slane %v3017_v33, 5  ;;  %v8551_v50 = vmul.f32 0.25, %v7030_v18  ;;  %v7033_v30 = vadd.low.f32.bf16 %v7029_v4, %v6839_v12  ;;  %v8568_v12 = vld [vmem:[#allocation2 + $0x2c] sm:$0x1]  ;;  %v8586_v33 = vld [vmem:[#allocation2 + $0x34] sm:$0x1] }
 0x1cc   :  { %v3006_v22 = vsel %vm7172_vm2, %v3001_v39, %v3005_v62  ;;  %v5237_v17 = vmul.f32 0.25, %v7031_v44  ;;  %v3027_v61 = vrot.slane %v3025_v28, 5  ;;  %v5240_v60 = vmul.f32 0.25, %v7032_v13  ;;  %v6859_v52 = vpop.permute.xlu1 %6858  ;;  %v6864_v44 = vpop.permute.xlu0 %6863 }
 0x1cd   :  { %6406 = vmatmul.mubr.msk.bf16.vlgmr.msra.gmra.mrb[0].mxu1 %vm2119_vm10, %v6949_v26  ;;  %v3015_v46 = vrot.slane %v3014_v57, 4  ;;  %v3031_v53 = vshll.u32 %v8547_v35, 16  ;;  %v3036_v11 = vshrl.u32 %v2967_v23, 16  ;;  %v9049_v0 = vunpack.c.h.bf16 %v7892_v15  ;;  %v6955_v57 = vld [vmem:[#allocation2 + $0x68] ss:$8 sps:$4 sm:$0xff]  }
 0x1ce   :  { %6409 = vmatprep.mubr.msk.bf16.mxu1 %vm2119_vm10, %v6951_v54  ;;  %6422 = vmatpush3.bf16.msra.mxu1 %v8450_v9  ;;  %v3022_v9 = vshrl.u32 %v2965_v45, 16  ;;  %v9050_v10 = vunpack.c.l.bf16 %v7892_v15  ;;  %v3039_v58 = vshll.u32 %v2967_v23, 16  ;;  %v5239_v49 = vmul.f32 0.25, %v7033_v30  ;;  %v8575_v15 = vld [vmem:[%s9015_s2 + $0xa0] sm:$0xff]  }
 0x1cf   :  { %6423 = vmatprep.subr.bf16.mxu1 %v6953_v7  ;;  %v3020_v1 = vsel %vm7172_vm2, %v3015_v46, %v3019_v55  ;;  %v7034_v20 = vadd.high.f32.bf16 %v9049_v0, %v6844_v41  ;;  %v3045_v34 = vshll.u32 %v8553_v40, 16  ;;  %v3064_v51 = vshrl.u32 %v2971_v42, 16  ;;  %v2973_v46 = vld [vmem:[#allocation2 + $0x38] sm:$0xf]  ;;  %v2975_v30 = vld [vmem:[#allocation2 + $0x40] sm:$0xf] }
 0x1d0   :  { %v3024_v24 = vrot.slane %v3022_v9, 4  ;;  %v7035_v2 = vadd.low.f32.bf16 %v9050_v10, %v6844_v41  ;;  %v9051_v31 = vunpack.c.h.bf16 %v7907_v59  ;;  %v3050_v47 = vshrl.u32 %v2969_v8, 16  ;;  %v6869_v41 = vpop.permute.xlu1 %6868 }
 0x1d1   :  { %v3053_v26 = vshll.u32 %v2969_v8, 16  ;;  %v8577_v54 = vcombine.low %v3006_v22, %v3020_v1  ;;  %v9052_v37 = vunpack.c.l.bf16 %v7907_v59  ;;  %v8581_v25 = vrot.slane %v3031_v53, 5  ;;  %v6958_v53 = vld [vmem:[#allocation2 + $0x88] ss:$8 sps:$4 sm:$0xff]  }
 0x1d2   :  { %6424 = vmatpush3.bf16.msra.mxu1 %v6953_v7  ;;  %v3067_v7 = vshll.u32 %v2971_v42, 16  ;;  %v7036_v14 = vadd.high.f32.bf16 %v9051_v31, %v6849_v38  ;;  %v3028_v27 = vor.u32 %v3027_v61, %v3024_v24  ;;  %v3038_v19 = vrot.slane %v3036_v11, 4 }
 0x1d3   :  { %6425 = vmatprep.subr.bf16.mxu1 %v6956_v5  ;;  %v7037_v6 = vadd.low.f32.bf16 %v9052_v37, %v6849_v38  ;;  %v3041_v63 = vrot.slane %v3039_v58, 5  ;;  %v3059_v48 = vshll.u32 %v8568_v12, 16  ;;  %v8584_v4 = vrot.slane %v3045_v34, 5  ;;  %v6957_v38 = vld [vmem:[#allocation2 + $0x78] ss:$8 sps:$4 sm:$0xff]  }
 0x1d4   :  { %v3066_v45 = vrot.slane %v3064_v51, 4  ;;  %v3069_v39 = vrot.slane %v3067_v7, 5  ;;  %v8588_v18 = vrot.slane %v3028_v27, 4  ;;  %v3052_v59 = vrot.slane %v3050_v47, 4  ;;  %v8603_v51 = vld [vmem:[#allocation2 + $0x44] sm:$0x1] }
 0x1d5   :  { %6410 = vmatmul.mubr.msk.bf16.gmra.mrb[4].mxu1 %vm2119_vm10, %v6952_v36  ;;  %v7038_v62 = vadd.low.f32.bf16 %v7035_v2, %v6854_v21  ;;  %v7039_v13 = vadd.high.f32.bf16 %v7034_v20, %v6854_v21  ;;  %v7040_v23 = vadd.high.f32.bf16 %v7036_v14, %v6859_v52  ;;  %v5249_v36 = vpack.c.bf16 %v8551_v50, %v5237_v17  ;;  %v2977_v20 = vld [vmem:[#allocation2 + $0x58] sm:$0xf] }
 0x1d6   :  { %6413 = vmatprep.mubr.msk.bf16.mxu1 %vm2119_vm10, %v6954_v43  ;;  %6426 = vmatpush3.bf16.msra.mxu1 %v6956_v5  ;;  %v3055_v5 = vrot.slane %v3053_v26, 5  ;;  %v3042_v9 = vor.u32 %v3041_v63, %v3038_v19  ;;  %v3073_v28 = vshll.u32 %v8586_v33, 16  ;;  %v7041_v43 = vadd.low.f32.bf16 %v7037_v6, %v6859_v52  ;;  %v2979_v52 = vld [vmem:[#allocation2 + $0x60] sm:$0xf]  ;;  %v8606_v6 = vld [vmem:[#allocation2 + $0x3c] sm:$0x1] }
 0x1d7   :  { %6427 = vmatprep.subr.bf16.mxu1 %v6959_v29  ;;  %v5250_v22 = vpack.c.bf16 %v5240_v60, %v5239_v49  ;;  %v3070_v55 = vor.u32 %v3069_v39, %v3066_v45  ;;  %5280 = vrot.lane.b32.xlu0 %v5249_v36, %s7070_s9  ;;  %v3078_v24 = vshrl.u32 %v2973_v46, 16  ;;  %v3081_v50 = vshll.u32 %v2973_v46, 16 }
 0x1d8   :  { %v3034_v17 = vsel %vm7172_vm2, %v8588_v18, %v8581_v25  ;;  %v7042_v61 = vadd.low.f32.bf16 %v7038_v62, %v6864_v44  ;;  %v7043_v42 = vadd.high.f32.bf16 %v7039_v13, %v6864_v44  ;;  %v7044_v60 = vadd.high.f32.bf16 %v7040_v23, %v6869_v41  ;;  %v2983_v62 = vld [vmem:[#allocation2 + $0x70] sm:$0xf]  ;;  %v8619_v23 = vld [vmem:[#allocation2 + $0x64] sm:$0x1] }
 0x1d9   :  { %5282 = vrot.lane.b32.xlu1 %v5250_v22, %s7070_s9  ;;  %v3043_v11 = vrot.slane %v3042_v9, 4  ;;  %v3056_v8 = vor.u32 %v3055_v5, %v3052_v59  ;;  %v7045_v1 = vadd.low.f32.bf16 %v7041_v43, %v6869_v41  ;;  %v3092_v0 = vshrl.u32 %v2975_v30, 16  ;;  %v2981_v59 = vld [vmem:[#allocation2 + $0x68] sm:$0xf] }
 0x1da   :  { %6428 = vmatpush3.bf16.msra.mxu1 %v6959_v29  ;;  %v8596_v29 = vrot.slane %v3059_v48, 5  ;;  %v3071_v10 = vrot.slane %v3070_v55, 4  ;;  %v3075_v2 = vrot.slane %v3073_v28, 5  ;;  %v3080_v58 = vrot.slane %v3078_v24, 4 }
 0x1db   :  { %6445 = vmatprep.subr.bf16.mxu1 %v8575_v15  ;;  %v3083_v21 = vrot.slane %v3081_v50, 5  ;;  %v5241_v49 = vmul.f32 0.25, %v7042_v61  ;;  %v5242_v34 = vmul.f32 0.25, %v7043_v42  ;;  %v3094_v7 = vrot.slane %v3092_v0, 4  ;;  %v6961_v42 = vld [vmem:[%s9015_s2 + $0xa8] sm:$0xff]  }
 0x1dc   :  { %v3095_v31 = vshll.u32 %v2975_v30, 16  ;;  %v5243_v14 = vmul.f32 0.25, %v7045_v1  ;;  %v5244_v27 = vmul.f32 0.25, %v7044_v60  ;;  %v3106_v47 = vshrl.u32 %v2977_v20, 16 }
 0x1dd   :  { %6414 = vmatmul.mubr.msk.bf16.gmra.mrb[8].mxu1 %vm2119_vm10, %v6955_v57  ;;  %v3109_v26 = vshll.u32 %v2977_v20, 16  ;;  %v3057_v37 = vrot.slane %v3056_v8, 4  ;;  %v3120_v19 = vshrl.u32 %v2979_v52, 16  ;;  %v3123_v63 = vshll.u32 %v2979_v52, 16  ;;  %v8614_v57 = vld [vmem:[#allocation2 + $0x5c] sm:$0x1] }
 0x1de   :  { %6417 = vmatprep.mubr.msk.bf16.mxu1 %vm2119_vm10, %v6957_v38  ;;  %v3097_v25 = vrot.slane %v3095_v31, 5  ;;  %v3048_v48 = vsel %vm7172_vm2, %v3043_v11, %v8584_v4  ;;  %v3084_v45 = vor.u32 %v3083_v21, %v3080_v58  ;;  %v3101_v39 = vshll.u32 %v8603_v51, 16  ;;  %v2985_v11 = vld [vmem:[#allocation2 + $0x78] sm:$0xf] }
 0x1df   :  { %v3108_v18 = vrot.slane %v3106_v47, 4  ;;  %v3111_v44 = vrot.slane %v3109_v26, 5  ;;  %v3122_v41 = vrot.slane %v3120_v19, 4  ;;  %v3125_v38 = vrot.slane %v3123_v63, 5 }
 0x1e0   :  { %v3098_v5 = vor.u32 %v3097_v25, %v3094_v7  ;;  %v3076_v13 = vsel %vm7172_vm2, %v3071_v10, %v3075_v2  ;;  %v5251_v4 = vpack.c.bf16 %v5242_v34, %v5241_v49  ;;  %v5252_v36 = vpack.c.bf16 %v5244_v27, %v5243_v14  ;;  %v2987_v10 = vld [vmem:[#allocation2 + $0x80] sm:$0xf]  ;;  %v6962_v34 = vld [vmem:[%s9015_s2 + $0xb0] sm:$0xff]   ;;  %v8643_v7 = vld [vmem:[#allocation2 + $0x84] sm:$0x1] }
 0x1e1   :  { %v3126_v9 = vor.u32 %v3125_v38, %v3122_v41  ;;  %v3134_v28 = vshrl.u32 %v2981_v59, 16  ;;  %v3137_v43 = vshll.u32 %v2981_v59, 16  ;;  %v3085_v22 = vrot.slane %v3084_v45, 4  ;;  %v2989_v25 = vld [vmem:[#allocation2 + $0x88] sm:$0xf] }
 0x1e2   :  { %v3099_v46 = vrot.slane %v3098_v5, 4  ;;  %v3103_v55 = vrot.slane %v3101_v39, 5  ;;  %v3115_v30 = vshll.u32 %v8614_v57, 16  ;;  %5284 = vrot.lane.b32.xlu0 %v5251_v4, %s7070_s9  ;;  %5286 = vrot.lane.b32.xlu1 %v5252_v36, %s7070_s9  ;;  %v3148_v24 = vshrl.u32 %v2983_v62, 16  ;;  %v2991_v45 = vld [vmem:[#allocation2 + $0x90] sm:$0xf] }
 0x1e3   :  { %v5793_v50 = vcombine.low %v3034_v17, %v3048_v48  ;;  %v3062_v61 = vsel %vm7172_vm2, %v3057_v37, %v8596_v29  ;;  %v3112_v60 = vor.u32 %v3111_v44, %v3108_v18  ;;  %v3127_v20 = vrot.slane %v3126_v9, 4  ;;  %v8634_v17 = vld [vmem:[#allocation2 + $0x74] sm:$0x1]  ;;  %v8647_v18 = vld [vmem:[#allocation2 + $0x6c] sm:$0x1] }
 0x1e4   :  { %v5794_v8 = vcombine.low %v3062_v61, %v3076_v13  ;;  %v3104_v0 = vsel %vm7172_vm2, %v3099_v46, %v3103_v55  ;;  %v3136_v29 = vrot.slane %v3134_v28, 4  ;;  %v3139_v2 = vrot.slane %v3137_v43, 5  ;;  %v8650_v38 = vld [vmem:[#allocation2 + $0x7c] sm:$0x1] }
 0x1e5   :  { %6418 = vmatmul.mubr.msk.bf16.gmra.mrb[12].mxu1 %vm2119_vm10, %v6958_v53  ;;  %v3129_v53 = vshll.u32 %v8619_v23, 16  ;;  %v3150_v58 = vrot.slane %v3148_v24, 4  ;;  %v3151_v21 = vshll.u32 %v2983_v62, 16  ;;  %v3117_v49 = vrot.slane %v3115_v30, 5  ;;  %v6963_v28 = vld [vmem:[%s9015_s2 + $0xb8] sm:$0xff]  }
 0x1e6   :  { %6429 = vmatprep.mubr.msk.bf16.mxu1 %vm2119_vm10, %v8577_v54  ;;  %v3087_v54 = vshll.u32 %v8606_v6, 16  ;;  %v3162_v31 = vshrl.u32 %v2985_v11, 16  ;;  %v3165_v14 = vshll.u32 %v2985_v11, 16  ;;  %v3113_v27 = vrot.slane %v3112_v60, 4 }
 0x1e7   :  { %v3131_v47 = vrot.slane %v3129_v53, 5  ;;  %v3153_v26 = vrot.slane %v3151_v21, 5  ;;  %v3176_v37 = vshrl.u32 %v2987_v10, 16  ;;  %v3179_v48 = vshll.u32 %v2987_v10, 16 }
 0x1e8   :  { %v3089_v1 = vrot.slane %v3087_v54, 5  ;;  %v3167_v63 = vrot.slane %v3165_v14, 5  ;;  %v3140_v59 = vor.u32 %v3139_v2, %v3136_v29  ;;  %v3157_v41 = vshll.u32 %v8634_v17, 16  ;;  %v8667_v29 = vld [vmem:[%s9015_s2 + $0xc0] sm:$0xff]  }
 0x1e9   :  { %v3132_v39 = vsel %vm7172_vm2, %v3127_v20, %v3131_v47  ;;  %v3154_v5 = vor.u32 %v3153_v26, %v3150_v58  ;;  %v3178_v44 = vrot.slane %v3176_v37, 4  ;;  %v3181_v62 = vrot.slane %v3179_v48, 5  ;;  %v8662_v20 = vld [vmem:[#allocation2 + $0x94] sm:$0x1]  ;;  %v3412_v47 = vld [vmem:[#allocation2 + $0x10] sm:$0xe] }
 0x1ea   :  { %v3090_v52 = vsel %vm7172_vm2, %v3085_v22, %v3089_v1  ;;  %v3190_v13 = vshrl.u32 %v2989_v25, 16  ;;  %v3193_v54 = vshll.u32 %v2989_v25, 16  ;;  %v3118_v4 = vsel %vm7172_vm2, %v3113_v27, %v3117_v49  ;;  %v8673_v49 = vld [vmem:[#allocation2 + $0x8c] sm:$0x1] }
 0x1eb   :  { %v5795_v19 = vcombine.low %v3090_v52, %v3104_v0  ;;  %v3185_v46 = vshll.u32 %v8643_v7, 16  ;;  %v3204_v9 = vshrl.u32 %v2991_v45, 16  ;;  %v5796_v43 = vcombine.low %v3118_v4, %v3132_v39 }
 0x1ec   :  { %v3143_v22 = vshll.u32 %v8647_v18, 16  ;;  %v3155_v55 = vrot.slane %v3154_v5, 4  ;;  %v3182_v30 = vor.u32 %v3181_v62, %v3178_v44  ;;  %v3141_v24 = vrot.slane %v3140_v59, 4 }
 0x1ed   :  { %6430 = vmatmul.mubr.msk.bf16.vlgmr.msra.gmra.mrb[0].mxu1 %vm2119_vm10, %v5793_v50  ;;  %v3171_v50 = vshll.u32 %v8650_v38, 16  ;;  %v3206_v61 = vrot.slane %v3204_v9, 4  ;;  %v3159_v60 = vrot.slane %v3157_v41, 5  ;;  %v3192_v11 = vrot.slane %v3190_v13, 4  ;;  %v3413_v9 = vld [vmem:[#allocation2 + $0x18] sm:$0xe] }
 0x1ee   :  { %6433 = vmatprep.mubr.msk.bf16.mxu1 %vm2119_vm10, %v5794_v8  ;;  %6446 = vmatpush3.bf16.msra.mxu1 %v8575_v15  ;;  %v3164_v15 = vrot.slane %v3162_v31, 4  ;;  %v3183_v53 = vrot.slane %v3182_v30, 4  ;;  %v3195_v8 = vrot.slane %v3193_v54, 5  ;;  %v3187_v0 = vrot.slane %v3185_v46, 5  ;;  %v3414_v54 = vld [vmem:[#allocation2 + $0x20] sm:$0xe] }
 0x1ef   :  { %6447 = vmatprep.subr.bf16.mxu1 %v6961_v42  ;;  %v3145_v2 = vrot.slane %v3143_v22, 5  ;;  %v3160_v58 = vsel %vm7172_vm2, %v3155_v55, %v3159_v60  ;;  %v3173_v21 = vrot.slane %v3171_v50, 5  ;;  %v3213_v27 = vshll.u32 %v8662_v20, 16  ;;  %v3415_v22 = vld [vmem:[#allocation2 + $0x28] sm:$0xe] }
 0x1f0   :  { %v3168_v36 = vor.u32 %v3167_v63, %v3164_v15  ;;  %v3188_v52 = vsel %vm7172_vm2, %v3183_v53, %v3187_v0  ;;  %v3196_v14 = vor.u32 %v3195_v8, %v3192_v11  ;;  %v3411_v63 = vld [vmem:[#allocation2 + $0x8] sm:$0xe]  ;;  %v5813_v48 = vrot.slane %v3412_v47, 9  ;;  %v3418_v53 = vld [vmem:[#allocation2 + $0x40] sm:$0xe] }
 0x1f1   :  { %v3146_v31 = vsel %vm7172_vm2, %v3141_v24, %v3145_v2  ;;  %v3215_v59 = vrot.slane %v3213_v27, 5  ;;  %v5812_v5 = vrot.slane %v3411_v63, 9  ;;  %v3461_v44 = vrot.slane %v8517_v16, 5  ;;  %v3420_v8 = vld [vmem:[#allocation2 + $0x60] sm:$0xe] }
 0x1f2   :  { %6448 = vmatpush3.bf16.msra.mxu1 %v6961_v42  ;;  %v3207_v42 = vshll.u32 %v2991_v45, 16  ;;  %v3169_v1 = vrot.slane %v3168_v36, 4  ;;  %v5797_v26 = vcombine.low %v3146_v31, %v3160_v58  ;;  %v3465_v45 = vrot.slane %v8531_v3, 5  ;;  %v3416_v36 = vld [vmem:[#allocation2 + $0x30] sm:$0xe] }
 0x1f3   :  { %6449 = vmatprep.subr.bf16.mxu1 %v6962_v34  ;;  %v3197_v39 = vrot.slane %v3196_v14, 4  ;;  %v3462_v46 = vsel %vm8066_vm8, %v5812_v5, %v3461_v44  ;;  %v3473_v16 = vrot.slane %v8553_v40, 5  ;;  %v5817_v55 = vrot.slane %v3416_v36, 9  ;;  %v3417_v0 = vld [vmem:[#allocation2 + $0x38] sm:$0xe] }
 0x1f4   :  { %v3209_v10 = vrot.slane %v3207_v42, 5  ;;  %v3174_v37 = vsel %vm7172_vm2, %v3169_v1, %v3173_v21  ;;  %v3466_v13 = vsel %vm8066_vm8, %v5813_v48, %v3465_v45  ;;  %v3481_v30 = vrot.slane %v8586_v33, 5  ;;  %v3419_v58 = vld [vmem:[#allocation2 + $0x58] sm:$0xe]  ;;  %v3425_v36 = vld [vmem:[#allocation2 + $0x88] sm:$0xe] }
 0x1f5   :  { %6434 = vmatmul.mubr.msk.bf16.gmra.mrb[4].mxu1 %vm2119_vm10, %v5795_v19  ;;  %v5798_v25 = vcombine.low %v3174_v37, %v3188_v52  ;;  %v3199_v19 = vshll.u32 %v8673_v49, 16  ;;  %v5814_v24 = vrot.slane %v3413_v9, 9  ;;  %v3469_v50 = vrot.slane %v8547_v35, 5  ;;  %v6965_v35 = vld [vmem:[%s9015_s2 + $0xc8] sm:$0xff]   ;;  %v3423_v45 = vld [vmem:[#allocation2 + $0x78] sm:$0xe] }
 0x1f6   :  { %6437 = vmatprep.mubr.msk.bf16.mxu1 %vm2119_vm10, %v5796_v43  ;;  %6450 = vmatpush3.bf16.msra.mxu1 %v6962_v34  ;;  %v3210_v34 = vor.u32 %v3209_v10, %v3206_v61  ;;  %v5815_v43 = vrot.slane %v3414_v54, 9  ;;  %v5816_v61 = vrot.slane %v3415_v22, 9  ;;  %v3477_v42 = vrot.slane %v8568_v12, 5  ;;  %v3426_v54 = vld [vmem:[#allocation2 + $0x90] sm:$0xe] }
 0x1f7   :  { %6451 = vmatprep.subr.bf16.mxu1 %v6963_v28  ;;  %v3201_v41 = vrot.slane %v3199_v19, 5  ;;  %v3482_v40 = vsel %vm8066_vm8, %v5817_v55, %v3481_v30  ;;  %v3470_v11 = vsel %vm8066_vm8, %v5814_v24, %v3469_v50  ;;  %v5819_v10 = vrot.slane %v3418_v53, 9  ;;  %v6967_v19 = vld [vmem:[%s9015_s2 + $0xd8] sm:$0xff]   ;;  %v6969_v24 = vld [vmem:[#allocation2 + $0x20] ss:$8 sps:$4 sm:$0xff]  }
 0x1f8   :  { %v3211_v15 = vrot.slane %v3210_v34, 4  ;;  %v3474_v60 = vsel %vm8066_vm8, %v5815_v43, %v3473_v16  ;;  %v3478_v1 = vsel %vm8066_vm8, %v5816_v61, %v3477_v42  ;;  %v3489_v2 = vrot.slane %v8603_v51, 5  ;;  %v6966_v51 = vld [vmem:[%s9015_s2 + $0xd0] sm:$0xff]   ;;  %v6973_v50 = vld [vmem:[%s9015_s2 + $0xe8] sm:$0xff]   ;;  %v3946_v61 = vld [vmem:[#allocation2 + $0x18] sm:$0xf] }
 0x1f9   :  { %v3202_v4 = vsel %vm7172_vm2, %v3197_v39, %v3201_v41  ;;  %v5837_v33 = vcombine.low %v3470_v11, %v3474_v60  ;;  %v5838_v12 = vcombine.low %v3478_v1, %v3482_v40  ;;  %v5821_v21 = vrot.slane %v3420_v8, 9  ;;  %v6968_v30 = vld [vmem:[#allocation2 + $0x10] ss:$8 sps:$4 sm:$0xff]   ;;  %v3950_v11 = vld [vmem:[#allocation2 + $0x28] sm:$0xf] }
 0x1fa   :  { %6452 = vmatpush3.bf16.msra.mxu1 %v6963_v28  ;;  %v3216_v62 = vsel %vm7172_vm2, %v3211_v15, %v3215_v59  ;;  %v5836_v28 = vcombine.low %v3462_v46, %v3466_v13  ;;  %v3497_v52 = vrot.slane %v8619_v23, 5  ;;  %v5818_v34 = vrot.slane %v3417_v0, 9  ;;  %v6976_v8 = vld [vmem:[%s9015_s2 + $0xf0] sm:$0xff]  }
 0x1fb   :  { %6469 = vmatprep.subr.bf16.mxu1 %v8667_v29  ;;  %v5799_v3 = vcombine.low %v3202_v4, %v3216_v62  ;;  %v3485_v31 = vrot.slane %v8606_v6, 5  ;;  %v5820_v14 = vrot.slane %v3419_v58, 9  ;;  %v3493_v27 = vrot.slane %v8614_v57, 5  ;;  %v3424_v6 = vld [vmem:[#allocation2 + $0x80] sm:$0xe] }
 0x1fc   :  { %v3490_v47 = vsel %vm8066_vm8, %v5819_v10, %v3489_v2  ;;  %v3498_v23 = vsel %vm8066_vm8, %v5821_v21, %v3497_v52  ;;  %v3505_v48 = vrot.slane %v8634_v17, 5  ;;  %v5825_v39 = vrot.slane %v3424_v6, 9  ;;  %v6970_v17 = vld [vmem:[%s9015_s2 + $0xe0] sm:$0xff]   ;;  %v6979_v21 = vld [vmem:[%s9015_s2 + $0xf8] sm:$0xff]   ;;  %v6982_v6 = vld [vmem:[#allocation2 + $0x14] sm:$0x1] }
 0x1fd   :  { %6438 = vmatmul.mubr.msk.bf16.gmra.mrb[8].mxu1 %vm2119_vm10, %v5797_v26  ;;  %v3422_v26 = vld [vmem:[#allocation2 + $0x70] sm:$0xe]  ;;  %v3494_v57 = vsel %vm8066_vm8, %v5820_v14, %v3493_v27  ;;  %v3513_v59 = vrot.slane %v8643_v7, 5  ;;  %v3501_v44 = vrot.slane %v8647_v18, 5  ;;  %v5824_v41 = vrot.slane %v3423_v45, 9 }
 0x1fe   :  { %6441 = vmatprep.mubr.msk.bf16.mxu1 %vm2119_vm10, %v5798_v25  ;;  %v3421_v25 = vld [vmem:[#allocation2 + $0x68] sm:$0xe]  ;;  %v5840_v15 = vcombine.low %v3494_v57, %v3498_v23  ;;  %v5823_v63 = vrot.slane %v3422_v26, 9  ;;  %v3509_v62 = vrot.slane %v8650_v38, 5  ;;  %v5827_v46 = vrot.slane %v3426_v54, 9 }
 0x1ff   :  { %v5822_v5 = vrot.slane %v3421_v25, 9  ;;  %v3514_v7 = vsel %vm8066_vm8, %v5825_v39, %v3513_v59  ;;  %v3521_v9 = vrot.slane %v8662_v20, 5  ;;  %v3517_v43 = vrot.slane %v8673_v49, 5  ;;  %v3944_v20 = vld [vmem:[#allocation2 + $0x10] sm:$0xf] }
 0x200   :  { %v3506_v13 = vsel %vm8066_vm8, %v5823_v63, %v3505_v48  ;;  %v3510_v38 = vsel %vm8066_vm8, %v5824_v41, %v3509_v62  ;;  %v6971_v49 = vld [vmem:[#allocation2 + $0x30] ss:$8 sps:$4 sm:$0xff]   ;;  %v3977_v42 = vshrl.u32 %v3944_v20, 16  ;;  %v3980_v60 = vshll.u32 %v3944_v20, 16  ;;  %v6972_v58 = vld [vmem:[#allocation2 + $0x40] ss:$8 sps:$4 sm:$0xff]  }
 0x201   :  { %v3502_v4 = vsel %vm8066_vm8, %v5822_v5, %v3501_v44  ;;  %v3522_v16 = vsel %vm8066_vm8, %v5827_v46, %v3521_v9  ;;  %v3991_v40 = vshrl.u32 %v3946_v61, 16  ;;  %v3994_v53 = vshll.u32 %v3946_v61, 16  ;;  %v3952_v27 = vld [vmem:[#allocation2 + $0x30] sm:$0xf]  ;;  %v3954_v26 = vld [vmem:[#allocation2 + $0x38] sm:$0xf] }
 0x202   :  { %v5841_v18 = vcombine.low %v3502_v4, %v3506_v13  ;;  %v3979_v1 = vrot.slane %v3977_v42, 4  ;;  %v4019_v0 = vshrl.u32 %v3950_v11, 16  ;;  %vm5300_vm15 = vcmask 261120   ;;  %v6975_v39 = vld [vmem:[#allocation2 + $0x70] ss:$8 sps:$4 sm:$0xff]  }
 0x203   :  { %v3993_v10 = vrot.slane %v3991_v40, 4  ;;  %v3996_v2 = vrot.slane %v3994_v53, 5  ;;  %v4036_v63 = vshll.u32 %v3952_v27, 16  ;;  %v4047_v48 = vshrl.u32 %v3954_v26, 16  ;;  %v6983_v59 = vld [vmem:[#allocation2 + $0x1c] sm:$0x1] }
 0x204   :  { %v4050_v45 = vshll.u32 %v3954_v26, 16  ;;  %v4000_v5 = vshll.u32 %v6983_v59, 16  ;;  %v3956_v41 = vld [vmem:[#allocation2 + $0x40] sm:$0xf]  ;;  %v6984_v13 = vld [vmem:[#allocation2 + $0x24] sm:$0x1] }
 0x205   :  { %6442 = vmatmul.mubr.msk.bf16.gmra.mrb[12].mxu1 %vm2119_vm10, %v5799_v3  ;;  %v5842_v3 = vcombine.low %v3510_v38, %v3514_v7  ;;  %v3997_v57 = vor.u32 %v3996_v2, %v3993_v10  ;;  %v4014_v7 = vshll.u32 %v6984_v13, 16  ;;  %v6985_v54 = vld [vmem:[#allocation2 + $0x2c] sm:$0x1]  ;;  %v4038_v9 = vrot.slane %v4036_v63, 5 }
 0x206   :  { %6453 = vmatprep.mubr.msk.bf16.mxu1 %vm2119_vm10, %v5836_v28  ;;  %v5826_v28 = vrot.slane %v3425_v36, 9  ;;  %v4028_v4 = vshll.u32 %v6985_v54, 16  ;;  %v4064_v20 = vshll.u32 %v3956_v41, 16 }
 0x207   :  { %v3998_v38 = vrot.slane %v3997_v57, 4  ;;  %v4016_v40 = vrot.slane %v4014_v7, 5  ;;  %v6989_v57 = vld [vmem:[#allocation2 + $0x44] sm:$0x1]  ;;  %v3968_v7 = vld [vmem:[#allocation2 + $0x80] sm:$0xf] }
 0x208   :  { %v3518_v22 = vsel %vm8066_vm8, %v5826_v28, %v3517_v43  ;;  %v3960_v43 = vld [vmem:[#allocation2 + $0x60] sm:$0xf] }
 0x209   :  { %v5843_v55 = vcombine.low %v3518_v22, %v3522_v16  ;;  %v6977_v16 = vld [vmem:[#allocation2 + $0x80] ss:$8 sps:$4 sm:$0xff]   ;;  %v4049_v22 = vrot.slane %v4047_v48, 4  ;;  %v4089_v53 = vshrl.u32 %v3960_v43, 16  ;;  %v6990_v48 = vld [vmem:[#allocation2 + $0x4c] sm:$0x1] }
 0x20d   :  { %6454 = vmatmul.mubr.msk.bf16.vlgmr.msra.gmra.mrb[0].mxu1 %vm2119_vm10, %v5837_v33  ;;  %v3948_v33 = vld [vmem:[#allocation2 + $0x20] sm:$0xf] }
 0x20e   :  { %6457 = vmatprep.mubr.msk.bf16.mxu1 %vm2119_vm10, %v5838_v12  ;;  %6470 = vmatpush3.bf16.msra.mxu1 %v8667_v29  ;;  %v3486_v29 = vsel %vm8066_vm8, %v5818_v34, %v3485_v31  ;;  %v3982_v12 = vrot.slane %v3980_v60, 5  ;;  %v4005_v52 = vshrl.u32 %v3948_v33, 16  ;;  %v4008_v34 = vshll.u32 %v3948_v33, 16  ;;  %v6974_v31 = vld [vmem:[#allocation2 + $0x60] ss:$8 sps:$4 sm:$0xff]  }
 0x20f   :  { %6471 = vmatprep.subr.bf16.mxu1 %v6965_v35  ;;  %v5839_v37 = vcombine.low %v3486_v29, %v3490_v47  ;;  %v4021_v47 = vrot.slane %v4019_v0, 4 }
 0x210   :  { %v3983_v29 = vor.u32 %v3982_v12, %v3979_v1  ;;  %v4007_v25 = vrot.slane %v4005_v52, 4  ;;  %v4030_v1 = vrot.slane %v4028_v4, 5  ;;  %v6987_v12 = vld [vmem:[#allocation2 + $0x34] sm:$0x1] }
 0x211   :  { %v4042_v10 = vshll.u32 %v6987_v12, 16 }
 0x212   :  { %6472 = vmatpush3.bf16.msra.mxu1 %v6965_v35  ;;  %v4022_v35 = vshll.u32 %v3950_v11, 16  ;;  %v3984_v62 = vrot.slane %v3983_v29, 4  ;;  %v4092_v11 = vshll.u32 %v3960_v43, 16  ;;  %v6978_v29 = vld [vmem:[#allocation2 + $0x90] ss:$8 sps:$4 sm:$0xff]  }
 0x213   :  { %6473 = vmatprep.subr.bf16.mxu1 %v6966_v51  ;;  %v6991_v43 = vld [vmem:[#allocation2 + $0x64] sm:$0x1] }
 0x214   :  { %v4024_v23 = vrot.slane %v4022_v35, 5  ;;  %v3962_v35 = vld [vmem:[#allocation2 + $0x68] sm:$0xf] }
 0x215   :  { %6458 = vmatmul.mubr.msk.bf16.gmra.mrb[4].mxu1 %vm2119_vm10, %v5839_v37  ;;  %v3986_v37 = vshll.u32 %v6982_v6, 16  ;;  %v4106_v26 = vshll.u32 %v3962_v35, 16 }
 0x216   :  { %6461 = vmatprep.mubr.msk.bf16.mxu1 %vm2119_vm10, %v5840_v15  ;;  %6474 = vmatpush3.bf16.msra.mxu1 %v6966_v51  ;;  %v4033_v15 = vshrl.u32 %v3952_v27, 16  ;;  %v4025_v44 = vor.u32 %v4024_v23, %v4021_v47  ;;  %v4094_v47 = vrot.slane %v4092_v11, 5  ;;  %v4103_v23 = vshrl.u32 %v3962_v35, 16 }
 0x217   :  { %6475 = vmatprep.subr.bf16.mxu1 %v6967_v19  ;;  %v4108_v13 = vrot.slane %v4106_v26, 5  ;;  %v8810_v26 = vld [vmem:[#allocation2 + $0x84] sm:$0x1] }
 0x218   :  { %v4035_v46 = vrot.slane %v4033_v15, 4  ;;  %v4026_v61 = vrot.slane %v4025_v44, 4 }
 0x21a   :  { %6476 = vmatpush3.bf16.msra.mxu1 %v6967_v19  ;;  %v4010_v19 = vrot.slane %v4008_v34, 5  ;;  %v4039_v0 = vor.u32 %v4038_v9, %v4035_v46  ;;  %v4031_v52 = vsel %vm7172_vm2, %v4026_v61, %v4030_v1  ;;  %v6988_v34 = vld [vmem:[#allocation2 + $0x3c] sm:$0x1] }
 0x21b   :  { %6493 = vmatprep.subr.bf16.mxu1 %v6970_v17 }
 0x21c   :  { %v4011_v36 = vor.u32 %v4010_v19, %v4007_v25  ;;  %v4070_v25 = vshll.u32 %v6989_v57, 16 }
 0x21d   :  { %6462 = vmatmul.mubr.msk.bf16.gmra.mrb[8].mxu1 %vm2119_vm10, %v5841_v18  ;;  %v3958_v18 = vld [vmem:[#allocation2 + $0x48] sm:$0xf] }
 0x21e   :  { %6465 = vmatprep.mubr.msk.bf16.mxu1 %vm2119_vm10, %v5842_v3  ;;  %v8777_v3 = vld [vmem:[%s9015_s2 + $0x100] sm:$0xff]   ;;  %v4078_v42 = vshll.u32 %v3958_v18, 16  ;;  %v4012_v33 = vrot.slane %v4011_v36, 4  ;;  %v4072_v4 = vrot.slane %v4070_v25, 5  ;;  %v6994_v25 = vld [vmem:[#allocation2 + $0x74] sm:$0x1] }
 0x220   :  { %v4080_v27 = vrot.slane %v4078_v42, 5  ;;  %v4017_v19 = vsel %vm7172_vm2, %v4012_v33, %v4016_v40 }
 0x221   :  { %v5893_v59 = vcombine.low %v4017_v19, %v4031_v52  ;;  %v4126_v19 = vshll.u32 %v6994_v25, 16 }
 0x225   :  { %6466 = vmatmul.mubr.msk.bf16.gmra.mrb[12].mxu1 %vm2119_vm10, %v5843_v55  ;;  %v4052_v55 = vrot.slane %v4050_v45, 5  ;;  %v4084_v45 = vshll.u32 %v6990_v48, 16 }
 0x226   :  { %6477 = vmatprep.mubr.msk.bf16.mxu1 %vm2119_vm10, %v6968_v30  ;;  %v4061_v30 = vshrl.u32 %v3956_v41, 16 }
 0x227   :  { %v4053_v2 = vor.u32 %v4052_v55, %v4049_v22  ;;  %v3970_v22 = vld [vmem:[#allocation2 + $0x88] sm:$0xf] }
 0x228   :  { %v4159_v11 = vshrl.u32 %v3970_v22, 16 }
 0x229   :  { %v4054_v15 = vrot.slane %v4053_v2, 4 }
 0x22d   :  { %6478 = vmatmul.mubr.msk.bf16.vlgmr.msra.gmra.mrb[0].mxu1 %vm2119_vm10, %v6969_v24 }
 0x22e   :  { %6481 = vmatprep.mubr.msk.bf16.mxu1 %vm2119_vm10, %v6971_v49  ;;  %6494 = vmatpush3.bf16.msra.mxu1 %v6970_v17  ;;  %v3988_v17 = vrot.slane %v3986_v37, 5  ;;  %v4075_v49 = vshrl.u32 %v3958_v18, 16  ;;  %v4040_v37 = vrot.slane %v4039_v0, 4  ;;  %v3964_v18 = vld [vmem:[#allocation2 + $0x70] sm:$0xf] }
 0x22f   :  { %6495 = vmatprep.subr.bf16.mxu1 %v6973_v50  ;;  %v4117_v42 = vshrl.u32 %v3964_v18, 16  ;;  %v3972_v0 = vld [vmem:[#allocation2 + $0x90] sm:$0xf] }
 0x230   :  { %v3989_v60 = vsel %vm7172_vm2, %v3984_v62, %v3988_v17  ;;  %v4105_v17 = vrot.slane %v4103_v23, 4 }
 0x232   :  { %6496 = vmatpush3.bf16.msra.mxu1 %v6973_v50  ;;  %v4002_v50 = vrot.slane %v4000_v5, 5  ;;  %v4044_v5 = vrot.slane %v4042_v10, 5 }
 0x233   :  { %6497 = vmatprep.subr.bf16.mxu1 %v6976_v8  ;;  %v5273_v14 = vpop.permute.xlu0 %5272 }
 0x234   :  { %v5275_v51 = vpop.permute.xlu1 %5274  ;;  %6545 = vmatprep.mubr.msk.bf16.mxu0 %vm5300_vm15, %v5273_v14  ;;  %v4077_v14 = vrot.slane %v4075_v49, 4  ;;  %v4045_v54 = vsel %vm7172_vm2, %v4040_v37, %v4044_v5  ;;  %v4109_v49 = vor.u32 %v4108_v13, %v4105_v17  ;;  %v4154_v17 = vshll.u32 %v8810_v26, 16 }
 0x235   :  { %6482 = vmatmul.mubr.msk.bf16.gmra.mrb[4].mxu1 %vm2119_vm10, %v6972_v58  ;;  %6546 = vmatmul.mubr.msk.bf16.vlgmr.msra.gmra.mrb[44].mxu0 %vm5300_vm15, %v5275_v51  ;;  %v4063_v58 = vrot.slane %v4061_v30, 4  ;;  %v4091_v51 = vrot.slane %v4089_v53, 4  ;;  %v6992_v30 = vld [vmem:[#allocation2 + $0x6c] sm:$0x1] }
 0x236   :  { %6485 = vmatprep.mubr.msk.bf16.mxu1 %vm2119_vm10, %v6974_v31  ;;  %6498 = vmatpush3.bf16.msra.mxu1 %v6976_v8  ;;  %v4003_v8 = vsel %vm7172_vm2, %v3998_v38, %v4002_v50  ;;  %v4056_v31 = vshll.u32 %v6988_v34, 16  ;;  %v4081_v44 = vor.u32 %v4080_v27, %v4077_v14  ;;  %v4148_v50 = vshll.u32 %v3968_v7, 16  ;;  %v6993_v27 = vld [vmem:[%s9015_s2 + $0x108] sm:$0xff]  }
 0x237   :  { %6499 = vmatprep.subr.bf16.mxu1 %v6979_v21  ;;  %v5892_v6 = vcombine.low %v3989_v60, %v4003_v8  ;;  %v4095_v62 = vor.u32 %v4094_v47, %v4091_v51  ;;  %v4120_v60 = vshll.u32 %v3964_v18, 16  ;;  %v4162_v8 = vshll.u32 %v3970_v22, 16 }
 0x238   :  { %v4058_v41 = vrot.slane %v4056_v31, 5  ;;  %v4082_v55 = vrot.slane %v4081_v44, 4  ;;  %v4150_v2 = vrot.slane %v4148_v50, 5  ;;  %v4110_v52 = vrot.slane %v4109_v49, 4  ;;  %v3971_v44 = vld [vmem:[#allocation2 + $0x8c] sm:$0x1] }
 0x239   :  { %v5279_v24 = vpop.permute.xlu1 %5278  ;;  %v4096_v61 = vrot.slane %v4095_v62, 4  ;;  %v4119_v34 = vrot.slane %v4117_v42, 4  ;;  %v4122_v31 = vrot.slane %v4120_v60, 5  ;;  %v4161_v47 = vrot.slane %v4159_v11, 4  ;;  %v4406_v11 = vld [vmem:[#allocation2 + $0x80] sm:$0xe] }
 0x23a   :  { %6500 = vmatpush3.bf16.msra.mxu1 %v6979_v21  ;;  %v5277_v28 = vpop.permute.xlu0 %5276  ;;  %v4066_v21 = vrot.slane %v4064_v20, 5  ;;  %v4059_v46 = vsel %vm7172_vm2, %v4054_v15, %v4058_v41  ;;  %v4112_v20 = vshll.u32 %v6992_v30, 16  ;;  %v4164_v23 = vrot.slane %v4162_v8, 5  ;;  %v3975_v30 = vld [vmem:[#allocation2 + $0x9c] sm:$0x1] }
 0x23b   :  { %6561 = vmatprep.subr.bf16.mxu1 %v8777_v3  ;;  %6549 = vmatprep.mubr.msk.bf16.mxu0 %vm5300_vm15, %v5277_v28  ;;  %v4086_v28 = vrot.slane %v4084_v45, 5  ;;  %v5894_v33 = vcombine.low %v4045_v54, %v4059_v46  ;;  %v4168_v46 = vshll.u32 %v3971_v44, 16  ;;  %v4156_v22 = vrot.slane %v4154_v17, 5 }
 0x23c   :  { %v4067_v63 = vor.u32 %v4066_v21, %v4063_v58  ;;  %v4114_v12 = vrot.slane %v4112_v20, 5  ;;  %v3974_v58 = vld [vmem:[#allocation2 + $0x98] sm:$0xf]  ;;  %v4165_v13 = vor.u32 %v4164_v23, %v4161_v47  ;;  %v4196_v49 = vshll.u32 %v3975_v30, 16 }
 0x23d   :  { %6486 = vmatmul.mubr.msk.bf16.gmra.mrb[8].mxu1 %vm2119_vm10, %v6975_v39  ;;  %6550 = vmatmul.mubr.msk.bf16.gmra.mrb[48].mxu0 %vm5300_vm15, %v5279_v24  ;;  %v3966_v39 = vld [vmem:[#allocation2 + $0x78] sm:$0xf]  ;;  %v4145_v24 = vshrl.u32 %v3968_v7, 16  ;;  %v4087_v21 = vsel %vm7172_vm2, %v4082_v55, %v4086_v28  ;;  %v4187_v37 = vshrl.u32 %v3974_v58, 16  ;;  %v4190_v57 = vshll.u32 %v3974_v58, 16  ;;  %v6996_v7 = vld [vmem:[%s9015_s2 + $0x110] sm:$0xff]  }
 0x23e   :  { %6489 = vmatprep.mubr.msk.bf16.mxu1 %vm2119_vm10, %v6977_v16  ;;  %v4131_v38 = vshrl.u32 %v3966_v39, 16  ;;  %v4134_v36 = vshll.u32 %v3966_v39, 16  ;;  %v4068_v9 = vrot.slane %v4067_v63, 4  ;;  %v4098_v16 = vshll.u32 %v6991_v43, 16  ;;  %v3973_v43 = vld [vmem:[#allocation2 + $0x94] sm:$0x1] }
 0x23f   :  { %v4147_v10 = vrot.slane %v4145_v24, 4  ;;  %v4115_v45 = vsel %vm7172_vm2, %v4110_v52, %v4114_v12  ;;  %v4123_v39 = vor.u32 %v4122_v31, %v4119_v34  ;;  %v4189_v18 = vrot.slane %v4187_v37, 4  ;;  %v6997_v20 = vld [vmem:[%s9015_s2 + $0x118] sm:$0xff]  }
 0x240   :  { %v4133_v40 = vrot.slane %v4131_v38, 4  ;;  %v4136_v53 = vrot.slane %v4134_v36, 5  ;;  %v4100_v1 = vrot.slane %v4098_v16, 5  ;;  %v4073_v35 = vsel %vm7172_vm2, %v4068_v9, %v4072_v4 }
 0x241   :  { %v4151_v15 = vor.u32 %v4150_v2, %v4147_v10  ;;  %v5895_v48 = vcombine.low %v4073_v35, %v4087_v21  ;;  %v4192_v38 = vrot.slane %v4190_v57, 5  ;;  %v4124_v9 = vrot.slane %v4123_v39, 4  ;;  %v4407_v10 = vld [vmem:[#allocation2 + $0x88] sm:$0xe] }
 0x242   :  { %v4101_v14 = vsel %vm7172_vm2, %v4096_v61, %v4100_v1  ;;  %v4137_v51 = vor.u32 %v4136_v53, %v4133_v40  ;;  %v4128_v16 = vrot.slane %v4126_v19, 5  ;;  %v4166_v55 = vrot.slane %v4165_v13, 4 }
 0x243   :  { %v5896_v41 = vcombine.low %v4101_v14, %v4115_v45  ;;  %v4152_v36 = vrot.slane %v4151_v15, 4  ;;  %v4193_v61 = vor.u32 %v4192_v38, %v4189_v18  ;;  %v4170_v60 = vrot.slane %v4168_v46, 5 }
 0x244   :  { %v4138_v62 = vrot.slane %v4137_v51, 4  ;;  %v4129_v40 = vsel %vm7172_vm2, %v4124_v9, %v4128_v16  ;;  %v4182_v53 = vshll.u32 %v3973_v43, 16  ;;  %v4198_v12 = vrot.slane %v4196_v49, 5 }
 0x245   :  { %6490 = vmatmul.mubr.msk.bf16.gmra.mrb[12].mxu1 %vm2119_vm10, %v6978_v29  ;;  %v4173_v29 = vshrl.u32 %v3972_v0, 16  ;;  %v4157_v42 = vsel %vm7172_vm2, %v4152_v36, %v4156_v22  ;;  %v4194_v35 = vrot.slane %v4193_v61, 4  ;;  %v5924_v21 = vrot.slane %v4406_v11, 9 }
 0x246   :  { %6501 = vmatprep.mubr.msk.bf16.mxu1 %vm2119_vm10, %v5892_v6  ;;  %v4176_v6 = vshll.u32 %v3972_v0, 16  ;;  %v4492_v52 = vrot.slane %v8810_v26, 5  ;;  %v4184_v34 = vrot.slane %v4182_v53, 5  ;;  %v5925_v31 = vrot.slane %v4407_v10, 9 }
 0x247   :  { %v4175_v54 = vrot.slane %v4173_v29, 4  ;;  %v4496_v14 = vrot.slane %v3971_v44, 5  ;;  %v4199_v51 = vsel %vm7172_vm2, %v4194_v35, %v4198_v12  ;;  %v4408_v29 = vld [vmem:[#allocation2 + $0x90] sm:$0xe]  ;;  %v4500_v37 = vrot.slane %v3973_v43, 5 }
 0x248   :  { %v4178_v4 = vrot.slane %v4176_v6, 5  ;;  %v4493_v47 = vsel %vm8066_vm8, %v5924_v21, %v4492_v52  ;;  %v4409_v6 = vld [vmem:[#allocation2 + $0x98] sm:$0xe]  ;;  %v4504_v57 = vrot.slane %v3975_v30, 5  ;;  %v5926_v25 = vrot.slane %v4408_v29, 9 }
 0x249   :  { %v4497_v26 = vsel %vm8066_vm8, %v5925_v31, %v4496_v14  ;;  %v5927_v19 = vrot.slane %v4409_v6, 9  ;;  %v8900_v12 = vld [vmem:[%s9017_s4] ss:$0 sm:$0xff]  ;;  %s7074_s4 = smov [#allocation4]  }
 0x24a   :  { %v4179_v50 = vor.u32 %v4178_v4, %v4175_v54 }
 0x24b   :  { %v5283_v63 = vpop.permute.xlu1 %5282  ;;  %v4505_v45 = vsel %vm8066_vm8, %v5927_v19, %v4504_v57 }
 0x24c   :  { %v4180_v0 = vrot.slane %v4179_v50, 4 }
 0x24d   :  { %6502 = vmatmul.mubr.msk.bf16.vlgmr.msra.gmra.mrb[0].mxu1 %vm2119_vm10, %v5893_v59  ;;  %v6995_v59 = vld [vmem:[#allocation2 + $0x7c] sm:$0x1] }
 0x24e   :  { %6505 = vmatprep.mubr.msk.bf16.mxu1 %vm2119_vm10, %v5894_v33  ;;  %6565 = vmatpush3.bf16.msra.mxu1 %v8777_v3  ;;  %v5281_v3 = vpop.permute.xlu0 %5280  ;;  %v4140_v5 = vshll.u32 %v6995_v59, 16  ;;  %v4171_v33 = vsel %vm7172_vm2, %v4166_v55, %v4170_v60 }
 0x24f   :  { %6562 = vmatprep.subr.bf16.mxu1 %v6993_v27  ;;  %6553 = vmatprep.mubr.msk.bf16.mxu0 %vm5300_vm15, %v5281_v3  ;;  %v5898_v1 = vcombine.low %v4157_v42, %v4171_v33  ;;  %v5942_v3 = vcombine.low %v4493_v47, %v4497_v26 }
 0x250   :  { %6554 = vmatmul.mubr.msk.bf16.gmra.mrb[52].mxu0 %vm5300_vm15, %v5283_v63  ;;  %v4142_v28 = vrot.slane %v4140_v5, 5 }
 0x252   :  { %6566 = vmatpush3.bf16.msra.mxu1 %v6993_v27  ;;  %v4143_v24 = vsel %vm7172_vm2, %v4138_v62, %v4142_v28  ;;  %v4185_v27 = vsel %vm7172_vm2, %v4180_v0, %v4184_v34  ;;  %v8905_v34 = vstv %s9018_s5  ;;  %s5477_s5 = sshll.u32 %s7074_s4, 4  ;;  %s5478_s5 = int_to_ptr.vmem [resolvable:$true] %s5477_s5 }
 0x253   :  { %6563 = vmatprep.subr.bf16.mxu1 %v6996_v7  ;;  %v5897_v8 = vcombine.low %v4129_v40, %v4143_v24  ;;  %v5899_v23 = vcombine.low %v4185_v27, %v4199_v51  ;;  %s7046_s27 = scalar_lea.vmem %s5478_s5, 2048  ;;  %p7051_p1 = scmp.lt.s32.totalorder %s5478_s5, %s5478_s5 }
 0x254   :  { %v5285_v2 = vpop.permute.xlu0 %5284  ;;  %v5287_v58 = vpop.permute.xlu1 %5286  ;;  %p7047_p0 = scmp.ne.s32.totalorder %s5478_s5, %s7046_s27  ;;  %p7052_p2 = scmp.lt.s32.totalorder %s7046_s27, %s7046_s27 }
 0x255   :  { %6506 = vmatmul.mubr.msk.bf16.gmra.mrb[4].mxu1 %vm2119_vm10, %v5895_v48  ;;  %6557 = vmatprep.mubr.msk.bf16.mxu0 %vm5300_vm15, %v5285_v2  ;;  %v4501_v48 = vsel %vm8066_vm8, %v5926_v25, %v4500_v37 }
 0x256   :  { %6509 = vmatprep.mubr.msk.bf16.mxu1 %vm2119_vm10, %v5896_v41  ;;  %6567 = vmatpush3.bf16.msra.mxu1 %v6996_v7  ;;  %v5943_v59 = vcombine.low %v4501_v48, %v4505_v45  ;;  %p7053_p3 = por %p7052_p2, %p7051_p1 }
 0x257   :  { %6564 = vmatprep.subr.bf16.mxu1 %v6997_v20 }
 0x258   :  { %6558 = vmatmul.mubr.msk.bf16.gmra.mrb[56].mxu0 %vm5300_vm15, %v5287_v58  ;;  %p7054_p4 = pnand %p7053_p3, %p7047_p0 }
 0x25a   :  { %6568 = vmatpush3.bf16.msra.mxu1 %v6997_v20 }
 0x25d   :  { %6510 = vmatmul.mubr.msk.bf16.gmra.mrb[8].mxu1 %vm2119_vm10, %v5897_v8 }
 0x25e   :  { %6513 = vmatprep.mubr.msk.bf16.mxu1 %vm2119_vm10, %v5898_v1 }
 0x265   :  { %6514 = vmatmul.mubr.msk.bf16.gmra.mrb[12].mxu1 %vm2119_vm10, %v5899_v23 }
 0x266   :  { %6537 = vmatprep.mubr.msk.bf16.mxu1 %vm2119_vm10, %v5942_v3 }
 0x26a   :  { %v6335_v32 = vpop.f32.mrb[16].mxu0 }
 0x26b   :  { %v2178_v15 = vpop.f32.mrb[17].mxu0 }
 0x26c   :  { %v6336_v63 = vpop.f32.mrb[18].mxu0 }
 0x26d   :  { %v2181_v39 = vpop.f32.mrb[19].mxu0 }
 0x271   :  { %6538 = vmatmul.mubr.msk.bf16.vlgmr.msra.gmra.mrb[12].mxu1 %vm2119_vm10, %v5943_v59 }
 0x273   :  { %v8853_v5 = vpop.f32.mrb[20].mxu0 }
 0x274   :  { %v8855_v44 = vpop.f32.mrb[21].mxu0 }
 0x275   :  { %v8857_v41 = vpop.f32.mrb[22].mxu0 }
 0x276   :  { %v8859_v62 = vpop.f32.mrb[23].mxu0 }
 0x27b   :  { %v8861_v17 = vpop.f32.mrb[24].mxu0 }
 0x27c   :  { %v8863_v13 = vpop.f32.mrb[25].mxu0 }
 0x27d   :  { %v8865_v7 = vpop.f32.mrb[26].mxu0 }
 0x27e   :  { %v8867_v56 = vpop.f32.mrb[27].mxu0 }
 0x283   :  { %v8869_v54 = vpop.f32.mrb[28].mxu0 }
 0x284   :  { %v8871_v4 = vpop.f32.mrb[29].mxu0 }
 0x285   :  { %v8873_v18 = vpop.f32.mrb[30].mxu0 }
 0x286   :  { %v8875_v38 = vpop.f32.mrb[31].mxu0 }
 0x28b   :  { %v6527_v36 = vpop.f32.mrb[32].mxu0 }
 0x28c   :  { %v4621_v46 = vpop.f32.mrb[33].mxu0 }
 0x28d   :  { %v6528_v9 = vpop.f32.mrb[34].mxu0 }
 0x28e   :  { %v4624_v28 = vpop.f32.mrb[35].mxu0 }
 0x293   :  { %v6531_v43 = vpop.f32.mrb[36].mxu0 }
 0x294   :  { %v8877_v16 = vpop.f32.mrb[37].mxu0 }
 0x295   :  { %v8879_v22 = vpop.f32.mrb[38].mxu0 }
 0x296   :  { %v8881_v55 = vpop.f32.mrb[39].mxu0 }
 0x29b   :  { %v8883_v30 = vpop.f32.mrb[40].mxu0 }
 0x29c   :  { %v8885_v20 = vpop.f32.mrb[41].mxu0 }
 0x29d   :  { %v8887_v24 = vpop.f32.mrb[42].mxu0 }
 0x29e   :  { %v8889_v50 = vpop.f32.mrb[43].mxu0 }
 0x308   :  { %v6547_v61 = vpop.f32.mrb[44].mxu0 }
 0x309   :  { %v5359_v49 = vpop.f32.mrb[45].mxu0  ;;  %v5368_v27 = vadd.f32 %v6547_v61, %v8900_v12 }
 0x30a   :  { %v6548_v42 = vpop.f32.mrb[46].mxu0  ;;  %v5360_v26 = vadd.f32 %v8900_v12, %v5359_v49 }
 0x30b   :  { %v5362_v60 = vpop.f32.mrb[47].mxu0  ;;  %v5371_v57 = vadd.f32 %v6548_v42, %v8900_v12 }
 0x30c   :  { %v5363_v59 = vadd.f32 %v8900_v12, %v5362_v60 }
 0x310   :  { %v6551_v40 = vpop.f32.mrb[48].mxu0 }
 0x311   :  { %v8891_v53 = vpop.f32.mrb[49].mxu0 }
 0x312   :  { %v8893_v11 = vpop.f32.mrb[50].mxu0 }
 0x313   :  { %v8895_v8 = vpop.f32.mrb[51].mxu0 }
 0x320   :  { %v6503_v33 = vpop.f32.mrb[0].mxu1 }
 0x321   :  { %v6569_v1 = vadd.f32 %v6503_v33, %v6335_v32  ;;  %v4315_v0 = vpop.f32.mrb[1].mxu1 }
 0x322   :  { %v6571_v35 = vadd.f32 %v4315_v0, %v2178_v15  ;;  %v6504_v10 = vpop.f32.mrb[2].mxu1 }
 0x323   :  { %v6570_v2 = vadd.f32 %v6569_v1, %v6527_v36  ;;  %v6573_v58 = vadd.f32 %v6504_v10, %v6336_v63  ;;  %v4318_v21 = vpop.f32.mrb[3].mxu1  ;;  %v8908_v47 = vpop.f32.mrb[52].mxu0 }
 0x324   :  { %v6572_v52 = vadd.f32 %v6571_v35, %v4621_v46  ;;  %v6575_v31 = vadd.f32 %v4318_v21, %v2181_v39  ;;  %v8911_v29 = vpop.f32.mrb[53].mxu0 }
 0x325   :  { %vm4702_vm2 = vcmp.gt.f32.partialorder %v6570_v2, 0.0  ;;  %v4718_v14 = vmul.f32 0.2, %v6570_v2  ;;  %v6574_v51 = vadd.f32 %v6573_v58, %v6528_v9  ;;  %v8914_v25 = vpop.f32.mrb[54].mxu0  ;;  %v5384_v58 = vadd.f32 %v6551_v40, %v8900_v12 }
 0x326   :  { %vm4700_vm8 = vcmp.gt.f32.partialorder %v6572_v52, 0.0  ;;  %v4716_v23 = vmul.f32 0.2, %v6572_v52  ;;  %v6576_v3 = vadd.f32 %v6575_v31, %v4624_v28  ;;  %v8917_v48 = vpop.f32.mrb[55].mxu0  ;;  %v5387_v31 = vadd.f32 %v8893_v11, %v8900_v12 }
 0x327   :  { %v4734_v6 = vsel %vm4702_vm2, %v6570_v2, %v4718_v14  ;;  %vm4703_vm0 = vcmp.gt.f32.partialorder %v6574_v51, 0.0  ;;  %v4719_v37 = vmul.f32 0.2, %v6574_v51 }
 0x328   :  { %v5426_v19 = vmul.f32 %v8905_v34, %v4734_v6  ;;  %v4732_v32 = vsel %vm4700_vm8, %v6572_v52, %v4716_v23  ;;  %vm4701_vm3 = vcmp.gt.f32.partialorder %v6576_v3, 0.0  ;;  %v4717_v15 = vmul.f32 0.2, %v6576_v3  ;;  %v6507_v63 = vpop.f32.mrb[4].mxu1 }
 0x329   :  { %v5424_v45 = vmul.f32 %v8905_v34, %v4732_v32  ;;  %v4735_v39 = vsel %vm4703_vm0, %v6574_v51, %v4719_v37  ;;  %v6577_v36 = vadd.f32 %v6507_v63, %v8853_v5  ;;  %v4331_v46 = vpop.f32.mrb[5].mxu1 }
 0x32a   :  { %v5442_v9 = vadd.f32 %v5426_v19, %v5368_v27  ;;  %v5427_v28 = vmul.f32 %v8905_v34, %v4735_v39  ;;  %v4733_v61 = vsel %vm4701_vm3, %v6576_v3, %v4717_v15  ;;  %v6579_v49 = vadd.f32 %v4331_v46, %v8855_v44  ;;  %v6508_v42 = vpop.f32.mrb[6].mxu1 }
 0x32b   :  { %v5440_v33 = vadd.f32 %v5424_v45, %v5360_v26  ;;  %v5425_v1 = vmul.f32 %v8905_v34, %v4733_v61  ;;  %v6578_v0 = vadd.f32 %v6577_v36, %v6531_v43  ;;  %v6581_v35 = vadd.f32 %v6508_v42, %v8857_v41  ;;  %v4334_v10 = vpop.f32.mrb[7].mxu1  ;;  %v8944_v6 = vpop.f32.mrb[56].mxu0 }
 0x32c   :  { %5458 = vst.msk [vmem:[#allocation4 + $0x10] sm:$0xff] %vm2119_vm10, %v5442_v9  ;;  %v5443_v60 = vadd.f32 %v5427_v28, %v5371_v57  ;;  %v6580_v5 = vadd.f32 %v6579_v49, %v8877_v16  ;;  %v6583_v2 = vadd.f32 %v4334_v10, %v8859_v62  ;;  %v5376_v16 = vadd.f32 %v8900_v12, %v8891_v53  ;;  %v8948_v15 = vpop.f32.mrb[57].mxu0 }
 0x32d   :  { %5456 = vst.msk [vmem:[#allocation4] sm:$0xff] %vm2119_vm10, %v5440_v33  ;;  %v5441_v44 = vadd.f32 %v5425_v1, %v5363_v59  ;;  %vm4706_vm4 = vcmp.gt.f32.partialorder %v6578_v0, 0.0  ;;  %v4722_v21 = vmul.f32 0.2, %v6578_v0  ;;  %v6582_v52 = vadd.f32 %v6581_v35, %v8879_v22  ;;  %v8953_v59 = vpop.f32.mrb[58].mxu0 }
 0x32e   :  { %5459 = vst.msk [vmem:[#allocation4 + $0x18] sm:$0xff] %vm2119_vm10, %v5443_v60  ;;  %vm4704_vm5 = vcmp.gt.f32.partialorder %v6580_v5, 0.0  ;;  %v4720_v41 = vmul.f32 0.2, %v6580_v5  ;;  %v6584_v43 = vadd.f32 %v6583_v2, %v8881_v55  ;;  %v5379_v53 = vadd.f32 %v8900_v12, %v8895_v8  ;;  %v8960_v28 = vpop.f32.mrb[59].mxu0 }
 0x32f   :  { %5457 = vst.msk [vmem:[#allocation4 + $0x8] sm:$0xff] %vm2119_vm10, %v5441_v44  ;;  %vm4707_vm6 = vcmp.gt.f32.partialorder %v6582_v52, 0.0  ;;  %v4723_v62 = vmul.f32 0.2, %v6582_v52  ;;  %v4738_v40 = vsel %vm4706_vm4, %v6578_v0, %v4722_v21  ;;  %v5400_v9 = vadd.f32 %v8908_v47, %v8900_v12 }
 0x330   :  { %vm4705_vm7 = vcmp.gt.f32.partialorder %v6584_v43, 0.0  ;;  %v4721_v14 = vmul.f32 0.2, %v6584_v43  ;;  %v5430_v22 = vmul.f32 %v8905_v34, %v4738_v40  ;;  %v4736_v27 = vsel %vm4704_vm5, %v6580_v5, %v4720_v41  ;;  %v6511_v51 = vpop.f32.mrb[8].mxu1 }
 0x331   :  { %v5428_v23 = vmul.f32 %v8905_v34, %v4736_v27  ;;  %v4739_v55 = vsel %vm4707_vm6, %v6582_v52, %v4723_v62  ;;  %v6585_v26 = vadd.f32 %v6511_v51, %v8861_v17  ;;  %v4347_v3 = vpop.f32.mrb[9].mxu1  ;;  %v5403_v33 = vadd.f32 %v8914_v25, %v8900_v12 }
 0x332   :  { %v5446_v37 = vadd.f32 %v5430_v22, %v5384_v58  ;;  %v5431_v11 = vmul.f32 %v8905_v34, %v4739_v55  ;;  %v4737_v57 = vsel %vm4705_vm7, %v6584_v43, %v4721_v14  ;;  %v6587_v19 = vadd.f32 %v4347_v3, %v8863_v13  ;;  %v6512_v32 = vpop.f32.mrb[10].mxu1 }
 0x333   :  { %v5444_v63 = vadd.f32 %v5428_v23, %v5376_v16  ;;  %v5429_v45 = vmul.f32 %v8905_v34, %v4737_v57  ;;  %v6586_v39 = vadd.f32 %v6585_v26, %v8883_v30  ;;  %v6589_v8 = vadd.f32 %v6512_v32, %v8865_v7  ;;  %v4350_v17 = vpop.f32.mrb[11].mxu1 }
 0x334   :  { %5462 = vst.msk [vmem:[#allocation4 + $0x30] sm:$0xff] %vm2119_vm10, %v5446_v37  ;;  %v5447_v36 = vadd.f32 %v5431_v11, %v5387_v31  ;;  %v6588_v46 = vadd.f32 %v6587_v19, %v8885_v20  ;;  %v6591_v13 = vadd.f32 %v4350_v17, %v8867_v56  ;;  %v5392_v56 = vadd.f32 %v8900_v12, %v8911_v29 }
 0x335   :  { %5460 = vst.msk [vmem:[#allocation4 + $0x20] sm:$0xff] %vm2119_vm10, %v5444_v63  ;;  %v5445_v30 = vadd.f32 %v5429_v45, %v5379_v53  ;;  %vm4710_vm9 = vcmp.gt.f32.partialorder %v6586_v39, 0.0  ;;  %v4726_v7 = vmul.f32 0.2, %v6586_v39  ;;  %v6590_v61 = vadd.f32 %v6589_v8, %v8887_v24 }
 0x336   :  { %5463 = vst.msk [vmem:[#allocation4 + $0x38] sm:$0xff] %vm2119_vm10, %v5447_v36  ;;  %vm4708_vm11 = vcmp.gt.f32.partialorder %v6588_v46, 0.0  ;;  %v4724_v49 = vmul.f32 0.2, %v6588_v46  ;;  %v6592_v20 = vadd.f32 %v6591_v13, %v8889_v50  ;;  %v5395_v50 = vadd.f32 %v8900_v12, %v8917_v48 }
 0x337   :  { %5461 = vst.msk [vmem:[#allocation4 + $0x28] sm:$0xff] %vm2119_vm10, %v5445_v30  ;;  %vm4711_vm12 = vcmp.gt.f32.partialorder %v6590_v61, 0.0  ;;  %v4727_v47 = vmul.f32 0.2, %v6590_v61  ;;  %v4742_v42 = vsel %vm4710_vm9, %v6586_v39, %v4726_v7  ;;  %v5416_v22 = vadd.f32 %v8944_v6, %v8900_v12 }
 0x338   :  { %vm4709_vm13 = vcmp.gt.f32.partialorder %v6592_v20, 0.0  ;;  %v4725_v1 = vmul.f32 0.2, %v6592_v20  ;;  %v5434_v24 = vmul.f32 %v8905_v34, %v4742_v42  ;;  %v4740_v0 = vsel %vm4708_vm11, %v6588_v46, %v4724_v49 }
 0x339   :  { %v5432_v35 = vmul.f32 %v8905_v34, %v4740_v0  ;;  %v4743_v10 = vsel %vm4711_vm12, %v6590_v61, %v4727_v47  ;;  %v5408_v55 = vadd.f32 %v8900_v12, %v8948_v15  ;;  %v5411_v11 = vadd.f32 %v8900_v12, %v8960_v28 }
 0x33a   :  { %v5450_v29 = vadd.f32 %v5434_v24, %v5400_v9  ;;  %v5435_v60 = vmul.f32 %v8905_v34, %v4743_v10  ;;  %v4741_v5 = vsel %vm4709_vm13, %v6592_v20, %v4725_v1 }
 0x33b   :  { %v5448_v2 = vadd.f32 %v5432_v35, %v5392_v56  ;;  %v5433_v58 = vmul.f32 %v8905_v34, %v4741_v5 }
 0x33c   :  { %5466 = vst.msk [vmem:[#allocation4 + $0x50] sm:$0xff] %vm2119_vm10, %v5450_v29  ;;  %v5451_v25 = vadd.f32 %v5435_v60, %v5403_v33 }
 0x33d   :  { %5464 = vst.msk [vmem:[#allocation4 + $0x40] sm:$0xff] %vm2119_vm10, %v5448_v2  ;;  %v5449_v44 = vadd.f32 %v5433_v58, %v5395_v50 }
 0x33e   :  { %5467 = vst.msk [vmem:[#allocation4 + $0x58] sm:$0xff] %vm2119_vm10, %v5451_v25 }
 0x33f   :  { %5465 = vst.msk [vmem:[#allocation4 + $0x48] sm:$0xff] %vm2119_vm10, %v5449_v44 }
 0x344   :  { %v6539_v21 = vpop.f32.mrb[12].mxu1 }
 0x345   :  { %v6593_v48 = vadd.f32 %v6539_v21, %v8869_v54  ;;  %v4669_v52 = vpop.f32.mrb[13].mxu1 }
 0x346   :  { %v6594_v41 = vadd.f32 %v4669_v52, %v8871_v4  ;;  %v6540_v43 = vpop.f32.mrb[14].mxu1 }
 0x347   :  { %vm4714_vm14 = vcmp.gt.f32.partialorder %v6593_v48, 0.0  ;;  %v4730_v16 = vmul.f32 0.2, %v6593_v48  ;;  %v6595_v62 = vadd.f32 %v6540_v43, %v8873_v18  ;;  %v4672_v40 = vpop.f32.mrb[15].mxu1 }
 0x348   :  { %vm4712_vm1 = vcmp.gt.f32.partialorder %v6594_v41, 0.0  ;;  %v4728_v31 = vmul.f32 0.2, %v6594_v41  ;;  %v6596_v14 = vadd.f32 %v4672_v40, %v8875_v38  ;;  %v5419_v38 = vadd.f32 %v8953_v59, %v8900_v12 }
 0x349   :  { %v4746_v27 = vsel %vm4714_vm14, %v6593_v48, %v4730_v16  ;;  %vm4715_vm15 = vcmp.gt.f32.partialorder %v6595_v62, 0.0  ;;  %v4731_v51 = vmul.f32 0.2, %v6595_v62 }
 0x34a   :  { %v5438_v54 = vmul.f32 %v8905_v34, %v4746_v27  ;;  %v4744_v23 = vsel %vm4712_vm1, %v6594_v41, %v4728_v31  ;;  %vm4713_vm2 = vcmp.gt.f32.partialorder %v6596_v14, 0.0  ;;  %v4729_v4 = vmul.f32 0.2, %v6596_v14 }
 0x34b   :  { %v5436_v18 = vmul.f32 %v8905_v34, %v4744_v23  ;;  %v4747_v53 = vsel %vm4715_vm15, %v6595_v62, %v4731_v51 }
 0x34c   :  { %v5454_v26 = vadd.f32 %v5438_v54, %v5416_v22  ;;  %v5439_v3 = vmul.f32 %v8905_v34, %v4747_v53  ;;  %v4745_v6 = vsel %vm4713_vm2, %v6596_v14, %v4729_v4 }
 0x34d   :  { %v5452_v37 = vadd.f32 %v5436_v18, %v5408_v55  ;;  %v5437_v57 = vmul.f32 %v8905_v34, %v4745_v6 }
 0x34e   :  { %5470 = vst.msk [vmem:[#allocation4 + $0x70] sm:$0xff] %vm2119_vm10, %v5454_v26  ;;  %v5455_v19 = vadd.f32 %v5439_v3, %v5419_v38 }
 0x34f   :  { %5468 = vst.msk [vmem:[#allocation4 + $0x60] sm:$0xff] %vm2119_vm10, %v5452_v37  ;;  %v5453_v32 = vadd.f32 %v5437_v57, %v5411_v11 }
 0x350   :  { %5471 = vst.msk [vmem:[#allocation4 + $0x78] sm:$0xff] %vm2119_vm10, %v5455_v19 }
 0x351   :  { %5469 = vst.msk [vmem:[#allocation4 + $0x68] sm:$0xff] %vm2119_vm10, %v5453_v32 }
 0x352   :  { %7057 = shalt.err (!%p7054_p4)
}
 0x353   :  { %s7058_s30 = scalar_lea.hbm %s9019_s6, 2048 }
 0x354   :  { %p7059_p5 = scmp.ne.s32.totalorder %s9019_s6, %s7058_s30  ;;  %p7062_p6 = scmp.lt.u32.totalorder %s7058_s30, %s9019_s6 }
 0x356   :  { %p7064_p7 = pnand %p7062_p6, %p7059_p5 }
 0x358   :  { %7067 = shalt.err (!%p7064_p7)
}
 0x359   :  { %s7075_s11 = smov 128   ;;  %s7076_s1 = smov 8  }
 0x35a   :  { %5483 = dma.vmem_to_hbm [thread:$0]  %s5478_s5, 2048, %s9019_s6, [#allocation5], %s7075_s11, %s7075_s11, %s7076_s1  }
 0x35b   :  { %7068 = dma.done.wait [#allocation5], 2048  }
 0x35c   :  { %7069 = vsyncadd [#allocation5], 4294965248 }
 0x35d   :  { %5487 = vsyncpa [#allocation5], 1 }

</bundles_post_ra>
